<compile_context>
chip_gen: v5e
topology: v5e:2x2
jax: 0.10.0
libtpu: 0.0.40
codegen_flags: <defaults>
</compile_context>

<pallas_src>
import functools

import jax
import jax.numpy as jnp
from jax import lax
from jax.experimental import pallas as pl
from jax.experimental.pallas import tpu as pltpu

LN_EPS = 1e-5


def _layernorm_f32(x, g, b, eps):
    mu = jnp.mean(x, axis=-1, keepdims=True)
    xc = x - mu
    var = jnp.mean(xc * xc, axis=-1, keepdims=True)
    return xc * lax.rsqrt(var + eps) * g + b


def _gelu_tanh(x):
    # TODO(synk): exact-erf GELU would match torch bit-for-bit; tanh approx used here.
    return 0.5 * x * (1.0 + jnp.tanh(0.7978845608028654 * (x + 0.044715 * x * x * x)))


# --------------------- fully fused Block kernel (per batch) ------------------
def _block_ca_kernel(fv_ref, fa_ref, g1_ref, b1_ref, wq_ref, wkv_ref, wp_ref,
                     bp_ref, g2_ref, b2_ref, w1_ref, b1m_ref, w2_ref, b2m_ref,
                     out_ref, attn_ref, *, num_heads, scale, eps):
    f32 = jnp.float32
    bf16 = jnp.bfloat16

    g1 = g1_ref[...].astype(f32)
    b1 = b1_ref[...].astype(f32)

    # LN1 on both streams (all non-matmul math stays in f32).
    xn_a = _layernorm_f32(fa_ref[0].astype(f32), g1, b1, eps)           # (N, C)
    xn_v = _layernorm_f32(fv_ref[0].astype(f32), g1, b1, eps)           # (N, C)

    # Projections: bf16 operands, f32 accumulation on the MXU.
    # wkv = [Wk^T | Wv^T] -> one (N,C)x(C,2C) matmul fills the 256-wide MXU.
    q = jnp.dot(xn_a.astype(bf16), wq_ref[...], preferred_element_type=f32)   # (N, C)
    kv = jnp.dot(xn_v.astype(bf16), wkv_ref[...], preferred_element_type=f32)  # (N, 2C)

    C = q.shape[-1]
    D = C // num_heads
    qb = q.astype(bf16)
    kb = kv[:, :C].astype(bf16)     # vreg-aligned lane-128 split
    vb = kv[:, C:].astype(bf16)

    # Per-head sigmoid attention. Heads are unrolled statically; per-head ctx
    # chunks are concatenated once into a lane-dense (N, C) value (no masked
    # partial stores), then fed straight into the output projection.
    ctx_parts = []
    for h in range(num_heads):
        lo = h * D
        s = lax.dot_general(qb[:, lo:lo + D], kb[:, lo:lo + D],
                            (((1,), (1,)), ((), ())),
                            preferred_element_type=f32) * scale
        a = pl.reciprocal(1.0 + jnp.exp(-s), approx=True)               # sigmoid via EUP
        attn_ref[0, h] = a.astype(attn_ref.dtype)                       # lane-dense (N, N) store
        ctx_parts.append(jnp.dot(a.astype(bf16), vb[:, lo:lo + D],
                                 preferred_element_type=f32))
    ctx = jnp.concatenate(ctx_parts, axis=-1)                           # (N, C)

    # Output projection + residual 1.
    proj = jnp.dot(ctx.astype(bf16), wp_ref[...], preferred_element_type=f32)
    x1 = xn_a + proj + bp_ref[...].astype(f32)

    # LN2 + MLP (fc1 -> GELU -> fc2) + residual 2.
    xn2 = _layernorm_f32(x1, g2_ref[...].astype(f32), b2_ref[...].astype(f32), eps)
    hdn = jnp.dot(xn2.astype(bf16), w1_ref[...],
                  preferred_element_type=f32) + b1m_ref[...].astype(f32)
    hdn = _gelu_tanh(hdn)
    out = x1 + jnp.dot(hdn.astype(bf16), w2_ref[...],
                       preferred_element_type=f32) + b2m_ref[...].astype(f32)
    out_ref[0] = out.astype(out_ref.dtype)


@functools.partial(jax.jit, static_argnames=("num_heads",))
def block_forward_ca(f_v, f_a, params, *, num_heads):
    """Block.forward_ca({'visual': f_v, 'audio': f_a}) -> (out, attn)."""
    B, N, C = f_a.shape
    assert f_v.shape == (B, N, C)
    assert C % num_heads == 0
    assert N % 8 == 0 and C % 128 == 0, "lane/sublane-aligned shapes expected"
    D = C // num_heads
    scale = float(D) ** -0.5
    dt = f_a.dtype
    Hm = params["w1"].shape[0]

    # Parameters: torch (out, in) -> (in, out); big weights pre-cast to bf16,
    # LN params / biases stay f32.
    g1 = params["norm1_g"].reshape(1, C).astype(jnp.float32)
    b1n = params["norm1_b"].reshape(1, C).astype(jnp.float32)
    wq = params["wq"].T.astype(jnp.bfloat16)                               # (C, C)
    wkv = jnp.concatenate([params["wk"].T, params["wv"].T],
                          axis=1).astype(jnp.bfloat16)                      # (C, 2C)
    wp = params["wp"].T.astype(jnp.bfloat16)                               # (C, C)
    bp = params["bp"].reshape(1, C).astype(jnp.float32)
    g2 = params["norm2_g"].reshape(1, C).astype(jnp.float32)
    b2n = params["norm2_b"].reshape(1, C).astype(jnp.float32)
    w1 = params["w1"].T.astype(jnp.bfloat16)                               # (C, Hm)
    b1m = params["b1"].reshape(1, Hm).astype(jnp.float32)
    w2 = params["w2"].T.astype(jnp.bfloat16)                               # (Hm, C)
    b2m = params["b2"].reshape(1, C).astype(jnp.float32)

    bnc = pl.BlockSpec((1, N, C), lambda b: (b, 0, 0))
    full = lambda shape: pl.BlockSpec(shape, lambda b: tuple(0 for _ in shape))

    out, attn = pl.pallas_call(
        functools.partial(_block_ca_kernel, num_heads=num_heads,
                          scale=scale, eps=LN_EPS),
        grid=(B,),
        in_specs=[bnc, bnc,
                  full((1, C)), full((1, C)),            # norm1
                  full((C, C)), full((C, 2 * C)),        # wq, wk||wv
                  full((C, C)), full((1, C)),            # wp, bp
                  full((1, C)), full((1, C)),            # norm2
                  full((C, Hm)), full((1, Hm)),          # fc1
                  full((Hm, C)), full((1, C))],          # fc2
        out_specs=(bnc,
                   pl.BlockSpec((1, num_heads, N, N), lambda b: (b, 0, 0, 0))),
        out_shape=(jax.ShapeDtypeStruct((B, N, C), dt),
                   jax.ShapeDtypeStruct((B, num_heads, N, N), dt)),
        compiler_params=pltpu.CompilerParams(
            dimension_semantics=("parallel",)),
    )(f_v, f_a, g1, b1n, wq, wkv, wp, bp, g2, b2n, w1, b1m, w2, b2m)
    return out, attn


# ------------------------------ pure-JAX reference ---------------------------
_HI = jax.lax.Precision.HIGHEST


def _layernorm_ref(x, g, b, eps=LN_EPS):
    mu = jnp.mean(x, -1, keepdims=True)
    var = jnp.mean((x - mu) ** 2, -1, keepdims=True)
    return (x - mu) * lax.rsqrt(var + eps) * g + b


def block_forward_ca_ref(f_v, f_a, p, num_heads):
    B, N, C = f_a.shape
    D = C // num_heads
    scale = D ** -0.5
    xa = _layernorm_ref(f_a, p["norm1_g"], p["norm1_b"])
    xv = _layernorm_ref(f_v, p["norm1_g"], p["norm1_b"])
    q = jnp.dot(xa, p["wq"].T, precision=_HI)
    k = jnp.dot(xv, p["wk"].T, precision=_HI)
    v = jnp.dot(xv, p["wv"].T, precision=_HI)
    qh = q.reshape(B, N, num_heads, D).transpose(0, 2, 1, 3)
    kh = k.reshape(B, N, num_heads, D).transpose(0, 2, 1, 3)
    vh = v.reshape(B, N, num_heads, D).transpose(0, 2, 1, 3)
    s = jnp.einsum("bhnd,bhmd->bhnm", qh, kh, precision=_HI) * scale
    attn = jax.nn.sigmoid(s)
    ctx = jnp.einsum("bhnm,bhmd->bhnd", attn, vh,
                     precision=_HI).transpose(0, 2, 1, 3).reshape(B, N, C)
    x1 = xa + (jnp.dot(ctx, p["wp"].T, precision=_HI) + p["bp"])
    xn2 = _layernorm_ref(x1, p["norm2_g"], p["norm2_b"])
    h = _gelu_tanh(jnp.dot(xn2, p["w1"].T, precision=_HI) + p["b1"])
    out = x1 + (jnp.dot(h, p["w2"].T, precision=_HI) + p["b2"])
    return out, attn


if __name__ == "__main__":
    # Small shapes consistent with the module: dim=128, heads=8, mlp_ratio=4.
    B, N, C = 2, 128, 128
    num_heads = 8
    hidden = int(C * 4.0)

    key = jax.random.PRNGKey(0)
    ks = jax.random.split(key, 16)
    f_v = jax.random.normal(ks[0], (B, N, C), dtype=jnp.float32)
    f_a = jax.random.normal(ks[1], (B, N, C), dtype=jnp.float32)

    def w(k, shape, s=0.02):
        return jax.random.normal(k, shape, jnp.float32) * s

    params = {
        "norm1_g": jnp.ones((C,), jnp.float32) + w(ks[2], (C,)),
        "norm1_b": w(ks[3], (C,)),
        "wq": w(ks[4], (C, C)),          # torch nn.Linear layout (out, in), bias=False
        "wk": w(ks[5], (C, C)),
        "wv": w(ks[6], (C, C)),
        "wp": w(ks[7], (C, C)),
        "bp": w(ks[8], (C,)),
        "norm2_g": jnp.ones((C,), jnp.float32) + w(ks[9], (C,)),
        "norm2_b": w(ks[10], (C,)),
        "w1": w(ks[11], (hidden, C)),
        "b1": w(ks[12], (hidden,)),
        "w2": w(ks[13], (C, hidden)),
        "b2": w(ks[14], (C,)),
    }

    out, attn = block_forward_ca(f_v, f_a, params, num_heads=num_heads)
    out, attn = jax.block_until_ready((out, attn))

    ref_out, ref_attn = block_forward_ca_ref(f_v, f_a, params, num_heads)
    assert out.shape == (B, N, C)
    assert attn.shape == (B, num_heads, N, N)
    # attn is bounded in (0,1): tight tolerance. out goes through bf16-operand
    # MXU matmuls (f32 accumulation), so allow ~1e-2 vs the HIGHEST-precision
    # f32 reference.
    assert jnp.allclose(attn, ref_attn, atol=2e-3, rtol=2e-3), "attention mismatch vs reference"
    assert jnp.allclose(out, ref_out, atol=1e-2, rtol=1e-2), "output mismatch vs reference"

    print("KERNEL_OK")
</pallas_src>

<mosaic_0001>
module attributes {stable_mosaic.version = 11 : i64} {
  func.func @_block_ca_kernel(%arg0: i32, %arg1: memref<1x128x128xf32, #tpu.memory_space<vmem>>, %arg2: memref<1x128x128xf32, #tpu.memory_space<vmem>>, %arg3: memref<1x128xf32, #tpu.memory_space<vmem>>, %arg4: memref<1x128xf32, #tpu.memory_space<vmem>>, %arg5: memref<128x128xbf16, #tpu.memory_space<vmem>>, %arg6: memref<128x256xbf16, #tpu.memory_space<vmem>>, %arg7: memref<128x128xbf16, #tpu.memory_space<vmem>>, %arg8: memref<1x128xf32, #tpu.memory_space<vmem>>, %arg9: memref<1x128xf32, #tpu.memory_space<vmem>>, %arg10: memref<1x128xf32, #tpu.memory_space<vmem>>, %arg11: memref<128x512xbf16, #tpu.memory_space<vmem>>, %arg12: memref<1x512xf32, #tpu.memory_space<vmem>>, %arg13: memref<512x128xbf16, #tpu.memory_space<vmem>>, %arg14: memref<1x128xf32, #tpu.memory_space<vmem>>, %arg15: memref<1x128x128xf32, #tpu.memory_space<vmem>>, %arg16: memref<1x8x128x128xf32, #tpu.memory_space<vmem>>) attributes {dimension_semantics = [#tpu.dimension_semantics<parallel>], iteration_bounds = array<i64: 2>, scalar_prefetch = 0 : i64, scratch_operands = 0 : i64, tpu.core_type = #tpu.core_type<tc>, window_params = [{transform_indices = @transform_0, window_bounds = array<i64: 1, 128, 128>}, {transform_indices = @transform_1, window_bounds = array<i64: 1, 128, 128>}, {pipeline_mode = #tpu.pipeline_mode<synchronous>, transform_indices = @transform_2, window_bounds = array<i64: 1, 128>}, {pipeline_mode = #tpu.pipeline_mode<synchronous>, transform_indices = @transform_3, window_bounds = array<i64: 1, 128>}, {pipeline_mode = #tpu.pipeline_mode<synchronous>, transform_indices = @transform_4, window_bounds = array<i64: 128, 128>}, {pipeline_mode = #tpu.pipeline_mode<synchronous>, transform_indices = @transform_5, window_bounds = array<i64: 128, 256>}, {pipeline_mode = #tpu.pipeline_mode<synchronous>, transform_indices = @transform_6, window_bounds = array<i64: 128, 128>}, {pipeline_mode = #tpu.pipeline_mode<synchronous>, transform_indices = @transform_7, window_bounds = array<i64: 1, 128>}, {pipeline_mode = #tpu.pipeline_mode<synchronous>, transform_indices = @transform_8, window_bounds = array<i64: 1, 128>}, {pipeline_mode = #tpu.pipeline_mode<synchronous>, transform_indices = @transform_9, window_bounds = array<i64: 1, 128>}, {pipeline_mode = #tpu.pipeline_mode<synchronous>, transform_indices = @transform_10, window_bounds = array<i64: 128, 512>}, {pipeline_mode = #tpu.pipeline_mode<synchronous>, transform_indices = @transform_11, window_bounds = array<i64: 1, 512>}, {pipeline_mode = #tpu.pipeline_mode<synchronous>, transform_indices = @transform_12, window_bounds = array<i64: 512, 128>}, {pipeline_mode = #tpu.pipeline_mode<synchronous>, transform_indices = @transform_13, window_bounds = array<i64: 1, 128>}, {transform_indices = @transform_14, window_bounds = array<i64: 1, 128, 128>}, {transform_indices = @transform_15, window_bounds = array<i64: 1, 8, 128, 128>}]} {
    %c0 = arith.constant 0 : index
    %c0_0 = arith.constant 0 : index
    %0 = vector.load %arg3[%c0, %c0_0] : memref<1x128xf32, #tpu.memory_space<vmem>>, vector<1x128xf32>
    %c0_1 = arith.constant 0 : index
    %c0_2 = arith.constant 0 : index
    %1 = vector.load %arg4[%c0_1, %c0_2] : memref<1x128xf32, #tpu.memory_space<vmem>>, vector<1x128xf32>
    %c0_3 = arith.constant 0 : index
    %c0_4 = arith.constant 0 : index
    %c0_5 = arith.constant 0 : index
    %2 = vector.load %arg2[%c0_3, %c0_4, %c0_5] : memref<1x128x128xf32, #tpu.memory_space<vmem>>, vector<1x128x128xf32>
    %3 = vector.shape_cast %2 : vector<1x128x128xf32> to vector<128x128xf32>
    %cst = arith.constant dense<0.000000e+00> : vector<128xf32>
    %4 = vector.multi_reduction <add>, %3, %cst [1] : vector<128x128xf32> to vector<128xf32>
    %5 = vector.shape_cast %4 : vector<128xf32> to vector<128x1xf32>
    %cst_6 = arith.constant 1.280000e+02 : f32
    %6 = vector.broadcast %cst_6 : f32 to vector<128x1xf32>
    %7 = arith.divf %5, %6 : vector<128x1xf32>
    %8 = vector.broadcast %7 : vector<128x1xf32> to vector<128x128xf32>
    %9 = arith.subf %3, %8 : vector<128x128xf32>
    %10 = arith.mulf %9, %9 : vector<128x128xf32>
    %cst_7 = arith.constant dense<0.000000e+00> : vector<128xf32>
    %11 = vector.multi_reduction <add>, %10, %cst_7 [1] : vector<128x128xf32> to vector<128xf32>
    %12 = vector.shape_cast %11 : vector<128xf32> to vector<128x1xf32>
    %cst_8 = arith.constant 1.280000e+02 : f32
    %13 = vector.broadcast %cst_8 : f32 to vector<128x1xf32>
    %14 = arith.divf %12, %13 : vector<128x1xf32>
    %cst_9 = arith.constant 9.99999974E-6 : f32
    %15 = vector.broadcast %cst_9 : f32 to vector<128x1xf32>
    %16 = arith.addf %14, %15 : vector<128x1xf32>
    %17 = math.rsqrt %16 : vector<128x1xf32>
    %18 = vector.broadcast %17 : vector<128x1xf32> to vector<128x128xf32>
    %19 = arith.mulf %9, %18 : vector<128x128xf32>
    %20 = vector.broadcast %0 : vector<1x128xf32> to vector<128x128xf32>
    %21 = arith.mulf %19, %20 : vector<128x128xf32>
    %22 = vector.broadcast %1 : vector<1x128xf32> to vector<128x128xf32>
    %23 = arith.addf %21, %22 : vector<128x128xf32>
    %c0_10 = arith.constant 0 : index
    %c0_11 = arith.constant 0 : index
    %c0_12 = arith.constant 0 : index
    %24 = vector.load %arg1[%c0_10, %c0_11, %c0_12] : memref<1x128x128xf32, #tpu.memory_space<vmem>>, vector<1x128x128xf32>
    %25 = vector.shape_cast %24 : vector<1x128x128xf32> to vector<128x128xf32>
    %cst_13 = arith.constant dense<0.000000e+00> : vector<128xf32>
    %26 = vector.multi_reduction <add>, %25, %cst_13 [1] : vector<128x128xf32> to vector<128xf32>
    %27 = vector.shape_cast %26 : vector<128xf32> to vector<128x1xf32>
    %cst_14 = arith.constant 1.280000e+02 : f32
    %28 = vector.broadcast %cst_14 : f32 to vector<128x1xf32>
    %29 = arith.divf %27, %28 : vector<128x1xf32>
    %30 = vector.broadcast %29 : vector<128x1xf32> to vector<128x128xf32>
    %31 = arith.subf %25, %30 : vector<128x128xf32>
    %32 = arith.mulf %31, %31 : vector<128x128xf32>
    %cst_15 = arith.constant dense<0.000000e+00> : vector<128xf32>
    %33 = vector.multi_reduction <add>, %32, %cst_15 [1] : vector<128x128xf32> to vector<128xf32>
    %34 = vector.shape_cast %33 : vector<128xf32> to vector<128x1xf32>
    %cst_16 = arith.constant 1.280000e+02 : f32
    %35 = vector.broadcast %cst_16 : f32 to vector<128x1xf32>
    %36 = arith.divf %34, %35 : vector<128x1xf32>
    %cst_17 = arith.constant 9.99999974E-6 : f32
    %37 = vector.broadcast %cst_17 : f32 to vector<128x1xf32>
    %38 = arith.addf %36, %37 : vector<128x1xf32>
    %39 = math.rsqrt %38 : vector<128x1xf32>
    %40 = vector.broadcast %39 : vector<128x1xf32> to vector<128x128xf32>
    %41 = arith.mulf %31, %40 : vector<128x128xf32>
    %42 = vector.broadcast %0 : vector<1x128xf32> to vector<128x128xf32>
    %43 = arith.mulf %41, %42 : vector<128x128xf32>
    %44 = vector.broadcast %1 : vector<1x128xf32> to vector<128x128xf32>
    %45 = arith.addf %43, %44 : vector<128x128xf32>
    %46 = arith.truncf %23 : vector<128x128xf32> to vector<128x128xbf16>
    %c0_18 = arith.constant 0 : index
    %c0_19 = arith.constant 0 : index
    %47 = vector.load %arg5[%c0_18, %c0_19] : memref<128x128xbf16, #tpu.memory_space<vmem>>, vector<128x128xbf16>
    %cst_20 = arith.constant dense<0.000000e+00> : vector<128x128xf32>
    %48 = tpu.matmul %46, %47, %cst_20 {dimension_numbers = #tpu.dot_dimension_numbers<[1], [0], [0], [1], [0, 0, 1, 1], [], []>} : vector<128x128xbf16>, vector<128x128xbf16>, vector<128x128xf32> -> vector<128x128xf32>
    %49 = arith.truncf %45 : vector<128x128xf32> to vector<128x128xbf16>
    %c0_21 = arith.constant 0 : index
    %c0_22 = arith.constant 0 : index
    %50 = vector.load %arg6[%c0_21, %c0_22] : memref<128x256xbf16, #tpu.memory_space<vmem>>, vector<128x256xbf16>
    %cst_23 = arith.constant dense<0.000000e+00> : vector<128x256xf32>
    %51 = tpu.matmul %49, %50, %cst_23 {dimension_numbers = #tpu.dot_dimension_numbers<[1], [0], [0], [1], [0, 0, 1, 1], [], []>} : vector<128x128xbf16>, vector<128x256xbf16>, vector<128x256xf32> -> vector<128x256xf32>
    %52 = arith.truncf %48 : vector<128x128xf32> to vector<128x128xbf16>
    %53 = vector.extract_strided_slice %51 {offsets = [0, 0], sizes = [128, 128], strides = [1, 1]} : vector<128x256xf32> to vector<128x128xf32>
    %54 = arith.truncf %53 : vector<128x128xf32> to vector<128x128xbf16>
    %55 = vector.extract_strided_slice %51 {offsets = [0, 128], sizes = [128, 128], strides = [1, 1]} : vector<128x256xf32> to vector<128x128xf32>
    %56 = arith.truncf %55 : vector<128x128xf32> to vector<128x128xbf16>
    %57 = vector.extract_strided_slice %52 {offsets = [0, 0], sizes = [128, 16], strides = [1, 1]} : vector<128x128xbf16> to vector<128x16xbf16>
    %58 = vector.extract_strided_slice %54 {offsets = [0, 0], sizes = [128, 16], strides = [1, 1]} : vector<128x128xbf16> to vector<128x16xbf16>
    %cst_24 = arith.constant dense<0.000000e+00> : vector<128x128xf32>
    %59 = tpu.matmul %57, %58, %cst_24 {dimension_numbers = #tpu.dot_dimension_numbers<[1], [1], [0], [0], [0, 0, 1, 0], [], []>} : vector<128x16xbf16>, vector<128x16xbf16>, vector<128x128xf32> -> vector<128x128xf32>
    %cst_25 = arith.constant 2.500000e-01 : f32
    %60 = vector.broadcast %cst_25 : f32 to vector<128x128xf32>
    %61 = arith.mulf %59, %60 : vector<128x128xf32>
    %cst_26 = arith.constant 0.000000e+00 : f32
    %62 = vector.broadcast %cst_26 : f32 to vector<128x128xf32>
    %63 = arith.subf %62, %61 : vector<128x128xf32>
    %64 = math.exp %63 : vector<128x128xf32>
    %cst_27 = arith.constant 1.000000e+00 : f32
    %65 = vector.broadcast %cst_27 : f32 to vector<128x128xf32>
    %66 = arith.addf %65, %64 : vector<128x128xf32>
    %67 = tpu.reciprocal %66 {approx = true} : vector<128x128xf32> -> vector<128x128xf32>
    %c0_28 = arith.constant 0 : index
    %c0_29 = arith.constant 0 : index
    %c0_30 = arith.constant 0 : index
    %c0_31 = arith.constant 0 : index
    %68 = vector.load %arg16[%c0_28, %c0_29, %c0_30, %c0_31] : memref<1x8x128x128xf32, #tpu.memory_space<vmem>>, vector<1x1x128x128xf32>
    %69 = vector.shape_cast %68 : vector<1x1x128x128xf32> to vector<128x128xf32>
    %70 = vector.shape_cast %67 : vector<128x128xf32> to vector<1x1x128x128xf32>
    tpu.vector_store %arg16[%c0_28, %c0_29, %c0_30, %c0_31], %70 {strides = array<i32>} : memref<1x8x128x128xf32, #tpu.memory_space<vmem>>, vector<1x1x128x128xf32>,
    %71 = arith.truncf %67 : vector<128x128xf32> to vector<128x128xbf16>
    %72 = vector.extract_strided_slice %56 {offsets = [0, 0], sizes = [128, 16], strides = [1, 1]} : vector<128x128xbf16> to vector<128x16xbf16>
    %cst_32 = arith.constant dense<0.000000e+00> : vector<128x16xf32>
    %73 = tpu.matmul %71, %72, %cst_32 {dimension_numbers = #tpu.dot_dimension_numbers<[1], [0], [0], [1], [0, 0, 1, 1], [], []>} : vector<128x128xbf16>, vector<128x16xbf16>, vector<128x16xf32> -> vector<128x16xf32>
    %74 = vector.extract_strided_slice %52 {offsets = [0, 16], sizes = [128, 16], strides = [1, 1]} : vector<128x128xbf16> to vector<128x16xbf16>
    %75 = vector.extract_strided_slice %54 {offsets = [0, 16], sizes = [128, 16], strides = [1, 1]} : vector<128x128xbf16> to vector<128x16xbf16>
    %cst_33 = arith.constant dense<0.000000e+00> : vector<128x128xf32>
    %76 = tpu.matmul %74, %75, %cst_33 {dimension_numbers = #tpu.dot_dimension_numbers<[1], [1], [0], [0], [0, 0, 1, 0], [], []>} : vector<128x16xbf16>, vector<128x16xbf16>, vector<128x128xf32> -> vector<128x128xf32>
    %cst_34 = arith.constant 2.500000e-01 : f32
    %77 = vector.broadcast %cst_34 : f32 to vector<128x128xf32>
    %78 = arith.mulf %76, %77 : vector<128x128xf32>
    %cst_35 = arith.constant 0.000000e+00 : f32
    %79 = vector.broadcast %cst_35 : f32 to vector<128x128xf32>
    %80 = arith.subf %79, %78 : vector<128x128xf32>
    %81 = math.exp %80 : vector<128x128xf32>
    %cst_36 = arith.constant 1.000000e+00 : f32
    %82 = vector.broadcast %cst_36 : f32 to vector<128x128xf32>
    %83 = arith.addf %82, %81 : vector<128x128xf32>
    %84 = tpu.reciprocal %83 {approx = true} : vector<128x128xf32> -> vector<128x128xf32>
    %c0_37 = arith.constant 0 : index
    %c1 = arith.constant 1 : index
    %c0_38 = arith.constant 0 : index
    %c0_39 = arith.constant 0 : index
    %85 = vector.load %arg16[%c0_37, %c1, %c0_38, %c0_39] : memref<1x8x128x128xf32, #tpu.memory_space<vmem>>, vector<1x1x128x128xf32>
    %86 = vector.shape_cast %85 : vector<1x1x128x128xf32> to vector<128x128xf32>
    %87 = vector.shape_cast %84 : vector<128x128xf32> to vector<1x1x128x128xf32>
    tpu.vector_store %arg16[%c0_37, %c1, %c0_38, %c0_39], %87 {strides = array<i32>} : memref<1x8x128x128xf32, #tpu.memory_space<vmem>>, vector<1x1x128x128xf32>,
    %88 = arith.truncf %84 : vector<128x128xf32> to vector<128x128xbf16>
    %89 = vector.extract_strided_slice %56 {offsets = [0, 16], sizes = [128, 16], strides = [1, 1]} : vector<128x128xbf16> to vector<128x16xbf16>
    %cst_40 = arith.constant dense<0.000000e+00> : vector<128x16xf32>
    %90 = tpu.matmul %88, %89, %cst_40 {dimension_numbers = #tpu.dot_dimension_numbers<[1], [0], [0], [1], [0, 0, 1, 1], [], []>} : vector<128x128xbf16>, vector<128x16xbf16>, vector<128x16xf32> -> vector<128x16xf32>
    %91 = vector.extract_strided_slice %52 {offsets = [0, 32], sizes = [128, 16], strides = [1, 1]} : vector<128x128xbf16> to vector<128x16xbf16>
    %92 = vector.extract_strided_slice %54 {offsets = [0, 32], sizes = [128, 16], strides = [1, 1]} : vector<128x128xbf16> to vector<128x16xbf16>
    %cst_41 = arith.constant dense<0.000000e+00> : vector<128x128xf32>
    %93 = tpu.matmul %91, %92, %cst_41 {dimension_numbers = #tpu.dot_dimension_numbers<[1], [1], [0], [0], [0, 0, 1, 0], [], []>} : vector<128x16xbf16>, vector<128x16xbf16>, vector<128x128xf32> -> vector<128x128xf32>
    %cst_42 = arith.constant 2.500000e-01 : f32
    %94 = vector.broadcast %cst_42 : f32 to vector<128x128xf32>
    %95 = arith.mulf %93, %94 : vector<128x128xf32>
    %cst_43 = arith.constant 0.000000e+00 : f32
    %96 = vector.broadcast %cst_43 : f32 to vector<128x128xf32>
    %97 = arith.subf %96, %95 : vector<128x128xf32>
    %98 = math.exp %97 : vector<128x128xf32>
    %cst_44 = arith.constant 1.000000e+00 : f32
    %99 = vector.broadcast %cst_44 : f32 to vector<128x128xf32>
    %100 = arith.addf %99, %98 : vector<128x128xf32>
    %101 = tpu.reciprocal %100 {approx = true} : vector<128x128xf32> -> vector<128x128xf32>
    %c0_45 = arith.constant 0 : index
    %c2 = arith.constant 2 : index
    %c0_46 = arith.constant 0 : index
    %c0_47 = arith.constant 0 : index
    %102 = vector.load %arg16[%c0_45, %c2, %c0_46, %c0_47] : memref<1x8x128x128xf32, #tpu.memory_space<vmem>>, vector<1x1x128x128xf32>
    %103 = vector.shape_cast %102 : vector<1x1x128x128xf32> to vector<128x128xf32>
    %104 = vector.shape_cast %101 : vector<128x128xf32> to vector<1x1x128x128xf32>
    tpu.vector_store %arg16[%c0_45, %c2, %c0_46, %c0_47], %104 {strides = array<i32>} : memref<1x8x128x128xf32, #tpu.memory_space<vmem>>, vector<1x1x128x128xf32>,
    %105 = arith.truncf %101 : vector<128x128xf32> to vector<128x128xbf16>
    %106 = vector.extract_strided_slice %56 {offsets = [0, 32], sizes = [128, 16], strides = [1, 1]} : vector<128x128xbf16> to vector<128x16xbf16>
    %cst_48 = arith.constant dense<0.000000e+00> : vector<128x16xf32>
    %107 = tpu.matmul %105, %106, %cst_48 {dimension_numbers = #tpu.dot_dimension_numbers<[1], [0], [0], [1], [0, 0, 1, 1], [], []>} : vector<128x128xbf16>, vector<128x16xbf16>, vector<128x16xf32> -> vector<128x16xf32>
    %108 = vector.extract_strided_slice %52 {offsets = [0, 48], sizes = [128, 16], strides = [1, 1]} : vector<128x128xbf16> to vector<128x16xbf16>
    %109 = vector.extract_strided_slice %54 {offsets = [0, 48], sizes = [128, 16], strides = [1, 1]} : vector<128x128xbf16> to vector<128x16xbf16>
    %cst_49 = arith.constant dense<0.000000e+00> : vector<128x128xf32>
    %110 = tpu.matmul %108, %109, %cst_49 {dimension_numbers = #tpu.dot_dimension_numbers<[1], [1], [0], [0], [0, 0, 1, 0], [], []>} : vector<128x16xbf16>, vector<128x16xbf16>, vector<128x128xf32> -> vector<128x128xf32>
    %cst_50 = arith.constant 2.500000e-01 : f32
    %111 = vector.broadcast %cst_50 : f32 to vector<128x128xf32>
    %112 = arith.mulf %110, %111 : vector<128x128xf32>
    %cst_51 = arith.constant 0.000000e+00 : f32
    %113 = vector.broadcast %cst_51 : f32 to vector<128x128xf32>
    %114 = arith.subf %113, %112 : vector<128x128xf32>
    %115 = math.exp %114 : vector<128x128xf32>
    %cst_52 = arith.constant 1.000000e+00 : f32
    %116 = vector.broadcast %cst_52 : f32 to vector<128x128xf32>
    %117 = arith.addf %116, %115 : vector<128x128xf32>
    %118 = tpu.reciprocal %117 {approx = true} : vector<128x128xf32> -> vector<128x128xf32>
    %c0_53 = arith.constant 0 : index
    %c3 = arith.constant 3 : index
    %c0_54 = arith.constant 0 : index
    %c0_55 = arith.constant 0 : index
    %119 = vector.load %arg16[%c0_53, %c3, %c0_54, %c0_55] : memref<1x8x128x128xf32, #tpu.memory_space<vmem>>, vector<1x1x128x128xf32>
    %120 = vector.shape_cast %119 : vector<1x1x128x128xf32> to vector<128x128xf32>
    %121 = vector.shape_cast %118 : vector<128x128xf32> to vector<1x1x128x128xf32>
    tpu.vector_store %arg16[%c0_53, %c3, %c0_54, %c0_55], %121 {strides = array<i32>} : memref<1x8x128x128xf32, #tpu.memory_space<vmem>>, vector<1x1x128x128xf32>,
    %122 = arith.truncf %118 : vector<128x128xf32> to vector<128x128xbf16>
    %123 = vector.extract_strided_slice %56 {offsets = [0, 48], sizes = [128, 16], strides = [1, 1]} : vector<128x128xbf16> to vector<128x16xbf16>
    %cst_56 = arith.constant dense<0.000000e+00> : vector<128x16xf32>
    %124 = tpu.matmul %122, %123, %cst_56 {dimension_numbers = #tpu.dot_dimension_numbers<[1], [0], [0], [1], [0, 0, 1, 1], [], []>} : vector<128x128xbf16>, vector<128x16xbf16>, vector<128x16xf32> -> vector<128x16xf32>
    %125 = vector.extract_strided_slice %52 {offsets = [0, 64], sizes = [128, 16], strides = [1, 1]} : vector<128x128xbf16> to vector<128x16xbf16>
    %126 = vector.extract_strided_slice %54 {offsets = [0, 64], sizes = [128, 16], strides = [1, 1]} : vector<128x128xbf16> to vector<128x16xbf16>
    %cst_57 = arith.constant dense<0.000000e+00> : vector<128x128xf32>
    %127 = tpu.matmul %125, %126, %cst_57 {dimension_numbers = #tpu.dot_dimension_numbers<[1], [1], [0], [0], [0, 0, 1, 0], [], []>} : vector<128x16xbf16>, vector<128x16xbf16>, vector<128x128xf32> -> vector<128x128xf32>
    %cst_58 = arith.constant 2.500000e-01 : f32
    %128 = vector.broadcast %cst_58 : f32 to vector<128x128xf32>
    %129 = arith.mulf %127, %128 : vector<128x128xf32>
    %cst_59 = arith.constant 0.000000e+00 : f32
    %130 = vector.broadcast %cst_59 : f32 to vector<128x128xf32>
    %131 = arith.subf %130, %129 : vector<128x128xf32>
    %132 = math.exp %131 : vector<128x128xf32>
    %cst_60 = arith.constant 1.000000e+00 : f32
    %133 = vector.broadcast %cst_60 : f32 to vector<128x128xf32>
    %134 = arith.addf %133, %132 : vector<128x128xf32>
    %135 = tpu.reciprocal %134 {approx = true} : vector<128x128xf32> -> vector<128x128xf32>
    %c0_61 = arith.constant 0 : index
    %c4 = arith.constant 4 : index
    %c0_62 = arith.constant 0 : index
    %c0_63 = arith.constant 0 : index
    %136 = vector.load %arg16[%c0_61, %c4, %c0_62, %c0_63] : memref<1x8x128x128xf32, #tpu.memory_space<vmem>>, vector<1x1x128x128xf32>
    %137 = vector.shape_cast %136 : vector<1x1x128x128xf32> to vector<128x128xf32>
    %138 = vector.shape_cast %135 : vector<128x128xf32> to vector<1x1x128x128xf32>
    tpu.vector_store %arg16[%c0_61, %c4, %c0_62, %c0_63], %138 {strides = array<i32>} : memref<1x8x128x128xf32, #tpu.memory_space<vmem>>, vector<1x1x128x128xf32>,
    %139 = arith.truncf %135 : vector<128x128xf32> to vector<128x128xbf16>
    %140 = vector.extract_strided_slice %56 {offsets = [0, 64], sizes = [128, 16], strides = [1, 1]} : vector<128x128xbf16> to vector<128x16xbf16>
    %cst_64 = arith.constant dense<0.000000e+00> : vector<128x16xf32>
    %141 = tpu.matmul %139, %140, %cst_64 {dimension_numbers = #tpu.dot_dimension_numbers<[1], [0], [0], [1], [0, 0, 1, 1], [], []>} : vector<128x128xbf16>, vector<128x16xbf16>, vector<128x16xf32> -> vector<128x16xf32>
    %142 = vector.extract_strided_slice %52 {offsets = [0, 80], sizes = [128, 16], strides = [1, 1]} : vector<128x128xbf16> to vector<128x16xbf16>
    %143 = vector.extract_strided_slice %54 {offsets = [0, 80], sizes = [128, 16], strides = [1, 1]} : vector<128x128xbf16> to vector<128x16xbf16>
    %cst_65 = arith.constant dense<0.000000e+00> : vector<128x128xf32>
    %144 = tpu.matmul %142, %143, %cst_65 {dimension_numbers = #tpu.dot_dimension_numbers<[1], [1], [0], [0], [0, 0, 1, 0], [], []>} : vector<128x16xbf16>, vector<128x16xbf16>, vector<128x128xf32> -> vector<128x128xf32>
    %cst_66 = arith.constant 2.500000e-01 : f32
    %145 = vector.broadcast %cst_66 : f32 to vector<128x128xf32>
    %146 = arith.mulf %144, %145 : vector<128x128xf32>
    %cst_67 = arith.constant 0.000000e+00 : f32
    %147 = vector.broadcast %cst_67 : f32 to vector<128x128xf32>
    %148 = arith.subf %147, %146 : vector<128x128xf32>
    %149 = math.exp %148 : vector<128x128xf32>
    %cst_68 = arith.constant 1.000000e+00 : f32
    %150 = vector.broadcast %cst_68 : f32 to vector<128x128xf32>
    %151 = arith.addf %150, %149 : vector<128x128xf32>
    %152 = tpu.reciprocal %151 {approx = true} : vector<128x128xf32> -> vector<128x128xf32>
    %c0_69 = arith.constant 0 : index
    %c5 = arith.constant 5 : index
    %c0_70 = arith.constant 0 : index
    %c0_71 = arith.constant 0 : index
    %153 = vector.load %arg16[%c0_69, %c5, %c0_70, %c0_71] : memref<1x8x128x128xf32, #tpu.memory_space<vmem>>, vector<1x1x128x128xf32>
    %154 = vector.shape_cast %153 : vector<1x1x128x128xf32> to vector<128x128xf32>
    %155 = vector.shape_cast %152 : vector<128x128xf32> to vector<1x1x128x128xf32>
    tpu.vector_store %arg16[%c0_69, %c5, %c0_70, %c0_71], %155 {strides = array<i32>} : memref<1x8x128x128xf32, #tpu.memory_space<vmem>>, vector<1x1x128x128xf32>,
    %156 = arith.truncf %152 : vector<128x128xf32> to vector<128x128xbf16>
    %157 = vector.extract_strided_slice %56 {offsets = [0, 80], sizes = [128, 16], strides = [1, 1]} : vector<128x128xbf16> to vector<128x16xbf16>
    %cst_72 = arith.constant dense<0.000000e+00> : vector<128x16xf32>
    %158 = tpu.matmul %156, %157, %cst_72 {dimension_numbers = #tpu.dot_dimension_numbers<[1], [0], [0], [1], [0, 0, 1, 1], [], []>} : vector<128x128xbf16>, vector<128x16xbf16>, vector<128x16xf32> -> vector<128x16xf32>
    %159 = vector.extract_strided_slice %52 {offsets = [0, 96], sizes = [128, 16], strides = [1, 1]} : vector<128x128xbf16> to vector<128x16xbf16>
    %160 = vector.extract_strided_slice %54 {offsets = [0, 96], sizes = [128, 16], strides = [1, 1]} : vector<128x128xbf16> to vector<128x16xbf16>
    %cst_73 = arith.constant dense<0.000000e+00> : vector<128x128xf32>
    %161 = tpu.matmul %159, %160, %cst_73 {dimension_numbers = #tpu.dot_dimension_numbers<[1], [1], [0], [0], [0, 0, 1, 0], [], []>} : vector<128x16xbf16>, vector<128x16xbf16>, vector<128x128xf32> -> vector<128x128xf32>
    %cst_74 = arith.constant 2.500000e-01 : f32
    %162 = vector.broadcast %cst_74 : f32 to vector<128x128xf32>
    %163 = arith.mulf %161, %162 : vector<128x128xf32>
    %cst_75 = arith.constant 0.000000e+00 : f32
    %164 = vector.broadcast %cst_75 : f32 to vector<128x128xf32>
    %165 = arith.subf %164, %163 : vector<128x128xf32>
    %166 = math.exp %165 : vector<128x128xf32>
    %cst_76 = arith.constant 1.000000e+00 : f32
    %167 = vector.broadcast %cst_76 : f32 to vector<128x128xf32>
    %168 = arith.addf %167, %166 : vector<128x128xf32>
    %169 = tpu.reciprocal %168 {approx = true} : vector<128x128xf32> -> vector<128x128xf32>
    %c0_77 = arith.constant 0 : index
    %c6 = arith.constant 6 : index
    %c0_78 = arith.constant 0 : index
    %c0_79 = arith.constant 0 : index
    %170 = vector.load %arg16[%c0_77, %c6, %c0_78, %c0_79] : memref<1x8x128x128xf32, #tpu.memory_space<vmem>>, vector<1x1x128x128xf32>
    %171 = vector.shape_cast %170 : vector<1x1x128x128xf32> to vector<128x128xf32>
    %172 = vector.shape_cast %169 : vector<128x128xf32> to vector<1x1x128x128xf32>
    tpu.vector_store %arg16[%c0_77, %c6, %c0_78, %c0_79], %172 {strides = array<i32>} : memref<1x8x128x128xf32, #tpu.memory_space<vmem>>, vector<1x1x128x128xf32>,
    %173 = arith.truncf %169 : vector<128x128xf32> to vector<128x128xbf16>
    %174 = vector.extract_strided_slice %56 {offsets = [0, 96], sizes = [128, 16], strides = [1, 1]} : vector<128x128xbf16> to vector<128x16xbf16>
    %cst_80 = arith.constant dense<0.000000e+00> : vector<128x16xf32>
    %175 = tpu.matmul %173, %174, %cst_80 {dimension_numbers = #tpu.dot_dimension_numbers<[1], [0], [0], [1], [0, 0, 1, 1], [], []>} : vector<128x128xbf16>, vector<128x16xbf16>, vector<128x16xf32> -> vector<128x16xf32>
    %176 = vector.extract_strided_slice %52 {offsets = [0, 112], sizes = [128, 16], strides = [1, 1]} : vector<128x128xbf16> to vector<128x16xbf16>
    %177 = vector.extract_strided_slice %54 {offsets = [0, 112], sizes = [128, 16], strides = [1, 1]} : vector<128x128xbf16> to vector<128x16xbf16>
    %cst_81 = arith.constant dense<0.000000e+00> : vector<128x128xf32>
    %178 = tpu.matmul %176, %177, %cst_81 {dimension_numbers = #tpu.dot_dimension_numbers<[1], [1], [0], [0], [0, 0, 1, 0], [], []>} : vector<128x16xbf16>, vector<128x16xbf16>, vector<128x128xf32> -> vector<128x128xf32>
    %cst_82 = arith.constant 2.500000e-01 : f32
    %179 = vector.broadcast %cst_82 : f32 to vector<128x128xf32>
    %180 = arith.mulf %178, %179 : vector<128x128xf32>
    %cst_83 = arith.constant 0.000000e+00 : f32
    %181 = vector.broadcast %cst_83 : f32 to vector<128x128xf32>
    %182 = arith.subf %181, %180 : vector<128x128xf32>
    %183 = math.exp %182 : vector<128x128xf32>
    %cst_84 = arith.constant 1.000000e+00 : f32
    %184 = vector.broadcast %cst_84 : f32 to vector<128x128xf32>
    %185 = arith.addf %184, %183 : vector<128x128xf32>
    %186 = tpu.reciprocal %185 {approx = true} : vector<128x128xf32> -> vector<128x128xf32>
    %c0_85 = arith.constant 0 : index
    %c7 = arith.constant 7 : index
    %c0_86 = arith.constant 0 : index
    %c0_87 = arith.constant 0 : index
    %187 = vector.load %arg16[%c0_85, %c7, %c0_86, %c0_87] : memref<1x8x128x128xf32, #tpu.memory_space<vmem>>, vector<1x1x128x128xf32>
    %188 = vector.shape_cast %187 : vector<1x1x128x128xf32> to vector<128x128xf32>
    %189 = vector.shape_cast %186 : vector<128x128xf32> to vector<1x1x128x128xf32>
    tpu.vector_store %arg16[%c0_85, %c7, %c0_86, %c0_87], %189 {strides = array<i32>} : memref<1x8x128x128xf32, #tpu.memory_space<vmem>>, vector<1x1x128x128xf32>,
    %190 = arith.truncf %186 : vector<128x128xf32> to vector<128x128xbf16>
    %191 = vector.extract_strided_slice %56 {offsets = [0, 112], sizes = [128, 16], strides = [1, 1]} : vector<128x128xbf16> to vector<128x16xbf16>
    %cst_88 = arith.constant dense<0.000000e+00> : vector<128x16xf32>
    %192 = tpu.matmul %190, %191, %cst_88 {dimension_numbers = #tpu.dot_dimension_numbers<[1], [0], [0], [1], [0, 0, 1, 1], [], []>} : vector<128x128xbf16>, vector<128x16xbf16>, vector<128x16xf32> -> vector<128x16xf32>
    %193 = tpu.concatenate %73, %90, %107, %124, %141, %158, %175, %192 in 1 : vector<128x16xf32>, vector<128x16xf32>, vector<128x16xf32>, vector<128x16xf32>, vector<128x16xf32>, vector<128x16xf32>, vector<128x16xf32>, vector<128x16xf32> -> vector<128x128xf32>
    %194 = arith.truncf %193 : vector<128x128xf32> to vector<128x128xbf16>
    %c0_89 = arith.constant 0 : index
    %c0_90 = arith.constant 0 : index
    %195 = vector.load %arg7[%c0_89, %c0_90] : memref<128x128xbf16, #tpu.memory_space<vmem>>, vector<128x128xbf16>
    %cst_91 = arith.constant dense<0.000000e+00> : vector<128x128xf32>
    %196 = tpu.matmul %194, %195, %cst_91 {dimension_numbers = #tpu.dot_dimension_numbers<[1], [0], [0], [1], [0, 0, 1, 1], [], []>} : vector<128x128xbf16>, vector<128x128xbf16>, vector<128x128xf32> -> vector<128x128xf32>
    %197 = arith.addf %23, %196 : vector<128x128xf32>
    %c0_92 = arith.constant 0 : index
    %c0_93 = arith.constant 0 : index
    %198 = vector.load %arg8[%c0_92, %c0_93] : memref<1x128xf32, #tpu.memory_space<vmem>>, vector<1x128xf32>
    %199 = vector.broadcast %198 : vector<1x128xf32> to vector<128x128xf32>
    %200 = arith.addf %197, %199 : vector<128x128xf32>
    %c0_94 = arith.constant 0 : index
    %c0_95 = arith.constant 0 : index
    %201 = vector.load %arg9[%c0_94, %c0_95] : memref<1x128xf32, #tpu.memory_space<vmem>>, vector<1x128xf32>
    %c0_96 = arith.constant 0 : index
    %c0_97 = arith.constant 0 : index
    %202 = vector.load %arg10[%c0_96, %c0_97] : memref<1x128xf32, #tpu.memory_space<vmem>>, vector<1x128xf32>
    %cst_98 = arith.constant dense<0.000000e+00> : vector<128xf32>
    %203 = vector.multi_reduction <add>, %200, %cst_98 [1] : vector<128x128xf32> to vector<128xf32>
    %204 = vector.shape_cast %203 : vector<128xf32> to vector<128x1xf32>
    %cst_99 = arith.constant 1.280000e+02 : f32
    %205 = vector.broadcast %cst_99 : f32 to vector<128x1xf32>
    %206 = arith.divf %204, %205 : vector<128x1xf32>
    %207 = vector.broadcast %206 : vector<128x1xf32> to vector<128x128xf32>
    %208 = arith.subf %200, %207 : vector<128x128xf32>
    %209 = arith.mulf %208, %208 : vector<128x128xf32>
    %cst_100 = arith.constant dense<0.000000e+00> : vector<128xf32>
    %210 = vector.multi_reduction <add>, %209, %cst_100 [1] : vector<128x128xf32> to vector<128xf32>
    %211 = vector.shape_cast %210 : vector<128xf32> to vector<128x1xf32>
    %cst_101 = arith.constant 1.280000e+02 : f32
    %212 = vector.broadcast %cst_101 : f32 to vector<128x1xf32>
    %213 = arith.divf %211, %212 : vector<128x1xf32>
    %cst_102 = arith.constant 9.99999974E-6 : f32
    %214 = vector.broadcast %cst_102 : f32 to vector<128x1xf32>
    %215 = arith.addf %213, %214 : vector<128x1xf32>
    %216 = math.rsqrt %215 : vector<128x1xf32>
    %217 = vector.broadcast %216 : vector<128x1xf32> to vector<128x128xf32>
    %218 = arith.mulf %208, %217 : vector<128x128xf32>
    %219 = vector.broadcast %201 : vector<1x128xf32> to vector<128x128xf32>
    %220 = arith.mulf %218, %219 : vector<128x128xf32>
    %221 = vector.broadcast %202 : vector<1x128xf32> to vector<128x128xf32>
    %222 = arith.addf %220, %221 : vector<128x128xf32>
    %223 = arith.truncf %222 : vector<128x128xf32> to vector<128x128xbf16>
    %c0_103 = arith.constant 0 : index
    %c0_104 = arith.constant 0 : index
    %224 = vector.load %arg11[%c0_103, %c0_104] : memref<128x512xbf16, #tpu.memory_space<vmem>>, vector<128x512xbf16>
    %cst_105 = arith.constant dense<0.000000e+00> : vector<128x512xf32>
    %225 = tpu.matmul %223, %224, %cst_105 {dimension_numbers = #tpu.dot_dimension_numbers<[1], [0], [0], [1], [0, 0, 1, 1], [], []>} : vector<128x128xbf16>, vector<128x512xbf16>, vector<128x512xf32> -> vector<128x512xf32>
    %c0_106 = arith.constant 0 : index
    %c0_107 = arith.constant 0 : index
    %226 = vector.load %arg12[%c0_106, %c0_107] : memref<1x512xf32, #tpu.memory_space<vmem>>, vector<1x512xf32>
    %227 = vector.broadcast %226 : vector<1x512xf32> to vector<128x512xf32>
    %228 = arith.addf %225, %227 : vector<128x512xf32>
    %cst_108 = arith.constant 5.000000e-01 : f32
    %229 = vector.broadcast %cst_108 : f32 to vector<128x512xf32>
    %230 = arith.mulf %229, %228 : vector<128x512xf32>
    %cst_109 = arith.constant 4.471500e-02 : f32
    %231 = vector.broadcast %cst_109 : f32 to vector<128x512xf32>
    %232 = arith.mulf %231, %228 : vector<128x512xf32>
    %233 = arith.mulf %232, %228 : vector<128x512xf32>
    %234 = arith.mulf %233, %228 : vector<128x512xf32>
    %235 = arith.addf %228, %234 : vector<128x512xf32>
    %cst_110 = arith.constant 0.797884583 : f32
    %236 = vector.broadcast %cst_110 : f32 to vector<128x512xf32>
    %237 = arith.mulf %236, %235 : vector<128x512xf32>
    %238 = math.tanh %237 : vector<128x512xf32>
    %cst_111 = arith.constant 1.000000e+00 : f32
    %239 = vector.broadcast %cst_111 : f32 to vector<128x512xf32>
    %240 = arith.addf %239, %238 : vector<128x512xf32>
    %241 = arith.mulf %230, %240 : vector<128x512xf32>
    %242 = arith.truncf %241 : vector<128x512xf32> to vector<128x512xbf16>
    %c0_112 = arith.constant 0 : index
    %c0_113 = arith.constant 0 : index
    %243 = vector.load %arg13[%c0_112, %c0_113] : memref<512x128xbf16, #tpu.memory_space<vmem>>, vector<512x128xbf16>
    %cst_114 = arith.constant dense<0.000000e+00> : vector<128x128xf32>
    %244 = tpu.matmul %242, %243, %cst_114 {dimension_numbers = #tpu.dot_dimension_numbers<[1], [0], [0], [1], [0, 0, 1, 1], [], []>} : vector<128x512xbf16>, vector<512x128xbf16>, vector<128x128xf32> -> vector<128x128xf32>
    %245 = arith.addf %200, %244 : vector<128x128xf32>
    %c0_115 = arith.constant 0 : index
    %c0_116 = arith.constant 0 : index
    %246 = vector.load %arg14[%c0_115, %c0_116] : memref<1x128xf32, #tpu.memory_space<vmem>>, vector<1x128xf32>
    %247 = vector.broadcast %246 : vector<1x128xf32> to vector<128x128xf32>
    %248 = arith.addf %245, %247 : vector<128x128xf32>
    %c0_117 = arith.constant 0 : index
    %c0_118 = arith.constant 0 : index
    %c0_119 = arith.constant 0 : index
    %249 = vector.load %arg15[%c0_117, %c0_118, %c0_119] : memref<1x128x128xf32, #tpu.memory_space<vmem>>, vector<1x128x128xf32>
    %250 = vector.shape_cast %249 : vector<1x128x128xf32> to vector<128x128xf32>
    %251 = vector.shape_cast %248 : vector<128x128xf32> to vector<1x128x128xf32>
    tpu.vector_store %arg15[%c0_117, %c0_118, %c0_119], %251 {strides = array<i32>} : memref<1x128x128xf32, #tpu.memory_space<vmem>>, vector<1x128x128xf32>,
    return
  }
  func.func @transform_0(%arg0: i32) -> (i32, i32, i32) {
    %c0_i32 = arith.constant 0 : i32
    %c0_i32_0 = arith.constant 0 : i32
    %c0_i32_1 = arith.constant 0 : i32
    return %arg0, %c0_i32, %c0_i32_0 : i32, i32, i32
  }
  func.func @transform_1(%arg0: i32) -> (i32, i32, i32) {
    %c0_i32 = arith.constant 0 : i32
    %c0_i32_0 = arith.constant 0 : i32
    %c0_i32_1 = arith.constant 0 : i32
    return %arg0, %c0_i32, %c0_i32_0 : i32, i32, i32
  }
  func.func @transform_2(%arg0: i32) -> (i32, i32) {
    %c0_i32 = arith.constant 0 : i32
    %c0_i32_0 = arith.constant 0 : i32
    %c0_i32_1 = arith.constant 0 : i32
    return %c0_i32, %c0_i32_0 : i32, i32
  }
  func.func @transform_3(%arg0: i32) -> (i32, i32) {
    %c0_i32 = arith.constant 0 : i32
    %c0_i32_0 = arith.constant 0 : i32
    %c0_i32_1 = arith.constant 0 : i32
    return %c0_i32, %c0_i32_0 : i32, i32
  }
  func.func @transform_4(%arg0: i32) -> (i32, i32) {
    %c0_i32 = arith.constant 0 : i32
    %c0_i32_0 = arith.constant 0 : i32
    %c0_i32_1 = arith.constant 0 : i32
    return %c0_i32, %c0_i32_0 : i32, i32
  }
  func.func @transform_5(%arg0: i32) -> (i32, i32) {
    %c0_i32 = arith.constant 0 : i32
    %c0_i32_0 = arith.constant 0 : i32
    %c0_i32_1 = arith.constant 0 : i32
    return %c0_i32, %c0_i32_0 : i32, i32
  }
  func.func @transform_6(%arg0: i32) -> (i32, i32) {
    %c0_i32 = arith.constant 0 : i32
    %c0_i32_0 = arith.constant 0 : i32
    %c0_i32_1 = arith.constant 0 : i32
    return %c0_i32, %c0_i32_0 : i32, i32
  }
  func.func @transform_7(%arg0: i32) -> (i32, i32) {
    %c0_i32 = arith.constant 0 : i32
    %c0_i32_0 = arith.constant 0 : i32
    %c0_i32_1 = arith.constant 0 : i32
    return %c0_i32, %c0_i32_0 : i32, i32
  }
  func.func @transform_8(%arg0: i32) -> (i32, i32) {
    %c0_i32 = arith.constant 0 : i32
    %c0_i32_0 = arith.constant 0 : i32
    %c0_i32_1 = arith.constant 0 : i32
    return %c0_i32, %c0_i32_0 : i32, i32
  }
  func.func @transform_9(%arg0: i32) -> (i32, i32) {
    %c0_i32 = arith.constant 0 : i32
    %c0_i32_0 = arith.constant 0 : i32
    %c0_i32_1 = arith.constant 0 : i32
    return %c0_i32, %c0_i32_0 : i32, i32
  }
  func.func @transform_10(%arg0: i32) -> (i32, i32) {
    %c0_i32 = arith.constant 0 : i32
    %c0_i32_0 = arith.constant 0 : i32
    %c0_i32_1 = arith.constant 0 : i32
    return %c0_i32, %c0_i32_0 : i32, i32
  }
  func.func @transform_11(%arg0: i32) -> (i32, i32) {
    %c0_i32 = arith.constant 0 : i32
    %c0_i32_0 = arith.constant 0 : i32
    %c0_i32_1 = arith.constant 0 : i32
    return %c0_i32, %c0_i32_0 : i32, i32
  }
  func.func @transform_12(%arg0: i32) -> (i32, i32) {
    %c0_i32 = arith.constant 0 : i32
    %c0_i32_0 = arith.constant 0 : i32
    %c0_i32_1 = arith.constant 0 : i32
    return %c0_i32, %c0_i32_0 : i32, i32
  }
  func.func @transform_13(%arg0: i32) -> (i32, i32) {
    %c0_i32 = arith.constant 0 : i32
    %c0_i32_0 = arith.constant 0 : i32
    %c0_i32_1 = arith.constant 0 : i32
    return %c0_i32, %c0_i32_0 : i32, i32
  }
  func.func @transform_14(%arg0: i32) -> (i32, i32, i32) {
    %c0_i32 = arith.constant 0 : i32
    %c0_i32_0 = arith.constant 0 : i32
    %c0_i32_1 = arith.constant 0 : i32
    return %arg0, %c0_i32, %c0_i32_0 : i32, i32, i32
  }
  func.func @transform_15(%arg0: i32) -> (i32, i32, i32, i32) {
    %c0_i32 = arith.constant 0 : i32
    %c0_i32_0 = arith.constant 0 : i32
    %c0_i32_1 = arith.constant 0 : i32
    %c0_i32_2 = arith.constant 0 : i32
    return %arg0, %c0_i32, %c0_i32_0, %c0_i32_1 : i32, i32, i32, i32
  }
}

</mosaic_0001>

<bundles_post_ra>
// kernel: block_forward_ca.1
= control target key start
LH: loop header
LB: loop body
LE: loop exit
PB: predicated region body
PF: predicated region fallthrough
CT: control target
= control target key end

     0   :  { %s12968_s0 = inlined_call_operand.vmem [shape: f32[2,128,128], index: 0, kind: input, shape index: {}]   ;;  %s12969_s1 = inlined_call_operand.vmem [shape: f32[2,128,128], index: 1, kind: input, shape index: {}]   ;;  %s12970_s2 = inlined_call_operand.vmem [shape: f32[1,128], index: 2, kind: input, shape index: {}]   ;;  %s12971_s3 = inlined_call_operand.vmem [shape: f32[1,128], index: 3, kind: input, shape index: {}]   ;;  %s12972_s4 = inlined_call_operand.vmem [shape: bf16[128,128], index: 4, kind: input, shape index: {}]   ;;  %s12973_s5 = inlined_call_operand.vmem [shape: bf16[128,256], index: 5, kind: input, shape index: {}]   ;;  %s12974_s6 = inlined_call_operand.vmem [shape: bf16[128,128], index: 6, kind: input, shape index: {}]   ;;  %s12975_s7 = inlined_call_operand.vmem [shape: f32[1,128], index: 7, kind: input, shape index: {}]   ;;  %s12976_s8 = inlined_call_operand.vmem [shape: f32[1,128], index: 8, kind: input, shape index: {}]   ;;  %s12977_s9 = inlined_call_operand.vmem [shape: f32[1,128], index: 9, kind: input, shape index: {}]   ;;  %s12978_s10 = inlined_call_operand.vmem [shape: bf16[128,512], index: 10, kind: input, shape index: {}]   ;;  %s12979_s11 = inlined_call_operand.vmem [shape: f32[1,512], index: 11, kind: input, shape index: {}]   ;;  %s12980_s12 = inlined_call_operand.vmem [shape: bf16[512,128], index: 12, kind: input, shape index: {}]   ;;  %s12981_s13 = inlined_call_operand.vmem [shape: f32[1,128], index: 13, kind: input, shape index: {}]   ;;  %s12982_s14 = inlined_call_operand.hbm [shape: f32[2,128,128], index: 14, kind: output, shape index: {0}]   ;;  %s12983_s15 = inlined_call_operand.hbm [shape: f32[2,8,128,128], index: 15, kind: output, shape index: {1}]  }
   0x1   :  { %13036 = sst [smem:[#allocation52_spill]] %s12968_s0 }
   0x2   :  { %13037 = sst [smem:[#allocation53_spill]] %s12969_s1 }
   0x3   :  { %13038 = sst [smem:[#allocation54_spill]] %s12970_s2 }
   0x4   :  { %21 = vsyncpa [#allocation3], 0 }
   0x5   :  { %23 = vsyncpa [#allocation3 + $0x1], 0 }
   0x6   :  { %24 = vsyncpa [#allocation5], 0 }
   0x7   :  { %26 = vsyncpa [#allocation5 + $0x1], 0  ;;  %s9002_s18 = smov 0   ;;  %s9004_s19 = smov 0  }
   0x8   :  { %s9006_s20 = smov 0   ;;  %s9008_s21 = smov 0  }
   0x9 LB: > { %13039 = sst [smem:[#allocation8_spill]] %s8898_s18  ;;  %s9023_s22 = sadd.s32 4294967295, %s8910_s21   ;;  %s8910_s21 = sphi %s9008_s21, %s13238_s21   ;;  %s8906_s20 = sphi %s9006_s20, %s13240_s20   ;;  %s8902_s19 = sphi %s9004_s19, %s13242_s19   ;;  %s8898_s18 = sphi %s9002_s18, %s13241_s18  }
   0xa   : > { %13040 = sst [smem:[#allocation9_spill]] %s8906_s20  ;;  %s7048_s23 = sadd.s32 4294967294, %s8910_s21  }
   0xb   : > { %s9027_s24 = sadd.s32 1, %s8910_s21   ;;  %s343_s25 = sadd.s32 1, %s8906_s20 }
   0xc   : > { %13041 = sst [smem:[#allocation10_spill]] %s9027_s24  ;;  %s340_s26 = ssub.s32 %s8910_s21, %s9027_s24 }
   0xd   : > { %p353_p0 = scmp.ne.s32.totalorder %s8906_s20, %s8902_s19  ;;  %p341_p1 = scmp.eq.s32.totalorder %s340_s26, 0 }
   0xe   : > { %p354_p2 = scmp.eq.s32.totalorder %s9023_s22, 1  ;;  %p359_p3 = scmp.ne.s32.totalorder %s8902_s19, %s8898_s18 }
   0xf   : > { %p360_p4 = scmp.eq.s32.totalorder %s7048_s23, 1  ;;  %p7051_p7 = scmp.ge.s32.totalorder %s8910_s21, 1 }
  0x10   : > { %s9038_s27 = scalar_select %p341_p1, %s8906_s20, %s343_s25  }
  0x11   : > { %p9040_p5 = por %p354_p2, %p353_p0  ;;  %p9044_p6 = por %p360_p4, %p359_p3 }
  0x12   : > { %13042 = sst [smem:[#allocation11_spill]] %s9038_s27  ;;  %p456_p8 = scmp.lt.s32.totalorder %s8910_s21, 3 }
  0x13   : > { %s13044_s29 = scalar_select %p9044_p6, 1, 0 }
  0x14   : > { %p457_p9 = pnand %p7051_p7, %p456_p8 }
  0x15   : > { %13045 = sst [smem:[#allocation12_spill]] %s13044_s29 }
  0x16   : > { %460 = sbr.rel (%p457_p9) target bundleno = 2813 (0xafd), region = 76 }
  0x1b   : > { %p514_p10 = scmp.lt.s32.totalorder %s9023_s22, 1  ;;  %s13046_s0 = sld [smem:[#allocation52_spill]]  ;;  %v8912_v7 = vmov 128.0   ;;  %v7148_v50 = vld [vmem:[%s12973_s5 + $0x70] sm:$0xf] }
  0x1c   : > { %8074 = vrcp.f32 %v8912_v7  ;;  %v7651_v51 = vld [vmem:[%s12973_s5 + $0x74] sm:$0xf0]  ;;  %v7650_v52 = vld [vmem:[%s12973_s5 + $0x74] sm:$0xf]  ;;  %v7150_v54 = vld [vmem:[%s12973_s5 + $0x78] sm:$0xf0] }
  0x1d   : > { %s9052_s30 = scalar_select %p514_p10, %s9023_s22, 1  ;;  %v7149_v53 = vor.u32 %v7651_v51, %v7148_v50  ;;  %v7153_v55 = vor.u32 %v7650_v52, %v7150_v54  ;;  %v7140_v56 = vld [vmem:[%s12973_s5 + $0x60] sm:$0xf]  ;;  %v7649_v57 = vld [vmem:[%s12973_s5 + $0x64] sm:$0xf0] }
  0x1e   : > { %v7648_v58 = vld [vmem:[%s12973_s5 + $0x64] sm:$0xf]  ;;  %v7141_v59 = vor.u32 %v7649_v57, %v7140_v56  ;;  %v7142_v60 = vld [vmem:[%s12973_s5 + $0x68] sm:$0xf0]  ;;  %v7132_v62 = vld [vmem:[%s12973_s5 + $0x50] sm:$0xf] }
  0x1f   : > { %s12984_s16 = sshll.u32 %s9052_s30, 7  ;;  %1500 = vmatpush.bf16.msra.mxu1 %v7149_v53  ;;  %1549 = vmatpush.bf16.msra.mxu2 %v7153_v55  ;;  %v7145_v61 = vor.u32 %v7648_v58, %v7142_v60  ;;  %v7647_v63 = vld [vmem:[%s12973_s5 + $0x54] sm:$0xf0]  ;;  %v7636_v50 = vld [vmem:[%s12973_s5 + $0x4] sm:$0xf]  ;;  %s13052_s2 = sld [smem:[#allocation54_spill]] }
  0x20   : > { %v7094_v51 = vld [vmem:[%s12973_s5 + $0x8] sm:$0xf0]  ;;  %s13057_s24 = sshll.u32 %s9052_s30, 7  ;;  %s13058_s1 = sld [smem:[#allocation53_spill]] }
  0x21   : > { %s9060_s25 = scalar_lea.vmem %s13046_s0, %s12984_s16  ;;  %v7097_v52 = vor.u32 %v7636_v50, %v7094_v51  ;;  %s8914_s18 = smov 96  }
  0x22   : > { %v909_v0 = vld [vmem:[%s9060_s25 + $0x10] sm:$0xff]  ;;  %v907_v1 = vld [vmem:[%s9060_s25] sm:$0xff]  ;;  %v910_v3 = vld [vmem:[%s9060_s25 + $0x18] sm:$0xff]  ;;  %v8075_v8 = vpop.eup %8074  ;;  %s8915_s29 = smov 80   ;;  %s10177_s30 = sand.u32 1, %s8902_s19  }
  0x23   : > { %927 = vadd.xlane.f32.xlu1 %v909_v0  ;;  %923 = vadd.xlane.f32.xlu0 %v907_v1  ;;  %v911_v2 = vld [vmem:[%s9060_s25 + $0x20] sm:$0xff]  ;;  %v908_v4 = vld [vmem:[%s9060_s25 + $0x8] sm:$0xff]  ;;  %v913_v6 = vld [vmem:[%s9060_s25 + $0x30] sm:$0xff]  ;;  %v575_v9 = vmul.f32 128.0, %v8075_v8  ;;  %vm579_vm0 = vweird.f32 %v8075_v8  ;;  %s7053_s17 = sshll.u32 %s10177_s30, 10  ;;  %s8916_s23 = smov 48  }
  0x24   : > { %931 = vadd.xlane.f32.xlu2 %v911_v2  ;;  %v912_v5 = vld [vmem:[%s9060_s25 + $0x28] sm:$0xff]  ;;  %v9085_v28 = vld [vmem:[%s9060_s25 + $0x38] sm:$0xff]  ;;  %v9100_v36 = vld [vmem:[%s9060_s25 + $0x40] sm:$0xff]  ;;  %1501 = vmatpush.bf16.msra.mxu1 %v7141_v59  ;;  %s10180_s16 = scalar_lea.vmem [#allocation4], %s7053_s17  ;;  %s13018_s0 = smov 64  }
  0x25   : > { %v576_v10 = vsub.f32 1.0, %v575_v9  ;;  %v9111_v42 = vld [vmem:[%s9060_s25 + $0x58] sm:$0xff]  ;;  %v9114_v43 = vld [vmem:[%s9060_s25 + $0x48] sm:$0xff]  ;;  %v9123_v46 = vld [vmem:[%s9060_s25 + $0x60] sm:$0xff]  ;;  %1550 = vmatpush.bf16.msra.mxu2 %v7145_v61  ;;  %s13016_s27 = smov 32   ;;  %s7052_s20 = sshll.u32 %s10177_s30, 7 }
  0x26   : > { %v9126_v47 = vld [vmem:[%s9060_s25 + $0x50] sm:$0xff]  ;;  %v9131_v48 = vld [vmem:[%s9060_s25 + $0x68] sm:$0xff]  ;;  %s9371_s26 = scalar_lea.vmem %s13058_s1, %s13057_s24  ;;  %s8913_s24 = smov 112  }
  0x27   : > { %v577_v11 = vmul.f32 %v8075_v8, %v576_v10  ;;  %v9135_v49 = vld [vmem:[%s9060_s25 + $0x70] sm:$0xff]  ;;  %s12863_s1 = scalar_lea.vmem [#allocation2], %s7052_s20 }
  0x28   : > { %v7116_v10 = vld [vmem:[%s12973_s5 + $0x30] sm:$0xf] }
  0x29   : > { %v578_v12 = vadd.f32 %v8075_v8, %v577_v11  ;;  %v7643_v11 = vld [vmem:[%s12973_s5 + $0x34] sm:$0xf0] }
  0x2b   : > { %929 = vadd.xlane.f32.xlu1 %v910_v3  ;;  %925 = vadd.xlane.f32.xlu0 %v908_v4  ;;  %v9069_v13 = vsel %vm579_vm0, %v8075_v8, %v578_v12  ;;  %v7126_v8 = vld [vmem:[%s12973_s5 + $0x48] sm:$0xf0]  ;;  %v7642_v12 = vld [vmem:[%s12973_s5 + $0x34] sm:$0xf] }
  0x2c   : > { %933 = vadd.xlane.f32.xlu2 %v912_v5  ;;  %13047 = vst [vmem:[#allocation13_spill] sm:$0xff] %v9069_v13 }
  0x34   : > { %935 = vadd.xlane.f32.xlu2 %v913_v6 }
  0x96   : > { %v928_v14 = vpop.xlane.xlu1 %927  ;;  %v924_v15 = vpop.xlane.xlu0 %923 }
  0x97   : > { %v955_v16 = vmul.f32 %v924_v15, %v9069_v13  ;;  %v932_v18 = vpop.xlane.xlu2 %931  ;;  %v957_v27 = vmul.f32 %v928_v14, %v9069_v13  ;;  %v7117_v14 = vor.u32 %v7643_v11, %v7116_v10  ;;  %v7118_v15 = vld [vmem:[%s12973_s5 + $0x38] sm:$0xf0] }
  0x98   : > { %v959_v26 = vmul.f32 %v932_v18, %v9069_v13  ;;  %v7108_v18 = vld [vmem:[%s12973_s5 + $0x20] sm:$0xf] }
  0x99   : > { %v9072_v17 = vsub.f32 %v907_v1, %v955_v16  ;;  %v9094_v33 = vsub.f32 %v909_v0, %v957_v27  ;;  %v7646_v0 = vld [vmem:[%s12973_s5 + $0x54] sm:$0xf]  ;;  %v7133_v1 = vor.u32 %v7647_v63, %v7132_v62  ;;  %v7121_v16 = vor.u32 %v7642_v12, %v7118_v15  ;;  %v7639_v27 = vld [vmem:[%s12973_s5 + $0x14] sm:$0xf0] }
  0x9a   : > { %v9092_v32 = vsub.f32 %v911_v2, %v959_v26  ;;  %v7134_v2 = vld [vmem:[%s12973_s5 + $0x58] sm:$0xf0]  ;;  %v7100_v26 = vld [vmem:[%s12973_s5 + $0x10] sm:$0xf] }
  0x9b   : > { %v987_v19 = vmul.f32 %v9072_v17, %v9072_v17  ;;  %v989_v37 = vmul.f32 %v9094_v33, %v9094_v33  ;;  %1502 = vmatpush.bf16.msra.mxu1 %v7133_v1 }
  0x9c   : > { %v991_v34 = vmul.f32 %v9092_v32, %v9092_v32 }
  0x9d   : > { %1003 = vadd.xlane.f32.xlu0 %v987_v19  ;;  %v7641_v19 = vld [vmem:[%s12973_s5 + $0x24] sm:$0xf0] }
  0x9e   : > { %v930_v20 = vpop.xlane.xlu1 %929  ;;  %v926_v21 = vpop.xlane.xlu0 %925 }
  0x9f   : > { %v958_v22 = vmul.f32 %v930_v20, %v9069_v13  ;;  %v956_v23 = vmul.f32 %v926_v21, %v9069_v13  ;;  %v934_v31 = vpop.xlane.xlu2 %933  ;;  %v7640_v20 = vld [vmem:[%s12973_s5 + $0x24] sm:$0xf]  ;;  %v7109_v21 = vor.u32 %v7641_v19, %v7108_v18 }
  0xa0   : > { %v960_v35 = vmul.f32 %v934_v31, %v9069_v13  ;;  %v7638_v31 = vld [vmem:[%s12973_s5 + $0x14] sm:$0xf] }
  0xa1   : > { %v9078_v24 = vsub.f32 %v910_v3, %v958_v22  ;;  %v9080_v25 = vsub.f32 %v908_v4, %v956_v23  ;;  %v7137_v3 = vor.u32 %v7646_v0, %v7134_v2  ;;  %v7124_v4 = vld [vmem:[%s12973_s5 + $0x40] sm:$0xf]  ;;  %v7110_v22 = vld [vmem:[%s12973_s5 + $0x28] sm:$0xf0] }
  0xa2   : > { %v9105_v38 = vsub.f32 %v912_v5, %v960_v35  ;;  %v7645_v5 = vld [vmem:[%s12973_s5 + $0x44] sm:$0xf0]  ;;  %v7113_v23 = vor.u32 %v7640_v20, %v7110_v22 }
  0xa3   : > { %v990_v29 = vmul.f32 %v9078_v24, %v9078_v24  ;;  %v988_v30 = vmul.f32 %v9080_v25, %v9080_v25  ;;  %1551 = vmatpush.bf16.msra.mxu2 %v7137_v3  ;;  %v7125_v7 = vor.u32 %v7645_v5, %v7124_v4 }
  0xa4   : > { %v992_v40 = vmul.f32 %v9105_v38, %v9105_v38 }
  0xa5   : > { %1009 = vadd.xlane.f32.xlu2 %v990_v29  ;;  %937 = vadd.xlane.f32.xlu0 %v9085_v28 }
  0xa6   : > { %1005 = vadd.xlane.f32.xlu1 %v988_v30  ;;  %1503 = vmatpush.bf16.msra.mxu1 %v7125_v7  ;;  %v7101_v30 = vor.u32 %v7639_v27, %v7100_v26 }
  0xa7   : > { %v936_v39 = vpop.xlane.xlu2 %935 }
  0xa8   : > { %v961_v41 = vmul.f32 %v936_v39, %v9069_v13 }
  0xaa   : > { %v9117_v44 = vsub.f32 %v913_v6, %v961_v41  ;;  %v7644_v6 = vld [vmem:[%s12973_s5 + $0x44] sm:$0xf]  ;;  %1504 = vmatpush.bf16.msra.mxu1 %v7117_v14  ;;  %v7637_v41 = vld [vmem:[%s12973_s5 + $0x4] sm:$0xf0] }
  0xab   : > { %v7129_v9 = vor.u32 %v7644_v6, %v7126_v8 }
  0xac   : > { %v993_v45 = vmul.f32 %v9117_v44, %v9117_v44 }
  0xad   : > { %1011 = vadd.xlane.f32.xlu2 %v991_v34  ;;  %939 = vadd.xlane.f32.xlu0 %v9100_v36  ;;  %v7102_v34 = vld [vmem:[%s12973_s5 + $0x18] sm:$0xf0] }
  0xae   : > { %1007 = vadd.xlane.f32.xlu1 %v989_v37  ;;  %1552 = vmatpush.bf16.msra.mxu2 %v7129_v9  ;;  %v7105_v37 = vor.u32 %v7638_v31, %v7102_v34 }
  0xaf   : > { %1505 = vmatpush.bf16.msra.mxu1 %v7109_v21 }
  0xb2   : > { %1553 = vmatpush.bf16.msra.mxu2 %v7121_v16 }
  0xb3   : > { %1506 = vmatpush.bf16.msra.mxu1 %v7101_v30 }
  0xb5   : > { %945 = vadd.xlane.f32.xlu2 %v9111_v42  ;;  %1013 = vadd.xlane.f32.xlu0 %v992_v40  ;;  %v7092_v40 = vld [vmem:[%s12973_s5] sm:$0xf] }
  0xb6   : > { %941 = vadd.xlane.f32.xlu1 %v9114_v43  ;;  %1554 = vmatpush.bf16.msra.mxu2 %v7113_v23 }
  0xba   : > { %1555 = vmatpush.bf16.msra.mxu2 %v7105_v37 }
  0xbd   : > { %947 = vadd.xlane.f32.xlu2 %v9123_v46  ;;  %1015 = vadd.xlane.f32.xlu0 %v993_v45  ;;  %v7093_v45 = vor.u32 %v7637_v41, %v7092_v40 }
  0xbe   : > { %943 = vadd.xlane.f32.xlu1 %v9126_v47  ;;  %1556 = vmatpush.bf16.msra.mxu2 %v7097_v52 }
  0xbf   : > { %1507 = vmatpush.bf16.msra.mxu1 %v7093_v45 }
  0xc5   : > { %949 = vadd.xlane.f32.xlu0 %v9131_v48 }
  0xcd   : > { %951 = vadd.xlane.f32.xlu0 %v9135_v49 }
 0x110   : > { %v1004_v29 = vpop.xlane.xlu0 %1003 }
 0x111   : > { %v1035_v35 = vmul.f32 %v1004_v29, %v9069_v13 }
 0x113   : > { %v1051_v39 = vadd.f32 1e-05, %v1035_v35 }
 0x115   : > { %8076 = vrsqrt.f32 %v1051_v39  ;;  %vm1073_vm2 = vweird.f32 %v1051_v39 }
 0x118   : > { %v1010_v53 = vpop.xlane.xlu2 %1009  ;;  %v938_v54 = vpop.xlane.xlu0 %937 }
 0x119   : > { %v1038_v55 = vmul.f32 %v1010_v53, %v9069_v13  ;;  %v1006_v56 = vpop.xlane.xlu1 %1005  ;;  %v962_v57 = vmul.f32 %v938_v54, %v9069_v13 }
 0x11a   : > { %v1036_v58 = vmul.f32 %v1006_v56, %v9069_v13 }
 0x11b   : > { %v8077_v59 = vpop.eup %8076  ;;  %v9238_v60 = vadd.f32 1e-05, %v1038_v55  ;;  %v9241_v61 = vsub.f32 %v9085_v28, %v962_v57  ;;  %v9300_v55 = vld [vmem:[%s9060_s25 + $0x78] sm:$0xff] }
 0x11c   : > { %v1068_v62 = vmul.f32 %v8077_v59, %v1051_v39  ;;  %v1052_v63 = vadd.f32 1e-05, %v1036_v58  ;;  %vm1074_vm1 = vweird.f32 %v8077_v59 }
 0x11d   : > { %8078 = vrsqrt.f32 %v9238_v60  ;;  %v994_v0 = vmul.f32 %v9241_v61, %v9241_v61  ;;  %vm9263_vm4 = vmor %vm1073_vm2, %vm1074_vm1  ;;  %vm1103_vm9 = vweird.f32 %v9238_v60 }
 0x11e   : > { %v1069_v1 = vmul.f32 %v8077_v59, %v1068_v62  ;;  %8080 = vrsqrt.f32 %v1052_v63  ;;  %vm1083_vm3 = vweird.f32 %v1052_v63 }
 0x11f   : > { %1017 = vadd.xlane.f32.xlu1 %v994_v0 }
 0x120   : > { %v1070_v2 = vmul.f32 0.5, %v1069_v1  ;;  %v1012_v3 = vpop.xlane.xlu2 %1011  ;;  %v940_v4 = vpop.xlane.xlu0 %939  ;;  %v9313_v1 = vld [vmem:[%s12971_s3] ss:$0 sm:$0xff] }
 0x121   : > { %v1008_v5 = vpop.xlane.xlu1 %1007  ;;  %v963_v6 = vmul.f32 %v940_v4, %v9069_v13  ;;  %v1039_v11 = vmul.f32 %v1012_v3, %v9069_v13 }
 0x122   : > { %v1071_v7 = vsub.f32 1.5, %v1070_v2  ;;  %v1037_v28 = vmul.f32 %v1008_v5, %v9069_v13 }
 0x123   : > { %v9248_v8 = vpop.eup %8078  ;;  %v9251_v9 = vsub.f32 %v9100_v36, %v963_v6  ;;  %v9261_v36 = vadd.f32 1e-05, %v1039_v11 }
 0x124   : > { %v8081_v10 = vpop.eup %8080  ;;  %v9254_v12 = vadd.f32 1e-05, %v1037_v28  ;;  %v1072_v15 = vmul.f32 %v8077_v59, %v1071_v7  ;;  %v1098_v16 = vmul.f32 %v9248_v8, %v9238_v60  ;;  %vm1104_vm10 = vweird.f32 %v9248_v8 }
 0x125   : > { %v1078_v14 = vmul.f32 %v8081_v10, %v1052_v63  ;;  %v995_v18 = vmul.f32 %v9251_v9, %v9251_v9  ;;  %vm1084_vm5 = vweird.f32 %v8081_v10  ;;  %vm9344_vm12 = vmor %vm1103_vm9, %vm1104_vm10  ;;  %vm1113_vm15 = vweird.f32 %v9261_v36 }
 0x126   : > { %8082 = vrsqrt.f32 %v9254_v12  ;;  %v1099_v30 = vmul.f32 %v9248_v8, %v1098_v16  ;;  %v1076_v34 = vsel %vm9263_vm4, %v8077_v59, %v1072_v15  ;;  %vm9279_vm6 = vmor %vm1083_vm3, %vm1084_vm5  ;;  %vm1093_vm7 = vweird.f32 %v9254_v12 }
 0x127   : > { %v1079_v19 = vmul.f32 %v8081_v10, %v1078_v14  ;;  %1019 = vadd.xlane.f32.xlu1 %v995_v18  ;;  %8084 = vrsqrt.f32 %v9261_v36  ;;  %v1227_v52 = vmul.f32 %v1076_v34, %v9072_v17 }
 0x128   : > { %v946_v20 = vpop.xlane.xlu2 %945  ;;  %v1014_v21 = vpop.xlane.xlu0 %1013  ;;  %v1100_v53 = vmul.f32 0.5, %v1099_v30 }
 0x129   : > { %v1080_v23 = vmul.f32 0.5, %v1079_v19  ;;  %v966_v26 = vmul.f32 %v946_v20, %v9069_v13  ;;  %v942_v27 = vpop.xlane.xlu1 %941  ;;  %v1040_v29 = vmul.f32 %v1014_v21, %v9069_v13 }
 0x12a   : > { %v964_v31 = vmul.f32 %v942_v27, %v9069_v13  ;;  %v1101_v4 = vsub.f32 1.5, %v1100_v53 }
 0x12b   : > { %v1081_v35 = vsub.f32 1.5, %v1080_v23  ;;  %v9273_v37 = vadd.f32 1e-05, %v1040_v29  ;;  %v9276_v39 = vsub.f32 %v9111_v42, %v966_v26  ;;  %v9292_v42 = vld [vmem:[%s13052_s2] ss:$0 sm:$0xff] }
 0x12c   : > { %v8083_v40 = vpop.eup %8082  ;;  %v9285_v45 = vsub.f32 %v9114_v43, %v964_v31  ;;  %v1243_v2 = vmul.f32 %v9292_v42, %v1227_v52  ;;  %v1102_v60 = vmul.f32 %v9248_v8, %v1101_v4 }
 0x12d   : > { %v1082_v50 = vmul.f32 %v8081_v10, %v1081_v35  ;;  %v1088_v51 = vmul.f32 %v8083_v40, %v9254_v12  ;;  %8086 = vrsqrt.f32 %v9273_v37  ;;  %v998_v54 = vmul.f32 %v9276_v39, %v9276_v39  ;;  %v9316_v3 = vpop.eup %8084 }
 0x12e   : > { %v996_v43 = vmul.f32 %v9285_v45, %v9285_v45  ;;  %vm1094_vm8 = vweird.f32 %v8083_v40  ;;  %v1259_v16 = vadd.f32 %v9313_v1, %v1243_v2  ;;  %v1108_v18 = vmul.f32 %v9316_v3, %v9261_v36 }
 0x12f   : > { %v1089_v56 = vmul.f32 %v8083_v40, %v1088_v51  ;;  %v1086_v57 = vsel %vm9279_vm6, %v8081_v10, %v1082_v50  ;;  %1025 = vadd.xlane.f32.xlu0 %v998_v54  ;;  %953 = vadd.xlane.f32.xlu1 %v9300_v55  ;;  %vm9331_vm11 = vmor %vm1093_vm7, %vm1094_vm8  ;;  %v1106_v29 = vsel %vm9344_vm12, %v9248_v8, %v1102_v60  ;;  %vm1123_vm13 = vweird.f32 %v9273_v37 }
 0x130   : > { %1021 = vadd.xlane.f32.xlu2 %v996_v43  ;;  %v948_v58 = vpop.xlane.xlu2 %947  ;;  %v9304_v59 = vpop.xlane.xlu0 %1015  ;;  %v1228_v17 = vmul.f32 %v1086_v57, %v9080_v25  ;;  %v1109_v27 = vmul.f32 %v9316_v3, %v1108_v18  ;;  %vm1114_vm0 = vweird.f32 %v9316_v3  ;;  %v9381_v43 = vld [vmem:[%s9371_s26] sm:$0xff] }
 0x131   : > { %v1090_v62 = vmul.f32 0.5, %v1089_v56  ;;  %v967_v63 = vmul.f32 %v948_v58, %v9069_v13  ;;  %v944_v0 = vpop.xlane.xlu1 %943  ;;  %vm1115_vm2 = vmor %vm1113_vm15, %vm1114_vm0 }
 0x132   : > { %v965_v25 = vmul.f32 %v944_v0, %v9069_v13  ;;  %v1244_v5 = vmul.f32 %v9292_v42, %v1228_v17  ;;  %v1110_v41 = vmul.f32 0.5, %v1109_v27 }
 0x133   : > { %v8087_v6 = vpop.eup %8086  ;;  %v1091_v7 = vsub.f32 1.5, %v1090_v62  ;;  %v9321_v28 = vsub.f32 %v9123_v46, %v967_v63  ;;  %v9390_v62 = vld [vmem:[%s9371_s26 + $0x8] sm:$0xff]  ;;  %v9393_v63 = vld [vmem:[%s9371_s26 + $0x18] sm:$0xff] }
 0x134   : > { %v1118_v10 = vmul.f32 %v8087_v6, %v9273_v37  ;;  %v9327_v11 = vsub.f32 %v9126_v47, %v965_v25  ;;  %v1260_v46 = vadd.f32 %v9313_v1, %v1244_v5  ;;  %vm1124_vm14 = vweird.f32 %v8087_v6  ;;  %v9402_v5 = vld [vmem:[%s9371_s26 + $0x20] sm:$0xff] }
 0x135   : > { %v1092_v14 = vmul.f32 %v8083_v40, %v1091_v7  ;;  %v999_v19 = vmul.f32 %v9321_v28, %v9321_v28  ;;  %vm1125_vm1 = vmor %vm1123_vm13, %vm1124_vm14 }
 0x136   : > { %v997_v47 = vmul.f32 %v9327_v11, %v9327_v11  ;;  %v1396_v20 = vpack.c.bf16 %v1260_v46, %v1259_v16  ;;  %v1119_v21 = vmul.f32 %v8087_v6, %v1118_v10 }
 0x137   : > { %v1096_v23 = vsel %vm9331_vm11, %v8083_v40, %v1092_v14  ;;  %1027 = vadd.xlane.f32.xlu1 %v999_v19  ;;  %v1230_v40 = vmul.f32 %v1106_v29, %v9078_v24 }
 0x138   : > { %1023 = vadd.xlane.f32.xlu2 %v997_v47  ;;  %v950_v22 = vpop.xlane.xlu0 %949  ;;  %1508 = vmatmul.bf16.vlgmr.msra.gmra.mxu1 %v1396_v20  ;;  %v1229_v31 = vmul.f32 %v1096_v23, %v9094_v33  ;;  %v1120_v34 = vmul.f32 0.5, %v1119_v21 }
 0x139   : > { %1557 = vmatmul.bf16.vlgmr.msra.gmra.mxu2 %v1396_v20  ;;  %v968_v26 = vmul.f32 %v950_v22, %v9069_v13  ;;  %v1246_v53 = vmul.f32 %v9292_v42, %v1230_v40 }
 0x13a   : > { %v1245_v50 = vmul.f32 %v9292_v42, %v1229_v31  ;;  %v1121_v51 = vsub.f32 1.5, %v1120_v34 }
 0x13b   : > { %v9356_v30 = vsub.f32 %v9131_v48, %v968_v26  ;;  %v1111_v48 = vsub.f32 1.5, %v1110_v41  ;;  %v1262_v37 = vadd.f32 %v9313_v1, %v1246_v53 }
 0x13c   : > { %v1261_v24 = vadd.f32 %v9313_v1, %v1245_v50  ;;  %v1122_v54 = vmul.f32 %v8087_v6, %v1121_v51 }
 0x13d   : > { %v1000_v35 = vmul.f32 %v9356_v30, %v9356_v30  ;;  %v1112_v57 = vmul.f32 %v9316_v3, %v1111_v48 }
 0x13e   : > { %v1126_v36 = vsel %vm1125_vm1, %v8087_v6, %v1122_v54 }
 0x13f   : > { %v1116_v58 = vsel %vm1115_vm2, %v9316_v3, %v1112_v57  ;;  %v1232_v17 = vmul.f32 %v1126_v36, %v9105_v38 }
 0x140   : > { %1029 = vadd.xlane.f32.xlu2 %v1000_v35  ;;  %v952_v52 = vpop.xlane.xlu0 %951  ;;  %v1231_v0 = vmul.f32 %v1116_v58, %v9092_v32  ;;  %v1041_v32 = vmul.f32 %v9304_v59, %v9069_v13 }
 0x141   : > { %v969_v8 = vmul.f32 %v952_v52, %v9069_v13  ;;  %v1248_v2 = vmul.f32 %v9292_v42, %v1232_v17 }
 0x142   : > { %v1247_v4 = vmul.f32 %v9292_v42, %v1231_v0  ;;  %v1057_v6 = vadd.f32 1e-05, %v1041_v32 }
 0x143   : > { %v9375_v33 = vsub.f32 %v9135_v49, %v969_v8  ;;  %v1397_v49 = vpack.c.bf16 %v1262_v37, %v1261_v24  ;;  %v1264_v25 = vadd.f32 %v9313_v1, %v1248_v2 }
 0x144   : > { %v1263_v38 = vadd.f32 %v9313_v1, %v1247_v4  ;;  %8088 = vrsqrt.f32 %v1057_v6  ;;  %vm1133_vm3 = vweird.f32 %v1057_v6 }
 0x145   : > { %v1001_v56 = vmul.f32 %v9375_v33, %v9375_v33 }
 0x146   : > { %v1398_v3 = vpack.c.bf16 %v1264_v25, %v1263_v38 }
 0x147   : > { %1031 = vadd.xlane.f32.xlu0 %v1001_v56 }
 0x148   : > { %542 = vadd.xlane.f32.xlu2 %v9381_v43  ;;  %1513 = vmatmul.bf16.gmra.mxu1 %v1397_v49 }
 0x149   : > { %1562 = vmatmul.bf16.gmra.mxu2 %v1397_v49 }
 0x14a   : > { %v8089_v7 = vpop.eup %8088 }
 0x14b   : > { %v1128_v10 = vmul.f32 %v8089_v7, %v1057_v6  ;;  %vm1134_vm4 = vweird.f32 %v8089_v7 }
 0x14c   : > { %vm1135_vm5 = vmor %vm1133_vm3, %vm1134_vm4 }
 0x14d   : > { %v1129_v14 = vmul.f32 %v8089_v7, %v1128_v10 }
 0x14f   : > { %544 = vadd.xlane.f32.xlu0 %v9390_v62  ;;  %v1130_v46 = vmul.f32 0.5, %v1129_v14  ;;  %v9434_v14 = vld [vmem:[%s9371_s26 + $0x10] sm:$0xff] }
 0x150   : > { %548 = vadd.xlane.f32.xlu2 %v9393_v63 }
 0x151   : > { %v1131_v18 = vsub.f32 1.5, %v1130_v46 }
 0x153   : > { %v1132_v19 = vmul.f32 %v8089_v7, %v1131_v18 }
 0x155   : > { %v1136_v23 = vsel %vm1135_vm5, %v8089_v7, %v1132_v19 }
 0x156   : > { %v1233_v31 = vmul.f32 %v1136_v23, %v9117_v44 }
 0x157   : > { %550 = vadd.xlane.f32.xlu0 %v9402_v5 }
 0x158   : > { %1518 = vmatmul.bf16.gmra.mxu1 %v1398_v3  ;;  %v1249_v54 = vmul.f32 %v9292_v42, %v1233_v31 }
 0x159   : > { %1567 = vmatmul.bf16.gmra.mxu2 %v1398_v3 }
 0x15a   : > { %v1265_v2 = vadd.f32 %v9313_v1, %v1249_v54 }
 0x192   : > { %v1018_v15 = vpop.xlane.xlu1 %1017 }
 0x193   : > { %v1042_v16 = vmul.f32 %v1018_v15, %v9069_v13 }
 0x195   : > { %v1058_v60 = vadd.f32 1e-05, %v1042_v16 }
 0x197   : > { %8090 = vrsqrt.f32 %v1058_v60  ;;  %vm1143_vm7 = vweird.f32 %v1058_v60 }
 0x19a   : > { %v1020_v47 = vpop.xlane.xlu1 %1019 }
 0x19b   : > { %v1043_v12 = vmul.f32 %v1020_v47, %v9069_v13 }
 0x19d   : > { %v8091_v20 = vpop.eup %8090  ;;  %v1059_v21 = vadd.f32 1e-05, %v1043_v12 }
 0x19e   : > { %v1138_v59 = vmul.f32 %v8091_v20, %v1058_v60  ;;  %vm1144_vm6 = vweird.f32 %v8091_v20 }
 0x19f   : > { %8092 = vrsqrt.f32 %v1059_v21  ;;  %vm1145_vm8 = vmor %vm1143_vm7, %vm1144_vm6  ;;  %vm1153_vm10 = vweird.f32 %v1059_v21 }
 0x1a0   : > { %v1139_v22 = vmul.f32 %v8091_v20, %v1138_v59 }
 0x1a2   : > { %v1140_v26 = vmul.f32 0.5, %v1139_v22  ;;  %v1026_v29 = vpop.xlane.xlu0 %1025  ;;  %v954_v40 = vpop.xlane.xlu1 %953 }
 0x1a3   : > { %v1022_v27 = vpop.xlane.xlu2 %1021  ;;  %v1046_v41 = vmul.f32 %v1026_v29, %v9069_v13  ;;  %v970_v50 = vmul.f32 %v954_v40, %v9069_v13  ;;  %v9453_v29 = vld [vmem:[%s9371_s26 + $0x28] sm:$0xff] }
 0x1a4   : > { %v1141_v34 = vsub.f32 1.5, %v1140_v26  ;;  %v1044_v35 = vmul.f32 %v1022_v27, %v9069_v13 }
 0x1a5   : > { %v8093_v51 = vpop.eup %8092  ;;  %v9414_v53 = vadd.f32 1e-05, %v1046_v41  ;;  %v9417_v24 = vsub.f32 %v9300_v55, %v970_v50 }
 0x1a6   : > { %v1142_v52 = vmul.f32 %v8091_v20, %v1141_v34  ;;  %v1060_v8 = vadd.f32 1e-05, %v1044_v35  ;;  %v1148_v48 = vmul.f32 %v8093_v51, %v1059_v21  ;;  %vm1154_vm9 = vweird.f32 %v8093_v51 }
 0x1a7   : > { %v1002_v56 = vmul.f32 %v9417_v24, %v9417_v24  ;;  %vm9436_vm11 = vmor %vm1153_vm10, %vm1154_vm9  ;;  %vm1183_vm1 = vweird.f32 %v9414_v53 }
 0x1a8   : > { %8094 = vrsqrt.f32 %v1060_v8  ;;  %v1146_v44 = vsel %vm1145_vm8, %v8091_v20, %v1142_v52  ;;  %v1149_v37 = vmul.f32 %v8093_v51, %v1148_v48  ;;  %vm1163_vm12 = vweird.f32 %v1060_v8 }
 0x1a9   : > { %8096 = vrsqrt.f32 %v9414_v53  ;;  %v1234_v57 = vmul.f32 %v1146_v44, %v9241_v61  ;;  %1033 = vadd.xlane.f32.xlu1 %v1002_v56 }
 0x1aa   : > { %v1150_v49 = vmul.f32 0.5, %v1149_v37  ;;  %v1028_v0 = vpop.xlane.xlu1 %1027 }
 0x1ab   : > { %v1024_v36 = vpop.xlane.xlu2 %1023  ;;  %v1250_v58 = vmul.f32 %v9292_v42, %v1234_v57  ;;  %v1047_v61 = vmul.f32 %v1028_v0, %v9069_v13 }
 0x1ac   : > { %v1045_v55 = vmul.f32 %v1024_v36, %v9069_v13  ;;  %v1151_v17 = vsub.f32 1.5, %v1150_v49 }
 0x1ad   : > { %v1266_v4 = vadd.f32 %v9313_v1, %v1250_v58  ;;  %v9440_v60 = vadd.f32 1e-05, %v1047_v61 }
 0x1ae   : > { %v8095_v25 = vpop.eup %8094  ;;  %v1061_v38 = vadd.f32 1e-05, %v1045_v55  ;;  %v1152_v7 = vmul.f32 %v8093_v51, %v1151_v17  ;;  %v9484_v55 = vld [vmem:[%s9371_s26 + $0x30] sm:$0xff] }
 0x1af   : > { %v9428_v3 = vpop.eup %8096  ;;  %v1158_v32 = vmul.f32 %v8095_v25, %v1060_v8  ;;  %v1399_v6 = vpack.c.bf16 %v1266_v4, %v1265_v2  ;;  %vm1164_vm13 = vweird.f32 %v8095_v25  ;;  %vm1193_vm7 = vweird.f32 %v9440_v60 }
 0x1b0   : > { %v1178_v10 = vmul.f32 %v9428_v3, %v9414_v53  ;;  %8098 = vrsqrt.f32 %v1061_v38  ;;  %v1156_v12 = vsel %vm9436_vm11, %v8093_v51, %v1152_v7  ;;  %vm1165_vm14 = vmor %vm1163_vm12, %vm1164_vm13  ;;  %vm1173_vm15 = vweird.f32 %v1061_v38 }
 0x1b1   : > { %v1159_v15 = vmul.f32 %v8095_v25, %v1158_v32  ;;  %1523 = vmatmul.bf16.gmra.mxu1 %v1399_v6  ;;  %1572 = vmatmul.bf16.gmra.mxu2 %v1399_v6  ;;  %8100 = vrsqrt.f32 %v9440_v60  ;;  %v1235_v26 = vmul.f32 %v1156_v12, %v9251_v9  ;;  %vm1184_vm2 = vweird.f32 %v9428_v3 }
 0x1b2   : > { %546 = vadd.xlane.f32.xlu1 %v9434_v14  ;;  %v1179_v47 = vmul.f32 %v9428_v3, %v1178_v10  ;;  %vm9486_vm4 = vmor %vm1183_vm1, %vm1184_vm2 }
 0x1b3   : > { %v1160_v46 = vmul.f32 0.5, %v1159_v15  ;;  %v1030_v18 = vpop.xlane.xlu2 %1029  ;;  %v1251_v51 = vmul.f32 %v9292_v42, %v1235_v26 }
 0x1b4   : > { %v1048_v19 = vmul.f32 %v1030_v18, %v9069_v13  ;;  %v1180_v27 = vmul.f32 0.5, %v1179_v47 }
 0x1b5   : > { %v1161_v20 = vsub.f32 1.5, %v1160_v46  ;;  %v1267_v36 = vadd.f32 %v9313_v1, %v1251_v51  ;;  %v9543_v51 = vld [vmem:[%s9371_s26 + $0x58] sm:$0xff] }
 0x1b6   : > { %v8099_v59 = vpop.eup %8098  ;;  %v9447_v21 = vadd.f32 1e-05, %v1048_v19  ;;  %v1181_v52 = vsub.f32 1.5, %v1180_v27 }
 0x1b7   : > { %v1162_v22 = vmul.f32 %v8095_v25, %v1161_v20  ;;  %v1168_v23 = vmul.f32 %v8099_v59, %v1061_v38  ;;  %vm1174_vm0 = vweird.f32 %v8099_v59  ;;  %v9462_v48 = vpop.eup %8100  ;;  %v9515_v20 = vld [vmem:[%s9371_s26 + $0x38] sm:$0xff] }
 0x1b8   : > { %8102 = vrsqrt.f32 %v9447_v21  ;;  %vm9473_vm3 = vmor %vm1173_vm15, %vm1174_vm0  ;;  %v1182_v53 = vmul.f32 %v9428_v3, %v1181_v52  ;;  %v1188_v58 = vmul.f32 %v9462_v48, %v9440_v60  ;;  %vm1203_vm5 = vweird.f32 %v9447_v21 }
 0x1b9   : > { %v1169_v31 = vmul.f32 %v8099_v59, %v1168_v23  ;;  %v1166_v34 = vsel %vm1165_vm14, %v8095_v25, %v1162_v22  ;;  %vm1194_vm8 = vweird.f32 %v9462_v48 }
 0x1ba   : > { %v9455_v35 = vpop.xlane.xlu0 %1031  ;;  %v1236_v40 = vmul.f32 %v1166_v34, %v9285_v45  ;;  %552 = vadd.xlane.f32.xlu1 %v9453_v29  ;;  %v1189_v61 = vmul.f32 %v9462_v48, %v1188_v58  ;;  %v1186_v7 = vsel %vm9486_vm4, %v9428_v3, %v1182_v53  ;;  %vm1195_vm10 = vmor %vm1193_vm7, %vm1194_vm8  ;;  %v9535_v34 = vld [vmem:[%s9371_s26 + $0x40] sm:$0xff]  ;;  %v7635_v53 = vld [vmem:[%s12972_s4 + $0x38] sm:$0xff] }
 0x1bb   : > { %v1170_v41 = vmul.f32 0.5, %v1169_v31  ;;  %v543_v50 = vpop.xlane.xlu2 %542  ;;  %v1238_v18 = vmul.f32 %v1186_v7, %v9276_v39  ;;  %1347 = vmatpush.bf16.msra.mxu0 %v7635_v53 }
 0x1bc   : > { %v581_v9 = vmul.f32 %v9069_v13, %v543_v50  ;;  %v1252_v8 = vmul.f32 %v9292_v42, %v1236_v40  ;;  %v1190_v47 = vmul.f32 0.5, %v1189_v61 }
 0x1bd   : > { %v1171_v44 = vsub.f32 1.5, %v1170_v41  ;;  %v1254_v39 = vmul.f32 %v9292_v42, %v1238_v18 }
 0x1be   : > { %v9464_v54 = vpop.eup %8102  ;;  %v1268_v45 = vadd.f32 %v9313_v1, %v1252_v8  ;;  %v9470_v37 = vsub.f32 %v9381_v43, %v581_v9 }
 0x1bf   : > { %v1172_v56 = vmul.f32 %v8099_v59, %v1171_v44  ;;  %v1198_v49 = vmul.f32 %v9464_v54, %v9447_v21  ;;  %vm1204_vm6 = vweird.f32 %v9464_v54  ;;  %v1270_v27 = vadd.f32 %v9313_v1, %v1254_v39  ;;  %v9586_v39 = vld [vmem:[%s9371_s26 + $0x48] sm:$0xff] }
 0x1c0   : > { %v1400_v17 = vpack.c.bf16 %v1268_v45, %v1267_v36  ;;  %v613_v0 = vmul.f32 %v9470_v37, %v9470_v37  ;;  %vm1205_vm9 = vmor %vm1203_vm5, %vm1204_vm6 }
 0x1c1   : > { %v1199_v2 = vmul.f32 %v9464_v54, %v1198_v49  ;;  %v1176_v25 = vsel %vm9473_vm3, %v8099_v59, %v1172_v56  ;;  %v1191_v59 = vsub.f32 1.5, %v1190_v47 }
 0x1c2   : > { %v545_v4 = vpop.xlane.xlu0 %544  ;;  %554 = vadd.xlane.f32.xlu1 %v9484_v55  ;;  %1528 = vmatmul.bf16.gmra.mxu1 %v1400_v17  ;;  %v1237_v15 = vmul.f32 %v1176_v25, %v9327_v11 }
 0x1c3   : > { %v549_v38 = vpop.xlane.xlu2 %548  ;;  %v582_v32 = vmul.f32 %v9069_v13, %v545_v4  ;;  %1577 = vmatmul.bf16.gmra.mxu2 %v1400_v17  ;;  %629 = vadd.xlane.f32.xlu2 %v613_v0  ;;  %v1200_v16 = vmul.f32 0.5, %v1199_v2  ;;  %v1192_v31 = vmul.f32 %v9462_v48, %v1191_v59  ;;  %v7633_v4 = vld [vmem:[%s12972_s4 + $0x28] sm:$0xff] }
 0x1c4   : > { %v584_v6 = vmul.f32 %v9069_v13, %v549_v38 }
 0x1c5   : > { %v9503_v10 = vsub.f32 %v9390_v62, %v582_v32  ;;  %v1253_v62 = vmul.f32 %v9292_v42, %v1237_v15  ;;  %v1201_v3 = vsub.f32 1.5, %v1200_v16  ;;  %v1196_v40 = vsel %vm1195_vm10, %v9462_v48, %v1192_v31  ;;  %v7632_v15 = vld [vmem:[%s12972_s4 + $0x20] sm:$0xff] }
 0x1c6   : > { %v9507_v46 = vsub.f32 %v9393_v63, %v584_v6  ;;  %v1239_v50 = vmul.f32 %v1196_v40, %v9321_v28  ;;  %v1049_v28 = vmul.f32 %v9455_v35, %v9069_v13  ;;  %v7634_v35 = vld [vmem:[%s12972_s4 + $0x30] sm:$0xff]  ;;  %v7629_v40 = vld [vmem:[%s12972_s4 + $0x8] sm:$0xff] }
 0x1c7   : > { %v614_v12 = vmul.f32 %v9503_v10, %v9503_v10  ;;  %v1269_v22 = vadd.f32 %v9313_v1, %v1253_v62  ;;  %v1202_v26 = vmul.f32 %v9464_v54, %v1201_v3  ;;  %1348 = vmatpush.bf16.msra.mxu0 %v7634_v35  ;;  %v9579_v62 = vpop.f32.mrf.mxu1 }
 0x1c8   : > { %v616_v19 = vmul.f32 %v9507_v46, %v9507_v46  ;;  %v1255_v9 = vmul.f32 %v9292_v42, %v1239_v50 }
 0x1c9   : > { %631 = vadd.xlane.f32.xlu0 %v614_v12  ;;  %v1206_v60 = vsel %vm1205_vm9, %v9464_v54, %v1202_v26  ;;  %v9551_v54 = vld [vmem:[%s9371_s26 + $0x60] sm:$0xff]  ;;  %v7631_v12 = vld [vmem:[%s12972_s4 + $0x18] sm:$0xff]  ;;  %v7630_v26 = vld [vmem:[%s12972_s4 + $0x10] sm:$0xff] }
 0x1ca   : > { %v551_v11 = vpop.xlane.xlu0 %550  ;;  %635 = vadd.xlane.f32.xlu1 %v616_v19  ;;  %v1240_v41 = vmul.f32 %v1206_v60, %v9356_v30  ;;  %v1271_v44 = vadd.f32 %v9313_v1, %v1255_v9  ;;  %v1065_v30 = vadd.f32 1e-05, %v1049_v28  ;;  %v9614_v28 = vld [vmem:[%s9371_s26 + $0x50] sm:$0xff] }
 0x1cb   : > { %v585_v63 = vmul.f32 %v9069_v13, %v551_v11  ;;  %556 = vadd.xlane.f32.xlu2 %v9515_v20  ;;  %1349 = vmatpush.bf16.msra.mxu0 %v7633_v4 }
 0x1cc   : > { %v1256_v52 = vmul.f32 %v9292_v42, %v1240_v41  ;;  %8104 = vrsqrt.f32 %v1065_v30  ;;  %vm1213_vm11 = vweird.f32 %v1065_v30  ;;  %v9602_v41 = vpop.f32.mrf.mxu2 }
 0x1cd   : > { %v9525_v23 = vsub.f32 %v9402_v5, %v585_v63  ;;  %v1401_v5 = vpack.c.bf16 %v1270_v27, %v1269_v22 }
 0x1ce   : > { %v1272_v8 = vadd.f32 %v9313_v1, %v1256_v52 }
 0x1cf   : > { %v617_v21 = vmul.f32 %v9525_v23, %v9525_v23  ;;  %1350 = vmatpush.bf16.msra.mxu0 %v7632_v15 }
 0x1d0   : > { %v1402_v45 = vpack.c.bf16 %v1272_v8, %v1271_v44  ;;  %v9609_v8 = vpop.f32.mrf.mxu1 }
 0x1d2   : > { %1533 = vmatmul.bf16.gmra.mxu1 %v1401_v5  ;;  %637 = vadd.xlane.f32.xlu1 %v617_v21  ;;  %v8105_v48 = vpop.eup %8104 }
 0x1d3   : > { %558 = vadd.xlane.f32.xlu2 %v9535_v34  ;;  %1582 = vmatmul.bf16.gmra.mxu2 %v1401_v5  ;;  %v1208_v56 = vmul.f32 %v8105_v48, %v1065_v30  ;;  %vm1214_vm12 = vweird.f32 %v8105_v48 }
 0x1d4   : > { %vm1215_vm13 = vmor %vm1213_vm11, %vm1214_vm12  ;;  %1351 = vmatpush.bf16.msra.mxu0 %v7631_v12  ;;  %v9630_v35 = vpop.f32.mrf.mxu2 }
 0x1d5   : > { %v1209_v57 = vmul.f32 %v8105_v48, %v1208_v56 }
 0x1d7   : > { %v1210_v43 = vmul.f32 0.5, %v1209_v57 }
 0x1d8   : > { %1352 = vmatpush.bf16.msra.mxu0 %v7630_v26 }
 0x1d9   : > { %v1211_v17 = vsub.f32 1.5, %v1210_v43 }
 0x1da   : > { %564 = vadd.xlane.f32.xlu1 %v9543_v51 }
 0x1db   : > { %v1212_v32 = vmul.f32 %v8105_v48, %v1211_v17 }
 0x1dc   : > { %1353 = vmatpush.bf16.msra.mxu0 %v7629_v40  ;;  %v9650_v12 = vpop.f32.mrf.mxu2 }
 0x1dd   : > { %v1216_v47 = vsel %vm1215_vm13, %v8105_v48, %v1212_v32 }
 0x1de   : > { %v1241_v11 = vmul.f32 %v1216_v47, %v9375_v33 }
 0x1e0   : > { %v1257_v33 = vmul.f32 %v9292_v42, %v1241_v11 }
 0x1e2   : > { %1538 = vmatmul.bf16.gmra.mxu1 %v1402_v45  ;;  %566 = vadd.xlane.f32.xlu1 %v9551_v54  ;;  %v1273_v50 = vadd.f32 %v9313_v1, %v1257_v33 }
 0x1e3   : > { %1587 = vmatmul.bf16.gmra.mxu2 %v1402_v45 }
 0x21c   : > { %v1034_v49 = vpop.xlane.xlu1 %1033 }
 0x21d   : > { %v1050_v36 = vmul.f32 %v1034_v49, %v9069_v13 }
 0x21f   : > { %v1066_v58 = vadd.f32 1e-05, %v1050_v36 }
 0x221   : > { %8106 = vrsqrt.f32 %v1066_v58  ;;  %vm1223_vm15 = vweird.f32 %v1066_v58 }
 0x225   : > { %v547_v0 = vpop.xlane.xlu1 %546 }
 0x226   : > { %v583_v2 = vmul.f32 %v9069_v13, %v547_v0 }
 0x227   : > { %v8107_v25 = vpop.eup %8106 }
 0x228   : > { %v9568_v38 = vsub.f32 %v9434_v14, %v583_v2  ;;  %v1218_v61 = vmul.f32 %v8107_v25, %v1066_v58  ;;  %vm1224_vm14 = vweird.f32 %v8107_v25  ;;  %v9625_v58 = vld [vmem:[%s9371_s26 + $0x68] sm:$0xff]  ;;  %v9634_v2 = vpop.f32.mrf.mxu1 }
 0x229   : > { %vm1225_vm0 = vmor %vm1223_vm15, %vm1224_vm14 }
 0x22a   : > { %v615_v6 = vmul.f32 %v9568_v38, %v9568_v38  ;;  %v1219_v7 = vmul.f32 %v8107_v25, %v1218_v61 }
 0x22c   : > { %633 = vadd.xlane.f32.xlu0 %v615_v6  ;;  %v1220_v16 = vmul.f32 0.5, %v1219_v7 }
 0x22d   : > { %v553_v18 = vpop.xlane.xlu1 %552 }
 0x22e   : > { %v586_v14 = vmul.f32 %v9069_v13, %v553_v18  ;;  %v1221_v19 = vsub.f32 1.5, %v1220_v16  ;;  %v9645_v18 = vld [vmem:[%s9371_s26 + $0x70] sm:$0xff] }
 0x230   : > { %v9582_v3 = vsub.f32 %v9453_v29, %v586_v14  ;;  %v1222_v63 = vmul.f32 %v8107_v25, %v1221_v19  ;;  %v9657_v26 = vpop.f32.mrf.mxu1 }
 0x232   : > { %v618_v59 = vmul.f32 %v9582_v3, %v9582_v3  ;;  %v1226_v22 = vsel %vm1225_vm0, %v8107_v25, %v1222_v63 }
 0x233   : > { %v1242_v29 = vmul.f32 %v1226_v22, %v9417_v24 }
 0x234   : > { %639 = vadd.xlane.f32.xlu2 %v618_v59  ;;  %560 = vadd.xlane.f32.xlu0 %v9586_v39 }
 0x235   : > { %v555_v27 = vpop.xlane.xlu1 %554  ;;  %v1258_v5 = vmul.f32 %v9292_v42, %v1242_v29 }
 0x236   : > { %v587_v21 = vmul.f32 %v9069_v13, %v555_v27  ;;  %v630_v31 = vpop.xlane.xlu2 %629 }
 0x237   : > { %v661_v60 = vmul.f32 %v630_v31, %v9069_v13  ;;  %v1274_v52 = vadd.f32 %v9313_v1, %v1258_v5 }
 0x238   : > { %v9605_v24 = vsub.f32 %v9484_v55, %v587_v21  ;;  %v7628_v55 = vld [vmem:[%s12972_s4] sm:$0xff] }
 0x239   : > { %v677_v9 = vadd.f32 1e-05, %v661_v60  ;;  %v1403_v45 = vpack.c.bf16 %v1274_v52, %v1273_v50  ;;  %1354 = vmatpush.bf16.msra.mxu0 %v7628_v55  ;;  %v9669_v50 = vld [vmem:[%s9371_s26 + $0x78] sm:$0xff]  ;;  %s8918_s26 = smov 16  }
 0x23a   : > { %v619_v44 = vmul.f32 %v9605_v24, %v9605_v24 }
 0x23b   : > { %8108 = vrsqrt.f32 %v677_v9  ;;  %1543 = vmatmul.bf16.gmra.mxu1 %v1403_v45  ;;  %1592 = vmatmul.bf16.gmra.mxu2 %v1403_v45  ;;  %vm699_vm1 = vweird.f32 %v677_v9 }
 0x23c   : > { %641 = vadd.xlane.f32.xlu2 %v619_v44  ;;  %v632_v30 = vpop.xlane.xlu0 %631  ;;  %562 = vadd.xlane.f32.xlu0 %v9614_v28  ;;  %v9672_v44 = vpop.f32.mrf.mxu2 }
 0x23d   : > { %v9620_v48 = vpop.xlane.xlu1 %635  ;;  %v662_v56 = vmul.f32 %v632_v30, %v9069_v13 }
 0x23e   : > { %v557_v57 = vpop.xlane.xlu2 %556 }
 0x23f   : > { %v588_v49 = vmul.f32 %v9069_v13, %v557_v57  ;;  %v678_v36 = vadd.f32 1e-05, %v662_v56 }
 0x241   : > { %v8109_v53 = vpop.eup %8108  ;;  %8110 = vrsqrt.f32 %v678_v36  ;;  %v9628_v43 = vsub.f32 %v9515_v20, %v588_v49  ;;  %vm709_vm4 = vweird.f32 %v678_v36 }
 0x242   : > { %v694_v17 = vmul.f32 %v8109_v53, %v677_v9  ;;  %vm700_vm2 = vweird.f32 %v8109_v53 }
 0x243   : > { %v620_v0 = vmul.f32 %v9628_v43, %v9628_v43  ;;  %vm9640_vm3 = vmor %vm699_vm1, %vm700_vm2 }
 0x244   : > { %v695_v4 = vmul.f32 %v8109_v53, %v694_v17  ;;  %568 = vadd.xlane.f32.xlu2 %v9625_v58  ;;  %v9691_v57 = vpop.f32.mrf.mxu2 }
 0x245   : > { %643 = vadd.xlane.f32.xlu0 %v620_v0  ;;  %v9637_v25 = vpop.xlane.xlu1 %637 }
 0x246   : > { %v696_v32 = vmul.f32 0.5, %v695_v4  ;;  %v559_v20 = vpop.xlane.xlu2 %558 }
 0x247   : > { %v8111_v61 = vpop.eup %8110  ;;  %v589_v6 = vmul.f32 %v9069_v13, %v559_v20 }
 0x248   : > { %v697_v7 = vsub.f32 1.5, %v696_v32  ;;  %v704_v15 = vmul.f32 %v8111_v61, %v678_v36  ;;  %vm710_vm5 = vweird.f32 %v8111_v61 }
 0x249   : > { %v9648_v19 = vsub.f32 %v9535_v34, %v589_v6  ;;  %vm711_vm6 = vmor %vm709_vm4, %vm710_vm5 }
 0x24a   : > { %v698_v47 = vmul.f32 %v8109_v53, %v697_v7  ;;  %v705_v14 = vmul.f32 %v8111_v61, %v704_v15 }
 0x24b   : > { %v621_v59 = vmul.f32 %v9648_v19, %v9648_v19 }
 0x24c   : > { %v706_v11 = vmul.f32 0.5, %v705_v14  ;;  %570 = vadd.xlane.f32.xlu2 %v9645_v18  ;;  %v702_v63 = vsel %vm9640_vm3, %v8109_v53, %v698_v47  ;;  %v9695_v36 = vpop.f32.mrf.mxu2  ;;  %v665_v47 = vmul.f32 %v9637_v25, %v9069_v13  ;;  %vm1726_vm3 = vcmask 130048  }
 0x24d   : > { %v565_v22 = vpop.xlane.xlu1 %564  ;;  %645 = vadd.xlane.f32.xlu0 %v621_v59  ;;  %v853_v33 = vmul.f32 %v702_v63, %v9470_v37 }
 0x24e   : > { %v707_v29 = vsub.f32 1.5, %v706_v11  ;;  %v592_v34 = vmul.f32 %v9069_v13, %v565_v22  ;;  %v9723_v59 = vadd.f32 1e-05, %v665_v47 }
 0x24f   : > { %v872_v40 = vmul.f32 %v9292_v42, %v853_v33 }
 0x250   : > { %v708_v27 = vmul.f32 %v8111_v61, %v707_v29  ;;  %v9662_v21 = vsub.f32 %v9543_v51, %v592_v34  ;;  %vm739_vm15 = vweird.f32 %v9723_v59 }
 0x251   : > { %v9677_v51 = vadd.f32 %v9313_v1, %v872_v40 }
 0x252   : > { %13067 = vst [vmem:[#allocation14_spill] sm:$0xff] %v9662_v21  ;;  %v624_v31 = vmul.f32 %v9662_v21, %v9662_v21  ;;  %v712_v5 = vsel %vm711_vm6, %v8111_v61, %v708_v27  ;;  %v664_v61 = vmul.f32 %v9620_v48, %v9069_v13 }
 0x253   : > { %v854_v60 = vmul.f32 %v712_v5, %v9503_v10  ;;  %13068 = vst [vmem:[#allocation15_spill] sm:$0xff] %v9677_v51  ;;  %v9682_v10 = vpop.f32.mrf.mxu1 }
 0x254   : > { %651 = vadd.xlane.f32.xlu2 %v624_v31  ;;  %v9699_v17 = vpop.f32.mrf.mxu2  ;;  %v680_v6 = vadd.f32 1e-05, %v664_v61 }
 0x255   : > { %v567_v52 = vpop.xlane.xlu1 %566  ;;  %v873_v9 = vmul.f32 %v9292_v42, %v854_v60  ;;  %572 = vadd.xlane.f32.xlu0 %v9669_v50 }
 0x256   : > { %v593_v37 = vmul.f32 %v9069_v13, %v567_v52  ;;  %8112 = vrsqrt.f32 %v680_v6  ;;  %vm729_vm7 = vweird.f32 %v680_v6 }
 0x257   : > { %v9680_v45 = vadd.f32 %v9313_v1, %v873_v9  ;;  %8114 = vrsqrt.f32 %v9723_v59 }
 0x258   : > { %v9685_v55 = vsub.f32 %v9551_v54, %v593_v37 }
 0x259   : > { %13069 = vst [vmem:[#allocation16_spill] sm:$0xff] %v9680_v45  ;;  %v1275_v30 = vpack.c.bf16 %v9680_v45, %v9677_v51 }
 0x25a   : > { %13070 = vst [vmem:[#allocation17_spill] sm:$0xff] %v9685_v55  ;;  %v625_v56 = vmul.f32 %v9685_v55, %v9685_v55 }
 0x25b   : > { %1355 = vmatmul.bf16.vlgmr.msra.gmra.mxu0 %v1275_v30  ;;  %v9693_v49 = vpop.f32.mrf.mxu1 }
 0x25c   : > { %v9703_v0 = vpop.f32.mrf.mxu2  ;;  %v8113_v16 = vpop.eup %8112 }
 0x25d   : > { %653 = vadd.xlane.f32.xlu0 %v625_v56  ;;  %v724_v11 = vmul.f32 %v8113_v16, %v680_v6  ;;  %v9731_v25 = vpop.eup %8114  ;;  %vm730_vm8 = vweird.f32 %v8113_v16 }
 0x25e   : > { %v734_v30 = vmul.f32 %v9731_v25, %v9723_v59  ;;  %vm9740_vm9 = vmor %vm729_vm7, %vm730_vm8  ;;  %vm740_vm0 = vweird.f32 %v9731_v25 }
 0x25f   : > { %v725_v22 = vmul.f32 %v8113_v16, %v724_v11  ;;  %vm9797_vm2 = vmor %vm739_vm15, %vm740_vm0 }
 0x261   : > { %v726_v33 = vmul.f32 0.5, %v725_v22 }
 0x263   : > { %v9697_v53 = vpop.f32.mrf.mxu1  ;;  %v727_v5 = vsub.f32 1.5, %v726_v33 }
 0x264   : > { %v9707_v32 = vpop.f32.mrf.mxu2 }
 0x265   : > { %v728_v47 = vmul.f32 %v8113_v16, %v727_v5 }
 0x26b   : > { %v9701_v54 = vpop.f32.mrf.mxu1 }
 0x26c   : > { %v9713_v7 = vpop.f32.mrf.mxu2 }
 0x273   : > { %v9705_v4 = vpop.f32.mrf.mxu1 }
 0x274   : > { %v9719_v14 = vpop.f32.mrf.mxu2 }
 0x27b   : > { %v9709_v20 = vpop.f32.mrf.mxu1 }
 0x27c   : > { %v9727_v27 = vpop.f32.mrf.mxu2 }
 0x283   : > { %v9715_v15 = vpop.f32.mrf.mxu1 }
 0x284   : > { %v9747_v33 = vpop.f32.mrf.mxu2 }
 0x28b   : > { %v9721_v63 = vpop.f32.mrf.mxu1 }
 0x293   : > { %v9729_v31 = vpop.f32.mrf.mxu1 }
 0x29f   : > { %v634_v29 = vpop.xlane.xlu0 %633 }
 0x2a0   : > { %v663_v48 = vmul.f32 %v634_v29, %v9069_v13 }
 0x2a2   : > { %v679_v34 = vadd.f32 1e-05, %v663_v48  ;;  %v735_v48 = vmul.f32 %v9731_v25, %v734_v30 }
 0x2a4   : > { %8116 = vrsqrt.f32 %v679_v34  ;;  %v736_v55 = vmul.f32 0.5, %v735_v48  ;;  %vm719_vm11 = vweird.f32 %v679_v34 }
 0x2a7   : > { %v640_v60 = vpop.xlane.xlu2 %639  ;;  %v561_v40 = vpop.xlane.xlu0 %560 }
 0x2a8   : > { %v666_v52 = vmul.f32 %v640_v60, %v9069_v13  ;;  %v590_v9 = vmul.f32 %v9069_v13, %v561_v40 }
 0x2aa   : > { %v8117_v37 = vpop.eup %8116  ;;  %v682_v56 = vadd.f32 1e-05, %v666_v52  ;;  %v9738_v61 = vsub.f32 %v9586_v39, %v590_v9  ;;  %v732_v39 = vsel %vm9740_vm9, %v8113_v16, %v728_v47  ;;  %v9752_v9 = vpop.f32.mrf.mxu1 }
 0x2ab   : > { %v714_v11 = vmul.f32 %v8117_v37, %v679_v34  ;;  %vm720_vm10 = vweird.f32 %v8117_v37 }
 0x2ac   : > { %8118 = vrsqrt.f32 %v682_v56  ;;  %v622_v29 = vmul.f32 %v9738_v61, %v9738_v61  ;;  %vm721_vm12 = vmor %vm719_vm11, %vm720_vm10  ;;  %vm749_vm13 = vweird.f32 %v682_v56 }
 0x2ad   : > { %v715_v6 = vmul.f32 %v8117_v37, %v714_v11 }
 0x2ae   : > { %647 = vadd.xlane.f32.xlu1 %v622_v29  ;;  %v856_v29 = vmul.f32 %v732_v39, %v9507_v46 }
 0x2af   : > { %v716_v60 = vmul.f32 0.5, %v715_v6  ;;  %v642_v40 = vpop.xlane.xlu2 %641  ;;  %v563_v52 = vpop.xlane.xlu0 %562 }
 0x2b0   : > { %v667_v5 = vmul.f32 %v642_v40, %v9069_v13  ;;  %v591_v51 = vmul.f32 %v9069_v13, %v563_v52  ;;  %v875_v40 = vmul.f32 %v9292_v42, %v856_v29 }
 0x2b1   : > { %v717_v45 = vsub.f32 1.5, %v716_v60 }
 0x2b2   : > { %v8119_v11 = vpop.eup %8118  ;;  %v9755_v30 = vadd.f32 1e-05, %v667_v5  ;;  %v9759_v16 = vsub.f32 %v9614_v28, %v591_v51  ;;  %v737_v5 = vsub.f32 1.5, %v736_v55  ;;  %v9766_v28 = vpop.f32.mrf.mxu2 }
 0x2b3   : > { %v718_v6 = vmul.f32 %v8117_v37, %v717_v45  ;;  %v744_v21 = vmul.f32 %v8119_v11, %v682_v56  ;;  %vm750_vm14 = vweird.f32 %v8119_v11 }
 0x2b4   : > { %8120 = vrsqrt.f32 %v9755_v30  ;;  %v623_v22 = vmul.f32 %v9759_v16, %v9759_v16  ;;  %vm9781_vm1 = vmor %vm749_vm13, %vm750_vm14  ;;  %vm759_vm6 = vweird.f32 %v9755_v30 }
 0x2b5   : > { %v745_v47 = vmul.f32 %v8119_v11, %v744_v21  ;;  %v722_v60 = vsel %vm721_vm12, %v8117_v37, %v718_v6  ;;  %v9772_v21 = vld [vmem:[%s13052_s2] ss:$0 sm:$0xff]  ;;  %v9789_v6 = vadd.f32 %v9313_v1, %v875_v40 }
 0x2b6   : > { %v855_v48 = vmul.f32 %v722_v60, %v9568_v38  ;;  %649 = vadd.xlane.f32.xlu1 %v623_v22 }
 0x2b7   : > { %v746_v46 = vmul.f32 0.5, %v745_v47  ;;  %v569_v45 = vpop.xlane.xlu2 %568  ;;  %13076 = vst [vmem:[#allocation19_spill] sm:$0xff] %v9789_v6  ;;  %v738_v47 = vmul.f32 %v9731_v25, %v737_v5 }
 0x2b8   : > { %v594_v51 = vmul.f32 %v9069_v13, %v569_v45  ;;  %v644_v34 = vpop.xlane.xlu0 %643  ;;  %v874_v38 = vmul.f32 %v9772_v21, %v855_v48  ;;  %v1544_v37 = vpop.f32.mrf.mxu1 }
 0x2b9   : > { %v747_v42 = vsub.f32 1.5, %v746_v46  ;;  %v668_v55 = vmul.f32 %v644_v34, %v9069_v13  ;;  %v1628_v5 = vpack.c.bf16 %v1544_v37, %v1544_v37 }
 0x2ba   : > { %v9778_v39 = vpop.eup %8120  ;;  %v9786_v29 = vadd.f32 %v9313_v1, %v874_v38  ;;  %v9792_v59 = vsub.f32 %v9625_v58, %v594_v51  ;;  %v742_v51 = vsel %vm9797_vm2, %v9731_v25, %v738_v47 }
 0x2bb   : > { %v748_v22 = vmul.f32 %v8119_v11, %v747_v42  ;;  %v754_v60 = vmul.f32 %v9778_v39, %v9755_v30  ;;  %v684_v56 = vadd.f32 1e-05, %v668_v55  ;;  %v857_v37 = vmul.f32 %v742_v51, %v9525_v23 }
 0x2bc   : > { %13075 = vst [vmem:[#allocation18_spill] sm:$0xff] %v9786_v29  ;;  %v1276_v46 = vpack.c.bf16 %v9789_v6, %v9786_v29  ;;  %v626_v1 = vmul.f32 %v9792_v59, %v9792_v59  ;;  %v1716_v25 = vunpack.c.l.b16 %v1628_v5  ;;  %vm760_vm7 = vweird.f32 %v9778_v39 }
 0x2bd   : > { %8122 = vrsqrt.f32 %v684_v56  ;;  %v752_v58 = vsel %vm9781_vm1, %v8119_v11, %v748_v22  ;;  %v755_v40 = vmul.f32 %v9778_v39, %v754_v60  ;;  %v1627_v60 = vpack.c.bf16 %v9752_v9, %v9752_v9  ;;  %vm9864_vm9 = vmor %vm759_vm6, %vm760_vm7 }
 0x2be   : > { %1360 = vmatmul.bf16.gmra.mxu0 %v1276_v46  ;;  %655 = vadd.xlane.f32.xlu1 %v626_v1  ;;  %v1593_v38 = vpop.f32.mrf.mxu2  ;;  %v858_v42 = vmul.f32 %v752_v58, %v9582_v3  ;;  %v876_v23 = vmul.f32 %v9772_v21, %v857_v37  ;;  %vm769_vm4 = vweird.f32 %v684_v56  ;;  %v1624_v30 = vpack.c.bf16 %v9715_v15, %v9715_v15 }
 0x2bf   : > { %v571_v45 = vpop.xlane.xlu2 %570  ;;  %v756_v48 = vmul.f32 0.5, %v755_v40  ;;  %v1715_v9 = vunpack.c.l.b16 %v1627_v60  ;;  %v1644_v5 = vpack.c.bf16 %v1593_v38, %v1593_v38  ;;  %v1642_v60 = vpack.c.bf16 %v9747_v33, %v9747_v33 }
 0x2c0   : > { %v595_v34 = vmul.f32 %v9069_v13, %v571_v45  ;;  %v1546_v55 = vpop.f32.mrf.mxu1  ;;  %v9813_v6 = vpop.xlane.xlu0 %645  ;;  %v877_v1 = vmul.f32 %v9772_v21, %v858_v42  ;;  %v1625_v33 = vpack.c.bf16 %v9721_v63, %v9721_v63 }
 0x2c1   : > { %v1629_v52 = vpack.c.bf16 %v1546_v55, %v1546_v55  ;;  %v757_v40 = vsub.f32 1.5, %v756_v48 }
 0x2c2   : > { %v9816_v11 = vsub.f32 %v9645_v18, %v595_v34  ;;  %v1626_v18 = vpack.c.bf16 %v9729_v31, %v9729_v31  ;;  %v9834_v31 = vld [vmem:[%s12971_s3] ss:$0 sm:$0xff] }
 0x2c3   : > { %v8123_v22 = vpop.eup %8122  ;;  %v1717_v46 = vunpack.c.l.b16 %v1629_v52  ;;  %v9837_v55 = vadd.f32 %v9834_v31, %v877_v1  ;;  %v1643_v52 = vpack.c.bf16 %v9766_v28, %v9766_v28 }
 0x2c4   : > { %v764_v47 = vmul.f32 %v8123_v22, %v684_v56  ;;  %v627_v3 = vmul.f32 %v9816_v11, %v9816_v11  ;;  %vm770_vm5 = vweird.f32 %v8123_v22  ;;  %v1714_v37 = vunpack.c.l.b16 %v1626_v18 }
 0x2c5   : > { %v9826_v45 = vpack.c.b16 %v1717_v46, %v1716_v25  ;;  %13079 = vst [vmem:[#allocation20_spill] sm:$0xff] %v9837_v55  ;;  %v758_v46 = vmul.f32 %v9778_v39, %v757_v40  ;;  %vm9851_vm8 = vmor %vm769_vm4, %vm770_vm5 }
 0x2c6   : > { %v765_v58 = vmul.f32 %v8123_v22, %v764_v47  ;;  %657 = vadd.xlane.f32.xlu2 %v627_v3  ;;  %v1595_v34 = vpop.f32.mrf.mxu2  ;;  %v9846_v47 = vadd.f32 %v9834_v31, %v876_v23  ;;  %v1974_v3 = vunpack.c.l.b16 %v1644_v5  ;;  %v1641_v5 = vpack.c.bf16 %v9727_v27, %v9727_v27 }
 0x2c7   : > { %v1773_v42 = vsel %vm1726_vm3, %v9826_v45, 0  ;;  %v1645_v38 = vpack.c.bf16 %v1595_v34, %v1595_v34 }
 0x2c8   : > { %v766_v51 = vmul.f32 0.5, %v765_v58  ;;  %1775 = vmatpush.bf16.xpose.msra.mxu3 %v1773_v42  ;;  %v573_v25 = vpop.xlane.xlu0 %572  ;;  %13080 = vst [vmem:[#allocation21_spill] sm:$0xff] %v9846_v47  ;;  %v9858_v58 = vpack.c.b16 %v1715_v9, %v1714_v37  ;;  %v1277_v40 = vpack.c.bf16 %v9837_v55, %v9846_v47  ;;  %v1640_v42 = vpack.c.bf16 %v9719_v14, %v9719_v14 }
 0x2c9   : > { %v1975_v1 = vunpack.c.l.b16 %v1645_v38  ;;  %v596_v18 = vmul.f32 %v9069_v13, %v573_v25  ;;  %v1972_v38 = vunpack.c.l.b16 %v1642_v60  ;;  %v1971_v14 = vunpack.c.l.b16 %v1641_v5 }
 0x2ca   : > { %v767_v48 = vsub.f32 1.5, %v766_v51  ;;  %v1973_v51 = vunpack.c.l.b16 %v1643_v52  ;;  %v1713_v52 = vunpack.c.l.b16 %v1625_v33  ;;  %v1770_v15 = vsel %vm1726_vm3, %v9858_v58, 0 }
 0x2cb   : > { %v9872_v34 = vpack.c.b16 %v1975_v1, %v1974_v3  ;;  %v9875_v63 = vsub.f32 %v9669_v50, %v596_v18  ;;  %v762_v50 = vsel %vm9864_vm9, %v9778_v39, %v758_v46  ;;  %v1638_v39 = vpack.c.bf16 %v9707_v32, %v9707_v32 }
 0x2cc   : > { %v768_v56 = vmul.f32 %v8123_v22, %v767_v48  ;;  %v9894_v60 = vpack.c.b16 %v1973_v51, %v1972_v38  ;;  %v1712_v48 = vunpack.c.l.b16 %v1624_v30  ;;  %v859_v25 = vmul.f32 %v762_v50, %v9605_v24 }
 0x2cd   : > { %1992 = vmatpush.bf16.msrb.mxu0 %v9872_v34  ;;  %v628_v27 = vmul.f32 %v9875_v63, %v9875_v63  ;;  %v1970_v46 = vunpack.c.l.b16 %v1640_v42  ;;  %v1637_v3 = vpack.c.bf16 %v9703_v0, %v9703_v0  ;;  %v1621_v24 = vpack.c.bf16 %v9701_v54, %v9701_v54 }
 0x2ce   : > { %1365 = vmatmul.bf16.gmra.mxu0 %v1277_v40  ;;  %v772_v9 = vsel %vm9851_vm8, %v8123_v22, %v768_v56  ;;  %v1639_v22 = vpack.c.bf16 %v9713_v7, %v9713_v7  ;;  %v9902_v28 = vpack.c.b16 %v1713_v52, %v1712_v48  ;;  %v1622_v32 = vpack.c.bf16 %v9705_v4, %v9705_v4 }
 0x2cf   : > { %v860_v37 = vmul.f32 %v772_v9, %v9628_v43  ;;  %659 = vadd.xlane.f32.xlu0 %v628_v27  ;;  %v1623_v43 = vpack.c.bf16 %v9709_v20, %v9709_v20  ;;  %v9907_v18 = vpack.c.b16 %v1971_v14, %v1970_v46  ;;  %v878_v33 = vmul.f32 %v9772_v21, %v859_v25 }
 0x2d0   : > { %1776 = vmatpush.bf16.xpose.msra.mxu3 %v1770_v15  ;;  %v1969_v1 = vunpack.c.l.b16 %v1639_v22  ;;  %v1636_v20 = vpack.c.bf16 %v9699_v17, %v9699_v17  ;;  %v1968_v23 = vunpack.c.l.b16 %v1638_v39  ;;  %v1620_v0 = vpack.c.bf16 %v9697_v53, %v9697_v53 }
 0x2d1   : > { %1993 = vmatpush.bf16.msrb.mxu0 %v9894_v60  ;;  %v879_v7 = vmul.f32 %v9772_v21, %v860_v37  ;;  %v1711_v56 = vunpack.c.l.b16 %v1623_v43  ;;  %v1767_v54 = vsel %vm1726_vm3, %v9902_v28, 0  ;;  %v1635_v17 = vpack.c.bf16 %v9695_v36, %v9695_v36 }
 0x2d2   : > { %v1967_v40 = vunpack.c.l.b16 %v1637_v3  ;;  %v9928_v5 = vpack.c.b16 %v1969_v1, %v1968_v23  ;;  %v1709_v51 = vunpack.c.l.b16 %v1621_v24  ;;  %v1710_v53 = vunpack.c.l.b16 %v1622_v32 }
 0x2d3   : > { %v9924_v4 = vadd.f32 %v9834_v31, %v879_v7  ;;  %v9931_v30 = vadd.f32 %v9834_v31, %v878_v33  ;;  %v1634_v9 = vpack.c.bf16 %v9691_v57, %v9691_v57  ;;  %v1966_v42 = vunpack.c.l.b16 %v1636_v20 }
 0x2d4   : > { %v1708_v38 = vunpack.c.l.b16 %v1620_v0  ;;  %v9936_v27 = vpack.c.b16 %v1711_v56, %v1710_v53  ;;  %v1633_v50 = vpack.c.bf16 %v9672_v44, %v9672_v44  ;;  %v1965_v52 = vunpack.c.l.b16 %v1635_v17 }
 0x2d5   : > { %1994 = vmatpush.bf16.msrb.mxu0 %v9907_v18  ;;  %13085 = vst [vmem:[#allocation22_spill] sm:$0xff] %v9924_v4  ;;  %v1278_v36 = vpack.c.bf16 %v9924_v4, %v9931_v30  ;;  %v9942_v15 = vpack.c.b16 %v1967_v40, %v1966_v42  ;;  %v1615_v37 = vpack.c.bf16 %v9609_v8, %v9609_v8  ;;  %v1964_v48 = vunpack.c.l.b16 %v1634_v9 }
 0x2d6   : > { %13086 = vst [vmem:[#allocation23_spill] sm:$0xff] %v9931_v30  ;;  %v9946_v22 = vpack.c.b16 %v1709_v51, %v1708_v38  ;;  %v1632_v14 = vpack.c.bf16 %v9650_v12, %v9650_v12  ;;  %v1614_v44 = vpack.c.bf16 %v9579_v62, %v9579_v62  ;;  %v1764_v8 = vsel %vm1726_vm3, %v9936_v27, 0 }
 0x2d7   : > { %2071 = vrot.lane.b32.xlu1 %v9826_v45, %s8913_s24  ;;  %v1631_v25 = vpack.c.bf16 %v9630_v35, %v9630_v35  ;;  %v1963_v39 = vunpack.c.l.b16 %v1633_v50  ;;  %v9961_v46 = vpack.c.b16 %v1965_v52, %v1964_v48  ;;  %v1703_v12 = vunpack.c.l.b16 %v1615_v37 }
 0x2d8   : > { %1777 = vmatpush.bf16.xpose.msra.mxu3 %v1767_v54  ;;  %v1356_v57 = vpop.f32.mrf.mxu0  ;;  %v1630_v43 = vpack.c.bf16 %v9602_v41, %v9602_v41  ;;  %v1962_v7 = vunpack.c.l.b16 %v1632_v14  ;;  %v1619_v62 = vpack.c.bf16 %v9693_v49, %v9693_v49  ;;  %v1702_v3 = vunpack.c.l.b16 %v1614_v44 }
 0x2d9   : > { %1995 = vmatpush.bf16.msrb.mxu0 %v9928_v5  ;;  %v1617_v1 = vpack.c.bf16 %v9657_v26, %v9657_v26  ;;  %v1961_v24 = vunpack.c.l.b16 %v1631_v25  ;;  %v1618_v32 = vpack.c.bf16 %v9682_v10, %v9682_v10  ;;  %v1616_v49 = vpack.c.bf16 %v9634_v2, %v9634_v2 }
 0x2da   : > { %v9970_v35 = vpack.c.b16 %v1963_v39, %v1962_v7  ;;  %v9976_v41 = vpack.c.b16 %v1703_v12, %v1702_v3  ;;  %v1960_v33 = vunpack.c.l.b16 %v1630_v43  ;;  %v1707_v20 = vunpack.c.l.b16 %v1619_v62  ;;  %v654_v62 = vpop.xlane.xlu0 %653 }
 0x2db   : > { %v1705_v26 = vunpack.c.l.b16 %v1617_v1  ;;  %v1761_v10 = vsel %vm1726_vm3, %v9946_v22, 0  ;;  %v1706_v56 = vunpack.c.l.b16 %v1618_v32  ;;  %v1704_v2 = vunpack.c.l.b16 %v1616_v49 }
 0x2dc   : > { %v9987_v0 = vpack.c.b16 %v1961_v24, %v1960_v33  ;;  %v1598_v51 = vpack.c.bf16 %v1356_v57, %v1356_v57  ;;  %v1752_v50 = vsel %vm1726_vm3, %v9976_v41, 0  ;;  %v669_v52 = vmul.f32 %v9813_v6, %v9069_v13  ;;  %v652_v57 = vpop.xlane.xlu2 %651 }
 0x2dd   : > { %1996 = vmatpush.bf16.msrb.mxu0 %v9942_v15  ;;  %v9989_v54 = vpack.c.b16 %v1707_v20, %v1706_v56  ;;  %v9992_v40 = vpack.c.b16 %v1705_v26, %v1704_v2  ;;  %v672_v48 = vmul.f32 %v652_v57, %v9069_v13  ;;  %v673_v49 = vmul.f32 %v654_v62, %v9069_v13 }
 0x2de   : > { %2069 = vrot.lane.b32.xlu2 %v9858_v58, %s8913_s24  ;;  %1370 = vmatmul.bf16.gmra.mxu0 %v1278_v36  ;;  %v1662_v42 = vunpack.c.l.b16 %v1598_v51  ;;  %v685_v37 = vadd.f32 1e-05, %v669_v52 }
 0x2df   : > { %2063 = vrot.lane.b32.xlu1 %v9946_v22, %s8913_s24  ;;  %v1758_v9 = vsel %vm1726_vm3, %v9989_v54, 0  ;;  %v1755_v36 = vsel %vm1726_vm3, %v9992_v40, 0  ;;  %v10023_v2 = vadd.f32 1e-05, %v673_v49 }
 0x2e0   : > { %1778 = vmatpush.bf16.xpose.msra.mxu3 %v1764_v8  ;;  %v1358_v23 = vpop.f32.mrf.mxu0  ;;  %8124 = vrsqrt.f32 %v685_v37  ;;  %v688_v8 = vadd.f32 1e-05, %v672_v48  ;;  %vm779_vm10 = vweird.f32 %v685_v37 }
 0x2e1   : > { %1997 = vmatpush.bf16.msrb.mxu0 %v9961_v46  ;;  %v1599_v17 = vpack.c.bf16 %v1358_v23, %v1358_v23  ;;  %vm819_vm9 = vweird.f32 %v10023_v2 }
 0x2e2   : > { %8126 = vrsqrt.f32 %v688_v8  ;;  %vm809_vm0 = vweird.f32 %v688_v8 }
 0x2e3   : > { %2067 = vrot.lane.b32.xlu0 %v9902_v28, %s8913_s24  ;;  %v1663_v53 = vunpack.c.l.b16 %v1599_v17 }
 0x2e5   : > { %1998 = vmatpush.bf16.msrb.mxu0 %v9970_v35  ;;  %v10000_v38 = vpack.c.b16 %v1663_v53, %v1662_v42 }
 0x2e6   : > { %2065 = vrot.lane.b32.xlu2 %v9936_v27, %s8913_s24  ;;  %v8125_v14 = vpop.eup %8124 }
 0x2e7   : > { %2057 = vrot.lane.b32.xlu1 %v9976_v41, %s8913_s24  ;;  %v774_v44 = vmul.f32 %v8125_v14, %v685_v37  ;;  %vm780_vm11 = vweird.f32 %v8125_v14 }
 0x2e8   : > { %1779 = vmatpush.bf16.xpose.msra.mxu3 %v1761_v10  ;;  %v10014_v6 = vpop.eup %8126  ;;  %vm10019_vm12 = vmor %vm779_vm10, %vm780_vm11 }
 0x2e9   : > { %1999 = vmatpush.bf16.msrb.mxu0 %v9987_v0  ;;  %v775_v39 = vmul.f32 %v8125_v14, %v774_v44  ;;  %v804_v23 = vmul.f32 %v10014_v6, %v688_v8  ;;  %vm810_vm1 = vweird.f32 %v10014_v6 }
 0x2ea   : > { %vm10050_vm5 = vmor %vm809_vm0, %vm810_vm1 }
 0x2eb   : > { %2061 = vrot.lane.b32.xlu0 %v9989_v54, %s8913_s24  ;;  %v776_v7 = vmul.f32 0.5, %v775_v39  ;;  %v805_v51 = vmul.f32 %v10014_v6, %v804_v23 }
 0x2ed   : > { %v777_v3 = vsub.f32 1.5, %v776_v7  ;;  %v806_v48 = vmul.f32 0.5, %v805_v51 }
 0x2ee   : > { %2059 = vrot.lane.b32.xlu2 %v9992_v40, %s8913_s24 }
 0x2ef   : > { %v778_v26 = vmul.f32 %v8125_v14, %v777_v3  ;;  %v807_v62 = vsub.f32 1.5, %v806_v48 }
 0x2f0   : > { %1780 = vmatpush.bf16.xpose.msra.mxu3 %v1758_v9 }
 0x2f1   : > { %v782_v9 = vsel %vm10019_vm12, %v8125_v14, %v778_v26  ;;  %v808_v26 = vmul.f32 %v10014_v6, %v807_v62 }
 0x2f2   : > { %v861_v57 = vmul.f32 %v782_v9, %v9648_v19 }
 0x2f3   : > { %2041 = vrot.lane.b32.xlu0 %v10000_v38, %s8913_s24 }
 0x2f8   : > { %1781 = vmatpush.bf16.xpose.msra.mxu3 %v1755_v36 }
 0x300   : > { %1782 = vmatpush.bf16.xpose.msra.mxu3 %v1752_v50 }
 0x307   : > { %7154 = vmatmul.msk.bf16.vlgmr.msra.gmra.mxu3 %vm1726_vm3, %v10000_v38 }
 0x321   : > { %v648_v25 = vpop.xlane.xlu1 %647 }
 0x322   : > { %v670_v12 = vmul.f32 %v648_v25, %v9069_v13 }
 0x324   : > { %v686_v43 = vadd.f32 1e-05, %v670_v12  ;;  %v880_v12 = vmul.f32 %v9772_v21, %v861_v57 }
 0x326   : > { %8128 = vrsqrt.f32 %v686_v43  ;;  %vm789_vm14 = vweird.f32 %v686_v43 }
 0x329   : > { %v650_v1 = vpop.xlane.xlu1 %649 }
 0x32a   : > { %v671_v24 = vmul.f32 %v650_v1, %v9069_v13 }
 0x32c   : > { %v8129_v32 = vpop.eup %8128  ;;  %v687_v20 = vadd.f32 1e-05, %v671_v24 }
 0x32d   : > { %v784_v33 = vmul.f32 %v8129_v32, %v686_v43  ;;  %vm790_vm13 = vweird.f32 %v8129_v32 }
 0x32e   : > { %8130 = vrsqrt.f32 %v687_v20  ;;  %vm791_vm15 = vmor %vm789_vm14, %vm790_vm13  ;;  %vm799_vm2 = vweird.f32 %v687_v20 }
 0x32f   : > { %v785_v56 = vmul.f32 %v8129_v32, %v784_v33  ;;  %8132 = vrsqrt.f32 %v10023_v2  ;;  %v10047_v33 = vadd.f32 %v9834_v31, %v880_v12 }
 0x331   : > { %v786_v17 = vmul.f32 0.5, %v785_v56  ;;  %v656_v53 = vpop.xlane.xlu1 %655  ;;  %13090 = vst [vmem:[#allocation25_spill] sm:$0xff] %v10047_v33 }
 0x332   : > { %v674_v36 = vmul.f32 %v656_v53, %v9069_v13 }
 0x333   : > { %v787_v42 = vsub.f32 1.5, %v786_v17 }
 0x334   : > { %v8131_v50 = vpop.eup %8130  ;;  %v10030_v37 = vadd.f32 1e-05, %v674_v36  ;;  %v812_v36 = vsel %vm10050_vm5, %v10014_v6, %v808_v26  ;;  %vm4783_vm5 = vcmask 392192  }
 0x335   : > { %v788_v52 = vmul.f32 %v8129_v32, %v787_v42  ;;  %v794_v44 = vmul.f32 %v8131_v50, %v687_v20  ;;  %v10036_v7 = vpop.eup %8132  ;;  %vm800_vm4 = vweird.f32 %v8131_v50 }
 0x336   : > { %8134 = vrsqrt.f32 %v10030_v37  ;;  %v814_v20 = vmul.f32 %v10036_v7, %v10023_v2  ;;  %vm801_vm6 = vmor %vm799_vm2, %vm800_vm4  ;;  %vm829_vm7 = vweird.f32 %v10030_v37  ;;  %vm820_vm10 = vweird.f32 %v10036_v7 }
 0x337   : > { %v792_v25 = vsel %vm791_vm15, %v8129_v32, %v788_v52  ;;  %v795_v14 = vmul.f32 %v8131_v50, %v794_v44  ;;  %vm10103_vm12 = vmor %vm819_vm9, %vm820_vm10  ;;  %vm4766_vm4 = vcmask 261120   ;;  %vm4851_vm9 = vcmask 916480  }
 0x338   : > { %v862_v39 = vmul.f32 %v792_v25, %v9738_v61  ;;  %v815_v9 = vmul.f32 %v10036_v7, %v814_v20 }
 0x339   : > { %v796_v3 = vmul.f32 0.5, %v795_v14  ;;  %v658_v43 = vpop.xlane.xlu2 %657  ;;  %v13093_v14 = vld [vmem:[#allocation14_spill] sm:$0xff] }
 0x33a   : > { %v881_v1 = vmul.f32 %v9772_v21, %v862_v39  ;;  %v675_v49 = vmul.f32 %v658_v43, %v9069_v13  ;;  %v864_v39 = vmul.f32 %v812_v36, %v13093_v14  ;;  %v816_v12 = vmul.f32 0.5, %v815_v9 }
 0x33b   : > { %v1361_v19 = vpop.f32.mrf.mxu0  ;;  %v797_v24 = vsub.f32 1.5, %v796_v3 }
 0x33c   : > { %v10041_v32 = vadd.f32 %v9834_v31, %v881_v1  ;;  %v10043_v61 = vpop.eup %8134  ;;  %v10061_v53 = vadd.f32 1e-05, %v675_v49  ;;  %v1600_v42 = vpack.c.bf16 %v1361_v19, %v1361_v19 }
 0x33d   : > { %v798_v23 = vmul.f32 %v8131_v50, %v797_v24  ;;  %v824_v10 = vmul.f32 %v10043_v61, %v10030_v37  ;;  %v817_v24 = vsub.f32 1.5, %v816_v12  ;;  %vm830_vm8 = vweird.f32 %v10043_v61 }
 0x33e   : > { %13089 = vst [vmem:[#allocation24_spill] sm:$0xff] %v10041_v32  ;;  %v1279_v56 = vpack.c.bf16 %v10041_v32, %v10047_v33  ;;  %8136 = vrsqrt.f32 %v10061_v53  ;;  %v1664_v62 = vunpack.c.l.b16 %v1600_v42  ;;  %vm10093_vm11 = vmor %vm829_vm7, %vm830_vm8  ;;  %vm839_vm15 = vweird.f32 %v10061_v53 }
 0x33f   : > { %v825_v17 = vmul.f32 %v10043_v61, %v824_v10  ;;  %v802_v51 = vsel %vm801_vm6, %v8131_v50, %v798_v23  ;;  %vm4800_vm6 = vcmask 523264   ;;  %vm4817_vm7 = vcmask 654336  }
 0x340   : > { %1375 = vmatmul.bf16.gmra.mxu0 %v1279_v56  ;;  %v863_v57 = vmul.f32 %v802_v51, %v9759_v16  ;;  %v883_v16 = vmul.f32 %v9772_v21, %v864_v39  ;;  %vm4834_vm8 = vcmask 785408  }
 0x341   : > { %v826_v48 = vmul.f32 0.5, %v825_v17  ;;  %v818_v17 = vmul.f32 %v10036_v7, %v817_v24  ;;  %v2070_v36 = vpop.permute.xlu2 %2069 }
 0x342   : > { %v660_v44 = vpop.xlane.xlu0 %659  ;;  %v882_v1 = vmul.f32 %v9772_v21, %v863_v57  ;;  %v10098_v56 = vadd.f32 %v9834_v31, %v883_v16  ;;  %v2116_v39 = vsel %vm1726_vm3, %v2070_v36, 0 }
 0x343   : > { %v1363_v52 = vpop.f32.mrf.mxu0  ;;  %v676_v50 = vmul.f32 %v660_v44, %v9069_v13  ;;  %v827_v6 = vsub.f32 1.5, %v826_v48 }
 0x344   : > { %v1601_v25 = vpack.c.bf16 %v1363_v52, %v1363_v52  ;;  %v10084_v26 = vpop.eup %8136  ;;  %v10088_v23 = vadd.f32 %v9834_v31, %v882_v1  ;;  %13097 = vst [vmem:[#allocation26_spill] sm:$0xff] %v10098_v56 }
 0x345   : > { %v10071_v43 = vadd.f32 1e-05, %v676_v50  ;;  %v828_v37 = vmul.f32 %v10043_v61, %v827_v6  ;;  %v834_v51 = vmul.f32 %v10084_v26, %v10061_v53  ;;  %v822_v50 = vsel %vm10103_vm12, %v10036_v7, %v818_v17 }
 0x346   : > { %v1665_v3 = vunpack.c.l.b16 %v1601_v25  ;;  %13094 = vst [vmem:[#allocation14_spill] sm:$0xff] %v10088_v23  ;;  %v1280_v42 = vpack.c.bf16 %v10098_v56, %v10088_v23  ;;  %vm840_vm0 = vweird.f32 %v10084_v26 }
 0x347   : > { %8138 = vrsqrt.f32 %v10071_v43  ;;  %v832_v57 = vsel %vm10093_vm11, %v10043_v61, %v828_v37  ;;  %v835_v48 = vmul.f32 %v10084_v26, %v834_v51  ;;  %vm849_vm13 = vweird.f32 %v10071_v43  ;;  %vm841_vm2 = vmor %vm839_vm15, %vm840_vm0 }
 0x348   : > { %v10074_v19 = vpack.c.b16 %v1665_v3, %v1664_v62  ;;  %v866_v12 = vmul.f32 %v832_v57, %v9792_v59  ;;  %v13100_v3 = vld [vmem:[#allocation17_spill] sm:$0xff] }
 0x349   : > { %v2072_v49 = vpop.permute.xlu1 %2071  ;;  %v865_v1 = vmul.f32 %v822_v50, %v13100_v3  ;;  %v836_v6 = vmul.f32 0.5, %v835_v48 }
 0x34a   : > { %2043 = vrot.lane.b32.xlu2 %v10074_v19, %s8913_s24  ;;  %7155 = vmatmul.msk.bf16.gmra.mxu3 %vm1726_vm3, %v10074_v19  ;;  %v2119_v20 = vsel %vm1726_vm3, %v2072_v49, 0  ;;  %v885_v49 = vmul.f32 %v9772_v21, %v866_v12 }
 0x34b   : > { %v1366_v8 = vpop.f32.mrf.mxu0  ;;  %2121 = vmatpush.bf16.xpose.msrb.mxu1 %v2119_v20  ;;  %v884_v7 = vmul.f32 %v9772_v21, %v865_v1  ;;  %v837_v10 = vsub.f32 1.5, %v836_v6 }
 0x34c   : > { %v1602_v25 = vpack.c.bf16 %v1366_v8, %v1366_v8  ;;  %v10135_v51 = vadd.f32 %v9834_v31, %v885_v49 }
 0x34d   : > { %v8139_v9 = vpop.eup %8138  ;;  %v10140_v2 = vadd.f32 %v9834_v31, %v884_v7 }
 0x34e   : > { %v844_v52 = vmul.f32 %v8139_v9, %v10071_v43  ;;  %v1666_v16 = vunpack.c.l.b16 %v1602_v25  ;;  %vm850_vm14 = vweird.f32 %v8139_v9  ;;  %13101 = vst [vmem:[#allocation17_spill] sm:$0xff] %v10135_v51 }
 0x34f   : > { %vm851_vm1 = vmor %vm849_vm13, %vm850_vm14  ;;  %13102 = vst [vmem:[#allocation27_spill] sm:$0xff] %v10140_v2  ;;  %v1281_v36 = vpack.c.bf16 %v10135_v51, %v10140_v2 }
 0x350   : > { %1380 = vmatmul.bf16.gmra.mxu0 %v1280_v42  ;;  %v845_v44 = vmul.f32 %v8139_v9, %v844_v52  ;;  %v838_v42 = vmul.f32 %v10084_v26, %v837_v10  ;;  %v2066_v52 = vpop.permute.xlu2 %2065 }
 0x351   : > { %v2110_v25 = vsel %vm1726_vm3, %v2066_v52, 0  ;;  %v2064_v3 = vpop.permute.xlu1 %2063 }
 0x352   : > { %2394 = vrot.lane.b32.xlu2 %v9826_v45, %s8914_s18  ;;  %v846_v62 = vmul.f32 0.5, %v845_v44  ;;  %v842_v53 = vsel %vm841_vm2, %v10084_v26, %v838_v42 }
 0x353   : > { %v1368_v14 = vpop.f32.mrf.mxu0  ;;  %2122 = vmatpush.bf16.xpose.msrb.mxu1 %v2116_v39  ;;  %v867_v39 = vmul.f32 %v842_v53, %v9816_v11 }
 0x354   : > { %v1603_v61 = vpack.c.bf16 %v1368_v14, %v1368_v14  ;;  %v847_v8 = vsub.f32 1.5, %v846_v62 }
 0x355   : > { %v2068_v37 = vpop.permute.xlu0 %2067 }
 0x356   : > { %v1667_v24 = vunpack.c.l.b16 %v1603_v61  ;;  %v2113_v17 = vsel %vm1726_vm3, %v2068_v37, 0  ;;  %v848_v43 = vmul.f32 %v8139_v9, %v847_v8 }
 0x358   : > { %v10123_v20 = vpack.c.b16 %v1667_v24, %v1666_v16  ;;  %v852_v57 = vsel %vm851_vm1, %v8139_v9, %v848_v43  ;;  %v886_v9 = vmul.f32 %v9772_v21, %v867_v39  ;;  %v2060_v24 = vpop.permute.xlu2 %2059 }
 0x359   : > { %v868_v50 = vmul.f32 %v852_v57, %v9875_v63  ;;  %v2107_v63 = vsel %vm1726_vm3, %v2064_v3, 0  ;;  %v2101_v49 = vsel %vm1726_vm3, %v2060_v24, 0 }
 0x35a   : > { %2392 = vrot.lane.b32.xlu2 %v9858_v58, %s8914_s18  ;;  %7156 = vmatmul.msk.bf16.gmra.mxu3 %vm1726_vm3, %v10123_v20  ;;  %v10162_v11 = vadd.f32 %v9834_v31, %v886_v9 }
 0x35b   : > { %2045 = vrot.lane.b32.xlu1 %v10123_v20, %s8913_s24  ;;  %v1371_v59 = vpop.f32.mrf.mxu0  ;;  %2123 = vmatpush.bf16.xpose.msrb.mxu1 %v2113_v17  ;;  %v887_v61 = vmul.f32 %v9772_v21, %v868_v50 }
 0x35c   : > { %v1604_v48 = vpack.c.bf16 %v1371_v59, %v1371_v59  ;;  %13104 = vst [vmem:[#allocation29_spill] sm:$0xff] %v10162_v11 }
 0x35d   : > { %v10159_v26 = vadd.f32 %v9834_v31, %v887_v61  ;;  %v2062_v16 = vpop.permute.xlu0 %2061  ;;  %v2058_v31 = vpop.permute.xlu1 %2057 }
 0x35e   : > { %v1668_v12 = vunpack.c.l.b16 %v1604_v48  ;;  %v2104_v21 = vsel %vm1726_vm3, %v2062_v16, 0  ;;  %v2098_v8 = vsel %vm1726_vm3, %v2058_v31, 0 }
 0x35f   : > { %13103 = vst [vmem:[#allocation28_spill] sm:$0xff] %v10159_v26  ;;  %v1282_v6 = vpack.c.bf16 %v10159_v26, %v10162_v11 }
 0x360   : > { %1385 = vmatmul.bf16.gmra.mxu0 %v1281_v36 }
 0x363   : > { %v1373_v44 = vpop.f32.mrf.mxu0  ;;  %2124 = vmatpush.bf16.xpose.msrb.mxu1 %v2110_v25 }
 0x364   : > { %v1605_v14 = vpack.c.bf16 %v1373_v44, %v1373_v44 }
 0x365   : > { %v2042_v37 = vpop.permute.xlu0 %2041 }
 0x366   : > { %v1669_v62 = vunpack.c.l.b16 %v1605_v14 }
 0x368   : > { %v10150_v1 = vpack.c.b16 %v1669_v62, %v1668_v12 }
 0x36a   : > { %7157 = vmatmul.msk.bf16.gmra.mxu3 %vm1726_vm3, %v10150_v1  ;;  %2047 = vrot.lane.b32.xlu0 %v10150_v1, %s8913_s24 }
 0x36b   : > { %2125 = vmatpush.bf16.xpose.msrb.mxu1 %v2107_v63 }
 0x370   : > { %1390 = vmatmul.bf16.gmra.mxu0 %v1282_v6 }
 0x372   : > { %2717 = vrot.lane.b32.xlu0 %v9826_v45, %s8915_s29 }
 0x373   : > { %2126 = vmatpush.bf16.xpose.msrb.mxu1 %v2104_v21 }
 0x37a   : > { %2390 = vrot.lane.b32.xlu0 %v9902_v28, %s8914_s18 }
 0x37b   : > { %2127 = vmatpush.bf16.xpose.msrb.mxu1 %v2101_v49 }
 0x382   : > { %2388 = vrot.lane.b32.xlu0 %v9936_v27, %s8914_s18 }
 0x383   : > { %2128 = vmatpush.bf16.xpose.msrb.mxu1 %v2098_v8 }
 0x38a   : > { %7162 = vmatmul.msk.bf16.vlgmr.msrb.gmra.mxu1 %vm1726_vm3, %v2042_v37  ;;  %v1784_v7 = vpop.f32.mrf.mxu3 }
 0x38b   : > { %v1824_v10 = vmul.f32 0.25, %v1784_v7 }
 0x38d   : > { %v1840_v59 = vsub.f32 0.0, %v1824_v10 }
 0x38f   : > { %v1856_v17 = vmul.f32 1.442695, %v1840_v59 }
 0x391   : > { %8140 = vpow2.f32 %v1856_v17 }
 0x392   : > { %v1786_v43 = vpop.f32.mrf.mxu3 }
 0x393   : > { %v1825_v42 = vmul.f32 0.25, %v1786_v43 }
 0x395   : > { %v1841_v36 = vsub.f32 0.0, %v1825_v42 }
 0x397   : > { %v8141_v52 = vpop.eup %8140  ;;  %v1858_v57 = vmul.f32 1.442695, %v1841_v36 }
 0x398   : > { %v1888_v48 = vadd.f32 1.0, %v8141_v52 }
 0x399   : > { %8142 = vpow2.f32 %v1858_v57 }
 0x39a   : > { %8144 = vrcp.f32 %v1888_v48 }
 0x39f   : > { %v8143_v53 = vpop.eup %8142 }
 0x3a0   : > { %v8145_v44 = vpop.eup %8144  ;;  %v1889_v25 = vadd.f32 1.0, %v8143_v53 }
 0x3a1   : > { %1920 = vst [vmem:[%s10180_s16] sm:$0xff] %v8145_v44 }
 0x3a2   : > { %8146 = vrcp.f32 %v1889_v25 }
 0x3a4   : > { %v2044_v50 = vpop.permute.xlu2 %2043 }
 0x3a5   : > { %7163 = vmatmul.msk.bf16.gmra.mxu1 %vm1726_vm3, %v2044_v50 }
 0x3a8   : > { %v8147_v14 = vpop.eup %8146 }
 0x3a9   : > { %1921 = vst [vmem:[%s10180_s16 + $0x8] sm:$0xff] %v8147_v14  ;;  %v1936_v39 = vpack.c.bf16 %v8147_v14, %v8145_v44 }
 0x3ab   : > { %2000 = vmatmul.bf16.vlgmr.msrb.gmra.mxu0 %v1936_v39 }
 0x3ac   : > { %v2395_v12 = vpop.permute.xlu2 %2394 }
 0x3ad   : > { %v2442_v62 = vsel %vm1726_vm3, %v2395_v12, 0 }
 0x3ae   : > { %2444 = vmatpush.bf16.xpose.msrb.mxu3 %v2442_v62 }
 0x3b4   : > { %v2393_v61 = vpop.permute.xlu2 %2392 }
 0x3b5   : > { %v2439_v3 = vsel %vm1726_vm3, %v2393_v61, 0 }
 0x3b6   : > { %2445 = vmatpush.bf16.xpose.msrb.mxu3 %v2439_v3 }
 0x3bd   : > { %v1376_v9 = vpop.f32.mrf.mxu0 }
 0x3be   : > { %v1606_v63 = vpack.c.bf16 %v1376_v9, %v1376_v9 }
 0x3c0   : > { %v1670_v21 = vunpack.c.l.b16 %v1606_v63 }
 0x3c5   : > { %v1378_v6 = vpop.f32.mrf.mxu0 }
 0x3c6   : > { %v1607_v16 = vpack.c.bf16 %v1378_v6, %v1378_v6 }
 0x3c8   : > { %v1671_v24 = vunpack.c.l.b16 %v1607_v16 }
 0x3ca   : > { %v10187_v49 = vpack.c.b16 %v1671_v24, %v1670_v21 }
 0x3cc   : > { %2049 = vrot.lane.b32.xlu1 %v10187_v49, %s8913_s24  ;;  %7158 = vmatmul.msk.bf16.gmra.mxu3 %vm1726_vm3, %v10187_v49 }
 0x3cd   : > { %v2046_v31 = vpop.permute.xlu1 %2045  ;;  %v1789_v8 = vpop.f32.mrf.mxu3 }
 0x3ce   : > { %v1381_v37 = vpop.f32.mrf.mxu0  ;;  %v1826_v7 = vmul.f32 0.25, %v1789_v8  ;;  %7164 = vmatmul.msk.bf16.gmra.mxu1 %vm1726_vm3, %v2046_v31 }
 0x3cf   : > { %v1608_v17 = vpack.c.bf16 %v1381_v37, %v1381_v37 }
 0x3d0   : > { %v1842_v10 = vsub.f32 0.0, %v1826_v7 }
 0x3d1   : > { %v1672_v48 = vunpack.c.l.b16 %v1608_v17 }
 0x3d2   : > { %v1860_v59 = vmul.f32 1.442695, %v1842_v10 }
 0x3d4   : > { %8148 = vpow2.f32 %v1860_v59  ;;  %2715 = vrot.lane.b32.xlu1 %v9858_v58, %s8915_s29 }
 0x3d5   : > { %v1791_v43 = vpop.f32.mrf.mxu3 }
 0x3d6   : > { %v1383_v42 = vpop.f32.mrf.mxu0  ;;  %v1827_v36 = vmul.f32 0.25, %v1791_v43 }
 0x3d7   : > { %v1609_v52 = vpack.c.bf16 %v1383_v42, %v1383_v42 }
 0x3d8   : > { %v1843_v57 = vsub.f32 0.0, %v1827_v36 }
 0x3d9   : > { %v1673_v53 = vunpack.c.l.b16 %v1609_v52 }
 0x3da   : > { %v8149_v44 = vpop.eup %8148  ;;  %v1862_v25 = vmul.f32 1.442695, %v1843_v57 }
 0x3db   : > { %v1890_v50 = vadd.f32 1.0, %v8149_v44  ;;  %v10196_v14 = vpack.c.b16 %v1673_v53, %v1672_v48 }
 0x3dc   : > { %8150 = vpow2.f32 %v1862_v25  ;;  %v2048_v39 = vpop.permute.xlu0 %2047  ;;  %2713 = vrot.lane.b32.xlu1 %v9902_v28, %s8915_s29 }
 0x3dd   : > { %8152 = vrcp.f32 %v1890_v50  ;;  %2051 = vrot.lane.b32.xlu2 %v10196_v14, %s8913_s24  ;;  %v1794_v12 = vpop.f32.mrf.mxu3  ;;  %7159 = vmatmul.msk.bf16.gmra.mxu3 %vm1726_vm3, %v10196_v14 }
 0x3de   : > { %v1386_v62 = vpop.f32.mrf.mxu0  ;;  %v1828_v61 = vmul.f32 0.25, %v1794_v12  ;;  %7165 = vmatmul.msk.bf16.gmra.mxu1 %vm1726_vm3, %v2048_v39 }
 0x3df   : > { %v1610_v24 = vpack.c.bf16 %v1386_v62, %v1386_v62 }
 0x3e0   : > { %v1844_v3 = vsub.f32 0.0, %v1828_v61 }
 0x3e1   : > { %v1674_v17 = vunpack.c.l.b16 %v1610_v24 }
 0x3e2   : > { %v8151_v9 = vpop.eup %8150  ;;  %v1864_v63 = vmul.f32 1.442695, %v1844_v3 }
 0x3e3   : > { %v8153_v6 = vpop.eup %8152  ;;  %v1891_v16 = vadd.f32 1.0, %v8151_v9 }
 0x3e4   : > { %1922 = vst [vmem:[%s10180_s16 + $0x10] sm:$0xff] %v8153_v6  ;;  %8154 = vpow2.f32 %v1864_v63  ;;  %v2718_v21 = vpop.permute.xlu0 %2717  ;;  %2386 = vrot.lane.b32.xlu1 %v9946_v22, %s8914_s18 }
 0x3e5   : > { %8156 = vrcp.f32 %v1891_v16  ;;  %2711 = vrot.lane.b32.xlu2 %v9936_v27, %s8915_s29  ;;  %v2765_v31 = vsel %vm1726_vm3, %v2718_v21, 0  ;;  %v1796_v8 = vpop.f32.mrf.mxu3 }
 0x3e6   : > { %v1388_v37 = vpop.f32.mrf.mxu0  ;;  %v1829_v7 = vmul.f32 0.25, %v1796_v8  ;;  %2767 = vmatpush.bf16.xpose.msra.mxu1 %v2765_v31 }
 0x3e7   : > { %v1611_v10 = vpack.c.bf16 %v1388_v37, %v1388_v37 }
 0x3e8   : > { %v1845_v59 = vsub.f32 0.0, %v1829_v7 }
 0x3e9   : > { %v1675_v43 = vunpack.c.l.b16 %v1611_v10 }
 0x3ea   : > { %v8155_v42 = vpop.eup %8154  ;;  %v1866_v36 = vmul.f32 1.442695, %v1845_v59 }
 0x3eb   : > { %v8157_v52 = vpop.eup %8156  ;;  %v1892_v57 = vadd.f32 1.0, %v8155_v42  ;;  %v10211_v48 = vpack.c.b16 %v1675_v43, %v1674_v17 }
 0x3ec   : > { %1923 = vst [vmem:[%s10180_s16 + $0x18] sm:$0xff] %v8157_v52  ;;  %8158 = vpow2.f32 %v1866_v36  ;;  %v2391_v53 = vpop.permute.xlu0 %2390  ;;  %v1937_v44 = vpack.c.bf16 %v8157_v52, %v8153_v6  ;;  %2384 = vrot.lane.b32.xlu1 %v9989_v54, %s8914_s18 }
 0x3ed   : > { %8160 = vrcp.f32 %v1892_v57  ;;  %2709 = vrot.lane.b32.xlu2 %v9946_v22, %s8915_s29  ;;  %v1799_v25 = vpop.f32.mrf.mxu3  ;;  %v2436_v50 = vsel %vm1726_vm3, %v2391_v53, 0  ;;  %2053 = vrot.lane.b32.xlu0 %v10211_v48, %s8913_s24 }
 0x3ee   : > { %7160 = vmatmul.msk.bf16.gmra.mxu3 %vm1726_vm3, %v10211_v48  ;;  %v1391_v39 = vpop.f32.mrf.mxu0  ;;  %v1830_v12 = vmul.f32 0.25, %v1799_v25  ;;  %2005 = vmatmul.bf16.gmra.mxu0 %v1937_v44 }
 0x3ef   : > { %2446 = vmatpush.bf16.xpose.msrb.mxu3 %v2436_v50  ;;  %v1612_v16 = vpack.c.bf16 %v1391_v39, %v1391_v39 }
 0x3f0   : > { %v1846_v62 = vsub.f32 0.0, %v1830_v12 }
 0x3f1   : > { %v1676_v10 = vunpack.c.l.b16 %v1612_v16 }
 0x3f2   : > { %v8159_v61 = vpop.eup %8158  ;;  %v1868_v3 = vmul.f32 1.442695, %v1846_v62 }
 0x3f3   : > { %v8161_v9 = vpop.eup %8160  ;;  %v1893_v63 = vadd.f32 1.0, %v8159_v61 }
 0x3f4   : > { %1924 = vst [vmem:[%s10180_s16 + $0x20] sm:$0xff] %v8161_v9  ;;  %8162 = vpow2.f32 %v1868_v3  ;;  %v2389_v6 = vpop.permute.xlu0 %2388 }
 0x3f5   : > { %8164 = vrcp.f32 %v1893_v63  ;;  %2382 = vrot.lane.b32.xlu2 %v9992_v40, %s8914_s18  ;;  %v1801_v21 = vpop.f32.mrf.mxu3  ;;  %v2433_v24 = vsel %vm1726_vm3, %v2389_v6, 0  ;;  %2707 = vrot.lane.b32.xlu0 %v9989_v54, %s8915_s29 }
 0x3f6   : > { %v1393_v31 = vpop.f32.mrf.mxu0  ;;  %v1831_v8 = vmul.f32 0.25, %v1801_v21 }
 0x3f7   : > { %v1613_v37 = vpack.c.bf16 %v1393_v31, %v1393_v31  ;;  %2447 = vmatpush.bf16.xpose.msrb.mxu3 %v2433_v24 }
 0x3f8   : > { %v1847_v7 = vsub.f32 0.0, %v1831_v8 }
 0x3f9   : > { %v1677_v59 = vunpack.c.l.b16 %v1613_v37 }
 0x3fa   : > { %v8163_v17 = vpop.eup %8162  ;;  %v1870_v43 = vmul.f32 1.442695, %v1847_v7 }
 0x3fb   : > { %v8165_v42 = vpop.eup %8164  ;;  %v1894_v36 = vadd.f32 1.0, %v8163_v17  ;;  %v10229_v52 = vpack.c.b16 %v1677_v59, %v1676_v10 }
 0x3fc   : > { %1925 = vst [vmem:[%s10180_s16 + $0x28] sm:$0xff] %v8165_v42  ;;  %8166 = vpow2.f32 %v1870_v43  ;;  %v1938_v57 = vpack.c.bf16 %v8165_v42, %v8161_v9 }
 0x3fd   : > { %8168 = vrcp.f32 %v1894_v36  ;;  %2380 = vrot.lane.b32.xlu2 %v9976_v41, %s8914_s18  ;;  %2055 = vrot.lane.b32.xlu1 %v10229_v52, %s8913_s24 }
 0x3fe   : > { %2705 = vrot.lane.b32.xlu0 %v9992_v40, %s8915_s29  ;;  %7161 = vmatmul.msk.bf16.gmra.mxu3 %vm1726_vm3, %v10229_v52 }
 0x3ff   : > { %2010 = vmatmul.bf16.gmra.mxu0 %v1938_v57 }
 0x402   : > { %v8167_v53 = vpop.eup %8166 }
 0x403   : > { %v8169_v44 = vpop.eup %8168  ;;  %v1895_v25 = vadd.f32 1.0, %v8167_v53 }
 0x404   : > { %1926 = vst [vmem:[%s10180_s16 + $0x30] sm:$0xff] %v8169_v44 }
 0x405   : > { %8170 = vrcp.f32 %v1895_v25  ;;  %2364 = vrot.lane.b32.xlu2 %v10000_v38, %s8914_s18  ;;  %2703 = vrot.lane.b32.xlu1 %v9976_v41, %s8915_s29 }
 0x406   : > { %2305 = vrot.lane.b32.xlu0 %v9872_v34, %s8913_s24 }
 0x407   : > { %v2130_v50 = vpop.f32.mrf.mxu1 }
 0x408   : > { %v2170_v39 = vmul.f32 0.25, %v2130_v50 }
 0x40a   : > { %v2186_v62 = vsub.f32 0.0, %v2170_v39 }
 0x40b   : > { %v8171_v12 = vpop.eup %8170 }
 0x40c   : > { %1927 = vst [vmem:[%s10180_s16 + $0x38] sm:$0xff] %v8171_v12  ;;  %v1939_v61 = vpack.c.bf16 %v8171_v12, %v8169_v44  ;;  %v2202_v3 = vmul.f32 1.442695, %v2186_v62 }
 0x40d   : > { %2301 = vrot.lane.b32.xlu2 %v9907_v18, %s8913_s24  ;;  %2687 = vrot.lane.b32.xlu1 %v10000_v38, %s8915_s29 }
 0x40e   : > { %2303 = vrot.lane.b32.xlu0 %v9894_v60, %s8913_s24  ;;  %8172 = vpow2.f32 %v2202_v3 }
 0x40f   : > { %2015 = vmatmul.bf16.gmra.mxu0 %v1939_v61  ;;  %v2132_v9 = vpop.f32.mrf.mxu1 }
 0x410   : > { %v2171_v63 = vmul.f32 0.25, %v2132_v9 }
 0x412   : > { %v2187_v6 = vsub.f32 0.0, %v2171_v63 }
 0x414   : > { %v8173_v16 = vpop.eup %8172  ;;  %v2204_v21 = vmul.f32 1.442695, %v2187_v6 }
 0x415   : > { %2366 = vrot.lane.b32.xlu2 %v10074_v19, %s8914_s18  ;;  %2299 = vrot.lane.b32.xlu1 %v9928_v5, %s8913_s24  ;;  %v2234_v24 = vadd.f32 1.0, %v8173_v16 }
 0x416   : > { %2297 = vrot.lane.b32.xlu0 %v9942_v15, %s8913_s24  ;;  %8174 = vpow2.f32 %v2204_v21 }
 0x417   : > { %8176 = vrcp.f32 %v2234_v24 }
 0x41c   : > { %v8175_v31 = vpop.eup %8174 }
 0x41d   : > { %2293 = vrot.lane.b32.xlu2 %v9970_v35, %s8913_s24  ;;  %2689 = vrot.lane.b32.xlu1 %v10074_v19, %s8915_s29  ;;  %v10264_v8 = vpop.eup %8176  ;;  %v2235_v37 = vadd.f32 1.0, %v8175_v31 }
 0x41e   : > { %2295 = vrot.lane.b32.xlu0 %v9961_v46, %s8913_s24  ;;  %7170 = vst [vmem:[%s10180_s16 + $0x80] sm:$0xff] %v10264_v8 }
 0x41f   : > { %8178 = vrcp.f32 %v2235_v37 }
 0x422   : > { %v2135_v7 = vpop.f32.mrf.mxu1 }
 0x423   : > { %v2172_v10 = vmul.f32 0.25, %v2135_v7 }
 0x425   : > { %v2188_v59 = vsub.f32 0.0, %v2172_v10  ;;  %2691 = vrot.lane.b32.xlu2 %v10123_v20, %s8915_s29  ;;  %2291 = vrot.lane.b32.xlu1 %v9987_v0, %s8913_s24  ;;  %v10274_v17 = vpop.eup %8178 }
 0x426   : > { %2368 = vrot.lane.b32.xlu0 %v10123_v20, %s8914_s18  ;;  %7171 = vst [vmem:[%s10180_s16 + $0x88] sm:$0xff] %v10274_v17  ;;  %v2283_v42 = vpack.c.bf16 %v10274_v17, %v10264_v8 }
 0x427   : > { %v2206_v43 = vmul.f32 1.442695, %v2188_v59 }
 0x429   : > { %8180 = vpow2.f32 %v2206_v43 }
 0x42a   : > { %v2137_v36 = vpop.f32.mrf.mxu1 }
 0x42b   : > { %v2173_v57 = vmul.f32 0.25, %v2137_v36 }
 0x42d   : > { %v2189_v53 = vsub.f32 0.0, %v2173_v57  ;;  %2372 = vrot.lane.b32.xlu2 %v10187_v49, %s8914_s18  ;;  %2370 = vrot.lane.b32.xlu1 %v10150_v1, %s8914_s18 }
 0x42e   : > { %2693 = vrot.lane.b32.xlu0 %v10150_v1, %s8915_s29 }
 0x42f   : > { %v8181_v44 = vpop.eup %8180  ;;  %v2208_v25 = vmul.f32 1.442695, %v2189_v53 }
 0x430   : > { %v2236_v50 = vadd.f32 1.0, %v8181_v44 }
 0x431   : > { %8182 = vpow2.f32 %v2208_v25 }
 0x432   : > { %8184 = vrcp.f32 %v2236_v50 }
 0x435   : > { %3363 = vrot.lane.b32.xlu2 %v9826_v45, %s8916_s23  ;;  %3040 = vrot.lane.b32.xlu1 %v9826_v45, %s13018_s0 }
 0x436   : > { %2695 = vrot.lane.b32.xlu0 %v10187_v49, %s8915_s29 }
 0x437   : > { %v8183_v39 = vpop.eup %8182  ;;  %v2052_v12 = vpop.permute.xlu2 %2051 }
 0x438   : > { %v10294_v62 = vpop.eup %8184  ;;  %v2237_v61 = vadd.f32 1.0, %v8183_v39 }
 0x439   : > { %7172 = vst [vmem:[%s10180_s16 + $0x90] sm:$0xff] %v10294_v62 }
 0x43a   : > { %8186 = vrcp.f32 %v2237_v61 }
 0x43d   : > { %2374 = vrot.lane.b32.xlu2 %v10196_v14, %s8914_s18  ;;  %3038 = vrot.lane.b32.xlu1 %v9858_v58, %s13018_s0 }
 0x43e   : > { %3361 = vrot.lane.b32.xlu0 %v9858_v58, %s8916_s23  ;;  %v2050_v3 = vpop.permute.xlu1 %2049 }
 0x43f   : > { %v2712_v9 = vpop.permute.xlu2 %2711  ;;  %7166 = vmatmul.msk.bf16.gmra.mxu1 %vm1726_vm3, %v2050_v3 }
 0x440   : > { %v10304_v63 = vpop.eup %8186 }
 0x441   : > { %7173 = vst [vmem:[%s10180_s16 + $0x98] sm:$0xff] %v10304_v63  ;;  %v2284_v6 = vpack.c.bf16 %v10304_v63, %v10294_v62 }
 0x445   : > { %3359 = vrot.lane.b32.xlu2 %v9902_v28, %s8916_s23  ;;  %3036 = vrot.lane.b32.xlu1 %v9902_v28, %s13018_s0 }
 0x446   : > { %2697 = vrot.lane.b32.xlu0 %v10196_v14, %s8915_s29  ;;  %v2716_v16 = vpop.permute.xlu1 %2715 }
 0x447   : > { %v10317_v21 = vpop.permute.xlu2 %2709  ;;  %v2762_v24 = vsel %vm1726_vm3, %v2716_v16, 0 }
 0x448   : > { %2768 = vmatpush.bf16.xpose.msra.mxu1 %v2762_v24 }
 0x44b   : > { %v2140_v31 = vpop.f32.mrf.mxu1 }
 0x44c   : > { %v2174_v37 = vmul.f32 0.25, %v2140_v31 }
 0x44d   : > { %2376 = vrot.lane.b32.xlu2 %v10211_v48, %s8914_s18  ;;  %3034 = vrot.lane.b32.xlu1 %v9936_v27, %s13018_s0 }
 0x44e   : > { %v2190_v7 = vsub.f32 0.0, %v2174_v37  ;;  %3357 = vrot.lane.b32.xlu0 %v9936_v27, %s8916_s23  ;;  %v2714_v10 = vpop.permute.xlu1 %2713 }
 0x44f   : > { %v10326_v59 = vpop.permute.xlu2 %2382  ;;  %v1804_v36 = vpop.f32.mrf.mxu3  ;;  %7167 = vmatmul.msk.bf16.gmra.mxu1 %vm1726_vm3, %v2052_v12  ;;  %v2759_v57 = vsel %vm1726_vm3, %v2714_v10, 0 }
 0x450   : > { %v2210_v43 = vmul.f32 1.442695, %v2190_v7  ;;  %v1832_v53 = vmul.f32 0.25, %v1804_v36  ;;  %2769 = vmatpush.bf16.xpose.msra.mxu1 %v2759_v57  ;;  %v2756_v7 = vsel %vm1726_vm3, %v2712_v9, 0 }
 0x452   : > { %8188 = vpow2.f32 %v2210_v43  ;;  %v1848_v44 = vsub.f32 0.0, %v1832_v53 }
 0x453   : > { %v2142_v25 = vpop.f32.mrf.mxu1 }
 0x454   : > { %v2175_v50 = vmul.f32 0.25, %v2142_v25  ;;  %v1872_v39 = vmul.f32 1.442695, %v1848_v44 }
 0x455   : > { %3355 = vrot.lane.b32.xlu2 %v9946_v22, %s8916_s23  ;;  %3032 = vrot.lane.b32.xlu1 %v9946_v22, %s13018_s0 }
 0x456   : > { %v2191_v61 = vsub.f32 0.0, %v2175_v50  ;;  %2699 = vrot.lane.b32.xlu0 %v10211_v48, %s8915_s29  ;;  %8190 = vpow2.f32 %v1872_v39  ;;  %v2387_v12 = vpop.permute.xlu1 %2386 }
 0x457   : > { %v10336_v3 = vpop.permute.xlu2 %2380  ;;  %v1806_v31 = vpop.f32.mrf.mxu3  ;;  %v2430_v37 = vsel %vm1726_vm3, %v2387_v12, 0 }
 0x458   : > { %v8189_v16 = vpop.eup %8188  ;;  %v2212_v24 = vmul.f32 1.442695, %v2191_v61  ;;  %v1833_v43 = vmul.f32 0.25, %v1806_v31  ;;  %2448 = vmatpush.bf16.xpose.msrb.mxu3 %v2430_v37  ;;  %2770 = vmatpush.bf16.xpose.msra.mxu1 %v2756_v7 }
 0x459   : > { %v2238_v10 = vadd.f32 1.0, %v8189_v16 }
 0x45a   : > { %8192 = vpow2.f32 %v2212_v24  ;;  %v1849_v36 = vsub.f32 0.0, %v1833_v43  ;;  %v2753_v43 = vsel %vm1726_vm3, %v10317_v21, 0 }
 0x45b   : > { %8194 = vrcp.f32 %v2238_v10  ;;  %v2145_v57 = vpop.f32.mrf.mxu1 }
 0x45c   : > { %v2176_v53 = vmul.f32 0.25, %v2145_v57  ;;  %v8191_v44 = vpop.eup %8190  ;;  %v1874_v25 = vmul.f32 1.442695, %v1849_v36 }
 0x45d   : > { %2378 = vrot.lane.b32.xlu2 %v10229_v52, %s8914_s18  ;;  %3030 = vrot.lane.b32.xlu1 %v9989_v54, %s13018_s0  ;;  %v1896_v50 = vadd.f32 1.0, %v8191_v44 }
 0x45e   : > { %v2192_v39 = vsub.f32 0.0, %v2176_v53  ;;  %3353 = vrot.lane.b32.xlu0 %v9989_v54, %s8916_s23  ;;  %8196 = vpow2.f32 %v1874_v25  ;;  %v2385_v9 = vpop.permute.xlu1 %2384 }
 0x45f   : > { %v10346_v61 = vpop.permute.xlu2 %2364  ;;  %8198 = vrcp.f32 %v1896_v50  ;;  %v2054_v24 = vpop.permute.xlu0 %2053  ;;  %v2427_v31 = vsel %vm1726_vm3, %v2385_v9, 0 }
 0x460   : > { %v8193_v12 = vpop.eup %8192  ;;  %v2214_v16 = vmul.f32 1.442695, %v2192_v39  ;;  %v1809_v10 = vpop.f32.mrf.mxu3  ;;  %7168 = vmatmul.msk.bf16.gmra.mxu1 %vm1726_vm3, %v2054_v24  ;;  %2449 = vmatpush.bf16.xpose.msrb.mxu3 %v2427_v31 }
 0x461   : > { %v10349_v37 = vpop.eup %8194  ;;  %v2239_v7 = vadd.f32 1.0, %v8193_v12  ;;  %v1834_v36 = vmul.f32 0.25, %v1809_v10  ;;  %2771 = vmatpush.bf16.xpose.msra.mxu1 %v2753_v43 }
 0x462   : > { %7174 = vst [vmem:[%s10180_s16 + $0xa0] sm:$0xff] %v10349_v37  ;;  %8200 = vpow2.f32 %v2214_v16 }
 0x463   : > { %8202 = vrcp.f32 %v2239_v7  ;;  %v2147_v57 = vpop.f32.mrf.mxu1  ;;  %v1850_v53 = vsub.f32 0.0, %v1834_v36  ;;  %v2424_v7 = vsel %vm1726_vm3, %v10326_v59, 0 }
 0x464   : > { %v2177_v44 = vmul.f32 0.25, %v2147_v57  ;;  %v8197_v25 = vpop.eup %8196 }
 0x465   : > { %3351 = vrot.lane.b32.xlu2 %v9992_v40, %s8916_s23  ;;  %3028 = vrot.lane.b32.xlu1 %v9992_v40, %s13018_s0  ;;  %v8199_v50 = vpop.eup %8198  ;;  %v1897_v39 = vadd.f32 1.0, %v8197_v25  ;;  %v1876_v21 = vmul.f32 1.442695, %v1850_v53 }
 0x466   : > { %v2193_v9 = vsub.f32 0.0, %v2177_v44  ;;  %2701 = vrot.lane.b32.xlu0 %v10229_v52, %s8915_s29  ;;  %1928 = vst [vmem:[%s10180_s16 + $0x40] sm:$0xff] %v8199_v50 }
 0x467   : > { %v10363_v12 = vpop.permute.xlu2 %2301  ;;  %8204 = vrcp.f32 %v1897_v39  ;;  %v2708_v31 = vpop.permute.xlu0 %2707 }
 0x468   : > { %v8201_v16 = vpop.eup %8200  ;;  %v2216_v24 = vmul.f32 1.442695, %v2193_v9  ;;  %8206 = vpow2.f32 %v1876_v21  ;;  %v1811_v36 = vpop.f32.mrf.mxu3  ;;  %2450 = vmatpush.bf16.xpose.msrb.mxu3 %v2424_v7  ;;  %v2750_v57 = vsel %vm1726_vm3, %v2708_v31, 0 }
 0x469   : > { %v10367_v10 = vpop.eup %8202  ;;  %v2240_v43 = vadd.f32 1.0, %v8201_v16  ;;  %v1835_v53 = vmul.f32 0.25, %v1811_v36  ;;  %2772 = vmatpush.bf16.xpose.msra.mxu1 %v2750_v57 }
 0x46a   : > { %7175 = vst [vmem:[%s10180_s16 + $0xa8] sm:$0xff] %v10367_v10  ;;  %8208 = vpow2.f32 %v2216_v24 }
 0x46b   : > { %8210 = vrcp.f32 %v2240_v43  ;;  %v1851_v25 = vsub.f32 0.0, %v1835_v53 }
 0x46d   : > { %2949 = vrot.lane.b32.xlu2 %v9894_v60, %s8915_s29  ;;  %3026 = vrot.lane.b32.xlu1 %v9976_v41, %s13018_s0  ;;  %v8205_v59 = vpop.eup %8204  ;;  %v1878_v39 = vmul.f32 1.442695, %v1851_v25  ;;  %v2421_v25 = vsel %vm1726_vm3, %v10336_v3, 0 }
 0x46e   : > { %3349 = vrot.lane.b32.xlu0 %v9976_v41, %s8916_s23  ;;  %v8207_v21 = vpop.eup %8206  ;;  %1929 = vst [vmem:[%s10180_s16 + $0x48] sm:$0xff] %v8205_v59  ;;  %v1940_v24 = vpack.c.bf16 %v8205_v59, %v8199_v50 }
 0x46f   : > { %v10381_v9 = vpop.permute.xlu2 %2366  ;;  %v2056_v16 = vpop.permute.xlu1 %2055  ;;  %v1898_v7 = vadd.f32 1.0, %v8207_v21  ;;  %8212 = vpow2.f32 %v1878_v39 }
 0x470   : > { %v8209_v31 = vpop.eup %8208  ;;  %v2706_v43 = vpop.permute.xlu0 %2705  ;;  %7169 = vmatmul.msk.bf16.gmra.mxu1 %vm1726_vm3, %v2056_v16  ;;  %2020 = vmatmul.bf16.gmra.mxu0 %v1940_v24 }
 0x471   : > { %v10383_v36 = vpop.eup %8210  ;;  %v2241_v57 = vadd.f32 1.0, %v8209_v31  ;;  %v1814_v53 = vpop.f32.mrf.mxu3  ;;  %v2747_v44 = vsel %vm1726_vm3, %v2706_v43, 0  ;;  %8214 = vrcp.f32 %v1898_v7  ;;  %2451 = vmatpush.bf16.xpose.msrb.mxu3 %v2421_v25 }
 0x472   : > { %7176 = vst [vmem:[%s10180_s16 + $0xb0] sm:$0xff] %v10383_v36  ;;  %v1836_v50 = vmul.f32 0.25, %v1814_v53  ;;  %2773 = vmatpush.bf16.xpose.msra.mxu1 %v2747_v44 }
 0x473   : > { %8216 = vrcp.f32 %v2241_v57 }
 0x474   : > { %v1852_v59 = vsub.f32 0.0, %v1836_v50 }
 0x475   : > { %2626 = vrot.lane.b32.xlu2 %v9894_v60, %s8914_s18  ;;  %3010 = vrot.lane.b32.xlu1 %v10000_v38, %s13018_s0  ;;  %v8213_v39 = vpop.eup %8212 }
 0x476   : > { %v1880_v3 = vmul.f32 1.442695, %v1852_v59  ;;  %3333 = vrot.lane.b32.xlu0 %v10000_v38, %s8916_s23  ;;  %v1899_v21 = vadd.f32 1.0, %v8213_v39 }
 0x477   : > { %v10397_v16 = vpop.permute.xlu2 %2293  ;;  %v2704_v24 = vpop.permute.xlu1 %2703 }
 0x478   : > { %v8215_v44 = vpop.eup %8214  ;;  %8218 = vpow2.f32 %v1880_v3  ;;  %v2306_v31 = vpop.permute.xlu0 %2305  ;;  %v2744_v7 = vsel %vm1726_vm3, %v2704_v24, 0  ;;  %7186 = vmatmul.msk.bf16.vlgmr.msrb.gmra.mxu3 %vm1726_vm3, %v10346_v61 }
 0x479   : > { %v10400_v43 = vpop.eup %8216  ;;  %1930 = vst [vmem:[%s10180_s16 + $0x50] sm:$0xff] %v8215_v44  ;;  %8220 = vrcp.f32 %v1899_v21  ;;  %v1816_v57 = vpop.f32.mrf.mxu3  ;;  %2315 = vmatpush.bf16.msrb.mxu2 %v2306_v31 }
 0x47a   : > { %7177 = vst [vmem:[%s10180_s16 + $0xb8] sm:$0xff] %v10400_v43  ;;  %v1837_v53 = vmul.f32 0.25, %v1816_v57  ;;  %2774 = vmatpush.bf16.xpose.msra.mxu1 %v2744_v7 }
 0x47c   : > { %v1853_v50 = vsub.f32 0.0, %v1837_v53 }
 0x47d   : > { %2951 = vrot.lane.b32.xlu2 %v9872_v34, %s8915_s29  ;;  %2945 = vrot.lane.b32.xlu1 %v9928_v5, %s8915_s29 }
 0x47e   : > { %v8219_v59 = vpop.eup %8218  ;;  %v1882_v39 = vmul.f32 1.442695, %v1853_v50  ;;  %2947 = vrot.lane.b32.xlu0 %v9907_v18, %s8915_s29 }
 0x47f   : > { %v8221_v61 = vpop.eup %8220  ;;  %v1900_v3 = vadd.f32 1.0, %v8219_v59  ;;  %v10415_v21 = vpop.permute.xlu2 %2691 }
 0x480   : > { %v2688_v24 = vpop.permute.xlu1 %2687  ;;  %1931 = vst [vmem:[%s10180_s16 + $0x58] sm:$0xff] %v8221_v61  ;;  %8222 = vpow2.f32 %v1882_v39  ;;  %v2304_v31 = vpop.permute.xlu0 %2303  ;;  %v1941_v7 = vpack.c.bf16 %v8221_v61, %v8215_v44 }
 0x481   : > { %8224 = vrcp.f32 %v1900_v3  ;;  %v1819_v57 = vpop.f32.mrf.mxu3  ;;  %2316 = vmatpush.bf16.msrb.mxu2 %v2304_v31  ;;  %7210 = vmatmul.msk.bf16.vlgmr.msra.gmra.mxu1 %vm1726_vm3, %v2688_v24 }
 0x482   : > { %v1838_v53 = vmul.f32 0.25, %v1819_v57  ;;  %2025 = vmatmul.bf16.gmra.mxu0 %v1941_v7 }
 0x484   : > { %v1854_v50 = vsub.f32 0.0, %v1838_v53 }
 0x485   : > { %2317 = vmatpush.bf16.msrb.mxu2 %v10363_v12  ;;  %2943 = vrot.lane.b32.xlu2 %v9942_v15, %s8915_s29 }
 0x486   : > { %v8223_v59 = vpop.eup %8222  ;;  %v1884_v25 = vmul.f32 1.442695, %v1854_v50  ;;  %2624 = vrot.lane.b32.xlu0 %v9907_v18, %s8914_s18  ;;  %2628 = vrot.lane.b32.xlu1 %v9872_v34, %s8914_s18 }
 0x487   : > { %v8225_v44 = vpop.eup %8224  ;;  %v1901_v39 = vadd.f32 1.0, %v8223_v59  ;;  %v10426_v61 = vpop.permute.xlu2 %2372 }
 0x488   : > { %v2300_v3 = vpop.permute.xlu1 %2299  ;;  %1932 = vst [vmem:[%s10180_s16 + $0x60] sm:$0xff] %v8225_v44  ;;  %8226 = vpow2.f32 %v1884_v25  ;;  %v2298_v24 = vpop.permute.xlu0 %2297  ;;  %7187 = vmatmul.msk.bf16.gmra.mxu3 %vm1726_vm3, %v10381_v9 }
 0x489   : > { %8228 = vrcp.f32 %v1901_v39  ;;  %v1821_v12 = vpop.f32.mrf.mxu3  ;;  %2318 = vmatpush.bf16.msrb.mxu2 %v2300_v3 }
 0x48a   : > { %v1839_v31 = vmul.f32 0.25, %v1821_v12 }
 0x48c   : > { %v1855_v7 = vsub.f32 0.0, %v1839_v31 }
 0x48d   : > { %2319 = vmatpush.bf16.msrb.mxu2 %v2298_v24  ;;  %3335 = vrot.lane.b32.xlu2 %v10074_v19, %s8916_s23 }
 0x48e   : > { %v8227_v57 = vpop.eup %8226  ;;  %v1886_v53 = vmul.f32 1.442695, %v1855_v7  ;;  %2622 = vrot.lane.b32.xlu0 %v9928_v5, %s8914_s18  ;;  %3012 = vrot.lane.b32.xlu1 %v10074_v19, %s13018_s0 }
 0x48f   : > { %v8229_v25 = vpop.eup %8228  ;;  %v1902_v50 = vadd.f32 1.0, %v8227_v57  ;;  %v3364_v59 = vpop.permute.xlu2 %3363 }
 0x490   : > { %v2690_v39 = vpop.permute.xlu1 %2689  ;;  %1933 = vst [vmem:[%s10180_s16 + $0x68] sm:$0xff] %v8229_v25  ;;  %8230 = vpow2.f32 %v1886_v53  ;;  %v3411_v9 = vsel %vm1726_vm3, %v3364_v59, 0  ;;  %v2296_v3 = vpop.permute.xlu0 %2295  ;;  %v1942_v24 = vpack.c.bf16 %v8229_v25, %v8225_v44 }
 0x491   : > { %8232 = vrcp.f32 %v1902_v50  ;;  %2320 = vmatpush.bf16.msrb.mxu2 %v2296_v3  ;;  %7211 = vmatmul.msk.bf16.gmra.mxu1 %vm1726_vm3, %v2690_v39 }
 0x492   : > { %2030 = vmatmul.bf16.gmra.mxu0 %v1942_v24  ;;  %3413 = vmatpush.bf16.xpose.msrb.mxu1 %v3411_v9 }
 0x495   : > { %2321 = vmatpush.bf16.msrb.mxu2 %v10397_v16  ;;  %2939 = vrot.lane.b32.xlu2 %v9970_v35, %s8915_s29 }
 0x496   : > { %v8231_v12 = vpop.eup %8230  ;;  %2620 = vrot.lane.b32.xlu0 %v9942_v15, %s8914_s18  ;;  %2941 = vrot.lane.b32.xlu1 %v9961_v46, %s8915_s29 }
 0x497   : > { %v8233_v31 = vpop.eup %8232  ;;  %v1903_v44 = vadd.f32 1.0, %v8231_v12  ;;  %v10447_v7 = vpop.permute.xlu2 %2374 }
 0x498   : > { %v2292_v57 = vpop.permute.xlu1 %2291  ;;  %1934 = vst [vmem:[%s10180_s16 + $0x70] sm:$0xff] %v8233_v31  ;;  %v2369_v53 = vpop.permute.xlu0 %2368 }
 0x499   : > { %8234 = vrcp.f32 %v1903_v44  ;;  %2322 = vmatpush.bf16.msrb.mxu2 %v2292_v57  ;;  %7188 = vmatmul.msk.bf16.gmra.mxu3 %vm1726_vm3, %v2369_v53  ;;  %v13105_v53 = vpack.c.bf16 %v10367_v10, %v10349_v37 }
 0x49c   : > { %2323 = vmatmul.bf16.vlgmr.msrb.gmra.mxu2 %v2283_v42 }
 0x49d   : > { %2616 = vrot.lane.b32.xlu2 %v9970_v35, %s8914_s18 }
 0x49e   : > { %2937 = vrot.lane.b32.xlu0 %v9987_v0, %s8915_s29  ;;  %2618 = vrot.lane.b32.xlu1 %v9961_v46, %s8914_s18 }
 0x49f   : > { %v8235_v16 = vpop.eup %8234  ;;  %v3360_v25 = vpop.permute.xlu2 %3359 }
 0x4a0   : > { %v2371_v50 = vpop.permute.xlu1 %2370  ;;  %1935 = vst [vmem:[%s10180_s16 + $0x78] sm:$0xff] %v8235_v16  ;;  %v2694_v59 = vpop.permute.xlu0 %2693  ;;  %v1943_v39 = vpack.c.bf16 %v8235_v16, %v8233_v31  ;;  %v3405_v57 = vsel %vm1726_vm3, %v3360_v25, 0 }
 0x4a1   : > { %7212 = vmatmul.msk.bf16.gmra.mxu1 %vm1726_vm3, %v10415_v21 }
 0x4a2   : > { %2035 = vmatmul.bf16.gmra.mxu0 %v1943_v39 }
 0x4a5   : > { %3337 = vrot.lane.b32.xlu2 %v10123_v20, %s8916_s23 }
 0x4a6   : > { %2614 = vrot.lane.b32.xlu0 %v9987_v0, %s8914_s18  ;;  %3014 = vrot.lane.b32.xlu1 %v10123_v20, %s13018_s0 }
 0x4a7   : > { %v10469_v8 = vpop.permute.xlu2 %2376 }
 0x4a8   : > { %v3041_v17 = vpop.permute.xlu1 %3040  ;;  %v2696_v9 = vpop.permute.xlu0 %2695 }
 0x4a9   : > { %v3088_v42 = vsel %vm1726_vm3, %v3041_v17, 0  ;;  %7189 = vmatmul.msk.bf16.gmra.mxu3 %vm1726_vm3, %v2371_v50 }
 0x4aa   : > { %3090 = vmatpush.bf16.xpose.msra.mxu3 %v3088_v42 }
 0x4ac   : > { %2328 = vmatmul.bf16.gmra.mxu2 %v2284_v6 }
 0x4ad   : > { %3018 = vrot.lane.b32.xlu2 %v10187_v49, %s13018_s0 }
 0x4ae   : > { %3339 = vrot.lane.b32.xlu0 %v10150_v1, %s8916_s23  ;;  %3016 = vrot.lane.b32.xlu1 %v10150_v1, %s13018_s0 }
 0x4af   : > { %v3356_v21 = vpop.permute.xlu2 %3355 }
 0x4b0   : > { %v3039_v3 = vpop.permute.xlu1 %3038  ;;  %v3362_v24 = vpop.permute.xlu0 %3361 }
 0x4b1   : > { %v3085_v12 = vsel %vm1726_vm3, %v3039_v3, 0  ;;  %7213 = vmatmul.msk.bf16.gmra.mxu1 %vm1726_vm3, %v2694_v59  ;;  %v3408_v31 = vsel %vm1726_vm3, %v3362_v24, 0 }
 0x4b2   : > { %3091 = vmatpush.bf16.xpose.msra.mxu3 %v3085_v12  ;;  %3414 = vmatpush.bf16.xpose.msrb.mxu1 %v3408_v31  ;;  %v3399_v31 = vsel %vm1726_vm3, %v3356_v21, 0 }
 0x4b5   : > { %4009 = vrot.lane.b32.xlu2 %v9826_v45, %s8918_s26 }
 0x4b6   : > { %3341 = vrot.lane.b32.xlu0 %v10187_v49, %s8916_s23  ;;  %3686 = vrot.lane.b32.xlu1 %v9826_v45, %s13016_s27 }
 0x4b7   : > { %v10491_v62 = vpop.permute.xlu2 %2378 }
 0x4b8   : > { %v3037_v63 = vpop.permute.xlu1 %3036  ;;  %v2698_v6 = vpop.permute.xlu0 %2697 }
 0x4b9   : > { %v3082_v44 = vsel %vm1726_vm3, %v3037_v63, 0  ;;  %7190 = vmatmul.msk.bf16.gmra.mxu3 %vm1726_vm3, %v10426_v61 }
 0x4ba   : > { %3092 = vmatpush.bf16.xpose.msra.mxu3 %v3082_v44  ;;  %3415 = vmatpush.bf16.xpose.msrb.mxu1 %v3405_v57 }
 0x4bc   : > { %2333 = vmatmul.bf16.gmra.mxu2 %v13105_v53  ;;  %v2150_v45 = vpop.f32.mrf.mxu1 }
 0x4bd   : > { %3020 = vrot.lane.b32.xlu2 %v10196_v14, %s13018_s0  ;;  %v2178_v16 = vmul.f32 0.25, %v2150_v45 }
 0x4be   : > { %4007 = vrot.lane.b32.xlu0 %v9858_v58, %s8918_s26  ;;  %3684 = vrot.lane.b32.xlu1 %v9858_v58, %s13016_s27 }
 0x4bf   : > { %v10506_v61 = vpop.permute.xlu2 %3351  ;;  %v2194_v50 = vsub.f32 0.0, %v2178_v16 }
 0x4c0   : > { %v3035_v25 = vpop.permute.xlu1 %3034  ;;  %v3358_v59 = vpop.permute.xlu0 %3357 }
 0x4c1   : > { %v3079_v39 = vsel %vm1726_vm3, %v3035_v25, 0  ;;  %7214 = vmatmul.msk.bf16.gmra.mxu1 %vm1726_vm3, %v2696_v9  ;;  %v3402_v37 = vsel %vm1726_vm3, %v3358_v59, 0  ;;  %v2218_v10 = vmul.f32 1.442695, %v2194_v50 }
 0x4c2   : > { %3093 = vmatpush.bf16.xpose.msra.mxu3 %v3079_v39  ;;  %3416 = vmatpush.bf16.xpose.msrb.mxu1 %v3402_v37 }
 0x4c3   : > { %8236 = vpow2.f32 %v2218_v10 }
 0x4c4   : > { %v2152_v58 = vpop.f32.mrf.mxu1 }
 0x4c5   : > { %4005 = vrot.lane.b32.xlu2 %v9902_v28, %s8918_s26  ;;  %v2179_v17 = vmul.f32 0.25, %v2152_v58 }
 0x4c6   : > { %3343 = vrot.lane.b32.xlu0 %v10196_v14, %s8916_s23  ;;  %3682 = vrot.lane.b32.xlu1 %v9902_v28, %s13016_s27  ;;  %v13106_v28 = vpack.c.bf16 %v10400_v43, %v10383_v36 }
 0x4c7   : > { %v2950_v42 = vpop.permute.xlu2 %2949  ;;  %v2195_v9 = vsub.f32 0.0, %v2179_v17 }
 0x4c8   : > { %v3033_v3 = vpop.permute.xlu1 %3032  ;;  %v10517_v24 = vpop.permute.xlu0 %2699 }
 0x4c9   : > { %v3076_v12 = vsel %vm1726_vm3, %v3033_v3, 0  ;;  %7191 = vmatmul.msk.bf16.gmra.mxu3 %vm1726_vm3, %v10447_v7  ;;  %v8237_v63 = vpop.eup %8236  ;;  %v2220_v44 = vmul.f32 1.442695, %v2195_v9 }
 0x4ca   : > { %3094 = vmatpush.bf16.xpose.msra.mxu3 %v3076_v12  ;;  %3417 = vmatpush.bf16.xpose.msrb.mxu1 %v3399_v31  ;;  %v2242_v57 = vadd.f32 1.0, %v8237_v63  ;;  %v3393_v12 = vsel %vm1726_vm3, %v10506_v61, 0 }
 0x4cb   : > { %8238 = vpow2.f32 %v2220_v44 }
 0x4cc   : > { %2338 = vmatmul.bf16.gmra.mxu2 %v13106_v28  ;;  %8240 = vrcp.f32 %v2242_v57  ;;  %v2155_v53 = vpop.f32.mrf.mxu1 }
 0x4cd   : > { %3022 = vrot.lane.b32.xlu2 %v10211_v48, %s13018_s0  ;;  %v2180_v7 = vmul.f32 0.25, %v2155_v53 }
 0x4ce   : > { %4003 = vrot.lane.b32.xlu0 %v9936_v27, %s8918_s26  ;;  %3680 = vrot.lane.b32.xlu1 %v9936_v27, %s13016_s27 }
 0x4cf   : > { %v10532_v21 = vpop.permute.xlu2 %2626  ;;  %v2196_v16 = vsub.f32 0.0, %v2180_v7 }
 0x4d0   : > { %v3031_v45 = vpop.permute.xlu1 %3030  ;;  %v3354_v25 = vpop.permute.xlu0 %3353 }
 0x4d1   : > { %v3073_v36 = vsel %vm1726_vm3, %v3031_v45, 0  ;;  %7215 = vmatmul.msk.bf16.gmra.mxu1 %vm1726_vm3, %v2698_v6  ;;  %v3396_v43 = vsel %vm1726_vm3, %v3354_v25, 0  ;;  %v8239_v50 = vpop.eup %8238  ;;  %v2222_v59 = vmul.f32 1.442695, %v2196_v16 }
 0x4d2   : > { %3095 = vmatpush.bf16.xpose.msra.mxu3 %v3073_v36  ;;  %3418 = vmatpush.bf16.xpose.msrb.mxu1 %v3396_v43  ;;  %v8241_v39 = vpop.eup %8240  ;;  %v2243_v37 = vadd.f32 1.0, %v8239_v50 }
 0x4d3   : > { %7178 = vst [vmem:[%s10180_s16 + $0xc0] sm:$0xff] %v8241_v39  ;;  %8242 = vpow2.f32 %v2222_v59 }
 0x4d4   : > { %8244 = vrcp.f32 %v2243_v37  ;;  %v2157_v27 = vpop.f32.mrf.mxu1 }
 0x4d5   : > { %4001 = vrot.lane.b32.xlu2 %v9946_v22, %s8918_s26  ;;  %v2181_v6 = vmul.f32 0.25, %v2157_v27 }
 0x4d6   : > { %3345 = vrot.lane.b32.xlu0 %v10211_v48, %s8916_s23  ;;  %3678 = vrot.lane.b32.xlu1 %v9946_v22, %s13016_s27 }
 0x4d7   : > { %v2952_v10 = vpop.permute.xlu2 %2951  ;;  %v2197_v17 = vsub.f32 0.0, %v2181_v6 }
 0x4d8   : > { %v3029_v58 = vpop.permute.xlu1 %3028  ;;  %v10544_v3 = vpop.permute.xlu0 %2701  ;;  %2961 = vmatpush.bf16.msra.mxu2 %v2952_v10 }
 0x4d9   : > { %v3070_v9 = vsel %vm1726_vm3, %v3029_v58, 0  ;;  %7192 = vmatmul.msk.bf16.gmra.mxu3 %vm1726_vm3, %v10469_v8  ;;  %v8243_v31 = vpop.eup %8242  ;;  %v2224_v63 = vmul.f32 1.442695, %v2197_v17 }
 0x4da   : > { %3096 = vmatpush.bf16.xpose.msra.mxu3 %v3070_v9  ;;  %3419 = vmatpush.bf16.xpose.msrb.mxu1 %v3393_v12  ;;  %v8245_v22 = vpop.eup %8244  ;;  %v2244_v44 = vadd.f32 1.0, %v8243_v31 }
 0x4db   : > { %7179 = vst [vmem:[%s10180_s16 + $0xc8] sm:$0xff] %v8245_v22  ;;  %8246 = vpow2.f32 %v2224_v63  ;;  %v2287_v57 = vpack.c.bf16 %v8245_v22, %v8241_v39 }
 0x4dc   : > { %2962 = vmatpush.bf16.msra.mxu2 %v2950_v42  ;;  %8248 = vrcp.f32 %v2244_v44 }
 0x4dd   : > { %3024 = vrot.lane.b32.xlu2 %v10229_v52, %s13018_s0  ;;  %v2160_v8 = vpop.f32.mrf.mxu1  ;;  %2343 = vmatmul.bf16.gmra.mxu2 %v2287_v57 }
 0x4de   : > { %3999 = vrot.lane.b32.xlu0 %v9989_v54, %s8918_s26  ;;  %3676 = vrot.lane.b32.xlu1 %v9989_v54, %s13016_s27  ;;  %v2182_v61 = vmul.f32 0.25, %v2160_v8 }
 0x4df   : > { %v10558_v28 = vpop.permute.xlu2 %2943 }
 0x4e0   : > { %v3027_v53 = vpop.permute.xlu1 %3026  ;;  %v3350_v7 = vpop.permute.xlu0 %3349  ;;  %v2198_v45 = vsub.f32 0.0, %v2182_v61 }
 0x4e1   : > { %v3067_v42 = vsel %vm1726_vm3, %v3027_v53, 0  ;;  %7216 = vmatmul.msk.bf16.gmra.mxu1 %vm1726_vm3, %v10517_v24  ;;  %v3390_v16 = vsel %vm1726_vm3, %v3350_v7, 0  ;;  %v8247_v25 = vpop.eup %8246 }
 0x4e2   : > { %3097 = vmatpush.bf16.xpose.msra.mxu3 %v3067_v42  ;;  %3420 = vmatpush.bf16.xpose.msrb.mxu1 %v3390_v16  ;;  %v8249_v54 = vpop.eup %8248  ;;  %v2245_v36 = vadd.f32 1.0, %v8247_v25  ;;  %v2226_v43 = vmul.f32 1.442695, %v2198_v45 }
 0x4e3   : > { %7180 = vst [vmem:[%s10180_s16 + $0xd0] sm:$0xff] %v8249_v54 }
 0x4e4   : > { %8250 = vrcp.f32 %v2245_v36 }
 0x4e5   : > { %3997 = vrot.lane.b32.xlu2 %v9992_v40, %s8918_s26  ;;  %8252 = vpow2.f32 %v2226_v43  ;;  %v2162_v24 = vpop.f32.mrf.mxu1 }
 0x4e6   : > { %3347 = vrot.lane.b32.xlu0 %v10229_v52, %s8916_s23  ;;  %3674 = vrot.lane.b32.xlu1 %v9992_v40, %s13016_s27  ;;  %v2183_v50 = vmul.f32 0.25, %v2162_v24 }
 0x4e7   : > { %v10571_v59 = vpop.permute.xlu2 %3335 }
 0x4e8   : > { %v3011_v39 = vpop.permute.xlu1 %3010  ;;  %v10573_v37 = vpop.permute.xlu0 %3333  ;;  %v2199_v27 = vsub.f32 0.0, %v2183_v50 }
 0x4e9   : > { %7193 = vmatmul.msk.bf16.gmra.mxu3 %vm1726_vm3, %v10491_v62  ;;  %v10607_v50 = vpop.f32.mrf.mxu0 }
 0x4ea   : > { %v8251_v6 = vpop.eup %8250  ;;  %v2228_v10 = vmul.f32 1.442695, %v2199_v27 }
 0x4eb   : > { %v8253_v58 = vpop.eup %8252  ;;  %7181 = vst [vmem:[%s10180_s16 + $0xd8] sm:$0xff] %v8251_v6  ;;  %v2288_v17 = vpack.c.bf16 %v8251_v6, %v8249_v54 }
 0x4ec   : > { %v2246_v9 = vadd.f32 1.0, %v8253_v58  ;;  %8254 = vpow2.f32 %v2228_v10 }
 0x4ed   : > { %3595 = vrot.lane.b32.xlu2 %v9894_v60, %s8916_s23  ;;  %v2165_v40 = vpop.f32.mrf.mxu1  ;;  %2348 = vmatmul.bf16.gmra.mxu2 %v2288_v17 }
 0x4ee   : > { %3995 = vrot.lane.b32.xlu0 %v9976_v41, %s8918_s26  ;;  %3672 = vrot.lane.b32.xlu1 %v9976_v41, %s13016_s27  ;;  %8256 = vrcp.f32 %v2246_v9  ;;  %v2184_v62 = vmul.f32 0.25, %v2165_v40 }
 0x4ef   : > { %v10584_v12 = vpop.permute.xlu2 %2939 }
 0x4f0   : > { %v2946_v31 = vpop.permute.xlu1 %2945  ;;  %v2948_v63 = vpop.permute.xlu0 %2947  ;;  %v2200_v22 = vsub.f32 0.0, %v2184_v62 }
 0x4f1   : > { %7217 = vmatmul.msk.bf16.gmra.mxu1 %vm1726_vm3, %v10544_v3  ;;  %2963 = vmatpush.bf16.msra.mxu2 %v2948_v63 }
 0x4f2   : > { %v8255_v44 = vpop.eup %8254  ;;  %v2230_v57 = vmul.f32 1.442695, %v2200_v22 }
 0x4f3   : > { %v2247_v8 = vadd.f32 1.0, %v8255_v44 }
 0x4f4   : > { %v8257_v61 = vpop.eup %8256  ;;  %8258 = vpow2.f32 %v2230_v57 }
 0x4f5   : > { %2964 = vmatpush.bf16.msra.mxu2 %v2946_v31  ;;  %3272 = vrot.lane.b32.xlu2 %v9894_v60, %s13018_s0  ;;  %7182 = vst [vmem:[%s10180_s16 + $0xe0] sm:$0xff] %v8257_v61  ;;  %8260 = vrcp.f32 %v2247_v8  ;;  %v2167_v41 = vpop.f32.mrf.mxu1 }
 0x4f6   : > { %3979 = vrot.lane.b32.xlu0 %v10000_v38, %s8918_s26  ;;  %3656 = vrot.lane.b32.xlu1 %v10000_v38, %s13016_s27  ;;  %v2185_v3 = vmul.f32 0.25, %v2167_v41 }
 0x4f7   : > { %v10595_v53 = vpop.permute.xlu2 %2616 }
 0x4f8   : > { %v2629_v7 = vpop.permute.xlu1 %2628  ;;  %v2625_v42 = vpop.permute.xlu0 %2624  ;;  %v2201_v45 = vsub.f32 0.0, %v2185_v3 }
 0x4f9   : > { %2638 = vmatpush.bf16.msra.mxu0 %v2629_v7  ;;  %2965 = vmatpush.bf16.msra.mxu2 %v10558_v28  ;;  %v10622_v7 = vpop.f32.mrf.mxu0 }
 0x4fa   : > { %7234 = vmatmul.msk.bf16.vlgmr.msra.gmra.mxu3 %vm1726_vm3, %v3011_v39  ;;  %v8259_v16 = vpop.eup %8258  ;;  %v2232_v25 = vmul.f32 1.442695, %v2201_v45 }
 0x4fb   : > { %v8261_v54 = vpop.eup %8260  ;;  %v2248_v36 = vadd.f32 1.0, %v8259_v16  ;;  %v2453_v43 = vpop.f32.mrf.mxu3 }
 0x4fc   : > { %7183 = vst [vmem:[%s10180_s16 + $0xe8] sm:$0xff] %v8261_v54  ;;  %8262 = vpow2.f32 %v2232_v25  ;;  %v2493_v38 = vmul.f32 0.25, %v2453_v43  ;;  %v2289_v24 = vpack.c.bf16 %v8261_v54, %v8257_v61 }
 0x4fd   : > { %2639 = vmatpush.bf16.msra.mxu0 %v10532_v21  ;;  %3597 = vrot.lane.b32.xlu2 %v9872_v34, %s8916_s23  ;;  %8264 = vrcp.f32 %v2248_v36 }
 0x4fe   : > { %3593 = vrot.lane.b32.xlu0 %v9907_v18, %s8916_s23  ;;  %3591 = vrot.lane.b32.xlu1 %v9928_v5, %s8916_s23  ;;  %v2776_v28 = vpop.f32.mrf.mxu1  ;;  %v2509_v39 = vsub.f32 0.0, %v2493_v38 }
 0x4ff   : > { %v2816_v27 = vmul.f32 0.25, %v2776_v28  ;;  %2353 = vmatmul.bf16.gmra.mxu2 %v2289_v24  ;;  %v10609_v6 = vpop.permute.xlu2 %3337 }
 0x500   : > { %v3013_v21 = vpop.permute.xlu1 %3012  ;;  %v2623_v10 = vpop.permute.xlu0 %2622  ;;  %v2525_v58 = vmul.f32 1.442695, %v2509_v39 }
 0x501   : > { %v2832_v17 = vsub.f32 0.0, %v2816_v27  ;;  %2640 = vmatpush.bf16.msra.mxu0 %v2625_v42  ;;  %7258 = vmatmul.msk.bf16.vlgmr.msrb.gmra.mxu1 %vm1726_vm3, %v10573_v37 }
 0x502   : > { %v8263_v9 = vpop.eup %8262  ;;  %8266 = vpow2.f32 %v2525_v58 }
 0x503   : > { %v2848_v40 = vmul.f32 1.442695, %v2832_v17  ;;  %v8265_v62 = vpop.eup %8264  ;;  %v2249_v31 = vadd.f32 1.0, %v8263_v9  ;;  %v2455_v63 = vpop.f32.mrf.mxu3 }
 0x504   : > { %7184 = vst [vmem:[%s10180_s16 + $0xf0] sm:$0xff] %v8265_v62  ;;  %v2494_v22 = vmul.f32 0.25, %v2455_v63 }
 0x505   : > { %8268 = vpow2.f32 %v2848_v40  ;;  %2641 = vmatpush.bf16.msra.mxu0 %v2623_v10  ;;  %3589 = vrot.lane.b32.xlu2 %v9942_v15, %s8916_s23  ;;  %v10634_v40 = vpop.f32.mrf.mxu0 }
 0x506   : > { %8270 = vrcp.f32 %v2249_v31  ;;  %3270 = vrot.lane.b32.xlu0 %v9907_v18, %s13018_s0  ;;  %3274 = vrot.lane.b32.xlu1 %v9872_v34, %s13018_s0  ;;  %v2778_v37 = vpop.f32.mrf.mxu1  ;;  %v2510_v44 = vsub.f32 0.0, %v2494_v22  ;;  %13107 = vst [vmem:[#allocation30_spill] sm:$0xff] %v10634_v40 }
 0x507   : > { %v2817_v57 = vmul.f32 0.25, %v2778_v37  ;;  %v10620_v8 = vpop.permute.xlu2 %3018 }
 0x508   : > { %v2942_v61 = vpop.permute.xlu1 %2941  ;;  %v2621_v41 = vpop.permute.xlu0 %2620  ;;  %v2527_v42 = vmul.f32 1.442695, %v2510_v44 }
 0x509   : > { %v8267_v3 = vpop.eup %8266  ;;  %v2833_v45 = vsub.f32 0.0, %v2817_v57  ;;  %2642 = vmatpush.bf16.msra.mxu0 %v2621_v41  ;;  %2966 = vmatpush.bf16.msra.mxu2 %v2942_v61 }
 0x50a   : > { %v2557_v16 = vadd.f32 1.0, %v8267_v3  ;;  %7235 = vmatmul.msk.bf16.gmra.mxu3 %vm1726_vm3, %v3013_v21  ;;  %8272 = vpow2.f32 %v2527_v42 }
 0x50b   : > { %v8269_v25 = vpop.eup %8268  ;;  %v2850_v54 = vmul.f32 1.442695, %v2833_v45  ;;  %v2458_v38 = vpop.f32.mrf.mxu3 }
 0x50c   : > { %v8271_v36 = vpop.eup %8270  ;;  %8274 = vrcp.f32 %v2557_v16  ;;  %v2880_v43 = vadd.f32 1.0, %v8269_v25  ;;  %v2495_v24 = vmul.f32 0.25, %v2458_v38 }
 0x50d   : > { %7185 = vst [vmem:[%s10180_s16 + $0xf8] sm:$0xff] %v8271_v36  ;;  %8276 = vpow2.f32 %v2850_v54  ;;  %2967 = vmatpush.bf16.msra.mxu2 %v10584_v12  ;;  %3981 = vrot.lane.b32.xlu2 %v10074_v19, %s8918_s26  ;;  %v2290_v28 = vpack.c.bf16 %v8271_v36, %v8265_v62 }
 0x50e   : > { %8278 = vrcp.f32 %v2880_v43  ;;  %3268 = vrot.lane.b32.xlu0 %v9928_v5, %s13018_s0  ;;  %3658 = vrot.lane.b32.xlu1 %v10074_v19, %s13016_s27  ;;  %v2781_v39 = vpop.f32.mrf.mxu1  ;;  %v2511_v27 = vsub.f32 0.0, %v2495_v24 }
 0x50f   : > { %v2818_v21 = vmul.f32 0.25, %v2781_v39  ;;  %2358 = vmatmul.bf16.gmra.mxu2 %v2290_v28  ;;  %v4010_v10 = vpop.permute.xlu2 %4009  ;;  %v10650_v28 = vpop.f32.mrf.mxu0 }
 0x510   : > { %v4057_v58 = vsel %vm1726_vm3, %v4010_v10, 0  ;;  %v2619_v12 = vpop.permute.xlu1 %2618  ;;  %v2938_v17 = vpop.permute.xlu0 %2937  ;;  %v2529_v62 = vmul.f32 1.442695, %v2511_v27  ;;  %13108 = vst [vmem:[#allocation31_spill] sm:$0xff] %v10650_v28 }
 0x511   : > { %v8273_v9 = vpop.eup %8272  ;;  %v2834_v31 = vsub.f32 0.0, %v2818_v21  ;;  %2643 = vmatpush.bf16.msra.mxu0 %v2619_v12  ;;  %2968 = vmatpush.bf16.msra.mxu2 %v2938_v17 }
 0x512   : > { %v8275_v63 = vpop.eup %8274  ;;  %v2558_v19 = vadd.f32 1.0, %v8273_v9  ;;  %7259 = vmatmul.msk.bf16.gmra.mxu1 %vm1726_vm3, %v10571_v59  ;;  %8280 = vpow2.f32 %v2529_v62 }
 0x513   : > { %v8277_v22 = vpop.eup %8276  ;;  %7194 = vst [vmem:[%s10180_s16 + $0x100] sm:$0xff] %v8275_v63  ;;  %v2852_v37 = vmul.f32 1.442695, %v2834_v31  ;;  %4059 = vmatpush.bf16.xpose.msra.mxu1 %v4057_v58  ;;  %v2460_v61 = vpop.f32.mrf.mxu3 }
 0x514   : > { %v8279_v44 = vpop.eup %8278  ;;  %8282 = vrcp.f32 %v2558_v19  ;;  %v2881_v57 = vadd.f32 1.0, %v8277_v22  ;;  %v2496_v41 = vmul.f32 0.25, %v2460_v61 }
 0x515   : > { %7218 = vst [vmem:[%s10180_s16 + $0x180] sm:$0xff] %v8279_v44  ;;  %8284 = vpow2.f32 %v2852_v37  ;;  %2644 = vmatpush.bf16.msra.mxu0 %v10595_v53  ;;  %3585 = vrot.lane.b32.xlu2 %v9970_v35, %s8916_s23 }
 0x516   : > { %8286 = vrcp.f32 %v2881_v57  ;;  %3266 = vrot.lane.b32.xlu0 %v9942_v15, %s13018_s0  ;;  %3587 = vrot.lane.b32.xlu1 %v9961_v46, %s8916_s23  ;;  %v2783_v59 = vpop.f32.mrf.mxu1  ;;  %v2512_v3 = vsub.f32 0.0, %v2496_v41 }
 0x517   : > { %v2819_v42 = vmul.f32 0.25, %v2783_v59  ;;  %v10647_v45 = vpop.permute.xlu2 %3020 }
 0x518   : > { %v3015_v16 = vpop.permute.xlu1 %3014  ;;  %v2615_v25 = vpop.permute.xlu0 %2614  ;;  %v2531_v53 = vmul.f32 1.442695, %v2512_v3 }
 0x519   : > { %v8281_v54 = vpop.eup %8280  ;;  %v2835_v36 = vsub.f32 0.0, %v2819_v42  ;;  %2645 = vmatpush.bf16.msra.mxu0 %v2615_v25 }
 0x51a   : > { %v8283_v43 = vpop.eup %8282  ;;  %v2559_v38 = vadd.f32 1.0, %v8281_v54  ;;  %7236 = vmatmul.msk.bf16.gmra.mxu3 %vm1726_vm3, %v3015_v16  ;;  %8288 = vpow2.f32 %v2531_v53  ;;  %v10669_v53 = vpop.f32.mrf.mxu0 }
 0x51b   : > { %v8285_v24 = vpop.eup %8284  ;;  %7195 = vst [vmem:[%s10180_s16 + $0x108] sm:$0xff] %v8283_v43  ;;  %v2854_v39 = vmul.f32 1.442695, %v2835_v36  ;;  %v2606_v27 = vpack.c.bf16 %v8283_v43, %v8275_v63 }
 0x51c   : > { %v8287_v21 = vpop.eup %8286  ;;  %8290 = vrcp.f32 %v2559_v38  ;;  %v2882_v10 = vadd.f32 1.0, %v8285_v24  ;;  %v2463_v58 = vpop.f32.mrf.mxu3  ;;  %13109 = vst [vmem:[#allocation32_spill] sm:$0xff] %v10669_v53 }
 0x51d   : > { %7219 = vst [vmem:[%s10180_s16 + $0x188] sm:$0xff] %v8287_v21  ;;  %8292 = vpow2.f32 %v2854_v39  ;;  %v2497_v12 = vmul.f32 0.25, %v2463_v58  ;;  %2646 = vmatmul.bf16.vlgmr.msra.gmra.mxu0 %v2606_v27  ;;  %3262 = vrot.lane.b32.xlu2 %v9970_v35, %s13018_s0  ;;  %v2929_v17 = vpack.c.bf16 %v8287_v21, %v8279_v44 }
 0x51e   : > { %8294 = vrcp.f32 %v2882_v10  ;;  %3583 = vrot.lane.b32.xlu0 %v9987_v0, %s8916_s23  ;;  %3264 = vrot.lane.b32.xlu1 %v9961_v46, %s13018_s0  ;;  %v2786_v9 = vpop.f32.mrf.mxu1 }
 0x51f   : > { %v2513_v62 = vsub.f32 0.0, %v2497_v12  ;;  %v2820_v31 = vmul.f32 0.25, %v2786_v9  ;;  %v10660_v63 = vpop.f32.mrf.mxu2  ;;  %2969 = vmatmul.bf16.vlgmr.msra.gmra.mxu2 %v2929_v17  ;;  %v10662_v19 = vpop.permute.xlu2 %4005 }
 0x520   : > { %v3017_v22 = vpop.permute.xlu1 %3016  ;;  %v8289_v37 = vpop.eup %8288 }
 0x521   : > { %v2533_v44 = vmul.f32 1.442695, %v2513_v62  ;;  %v2836_v57 = vsub.f32 0.0, %v2820_v31  ;;  %v10664_v61 = vpop.permute.xlu0 %3339  ;;  %v2560_v59 = vadd.f32 1.0, %v8289_v37 }
 0x522   : > { %v8291_v41 = vpop.eup %8290  ;;  %7260 = vmatmul.msk.bf16.gmra.mxu1 %vm1726_vm3, %v10609_v6 }
 0x523   : > { %v8293_v3 = vpop.eup %8292  ;;  %7196 = vst [vmem:[%s10180_s16 + $0x110] sm:$0xff] %v8291_v41  ;;  %8296 = vpow2.f32 %v2533_v44  ;;  %v2856_v42 = vmul.f32 1.442695, %v2836_v57 }
 0x524   : > { %v8295_v16 = vpop.eup %8294  ;;  %8298 = vrcp.f32 %v2560_v59  ;;  %v2883_v25 = vadd.f32 1.0, %v8293_v3  ;;  %v2465_v54 = vpop.f32.mrf.mxu3 }
 0x525   : > { %7220 = vst [vmem:[%s10180_s16 + $0x190] sm:$0xff] %v8295_v16  ;;  %8300 = vpow2.f32 %v2856_v42  ;;  %v2498_v36 = vmul.f32 0.25, %v2465_v54  ;;  %3983 = vrot.lane.b32.xlu2 %v10123_v20, %s8918_s26 }
 0x526   : > { %8302 = vrcp.f32 %v2883_v25  ;;  %3260 = vrot.lane.b32.xlu0 %v9987_v0, %s13018_s0  ;;  %3660 = vrot.lane.b32.xlu1 %v10123_v20, %s13016_s27  ;;  %v2788_v6 = vpop.f32.mrf.mxu1 }
 0x527   : > { %v2514_v43 = vsub.f32 0.0, %v2498_v36  ;;  %v2821_v38 = vmul.f32 0.25, %v2788_v6  ;;  %v10678_v24 = vpop.f32.mrf.mxu2  ;;  %v10682_v27 = vpop.permute.xlu2 %3022 }
 0x528   : > { %v7788_v39 = vpack.i.bf16 %v10678_v24, %v10660_v63  ;;  %v3687_v21 = vpop.permute.xlu1 %3686 }
 0x529   : > { %v8297_v10 = vpop.eup %8296  ;;  %v2535_v58 = vmul.f32 1.442695, %v2514_v43  ;;  %v2837_v12 = vsub.f32 0.0, %v2821_v38  ;;  %v3734_v17 = vsel %vm1726_vm3, %v3687_v21, 0  ;;  %v10685_v9 = vpop.permute.xlu0 %3341 }
 0x52a   : > { %v8299_v20 = vpop.eup %8298  ;;  %v2561_v62 = vadd.f32 1.0, %v8297_v10  ;;  %7237 = vmatmul.msk.bf16.gmra.mxu3 %vm1726_vm3, %v3017_v22 }
 0x52b   : > { %v8301_v31 = vpop.eup %8300  ;;  %7197 = vst [vmem:[%s10180_s16 + $0x118] sm:$0xff] %v8299_v20  ;;  %8304 = vpow2.f32 %v2535_v58  ;;  %v2858_v37 = vmul.f32 1.442695, %v2837_v12  ;;  %3736 = vmatpush.bf16.xpose.msrb.mxu3 %v3734_v17  ;;  %v2607_v44 = vpack.c.bf16 %v8299_v20, %v8291_v41  ;;  %v10696_v41 = vpop.f32.mrf.mxu0 }
 0x52c   : > { %v8303_v57 = vpop.eup %8302  ;;  %8306 = vrcp.f32 %v2561_v62  ;;  %v2884_v59 = vadd.f32 1.0, %v8301_v31  ;;  %v2468_v3 = vpop.f32.mrf.mxu3  ;;  %13110 = vst [vmem:[#allocation33_spill] sm:$0xff] %v10696_v41 }
 0x52d   : > { %7221 = vst [vmem:[%s10180_s16 + $0x198] sm:$0xff] %v8303_v57  ;;  %8308 = vpow2.f32 %v2858_v37  ;;  %v2499_v42 = vmul.f32 0.25, %v2468_v3  ;;  %2651 = vmatmul.bf16.gmra.mxu0 %v2607_v44  ;;  %3664 = vrot.lane.b32.xlu2 %v10187_v49, %s13016_s27  ;;  %v2930_v25 = vpack.c.bf16 %v8303_v57, %v8295_v16 }
 0x52e   : > { %8310 = vrcp.f32 %v2884_v59  ;;  %3985 = vrot.lane.b32.xlu0 %v10150_v1, %s8918_s26  ;;  %3662 = vrot.lane.b32.xlu1 %v10150_v1, %s13016_s27  ;;  %v2791_v22 = vpop.f32.mrf.mxu1 }
 0x52f   : > { %v2515_v54 = vsub.f32 0.0, %v2499_v42  ;;  %v2822_v36 = vmul.f32 0.25, %v2791_v22  ;;  %v10698_v6 = vpop.f32.mrf.mxu2  ;;  %2974 = vmatmul.bf16.gmra.mxu2 %v2930_v25  ;;  %v10700_v43 = vpop.permute.xlu2 %4001 }
 0x530   : > { %v3685_v38 = vpop.permute.xlu1 %3684 }
 0x531   : > { %v8305_v16 = vpop.eup %8304  ;;  %v2537_v21 = vmul.f32 1.442695, %v2515_v54  ;;  %v2838_v10 = vsub.f32 0.0, %v2822_v36  ;;  %v4008_v58 = vpop.permute.xlu0 %4007  ;;  %v3731_v12 = vsel %vm1726_vm3, %v3685_v38, 0 }
 0x532   : > { %v8307_v1 = vpop.eup %8306  ;;  %v2562_v17 = vadd.f32 1.0, %v8305_v16  ;;  %7261 = vmatmul.msk.bf16.gmra.mxu1 %vm1726_vm3, %v10664_v61  ;;  %v4054_v20 = vsel %vm1726_vm3, %v4008_v58, 0 }
 0x533   : > { %v8309_v62 = vpop.eup %8308  ;;  %7198 = vst [vmem:[%s10180_s16 + $0x120] sm:$0xff] %v8307_v1  ;;  %8312 = vpow2.f32 %v2537_v21  ;;  %v2860_v31 = vmul.f32 1.442695, %v2838_v10  ;;  %3737 = vmatpush.bf16.xpose.msrb.mxu3 %v3731_v12  ;;  %4060 = vmatpush.bf16.xpose.msra.mxu1 %v4054_v20  ;;  %v10723_v58 = vpop.f32.mrf.mxu0 }
 0x534   : > { %v8311_v37 = vpop.eup %8310  ;;  %8314 = vrcp.f32 %v2562_v17  ;;  %v2885_v44 = vadd.f32 1.0, %v8309_v62  ;;  %v2470_v57 = vpop.f32.mrf.mxu3  ;;  %13111 = vst [vmem:[#allocation34_spill] sm:$0xff] %v10723_v58  ;;  %v4051_v17 = vsel %vm1726_vm3, %v10662_v19, 0 }
 0x535   : > { %7222 = vst [vmem:[%s10180_s16 + $0x1a0] sm:$0xff] %v8311_v37  ;;  %8316 = vpow2.f32 %v2860_v31  ;;  %v2500_v59 = vmul.f32 0.25, %v2470_v57  ;;  %3989 = vrot.lane.b32.xlu2 %v10196_v14, %s8918_s26 }
 0x536   : > { %8318 = vrcp.f32 %v2885_v44  ;;  %3666 = vrot.lane.b32.xlu0 %v10196_v14, %s13016_s27  ;;  %3987 = vrot.lane.b32.xlu1 %v10187_v49, %s8918_s26  ;;  %v2793_v61 = vpop.f32.mrf.mxu1 }
 0x537   : > { %v2516_v3 = vsub.f32 0.0, %v2500_v59  ;;  %v2823_v42 = vmul.f32 0.25, %v2793_v61  ;;  %v10714_v25 = vpop.f32.mrf.mxu2  ;;  %v10718_v54 = vpop.permute.xlu2 %3024 }
 0x538   : > { %v3683_v36 = vpop.permute.xlu1 %3682 }
 0x539   : > { %v8313_v38 = vpop.eup %8312  ;;  %v2539_v16 = vmul.f32 1.442695, %v2516_v3  ;;  %v2839_v21 = vsub.f32 0.0, %v2823_v42  ;;  %v10720_v10 = vpop.permute.xlu0 %3343  ;;  %v3728_v14 = vsel %vm1726_vm3, %v3683_v36, 0 }
 0x53a   : > { %v8315_v49 = vpop.eup %8314  ;;  %v2563_v12 = vadd.f32 1.0, %v8313_v38  ;;  %7238 = vmatmul.msk.bf16.gmra.mxu3 %vm1726_vm3, %v10620_v8 }
 0x53b   : > { %v8317_v20 = vpop.eup %8316  ;;  %7199 = vst [vmem:[%s10180_s16 + $0x128] sm:$0xff] %v8315_v49  ;;  %8320 = vpow2.f32 %v2539_v16  ;;  %v2862_v62 = vmul.f32 1.442695, %v2839_v21  ;;  %3738 = vmatpush.bf16.xpose.msrb.mxu3 %v3728_v14  ;;  %4061 = vmatpush.bf16.xpose.msra.mxu1 %v4051_v17  ;;  %v2608_v31 = vpack.c.bf16 %v8315_v49, %v8307_v1 }
 0x53c   : > { %v8319_v44 = vpop.eup %8318  ;;  %8322 = vrcp.f32 %v2563_v12  ;;  %v2886_v57 = vadd.f32 1.0, %v8317_v20  ;;  %v2473_v59 = vpop.f32.mrf.mxu3 }
 0x53d   : > { %7223 = vst [vmem:[%s10180_s16 + $0x1a8] sm:$0xff] %v8319_v44  ;;  %8324 = vpow2.f32 %v2862_v62  ;;  %v2501_v61 = vmul.f32 0.25, %v2473_v59  ;;  %2656 = vmatmul.bf16.gmra.mxu0 %v2608_v31  ;;  %3670 = vrot.lane.b32.xlu2 %v10229_v52, %s13016_s27  ;;  %v2931_v8 = vpack.c.bf16 %v8319_v44, %v8311_v37  ;;  %v10746_v44 = vpop.f32.mrf.mxu0 }
 0x53e   : > { %8326 = vrcp.f32 %v2886_v57  ;;  %3668 = vrot.lane.b32.xlu1 %v10211_v48, %s13016_s27  ;;  %3991 = vrot.lane.b32.xlu0 %v10211_v48, %s8918_s26  ;;  %v2796_v19 = vpop.f32.mrf.mxu1  ;;  %13112 = vst [vmem:[#allocation35_spill] sm:$0xff] %v10746_v44 }
 0x53f   : > { %v2517_v1 = vsub.f32 0.0, %v2501_v61  ;;  %v2824_v3 = vmul.f32 0.25, %v2796_v19  ;;  %v10737_v42 = vpop.f32.mrf.mxu2  ;;  %2979 = vmatmul.bf16.gmra.mxu2 %v2931_v8  ;;  %v10739_v36 = vpop.permute.xlu2 %3997 }
 0x540   : > { %v3681_v38 = vpop.permute.xlu1 %3680 }
 0x541   : > { %v8321_v16 = vpop.eup %8320  ;;  %v2541_v21 = vmul.f32 1.442695, %v2517_v1  ;;  %v2840_v37 = vsub.f32 0.0, %v2824_v3  ;;  %v4004_v14 = vpop.permute.xlu0 %4003  ;;  %v3725_v49 = vsel %vm1726_vm3, %v3681_v38, 0 }
 0x542   : > { %v8323_v12 = vpop.eup %8322  ;;  %v2564_v17 = vadd.f32 1.0, %v8321_v16  ;;  %7262 = vmatmul.msk.bf16.gmra.mxu1 %vm1726_vm3, %v10685_v9  ;;  %v4048_v48 = vsel %vm1726_vm3, %v4004_v14, 0 }
 0x543   : > { %v8325_v20 = vpop.eup %8324  ;;  %7200 = vst [vmem:[%s10180_s16 + $0x130] sm:$0xff] %v8323_v12  ;;  %8328 = vpow2.f32 %v2541_v21  ;;  %v2864_v62 = vmul.f32 1.442695, %v2840_v37  ;;  %3739 = vmatpush.bf16.xpose.msrb.mxu3 %v3725_v49  ;;  %4062 = vmatpush.bf16.xpose.msra.mxu1 %v4048_v48  ;;  %v4045_v48 = vsel %vm1726_vm3, %v10700_v43, 0 }
 0x544   : > { %v8327_v31 = vpop.eup %8326  ;;  %8330 = vrcp.f32 %v2564_v17  ;;  %v2887_v57 = vadd.f32 1.0, %v8325_v20  ;;  %v2475_v59 = vpop.f32.mrf.mxu3 }
 0x545   : > { %7224 = vst [vmem:[%s10180_s16 + $0x1b0] sm:$0xff] %v8327_v31  ;;  %8332 = vpow2.f32 %v2864_v62  ;;  %v2502_v61 = vmul.f32 0.25, %v2475_v59  ;;  %4241 = vrot.lane.b32.xlu2 %v9894_v60, %s8918_s26 }
 0x546   : > { %8334 = vrcp.f32 %v2887_v57  ;;  %3993 = vrot.lane.b32.xlu1 %v10229_v52, %s8918_s26  ;;  %4243 = vrot.lane.b32.xlu0 %v9872_v34, %s8918_s26  ;;  %v2798_v9 = vpop.f32.mrf.mxu1 }
 0x547   : > { %v2518_v8 = vsub.f32 0.0, %v2502_v61  ;;  %v2825_v19 = vmul.f32 0.25, %v2798_v9  ;;  %v10755_v1 = vpop.f32.mrf.mxu2  ;;  %v10759_v38 = vpop.permute.xlu2 %3595 }
 0x548   : > { %v3679_v16 = vpop.permute.xlu1 %3678  ;;  %v10769_v9 = vpop.f32.mrf.mxu0  ;;  %v13124_v32 = vpack.i.bf16 %v10755_v1, %v10737_v42 }
 0x549   : > { %v8329_v21 = vpop.eup %8328  ;;  %v2543_v37 = vmul.f32 1.442695, %v2518_v8  ;;  %v2841_v14 = vsub.f32 0.0, %v2825_v19  ;;  %v3722_v52 = vsel %vm1726_vm3, %v3679_v16, 0  ;;  %v10762_v49 = vpop.permute.xlu0 %3345  ;;  %13113 = vst [vmem:[#allocation36_spill] sm:$0xff] %v10769_v9 }
 0x54a   : > { %v8331_v17 = vpop.eup %8330  ;;  %v2565_v20 = vadd.f32 1.0, %v8329_v21  ;;  %7239 = vmatmul.msk.bf16.gmra.mxu3 %vm1726_vm3, %v10647_v45 }
 0x54b   : > { %v8333_v62 = vpop.eup %8332  ;;  %7201 = vst [vmem:[%s10180_s16 + $0x138] sm:$0xff] %v8331_v17  ;;  %8336 = vpow2.f32 %v2543_v37  ;;  %v2866_v57 = vmul.f32 1.442695, %v2841_v14  ;;  %3740 = vmatpush.bf16.xpose.msrb.mxu3 %v3722_v52  ;;  %4063 = vmatpush.bf16.xpose.msra.mxu1 %v4045_v48  ;;  %v2609_v59 = vpack.c.bf16 %v8331_v17, %v8323_v12 }
 0x54c   : > { %v8335_v61 = vpop.eup %8334  ;;  %8338 = vrcp.f32 %v2565_v20  ;;  %v2888_v8 = vadd.f32 1.0, %v8333_v62  ;;  %v2478_v19 = vpop.f32.mrf.mxu3 }
 0x54d   : > { %7225 = vst [vmem:[%s10180_s16 + $0x1b8] sm:$0xff] %v8335_v61  ;;  %8340 = vpow2.f32 %v2866_v57  ;;  %v2503_v43 = vmul.f32 0.25, %v2478_v19  ;;  %2661 = vmatmul.bf16.gmra.mxu0 %v2609_v59  ;;  %3918 = vrot.lane.b32.xlu2 %v9894_v60, %s13016_s27  ;;  %v2932_v45 = vpack.c.bf16 %v8335_v61, %v8327_v31 }
 0x54e   : > { %8342 = vrcp.f32 %v2888_v8  ;;  %3920 = vrot.lane.b32.xlu1 %v9872_v34, %s13016_s27  ;;  %4239 = vrot.lane.b32.xlu0 %v9907_v18, %s8918_s26  ;;  %v2801_v12 = vpop.f32.mrf.mxu1 }
 0x54f   : > { %v2519_v16 = vsub.f32 0.0, %v2503_v43  ;;  %v2826_v21 = vmul.f32 0.25, %v2801_v12  ;;  %v10778_v37 = vpop.f32.mrf.mxu2  ;;  %2984 = vmatmul.bf16.gmra.mxu2 %v2932_v45  ;;  %v10780_v14 = vpop.permute.xlu2 %3272 }
 0x550   : > { %v3677_v52 = vpop.permute.xlu1 %3676  ;;  %v10790_v12 = vpop.f32.mrf.mxu0 }
 0x551   : > { %v8337_v17 = vpop.eup %8336  ;;  %v2545_v60 = vmul.f32 1.442695, %v2519_v16  ;;  %v2842_v31 = vsub.f32 0.0, %v2826_v21  ;;  %v3719_v48 = vsel %vm1726_vm3, %v3677_v52, 0  ;;  %v4000_v34 = vpop.permute.xlu0 %3999  ;;  %13114 = vst [vmem:[#allocation37_spill] sm:$0xff] %v10790_v12 }
 0x552   : > { %v8339_v20 = vpop.eup %8338  ;;  %v2566_v62 = vadd.f32 1.0, %v8337_v17  ;;  %v4042_v57 = vsel %vm1726_vm3, %v4000_v34, 0  ;;  %7263 = vmatmul.msk.bf16.gmra.mxu1 %vm1726_vm3, %v10720_v10 }
 0x553   : > { %v8341_v59 = vpop.eup %8340  ;;  %7202 = vst [vmem:[%s10180_s16 + $0x140] sm:$0xff] %v8339_v20  ;;  %8344 = vpow2.f32 %v2545_v60  ;;  %v2868_v61 = vmul.f32 1.442695, %v2842_v31  ;;  %3741 = vmatpush.bf16.xpose.msrb.mxu3 %v3719_v48  ;;  %4064 = vmatpush.bf16.xpose.msra.mxu1 %v4042_v57 }
 0x554   : > { %v8343_v8 = vpop.eup %8342  ;;  %8346 = vrcp.f32 %v2566_v62  ;;  %v2889_v19 = vadd.f32 1.0, %v8341_v59  ;;  %v2480_v43 = vpop.f32.mrf.mxu3 }
 0x555   : > { %7226 = vst [vmem:[%s10180_s16 + $0x1c0] sm:$0xff] %v8343_v8  ;;  %8348 = vpow2.f32 %v2868_v61  ;;  %v2504_v45 = vmul.f32 0.25, %v2480_v43  ;;  %4235 = vrot.lane.b32.xlu2 %v9942_v15, %s8918_s26  ;;  %v4039_v61 = vsel %vm1726_vm3, %v10739_v36, 0 }
 0x556   : > { %8350 = vrcp.f32 %v2889_v19  ;;  %4237 = vrot.lane.b32.xlu1 %v9928_v5, %s8918_s26  ;;  %3916 = vrot.lane.b32.xlu0 %v9907_v18, %s13016_s27  ;;  %v2803_v10 = vpop.f32.mrf.mxu1 }
 0x557   : > { %v2520_v16 = vsub.f32 0.0, %v2504_v45  ;;  %v2827_v21 = vmul.f32 0.25, %v2803_v10  ;;  %v10796_v52 = vpop.f32.mrf.mxu2  ;;  %v3598_v60 = vpop.permute.xlu2 %3597 }
 0x558   : > { %v3675_v31 = vpop.permute.xlu1 %3674  ;;  %3607 = vmatpush.bf16.msrb.mxu2 %v3598_v60 }
 0x559   : > { %v8345_v48 = vpop.eup %8344  ;;  %v2547_v34 = vmul.f32 1.442695, %v2520_v16  ;;  %v2843_v62 = vsub.f32 0.0, %v2827_v21  ;;  %v3716_v57 = vsel %vm1726_vm3, %v3675_v31, 0  ;;  %v10801_v59 = vpop.permute.xlu0 %3347 }
 0x55a   : > { %v8347_v18 = vpop.eup %8346  ;;  %v2567_v19 = vadd.f32 1.0, %v8345_v48  ;;  %7240 = vmatmul.msk.bf16.gmra.mxu3 %vm1726_vm3, %v10682_v27 }
 0x55b   : > { %v8349_v43 = vpop.eup %8348  ;;  %7203 = vst [vmem:[%s10180_s16 + $0x148] sm:$0xff] %v8347_v18  ;;  %8352 = vpow2.f32 %v2547_v34  ;;  %v2870_v45 = vmul.f32 1.442695, %v2843_v62  ;;  %3742 = vmatpush.bf16.xpose.msrb.mxu3 %v3716_v57  ;;  %4065 = vmatpush.bf16.xpose.msra.mxu1 %v4039_v61  ;;  %v2610_v10 = vpack.c.bf16 %v8347_v18, %v8339_v20  ;;  %v10816_v34 = vpop.f32.mrf.mxu0 }
 0x55c   : > { %v8351_v16 = vpop.eup %8350  ;;  %8354 = vrcp.f32 %v2567_v19  ;;  %v2890_v21 = vadd.f32 1.0, %v8349_v43  ;;  %v2483_v60 = vpop.f32.mrf.mxu3  ;;  %3608 = vmatpush.bf16.msrb.mxu2 %v10759_v38  ;;  %13115 = vst [vmem:[#allocation38_spill] sm:$0xff] %v10816_v34 }
 0x55d   : > { %7227 = vst [vmem:[%s10180_s16 + $0x1c8] sm:$0xff] %v8351_v16  ;;  %8356 = vpow2.f32 %v2870_v45  ;;  %v2505_v31 = vmul.f32 0.25, %v2483_v60  ;;  %2666 = vmatmul.bf16.gmra.mxu0 %v2610_v10  ;;  %v2933_v36 = vpack.c.bf16 %v8351_v16, %v8343_v8  ;;  %3912 = vrot.lane.b32.xlu2 %v9942_v15, %s13016_s27 }
 0x55e   : > { %8358 = vrcp.f32 %v2890_v21  ;;  %3914 = vrot.lane.b32.xlu1 %v9928_v5, %s13016_s27  ;;  %v2806_v27 = vpop.f32.mrf.mxu1  ;;  %4233 = vrot.lane.b32.xlu0 %v9961_v46, %s8918_s26 }
 0x55f   : > { %v2521_v20 = vsub.f32 0.0, %v2505_v31  ;;  %v2828_v48 = vmul.f32 0.25, %v2806_v27  ;;  %2989 = vmatmul.bf16.gmra.mxu2 %v2933_v36  ;;  %v10825_v16 = vpop.permute.xlu2 %3589 }
 0x560   : > { %v3673_v62 = vpop.permute.xlu1 %3672  ;;  %v10822_v43 = vpop.f32.mrf.mxu2 }
 0x561   : > { %v8353_v38 = vpop.eup %8352  ;;  %v2549_v8 = vmul.f32 1.442695, %v2521_v20  ;;  %v2844_v57 = vsub.f32 0.0, %v2828_v48  ;;  %v3713_v18 = vsel %vm1726_vm3, %v3673_v62, 0  ;;  %v3996_v15 = vpop.permute.xlu0 %3995 }
 0x562   : > { %v8355_v61 = vpop.eup %8354  ;;  %v2568_v5 = vadd.f32 1.0, %v8353_v38  ;;  %v4036_v19 = vsel %vm1726_vm3, %v3996_v15, 0  ;;  %7264 = vmatmul.msk.bf16.gmra.mxu1 %vm1726_vm3, %v10762_v49 }
 0x563   : > { %v8357_v45 = vpop.eup %8356  ;;  %7204 = vst [vmem:[%s10180_s16 + $0x150] sm:$0xff] %v8355_v61  ;;  %8360 = vpow2.f32 %v2549_v8  ;;  %v2872_v10 = vmul.f32 1.442695, %v2844_v57  ;;  %3743 = vmatpush.bf16.xpose.msrb.mxu3 %v3713_v18  ;;  %4066 = vmatpush.bf16.xpose.msra.mxu1 %v4036_v19  ;;  %v10838_v15 = vpop.f32.mrf.mxu0 }
 0x564   : > { %v8359_v21 = vpop.eup %8358  ;;  %8362 = vrcp.f32 %v2568_v5  ;;  %v2891_v60 = vadd.f32 1.0, %v8357_v45  ;;  %v2485_v31 = vpop.f32.mrf.mxu3  ;;  %13116 = vst [vmem:[#allocation39_spill] sm:$0xff] %v10838_v15 }
 0x565   : > { %7228 = vst [vmem:[%s10180_s16 + $0x1d0] sm:$0xff] %v8359_v21  ;;  %8364 = vpow2.f32 %v2872_v10  ;;  %v2506_v36 = vmul.f32 0.25, %v2485_v31  ;;  %4229 = vrot.lane.b32.xlu2 %v9987_v0, %s8918_s26 }
 0x566   : > { %8366 = vrcp.f32 %v2891_v60  ;;  %4231 = vrot.lane.b32.xlu1 %v9970_v35, %s8918_s26  ;;  %v2808_v49 = vpop.f32.mrf.mxu1  ;;  %3910 = vrot.lane.b32.xlu0 %v9961_v46, %s13016_s27 }
 0x567   : > { %v2522_v27 = vsub.f32 0.0, %v2506_v36  ;;  %v2829_v20 = vmul.f32 0.25, %v2808_v49 }
 0x568   : > { %v10834_v48 = vpop.permute.xlu1 %3656  ;;  %v10842_v19 = vpop.f32.mrf.mxu2 }
 0x569   : > { %v8361_v62 = vpop.eup %8360  ;;  %v2551_v38 = vmul.f32 1.442695, %v2522_v27  ;;  %v2845_v8 = vsub.f32 0.0, %v2829_v20  ;;  %v10836_v57 = vpop.permute.xlu0 %3979 }
 0x56a   : > { %v8363_v18 = vpop.eup %8362  ;;  %v2569_v5 = vadd.f32 1.0, %v8361_v62  ;;  %7241 = vmatmul.msk.bf16.gmra.mxu3 %vm1726_vm3, %v10718_v54  ;;  %v10848_v27 = vpop.permute.xlu2 %3981 }
 0x56b   : > { %v8365_v45 = vpop.eup %8364  ;;  %7205 = vst [vmem:[%s10180_s16 + $0x158] sm:$0xff] %v8363_v18  ;;  %8368 = vpow2.f32 %v2551_v38  ;;  %v2874_v46 = vmul.f32 1.442695, %v2845_v8  ;;  %v2611_v60 = vpack.c.bf16 %v8363_v18, %v8355_v61 }
 0x56c   : > { %v8367_v31 = vpop.eup %8366  ;;  %8370 = vrcp.f32 %v2569_v5  ;;  %v2892_v36 = vadd.f32 1.0, %v8365_v45  ;;  %v2488_v49 = vpop.f32.mrf.mxu3 }
 0x56d   : > { %7229 = vst [vmem:[%s10180_s16 + $0x1d8] sm:$0xff] %v8367_v31  ;;  %8372 = vpow2.f32 %v2874_v46  ;;  %v2507_v20 = vmul.f32 0.25, %v2488_v49  ;;  %2671 = vmatmul.bf16.gmra.mxu0 %v2611_v60  ;;  %v2934_v54 = vpack.c.bf16 %v8367_v31, %v8359_v21  ;;  %7789 = vrot.lane.b32.xlu2 %v7788_v39, %s8918_s26  ;;  %v10863_v60 = vpop.f32.mrf.mxu0 }
 0x56e   : > { %8374 = vrcp.f32 %v2892_v36  ;;  %3908 = vrot.lane.b32.xlu1 %v9970_v35, %s13016_s27  ;;  %v2811_v61 = vpop.f32.mrf.mxu1  ;;  %3906 = vrot.lane.b32.xlu0 %v9987_v0, %s13016_s27  ;;  %13117 = vst [vmem:[#allocation40_spill] sm:$0xff] %v10863_v60 }
 0x56f   : > { %v2523_v62 = vsub.f32 0.0, %v2507_v20  ;;  %v2830_v38 = vmul.f32 0.25, %v2811_v61  ;;  %2994 = vmatmul.bf16.gmra.mxu2 %v2934_v54 }
 0x570   : > { %v3592_v8 = vpop.permute.xlu1 %3591  ;;  %v10860_v63 = vpop.f32.mrf.mxu2 }
 0x571   : > { %v8369_v18 = vpop.eup %8368  ;;  %v2553_v21 = vmul.f32 1.442695, %v2523_v62  ;;  %v2846_v5 = vsub.f32 0.0, %v2830_v38  ;;  %v3594_v45 = vpop.permute.xlu0 %3593 }
 0x572   : > { %v8371_v35 = vpop.eup %8370  ;;  %v2570_v46 = vadd.f32 1.0, %v8369_v18  ;;  %7265 = vmatmul.msk.bf16.gmra.mxu1 %vm1726_vm3, %v10801_v59  ;;  %3609 = vmatpush.bf16.msrb.mxu2 %v3594_v45  ;;  %v10866_v59 = vpop.permute.xlu2 %3585 }
 0x573   : > { %v8373_v24 = vpop.eup %8372  ;;  %7206 = vst [vmem:[%s10180_s16 + $0x160] sm:$0xff] %v8371_v35  ;;  %8376 = vpow2.f32 %v2553_v21  ;;  %v2876_v0 = vmul.f32 1.442695, %v2846_v5 }
 0x574   : > { %v8375_v39 = vpop.eup %8374  ;;  %8378 = vrcp.f32 %v2570_v46  ;;  %v2893_v31 = vadd.f32 1.0, %v8373_v24  ;;  %v2490_v36 = vpop.f32.mrf.mxu3 }
 0x575   : > { %7230 = vst [vmem:[%s10180_s16 + $0x1e0] sm:$0xff] %v8375_v39  ;;  %8380 = vpow2.f32 %v2876_v0  ;;  %v2508_v49 = vmul.f32 0.25, %v2490_v36 }
 0x576   : > { %8382 = vrcp.f32 %v2893_v31  ;;  %3610 = vmatpush.bf16.msrb.mxu2 %v3592_v8  ;;  %v2813_v20 = vpop.f32.mrf.mxu1 }
 0x577   : > { %v2524_v54 = vsub.f32 0.0, %v2508_v49  ;;  %v2831_v61 = vmul.f32 0.25, %v2813_v20 }
 0x578   : > { %v3275_v62 = vpop.permute.xlu1 %3274  ;;  %v10871_v8 = vpop.f32.mrf.mxu2 }
 0x579   : > { %v8377_v38 = vpop.eup %8376  ;;  %v2555_v18 = vmul.f32 1.442695, %v2524_v54  ;;  %v2847_v21 = vsub.f32 0.0, %v2831_v61  ;;  %v3271_v5 = vpop.permute.xlu0 %3270  ;;  %3284 = vmatpush.bf16.msrb.mxu0 %v3275_v62 }
 0x57a   : > { %v8379_v45 = vpop.eup %8378  ;;  %v2571_v46 = vadd.f32 1.0, %v8377_v38  ;;  %3611 = vmatpush.bf16.msrb.mxu2 %v10825_v16  ;;  %7282 = vmatmul.msk.bf16.vlgmr.msrb.gmra.mxu3 %vm1726_vm3, %v10834_v48  ;;  %v10877_v61 = vpop.f32.mrf.mxu0 }
 0x57b   : > { %v8381_v24 = vpop.eup %8380  ;;  %7207 = vst [vmem:[%s10180_s16 + $0x168] sm:$0xff] %v8379_v45  ;;  %8384 = vpow2.f32 %v2555_v18  ;;  %v2878_v0 = vmul.f32 1.442695, %v2847_v21  ;;  %v2612_v36 = vpack.c.bf16 %v8379_v45, %v8371_v35  ;;  %v10880_v45 = vpop.permute.xlu2 %3262 }
 0x57c   : > { %v8383_v49 = vpop.eup %8382  ;;  %8386 = vrcp.f32 %v2571_v46  ;;  %v2894_v20 = vadd.f32 1.0, %v8381_v24  ;;  %13118 = vst [vmem:[#allocation41_spill] sm:$0xff] %v10877_v61 }
 0x57d   : > { %7231 = vst [vmem:[%s10180_s16 + $0x1e8] sm:$0xff] %v8383_v49  ;;  %8388 = vpow2.f32 %v2878_v0  ;;  %v3099_v54 = vpop.f32.mrf.mxu3  ;;  %2676 = vmatmul.bf16.gmra.mxu0 %v2612_v36  ;;  %v2935_v16 = vpack.c.bf16 %v8383_v49, %v8375_v39 }
 0x57e   : > { %8390 = vrcp.f32 %v2894_v20  ;;  %v3139_v48 = vmul.f32 0.25, %v3099_v54  ;;  %3285 = vmatpush.bf16.msrb.mxu0 %v10780_v14  ;;  %v3422_v62 = vpop.f32.mrf.mxu1 }
 0x57f   : > { %v3462_v38 = vmul.f32 0.25, %v3422_v62  ;;  %2999 = vmatmul.bf16.gmra.mxu2 %v2935_v16 }
 0x580   : > { %v3155_v18 = vsub.f32 0.0, %v3139_v48  ;;  %v3659_v35 = vpop.permute.xlu1 %3658 }
 0x581   : > { %v8385_v21 = vpop.eup %8384  ;;  %v3478_v46 = vsub.f32 0.0, %v3462_v38  ;;  %v3269_v24 = vpop.permute.xlu0 %3268 }
 0x582   : > { %v8387_v0 = vpop.eup %8386  ;;  %v2572_v39 = vadd.f32 1.0, %v8385_v21  ;;  %v3171_v36 = vmul.f32 1.442695, %v3155_v18  ;;  %3286 = vmatpush.bf16.msrb.mxu0 %v3271_v5  ;;  %7306 = vmatmul.msk.bf16.vlgmr.msra.gmra.mxu1 %vm1726_vm3, %v10836_v57  ;;  %v10884_v14 = vpop.f32.mrf.mxu2 }
 0x583   : > { %v8389_v49 = vpop.eup %8388  ;;  %7208 = vst [vmem:[%s10180_s16 + $0x170] sm:$0xff] %v8387_v0  ;;  %v3494_v20 = vmul.f32 1.442695, %v3478_v46  ;;  %v10888_v18 = vpop.f32.mrf.mxu0 }
 0x584   : > { %v8391_v54 = vpop.eup %8390  ;;  %8392 = vrcp.f32 %v2572_v39  ;;  %v2895_v16 = vadd.f32 1.0, %v8389_v49  ;;  %13119 = vst [vmem:[#allocation42_spill] sm:$0xff] %v10888_v18  ;;  %v10894_v49 = vpop.permute.xlu2 %3983 }
 0x585   : > { %7232 = vst [vmem:[%s10180_s16 + $0x1f0] sm:$0xff] %v8391_v54  ;;  %8394 = vpow2.f32 %v3171_v36  ;;  %v3101_v48 = vpop.f32.mrf.mxu3 }
 0x586   : > { %8396 = vrcp.f32 %v2895_v16  ;;  %v3140_v62 = vmul.f32 0.25, %v3101_v48  ;;  %3287 = vmatpush.bf16.msrb.mxu0 %v3269_v24  ;;  %v3424_v38 = vpop.f32.mrf.mxu1 }
 0x587   : > { %8398 = vpow2.f32 %v3494_v20  ;;  %v3463_v5 = vmul.f32 0.25, %v3424_v38 }
 0x588   : > { %v3156_v57 = vsub.f32 0.0, %v3140_v62  ;;  %v3588_v21 = vpop.permute.xlu1 %3587 }
 0x589   : > { %v3479_v31 = vsub.f32 0.0, %v3463_v5  ;;  %v3267_v10 = vpop.permute.xlu0 %3266  ;;  %3612 = vmatpush.bf16.msrb.mxu2 %v3588_v21 }
 0x58a   : > { %v8393_v46 = vpop.eup %8392  ;;  %v3173_v39 = vmul.f32 1.442695, %v3156_v57  ;;  %3288 = vmatpush.bf16.msrb.mxu0 %v3267_v10  ;;  %7283 = vmatmul.msk.bf16.gmra.mxu3 %vm1726_vm3, %v3659_v35  ;;  %v10891_v36 = vpop.f32.mrf.mxu2 }
 0x58b   : > { %v8395_v24 = vpop.eup %8394  ;;  %7209 = vst [vmem:[%s10180_s16 + $0x178] sm:$0xff] %v8393_v46  ;;  %v3496_v20 = vmul.f32 1.442695, %v3479_v31  ;;  %v2613_v48 = vpack.c.bf16 %v8393_v46, %v8387_v0 }
 0x58c   : > { %v8397_v62 = vpop.eup %8396  ;;  %v3203_v38 = vadd.f32 1.0, %v8395_v24  ;;  %8400 = vpow2.f32 %v3173_v39  ;;  %v10900_v24 = vpop.f32.mrf.mxu0 }
 0x58d   : > { %v8399_v5 = vpop.eup %8398  ;;  %7233 = vst [vmem:[%s10180_s16 + $0x1f8] sm:$0xff] %v8397_v62  ;;  %8402 = vpow2.f32 %v3496_v20  ;;  %v3104_v10 = vpop.f32.mrf.mxu3  ;;  %2681 = vmatmul.bf16.gmra.mxu0 %v2613_v48  ;;  %3613 = vmatpush.bf16.msrb.mxu2 %v10866_v59  ;;  %v2936_v35 = vpack.c.bf16 %v8397_v62, %v8391_v54 }
 0x58e   : > { %8404 = vrcp.f32 %v3203_v38  ;;  %v3526_v57 = vadd.f32 1.0, %v8399_v5  ;;  %v3141_v21 = vmul.f32 0.25, %v3104_v10  ;;  %13120 = vst [vmem:[#allocation43_spill] sm:$0xff] %v10900_v24  ;;  %v10907_v10 = vpop.permute.xlu2 %3664 }
 0x58f   : > { %v3427_v17 = vpop.f32.mrf.mxu1  ;;  %3004 = vmatmul.bf16.gmra.mxu2 %v2936_v35 }
 0x590   : > { %8406 = vrcp.f32 %v3526_v57  ;;  %v3157_v31 = vsub.f32 0.0, %v3141_v21  ;;  %v3464_v16 = vmul.f32 0.25, %v3427_v17  ;;  %v3265_v0 = vpop.permute.xlu1 %3264 }
 0x591   : > { %v3584_v46 = vpop.permute.xlu0 %3583  ;;  %3289 = vmatpush.bf16.msrb.mxu0 %v3265_v0 }
 0x592   : > { %v8401_v39 = vpop.eup %8400  ;;  %v3175_v20 = vmul.f32 1.442695, %v3157_v31  ;;  %v3480_v48 = vsub.f32 0.0, %v3464_v16  ;;  %3614 = vmatpush.bf16.msrb.mxu2 %v3584_v46  ;;  %7307 = vmatmul.msk.bf16.gmra.mxu1 %vm1726_vm3, %v10848_v27  ;;  %v10904_v59 = vpop.f32.mrf.mxu2 }
 0x593   : > { %13121 = vst [vmem:[#allocation44_spill] sm:$0xff] %v10904_v59  ;;  %v8403_v54 = vpop.eup %8402  ;;  %v3204_v62 = vadd.f32 1.0, %v8401_v39 }
 0x594   : > { %v8405_v38 = vpop.eup %8404  ;;  %v3527_v17 = vadd.f32 1.0, %v8403_v54  ;;  %8408 = vpow2.f32 %v3175_v20  ;;  %v3498_v5 = vmul.f32 1.442695, %v3480_v48 }
 0x595   : > { %7242 = vst [vmem:[%s10180_s16 + $0x200] sm:$0xff] %v8405_v38  ;;  %8410 = vrcp.f32 %v3204_v62  ;;  %v3106_v35 = vpop.f32.mrf.mxu3  ;;  %3290 = vmatpush.bf16.msrb.mxu0 %v10880_v45 }
 0x596   : > { %v8407_v16 = vpop.eup %8406  ;;  %8412 = vrcp.f32 %v3527_v17  ;;  %v3142_v57 = vmul.f32 0.25, %v3106_v35  ;;  %v10918_v22 = vpop.permute.xlu2 %3989 }
 0x597   : > { %7266 = vst [vmem:[%s10180_s16 + $0x280] sm:$0xff] %v8407_v16  ;;  %8414 = vpow2.f32 %v3498_v5  ;;  %v3429_v27 = vpop.f32.mrf.mxu1 }
 0x598   : > { %v3158_v21 = vsub.f32 0.0, %v3142_v57  ;;  %v3465_v31 = vmul.f32 0.25, %v3429_v27  ;;  %v3661_v0 = vpop.permute.xlu1 %3660 }
 0x599   : > { %v3261_v46 = vpop.permute.xlu0 %3260 }
 0x59a   : > { %v8409_v39 = vpop.eup %8408  ;;  %v3177_v20 = vmul.f32 1.442695, %v3158_v21  ;;  %v3481_v48 = vsub.f32 0.0, %v3465_v31  ;;  %3291 = vmatpush.bf16.msrb.mxu0 %v3261_v46  ;;  %7284 = vmatmul.msk.bf16.gmra.mxu3 %vm1726_vm3, %v3661_v0  ;;  %v10912_v54 = vpop.f32.mrf.mxu2 }
 0x59b   : > { %13122 = vst [vmem:[#allocation45_spill] sm:$0xff] %v10912_v54  ;;  %v2647_v45 = vpop.f32.mrf.mxu0  ;;  %v8411_v62 = vpop.eup %8410  ;;  %v3205_v17 = vadd.f32 1.0, %v8409_v39 }
 0x59c   : > { %v8413_v35 = vpop.eup %8412  ;;  %7243 = vst [vmem:[%s10180_s16 + $0x208] sm:$0xff] %v8411_v62  ;;  %8416 = vpow2.f32 %v3177_v20  ;;  %v3500_v57 = vmul.f32 1.442695, %v3481_v48  ;;  %v3252_v27 = vpack.c.bf16 %v8411_v62, %v8405_v38 }
 0x59d   : > { %v8415_v3 = vpop.eup %8414  ;;  %7267 = vst [vmem:[%s10180_s16 + $0x288] sm:$0xff] %v8413_v35  ;;  %8418 = vrcp.f32 %v3205_v17  ;;  %v3109_v21 = vpop.f32.mrf.mxu3  ;;  %v3575_v31 = vpack.c.bf16 %v8413_v35, %v8407_v16 }
 0x59e   : > { %v3528_v46 = vadd.f32 1.0, %v8415_v3  ;;  %8420 = vpow2.f32 %v3500_v57  ;;  %v3143_v0 = vmul.f32 0.25, %v3109_v21  ;;  %3292 = vmatmul.bf16.vlgmr.msrb.gmra.mxu0 %v3252_v27 }
 0x59f   : > { %v3432_v39 = vpop.f32.mrf.mxu1  ;;  %3615 = vmatmul.bf16.vlgmr.msrb.gmra.mxu2 %v3575_v31 }
 0x5a0   : > { %8422 = vrcp.f32 %v3528_v46  ;;  %v3159_v5 = vsub.f32 0.0, %v3143_v0  ;;  %v3466_v26 = vmul.f32 0.25, %v3432_v39  ;;  %v3663_v20 = vpop.permute.xlu1 %3662 }
 0x5a1   : > { %v3986_v48 = vpop.permute.xlu0 %3985 }
 0x5a2   : > { %v8417_v38 = vpop.eup %8416  ;;  %v3179_v62 = vmul.f32 1.442695, %v3159_v5  ;;  %v3482_v11 = vsub.f32 0.0, %v3466_v26  ;;  %7308 = vmatmul.msk.bf16.gmra.mxu1 %vm1726_vm3, %v10894_v49  ;;  %v10922_v16 = vpop.f32.mrf.mxu2 }
 0x5a3   : > { %v2649_v3 = vpop.f32.mrf.mxu0  ;;  %v8419_v17 = vpop.eup %8418  ;;  %v3206_v35 = vadd.f32 1.0, %v8417_v38 }
 0x5a4   : > { %v7793_v57 = vpack.i.bf16 %v2649_v3, %v2647_v45  ;;  %v8421_v27 = vpop.eup %8420  ;;  %7244 = vst [vmem:[%s10180_s16 + $0x210] sm:$0xff] %v8419_v17  ;;  %8424 = vpow2.f32 %v3179_v62  ;;  %v3502_v21 = vmul.f32 1.442695, %v3482_v11  ;;  %v10929_v45 = vpop.permute.xlu2 %3670 }
 0x5a5   : > { %8426 = vrcp.f32 %v3206_v35  ;;  %v3529_v31 = vadd.f32 1.0, %v8421_v27  ;;  %v3111_v46 = vpop.f32.mrf.mxu3 }
 0x5a6   : > { %7794 = vrot.lane.b32.xlu1 %v7793_v57, %s13016_s27  ;;  %v8423_v26 = vpop.eup %8422  ;;  %8428 = vpow2.f32 %v3502_v21  ;;  %v3144_v5 = vmul.f32 0.25, %v3111_v46 }
 0x5a7   : > { %7268 = vst [vmem:[%s10180_s16 + $0x290] sm:$0xff] %v8423_v26  ;;  %8430 = vrcp.f32 %v3529_v31  ;;  %v3434_v49 = vpop.f32.mrf.mxu1 }
 0x5a8   : > { %v3160_v0 = vsub.f32 0.0, %v3144_v5  ;;  %v3467_v39 = vmul.f32 0.25, %v3434_v49  ;;  %v10927_v38 = vpop.permute.xlu1 %3987 }
 0x5a9   : > { %v10931_v62 = vpop.permute.xlu0 %3666 }
 0x5aa   : > { %v8425_v11 = vpop.eup %8424  ;;  %v3181_v3 = vmul.f32 1.442695, %v3160_v0  ;;  %v3483_v35 = vsub.f32 0.0, %v3467_v39  ;;  %7285 = vmatmul.msk.bf16.gmra.mxu3 %vm1726_vm3, %v3663_v20  ;;  %v10934_v27 = vpop.f32.mrf.mxu2  ;;  %v13123_v0 = vpack.i.bf16 %v10714_v25, %v10698_v6 }
 0x5ab   : > { %v2652_v57 = vpop.f32.mrf.mxu0  ;;  %v8427_v21 = vpop.eup %8426  ;;  %v3207_v31 = vadd.f32 1.0, %v8425_v11 }
 0x5ac   : > { %v8429_v46 = vpop.eup %8428  ;;  %7245 = vst [vmem:[%s10180_s16 + $0x218] sm:$0xff] %v8427_v21  ;;  %8432 = vpow2.f32 %v3181_v3  ;;  %v3504_v5 = vmul.f32 1.442695, %v3483_v35  ;;  %v3253_v49 = vpack.c.bf16 %v8427_v21, %v8419_v17 }
 0x5ad   : > { %v8431_v51 = vpop.eup %8430  ;;  %8434 = vrcp.f32 %v3207_v31  ;;  %v3530_v2 = vadd.f32 1.0, %v8429_v46  ;;  %v3114_v56 = vpop.f32.mrf.mxu3 }
 0x5ae   : > { %7799 = vrot.lane.b32.xlu1 %v13123_v0, %s8918_s26  ;;  %7269 = vst [vmem:[%s10180_s16 + $0x298] sm:$0xff] %v8431_v51  ;;  %8436 = vpow2.f32 %v3504_v5  ;;  %v3145_v20 = vmul.f32 0.25, %v3114_v56  ;;  %3297 = vmatmul.bf16.gmra.mxu0 %v3253_v49  ;;  %v3576_v39 = vpack.c.bf16 %v8431_v51, %v8423_v26 }
 0x5af   : > { %8438 = vrcp.f32 %v3530_v2  ;;  %v3437_v11 = vpop.f32.mrf.mxu1  ;;  %v4242_v2 = vpop.permute.xlu2 %4241 }
 0x5b0   : > { %v3161_v23 = vsub.f32 0.0, %v3145_v20  ;;  %v3468_v3 = vmul.f32 0.25, %v3437_v11  ;;  %3620 = vmatmul.bf16.gmra.mxu2 %v3576_v39  ;;  %v10942_v17 = vpop.permute.xlu1 %3668 }
 0x5b1   : > { %v10944_v35 = vpop.permute.xlu0 %3991 }
 0x5b2   : > { %v8433_v21 = vpop.eup %8432  ;;  %v3183_v31 = vmul.f32 1.442695, %v3161_v23  ;;  %v3484_v46 = vsub.f32 0.0, %v3468_v3  ;;  %7309 = vmatmul.msk.bf16.gmra.mxu1 %vm1726_vm3, %v3986_v48  ;;  %v10947_v56 = vpop.f32.mrf.mxu2 }
 0x5b3   : > { %v2654_v6 = vpop.f32.mrf.mxu0  ;;  %v8435_v51 = vpop.eup %8434  ;;  %v3208_v25 = vadd.f32 1.0, %v8433_v21 }
 0x5b4   : > { %v7803_v26 = vpack.i.bf16 %v2654_v6, %v2652_v57  ;;  %v8437_v5 = vpop.eup %8436  ;;  %7246 = vst [vmem:[%s10180_s16 + $0x220] sm:$0xff] %v8435_v51  ;;  %8440 = vpow2.f32 %v3183_v31  ;;  %v3506_v49 = vmul.f32 1.442695, %v3484_v46 }
 0x5b5   : > { %v8439_v0 = vpop.eup %8438  ;;  %8442 = vrcp.f32 %v3208_v25  ;;  %v3531_v20 = vadd.f32 1.0, %v8437_v5  ;;  %v3116_v39 = vpop.f32.mrf.mxu3 }
 0x5b6   : > { %7804 = vrot.lane.b32.xlu0 %v7803_v26, %s13016_s27  ;;  %7270 = vst [vmem:[%s10180_s16 + $0x2a0] sm:$0xff] %v8439_v0  ;;  %8444 = vpow2.f32 %v3506_v49  ;;  %v3146_v23 = vmul.f32 0.25, %v3116_v39 }
 0x5b7   : > { %8446 = vrcp.f32 %v3531_v20  ;;  %v3439_v48 = vpop.f32.mrf.mxu1 }
 0x5b8   : > { %v3162_v11 = vsub.f32 0.0, %v3146_v23  ;;  %v3469_v3 = vmul.f32 0.25, %v3439_v48  ;;  %v10952_v21 = vpop.permute.xlu1 %3993 }
 0x5b9   : > { %v4244_v57 = vpop.permute.xlu0 %4243 }
 0x5ba   : > { %v8441_v6 = vpop.eup %8440  ;;  %v3185_v31 = vmul.f32 1.442695, %v3162_v11  ;;  %v3485_v46 = vsub.f32 0.0, %v3469_v3  ;;  %7286 = vmatmul.msk.bf16.gmra.mxu3 %vm1726_vm3, %v10907_v10  ;;  %4253 = vmatpush.bf16.msra.mxu2 %v4244_v57  ;;  %v10958_v26 = vpop.f32.mrf.mxu2 }
 0x5bb   : > { %v10956_v25 = vpop.f32.mrf.mxu0  ;;  %v8443_v5 = vpop.eup %8442  ;;  %v3209_v49 = vadd.f32 1.0, %v8441_v6 }
 0x5bc   : > { %v8445_v39 = vpop.eup %8444  ;;  %7247 = vst [vmem:[%s10180_s16 + $0x228] sm:$0xff] %v8443_v5  ;;  %8448 = vpow2.f32 %v3185_v31  ;;  %v3508_v23 = vmul.f32 1.442695, %v3485_v46  ;;  %v3254_v48 = vpack.c.bf16 %v8443_v5, %v8435_v51  ;;  %v3919_v3 = vpop.permute.xlu2 %3918 }
 0x5bd   : > { %v8447_v11 = vpop.eup %8446  ;;  %8450 = vrcp.f32 %v3209_v49  ;;  %v3532_v10 = vadd.f32 1.0, %v8445_v39  ;;  %v3119_v57 = vpop.f32.mrf.mxu3 }
 0x5be   : > { %7809 = vrot.lane.b32.xlu0 %v13124_v32, %s8918_s26  ;;  %7271 = vst [vmem:[%s10180_s16 + $0x2a8] sm:$0xff] %v8447_v11  ;;  %8452 = vpow2.f32 %v3508_v23  ;;  %v3147_v6 = vmul.f32 0.25, %v3119_v57  ;;  %3302 = vmatmul.bf16.gmra.mxu0 %v3254_v48  ;;  %v3577_v20 = vpack.c.bf16 %v8447_v11, %v8439_v0 }
 0x5bf   : > { %4254 = vmatpush.bf16.msra.mxu2 %v4242_v2  ;;  %8454 = vrcp.f32 %v3532_v10  ;;  %v3442_v31 = vpop.f32.mrf.mxu1  ;;  %v7813_v2 = vpack.i.bf16 %v10934_v27, %v10922_v16 }
 0x5c0   : > { %v3163_v46 = vsub.f32 0.0, %v3147_v6  ;;  %v3470_v51 = vmul.f32 0.25, %v3442_v31  ;;  %3625 = vmatmul.bf16.gmra.mxu2 %v3577_v20  ;;  %v3921_v5 = vpop.permute.xlu1 %3920 }
 0x5c1   : > { %v4240_v49 = vpop.permute.xlu0 %4239  ;;  %3930 = vmatpush.bf16.msra.mxu0 %v3921_v5 }
 0x5c2   : > { %v8449_v39 = vpop.eup %8448  ;;  %v3187_v33 = vmul.f32 1.442695, %v3163_v46  ;;  %v3486_v4 = vsub.f32 0.0, %v3470_v51  ;;  %7310 = vmatmul.msk.bf16.gmra.mxu1 %vm1726_vm3, %v10927_v38  ;;  %v10972_v42 = vpop.f32.mrf.mxu2 }
 0x5c3   : > { %4255 = vmatpush.bf16.msra.mxu2 %v4240_v49  ;;  %v10970_v32 = vpop.f32.mrf.mxu0  ;;  %v8451_v1 = vpop.eup %8450  ;;  %v3210_v0 = vadd.f32 1.0, %v8449_v39 }
 0x5c4   : > { %v8453_v23 = vpop.eup %8452  ;;  %7248 = vst [vmem:[%s10180_s16 + $0x230] sm:$0xff] %v8451_v1  ;;  %8456 = vpow2.f32 %v3187_v33  ;;  %v3510_v48 = vmul.f32 1.442695, %v3486_v4  ;;  %v4236_v6 = vpop.permute.xlu2 %4235 }
 0x5c5   : > { %v8455_v11 = vpop.eup %8454  ;;  %8458 = vrcp.f32 %v3210_v0  ;;  %v3533_v38 = vadd.f32 1.0, %v8453_v23  ;;  %v3121_v10 = vpop.f32.mrf.mxu3  ;;  %3931 = vmatpush.bf16.msra.mxu0 %v3919_v3 }
 0x5c6   : > { %7814 = vrot.lane.b32.xlu0 %v7813_v2, %s8916_s23  ;;  %7272 = vst [vmem:[%s10180_s16 + $0x2b0] sm:$0xff] %v8455_v11  ;;  %8460 = vpow2.f32 %v3510_v48  ;;  %v3148_v57 = vmul.f32 0.25, %v3121_v10 }
 0x5c7   : > { %8462 = vrcp.f32 %v3533_v38  ;;  %v3444_v16 = vpop.f32.mrf.mxu1 }
 0x5c8   : > { %v3164_v27 = vsub.f32 0.0, %v3148_v57  ;;  %v3471_v31 = vmul.f32 0.25, %v3444_v16  ;;  %v4238_v46 = vpop.permute.xlu1 %4237 }
 0x5c9   : > { %v3917_v51 = vpop.permute.xlu0 %3916  ;;  %4256 = vmatpush.bf16.msra.mxu2 %v4238_v46 }
 0x5ca   : > { %v8457_v4 = vpop.eup %8456  ;;  %v3189_v33 = vmul.f32 1.442695, %v3164_v27  ;;  %v3487_v5 = vsub.f32 0.0, %v3471_v31  ;;  %7287 = vmatmul.msk.bf16.gmra.mxu3 %vm1726_vm3, %v10931_v62  ;;  %3932 = vmatpush.bf16.msra.mxu0 %v3917_v51  ;;  %v10985_v49 = vpop.f32.mrf.mxu2 }
 0x5cb   : > { %v10983_v3 = vpop.f32.mrf.mxu0  ;;  %v8459_v39 = vpop.eup %8458  ;;  %v3211_v2 = vadd.f32 1.0, %v8457_v4 }
 0x5cc   : > { %v8461_v23 = vpop.eup %8460  ;;  %7249 = vst [vmem:[%s10180_s16 + $0x238] sm:$0xff] %v8459_v39  ;;  %8464 = vpow2.f32 %v3189_v33  ;;  %v3512_v48 = vmul.f32 1.442695, %v3487_v5  ;;  %v3255_v38 = vpack.c.bf16 %v8459_v39, %v8451_v1  ;;  %v3913_v33 = vpop.permute.xlu2 %3912 }
 0x5cd   : > { %v8463_v10 = vpop.eup %8462  ;;  %8466 = vrcp.f32 %v3211_v2  ;;  %v3534_v57 = vadd.f32 1.0, %v8461_v23  ;;  %v3124_v62 = vpop.f32.mrf.mxu3  ;;  %4257 = vmatpush.bf16.msra.mxu2 %v4236_v6 }
 0x5ce   : > { %7273 = vst [vmem:[%s10180_s16 + $0x2b8] sm:$0xff] %v8463_v10  ;;  %8468 = vpow2.f32 %v3512_v48  ;;  %v3149_v16 = vmul.f32 0.25, %v3124_v62  ;;  %3307 = vmatmul.bf16.gmra.mxu0 %v3255_v38  ;;  %v3578_v27 = vpack.c.bf16 %v8463_v10, %v8455_v11 }
 0x5cf   : > { %8470 = vrcp.f32 %v3534_v57  ;;  %v3447_v31 = vpop.f32.mrf.mxu1 }
 0x5d0   : > { %v3165_v46 = vsub.f32 0.0, %v3149_v16  ;;  %v3472_v51 = vmul.f32 0.25, %v3447_v31  ;;  %3630 = vmatmul.bf16.gmra.mxu2 %v3578_v27  ;;  %v3915_v4 = vpop.permute.xlu1 %3914 }
 0x5d1   : > { %v4234_v5 = vpop.permute.xlu0 %4233  ;;  %3933 = vmatpush.bf16.msra.mxu0 %v3915_v4 }
 0x5d2   : > { %v8465_v1 = vpop.eup %8464  ;;  %v3191_v39 = vmul.f32 1.442695, %v3165_v46  ;;  %v3488_v2 = vsub.f32 0.0, %v3472_v51  ;;  %7311 = vmatmul.msk.bf16.gmra.mxu1 %vm1726_vm3, %v10918_v22  ;;  %4258 = vmatpush.bf16.msra.mxu2 %v4234_v5  ;;  %v10995_v11 = vpop.f32.mrf.mxu2 }
 0x5d3   : > { %v10993_v6 = vpop.f32.mrf.mxu0  ;;  %v8467_v23 = vpop.eup %8466  ;;  %v3212_v48 = vadd.f32 1.0, %v8465_v1 }
 0x5d4   : > { %v8469_v10 = vpop.eup %8468  ;;  %7250 = vst [vmem:[%s10180_s16 + $0x240] sm:$0xff] %v8467_v23  ;;  %8472 = vpow2.f32 %v3191_v39  ;;  %v3514_v57 = vmul.f32 1.442695, %v3488_v2 }
 0x5d5   : > { %v8471_v62 = vpop.eup %8470  ;;  %8474 = vrcp.f32 %v3212_v48  ;;  %v3535_v16 = vadd.f32 1.0, %v8469_v10  ;;  %v3126_v27 = vpop.f32.mrf.mxu3  ;;  %3934 = vmatpush.bf16.msra.mxu0 %v3913_v33 }
 0x5d6   : > { %7274 = vst [vmem:[%s10180_s16 + $0x2c0] sm:$0xff] %v8471_v62  ;;  %8476 = vpow2.f32 %v3514_v57  ;;  %v3150_v22 = vmul.f32 0.25, %v3126_v27  ;;  %v4230_v27 = vpop.permute.xlu2 %4229 }
 0x5d7   : > { %8478 = vrcp.f32 %v3535_v16  ;;  %v3449_v31 = vpop.f32.mrf.mxu1 }
 0x5d8   : > { %v3166_v46 = vsub.f32 0.0, %v3150_v22  ;;  %v3473_v51 = vmul.f32 0.25, %v3449_v31  ;;  %v4232_v4 = vpop.permute.xlu1 %4231 }
 0x5d9   : > { %v3911_v5 = vpop.permute.xlu0 %3910  ;;  %4259 = vmatpush.bf16.msra.mxu2 %v4232_v4 }
 0x5da   : > { %v8473_v1 = vpop.eup %8472  ;;  %v3193_v38 = vmul.f32 1.442695, %v3166_v46  ;;  %v3489_v39 = vsub.f32 0.0, %v3473_v51  ;;  %7288 = vmatmul.msk.bf16.gmra.mxu3 %vm1726_vm3, %v10942_v17  ;;  %3935 = vmatpush.bf16.msra.mxu0 %v3911_v5  ;;  %v11005_v33 = vpop.f32.mrf.mxu2 }
 0x5db   : > { %v11003_v2 = vpop.f32.mrf.mxu0  ;;  %v8475_v48 = vpop.eup %8474  ;;  %v3213_v10 = vadd.f32 1.0, %v8473_v1 }
 0x5dc   : > { %v8477_v16 = vpop.eup %8476  ;;  %7251 = vst [vmem:[%s10180_s16 + $0x248] sm:$0xff] %v8475_v48  ;;  %8480 = vpow2.f32 %v3193_v38  ;;  %v3516_v22 = vmul.f32 1.442695, %v3489_v39  ;;  %v3256_v31 = vpack.c.bf16 %v8475_v48, %v8467_v23 }
 0x5dd   : > { %v8479_v46 = vpop.eup %8478  ;;  %8482 = vrcp.f32 %v3213_v10  ;;  %v3536_v17 = vadd.f32 1.0, %v8477_v16  ;;  %v3129_v51 = vpop.f32.mrf.mxu3  ;;  %4260 = vmatpush.bf16.msra.mxu2 %v4230_v27 }
 0x5de   : > { %7275 = vst [vmem:[%s10180_s16 + $0x2c8] sm:$0xff] %v8479_v46  ;;  %8484 = vpow2.f32 %v3516_v22  ;;  %v3151_v4 = vmul.f32 0.25, %v3129_v51  ;;  %3312 = vmatmul.bf16.gmra.mxu0 %v3256_v31  ;;  %v3579_v5 = vpack.c.bf16 %v8479_v46, %v8471_v62 }
 0x5df   : > { %8486 = vrcp.f32 %v3536_v17  ;;  %v3452_v1 = vpop.f32.mrf.mxu1 }
 0x5e0   : > { %v3167_v20 = vsub.f32 0.0, %v3151_v4  ;;  %v3474_v57 = vmul.f32 0.25, %v3452_v1  ;;  %3635 = vmatmul.bf16.gmra.mxu2 %v3579_v5  ;;  %v3909_v0 = vpop.permute.xlu1 %3908 }
 0x5e1   : > { %3936 = vmatpush.bf16.msra.mxu0 %v3909_v0  ;;  %v3907_v31 = vpop.permute.xlu0 %3906 }
 0x5e2   : > { %v8481_v38 = vpop.eup %8480  ;;  %v3195_v23 = vmul.f32 1.442695, %v3167_v20  ;;  %v3490_v39 = vsub.f32 0.0, %v3474_v57  ;;  %7312 = vmatmul.msk.bf16.gmra.mxu1 %vm1726_vm3, %v10944_v35  ;;  %v11015_v10 = vpop.f32.mrf.mxu2 }
 0x5e3   : > { %v11013_v48 = vpop.f32.mrf.mxu0  ;;  %v8483_v62 = vpop.eup %8482  ;;  %v3214_v16 = vadd.f32 1.0, %v8481_v38 }
 0x5e4   : > { %v8485_v22 = vpop.eup %8484  ;;  %7252 = vst [vmem:[%s10180_s16 + $0x250] sm:$0xff] %v8483_v62  ;;  %8488 = vpow2.f32 %v3195_v23  ;;  %v3518_v0 = vmul.f32 1.442695, %v3490_v39 }
 0x5e5   : > { %v8487_v20 = vpop.eup %8486  ;;  %8490 = vrcp.f32 %v3214_v16  ;;  %v3537_v57 = vadd.f32 1.0, %v8485_v22  ;;  %v3131_v46 = vpop.f32.mrf.mxu3  ;;  %3937 = vmatpush.bf16.msra.mxu0 %v3907_v31 }
 0x5e6   : > { %7276 = vst [vmem:[%s10180_s16 + $0x2d0] sm:$0xff] %v8487_v20  ;;  %8492 = vpow2.f32 %v3518_v0  ;;  %v3152_v35 = vmul.f32 0.25, %v3131_v46 }
 0x5e7   : > { %8494 = vrcp.f32 %v3537_v57  ;;  %v3454_v17 = vpop.f32.mrf.mxu1 }
 0x5e8   : > { %v3168_v51 = vsub.f32 0.0, %v3152_v35  ;;  %v3475_v4 = vmul.f32 0.25, %v3454_v17 }
 0x5ea   : > { %v8489_v5 = vpop.eup %8488  ;;  %v3197_v1 = vmul.f32 1.442695, %v3168_v51  ;;  %v3491_v38 = vsub.f32 0.0, %v3475_v4  ;;  %7289 = vmatmul.msk.bf16.gmra.mxu3 %vm1726_vm3, %v10929_v45  ;;  %v11025_v39 = vpop.f32.mrf.mxu2 }
 0x5eb   : > { %v11023_v23 = vpop.f32.mrf.mxu0  ;;  %v8491_v16 = vpop.eup %8490  ;;  %v3215_v22 = vadd.f32 1.0, %v8489_v5 }
 0x5ec   : > { %v8493_v31 = vpop.eup %8492  ;;  %7253 = vst [vmem:[%s10180_s16 + $0x258] sm:$0xff] %v8491_v16  ;;  %8496 = vpow2.f32 %v3197_v1  ;;  %v3520_v57 = vmul.f32 1.442695, %v3491_v38  ;;  %v3257_v46 = vpack.c.bf16 %v8491_v16, %v8483_v62 }
 0x5ed   : > { %v8495_v35 = vpop.eup %8494  ;;  %8498 = vrcp.f32 %v3215_v22  ;;  %v3538_v17 = vadd.f32 1.0, %v8493_v31  ;;  %v3134_v51 = vpop.f32.mrf.mxu3 }
 0x5ee   : > { %7277 = vst [vmem:[%s10180_s16 + $0x2d8] sm:$0xff] %v8495_v35  ;;  %8500 = vpow2.f32 %v3520_v57  ;;  %v3153_v45 = vmul.f32 0.25, %v3134_v51  ;;  %3317 = vmatmul.bf16.gmra.mxu0 %v3257_v46  ;;  %v3580_v4 = vpack.c.bf16 %v8495_v35, %v8487_v20 }
 0x5ef   : > { %8502 = vrcp.f32 %v3538_v17  ;;  %v3457_v5 = vpop.f32.mrf.mxu1 }
 0x5f0   : > { %v3169_v27 = vsub.f32 0.0, %v3153_v45  ;;  %v3476_v13 = vmul.f32 0.25, %v3457_v5  ;;  %3640 = vmatmul.bf16.gmra.mxu2 %v3580_v4 }
 0x5f2   : > { %v8497_v0 = vpop.eup %8496  ;;  %v3199_v30 = vmul.f32 1.442695, %v3169_v27  ;;  %v3492_v1 = vsub.f32 0.0, %v3476_v13  ;;  %7313 = vmatmul.msk.bf16.gmra.mxu1 %vm1726_vm3, %v10952_v21  ;;  %v11035_v38 = vpop.f32.mrf.mxu2 }
 0x5f3   : > { %v11033_v62 = vpop.f32.mrf.mxu0  ;;  %v8499_v16 = vpop.eup %8498  ;;  %v3216_v22 = vadd.f32 1.0, %v8497_v0 }
 0x5f4   : > { %v8501_v31 = vpop.eup %8500  ;;  %7254 = vst [vmem:[%s10180_s16 + $0x260] sm:$0xff] %v8499_v16  ;;  %8504 = vpow2.f32 %v3199_v30  ;;  %v3522_v57 = vmul.f32 1.442695, %v3492_v1 }
 0x5f5   : > { %v8503_v46 = vpop.eup %8502  ;;  %8506 = vrcp.f32 %v3216_v22  ;;  %v3539_v27 = vadd.f32 1.0, %v8501_v31  ;;  %v3136_v13 = vpop.f32.mrf.mxu3 }
 0x5f6   : > { %7278 = vst [vmem:[%s10180_s16 + $0x2e0] sm:$0xff] %v8503_v46  ;;  %8508 = vpow2.f32 %v3522_v57  ;;  %v3154_v21 = vmul.f32 0.25, %v3136_v13 }
 0x5f7   : > { %8510 = vrcp.f32 %v3539_v27  ;;  %v3459_v35 = vpop.f32.mrf.mxu1 }
 0x5f8   : > { %v3170_v17 = vsub.f32 0.0, %v3154_v21  ;;  %v3477_v51 = vmul.f32 0.25, %v3459_v35 }
 0x5fa   : > { %v8505_v0 = vpop.eup %8504  ;;  %v3201_v45 = vmul.f32 1.442695, %v3170_v17  ;;  %v3493_v4 = vsub.f32 0.0, %v3477_v51  ;;  %v11043_v30 = vpop.f32.mrf.mxu2 }
 0x5fb   : > { %v11041_v5 = vpop.f32.mrf.mxu0  ;;  %v8507_v1 = vpop.eup %8506  ;;  %v3217_v22 = vadd.f32 1.0, %v8505_v0 }
 0x5fc   : > { %v8509_v20 = vpop.eup %8508  ;;  %7255 = vst [vmem:[%s10180_s16 + $0x268] sm:$0xff] %v8507_v1  ;;  %8512 = vpow2.f32 %v3201_v45  ;;  %v3524_v57 = vmul.f32 1.442695, %v3493_v4  ;;  %v3258_v27 = vpack.c.bf16 %v8507_v1, %v8499_v16 }
 0x5fd   : > { %v8511_v13 = vpop.eup %8510  ;;  %8514 = vrcp.f32 %v3217_v22  ;;  %v3540_v21 = vadd.f32 1.0, %v8509_v20  ;;  %v3745_v35 = vpop.f32.mrf.mxu3 }
 0x5fe   : > { %7279 = vst [vmem:[%s10180_s16 + $0x2e8] sm:$0xff] %v8511_v13  ;;  %8516 = vpow2.f32 %v3524_v57  ;;  %v3785_v17 = vmul.f32 0.25, %v3745_v35  ;;  %3322 = vmatmul.bf16.gmra.mxu0 %v3258_v27  ;;  %v3581_v51 = vpack.c.bf16 %v8511_v13, %v8503_v46 }
 0x5ff   : > { %8518 = vrcp.f32 %v3540_v21  ;;  %v4068_v0 = vpop.f32.mrf.mxu1 }
 0x600   : > { %v3801_v55 = vsub.f32 0.0, %v3785_v17  ;;  %v4108_v47 = vmul.f32 0.25, %v4068_v0  ;;  %3645 = vmatmul.bf16.gmra.mxu2 %v3581_v51 }
 0x602   : > { %v8513_v31 = vpop.eup %8512  ;;  %v3817_v45 = vmul.f32 1.442695, %v3801_v55  ;;  %v4124_v4 = vsub.f32 0.0, %v4108_v47  ;;  %v11051_v1 = vpop.f32.mrf.mxu2 }
 0x603   : > { %v11049_v16 = vpop.f32.mrf.mxu0  ;;  %v8515_v20 = vpop.eup %8514  ;;  %v3218_v22 = vadd.f32 1.0, %v8513_v31 }
 0x604   : > { %v8517_v27 = vpop.eup %8516  ;;  %7256 = vst [vmem:[%s10180_s16 + $0x270] sm:$0xff] %v8515_v20  ;;  %8520 = vpow2.f32 %v3817_v45  ;;  %v4140_v46 = vmul.f32 1.442695, %v4124_v4 }
 0x605   : > { %v8519_v13 = vpop.eup %8518  ;;  %8522 = vrcp.f32 %v3218_v22  ;;  %v3541_v21 = vadd.f32 1.0, %v8517_v27  ;;  %v3747_v35 = vpop.f32.mrf.mxu3 }
 0x606   : > { %7280 = vst [vmem:[%s10180_s16 + $0x2f0] sm:$0xff] %v8519_v13  ;;  %8524 = vpow2.f32 %v4140_v46  ;;  %v3786_v55 = vmul.f32 0.25, %v3747_v35 }
 0x607   : > { %8526 = vrcp.f32 %v3541_v21  ;;  %v4070_v47 = vpop.f32.mrf.mxu1 }
 0x608   : > { %v3802_v17 = vsub.f32 0.0, %v3786_v55  ;;  %v4109_v51 = vmul.f32 0.25, %v4070_v47 }
 0x60a   : > { %v8521_v31 = vpop.eup %8520  ;;  %v3819_v0 = vmul.f32 1.442695, %v3802_v17  ;;  %v4125_v57 = vsub.f32 0.0, %v4109_v51  ;;  %v11059_v45 = vpop.f32.mrf.mxu2 }
 0x60b   : > { %v11057_v29 = vpop.f32.mrf.mxu0  ;;  %v8523_v4 = vpop.eup %8522  ;;  %v3849_v22 = vadd.f32 1.0, %v8521_v31 }
 0x60c   : > { %13125 = vst [vmem:[#allocation46_spill] sm:$0xff] %v11057_v29  ;;  %v8525_v18 = vpop.eup %8524  ;;  %8528 = vpow2.f32 %v3819_v0  ;;  %v4142_v46 = vmul.f32 1.442695, %v4125_v57  ;;  %v3259_v21 = vpack.c.bf16 %v8523_v4, %v8515_v20 }
 0x60d   : > { %7257 = vst [vmem:[%s10180_s16 + $0x278] sm:$0xff] %v8523_v4  ;;  %v8527_v35 = vpop.eup %8526  ;;  %8530 = vrcp.f32 %v3849_v22  ;;  %v4172_v55 = vadd.f32 1.0, %v8525_v18  ;;  %v3750_v47 = vpop.f32.mrf.mxu3 }
 0x60e   : > { %7281 = vst [vmem:[%s10180_s16 + $0x2f8] sm:$0xff] %v8527_v35  ;;  %8532 = vpow2.f32 %v4142_v46  ;;  %v3787_v17 = vmul.f32 0.25, %v3750_v47  ;;  %3327 = vmatmul.bf16.gmra.mxu0 %v3259_v21  ;;  %v3582_v51 = vpack.c.bf16 %v8527_v35, %v8519_v13 }
 0x60f   : > { %8534 = vrcp.f32 %v4172_v55  ;;  %v4073_v31 = vpop.f32.mrf.mxu1 }
 0x610   : > { %v3803_v24 = vsub.f32 0.0, %v3787_v17  ;;  %v4110_v60 = vmul.f32 0.25, %v4073_v31  ;;  %3650 = vmatmul.bf16.gmra.mxu2 %v3582_v51 }
 0x612   : > { %v8529_v27 = vpop.eup %8528  ;;  %v3821_v0 = vmul.f32 1.442695, %v3803_v24  ;;  %v4126_v57 = vsub.f32 0.0, %v4110_v60  ;;  %v11067_v4 = vpop.f32.mrf.mxu2 }
 0x613   : > { %v11065_v20 = vpop.f32.mrf.mxu0  ;;  %13127 = vst [vmem:[#allocation48_spill] sm:$0xff] %v11067_v4  ;;  %v8531_v18 = vpop.eup %8530  ;;  %v3850_v22 = vadd.f32 1.0, %v8529_v27 }
 0x614   : > { %13126 = vst [vmem:[#allocation47_spill] sm:$0xff] %v11065_v20  ;;  %v8533_v21 = vpop.eup %8532  ;;  %8536 = vpow2.f32 %v3821_v0  ;;  %v4144_v13 = vmul.f32 1.442695, %v4126_v57 }
 0x615   : > { %7290 = vst [vmem:[%s10180_s16 + $0x300] sm:$0xff] %v8531_v18  ;;  %v8535_v35 = vpop.eup %8534  ;;  %8538 = vrcp.f32 %v3850_v22  ;;  %v4173_v55 = vadd.f32 1.0, %v8533_v21  ;;  %v3752_v47 = vpop.f32.mrf.mxu3 }
 0x616   : > { %7314 = vst [vmem:[%s10180_s16 + $0x380] sm:$0xff] %v8535_v35  ;;  %8540 = vpow2.f32 %v4144_v13  ;;  %v3788_v60 = vmul.f32 0.25, %v3752_v47 }
 0x617   : > { %8542 = vrcp.f32 %v4173_v55  ;;  %v4075_v24 = vpop.f32.mrf.mxu1 }
 0x618   : > { %v3804_v17 = vsub.f32 0.0, %v3788_v60  ;;  %v4111_v51 = vmul.f32 0.25, %v4075_v24 }
 0x61a   : > { %v8537_v27 = vpop.eup %8536  ;;  %v3823_v31 = vmul.f32 1.442695, %v3804_v17  ;;  %v4127_v46 = vsub.f32 0.0, %v4111_v51  ;;  %v11073_v61 = vpop.f32.mrf.mxu2 }
 0x61b   : > { %13128 = vst [vmem:[#allocation49_spill] sm:$0xff] %v11073_v61  ;;  %v8539_v0 = vpop.eup %8538  ;;  %v3851_v57 = vadd.f32 1.0, %v8537_v27  ;;  %v3293_v21 = vpop.f32.mrf.mxu0 }
 0x61c   : > { %v8541_v34 = vpop.eup %8540  ;;  %7291 = vst [vmem:[%s10180_s16 + $0x308] sm:$0xff] %v8539_v0  ;;  %8544 = vpow2.f32 %v3823_v31  ;;  %v4146_v13 = vmul.f32 1.442695, %v4127_v46  ;;  %v3898_v55 = vpack.c.bf16 %v8539_v0, %v8531_v18 }
 0x61d   : > { %v8543_v47 = vpop.eup %8542  ;;  %8546 = vrcp.f32 %v3851_v57  ;;  %v4174_v60 = vadd.f32 1.0, %v8541_v34  ;;  %v3755_v24 = vpop.f32.mrf.mxu3 }
 0x61e   : > { %7315 = vst [vmem:[%s10180_s16 + $0x388] sm:$0xff] %v8543_v47  ;;  %8548 = vpow2.f32 %v4146_v13  ;;  %v3789_v17 = vmul.f32 0.25, %v3755_v24  ;;  %3938 = vmatmul.bf16.vlgmr.msra.gmra.mxu0 %v3898_v55  ;;  %v4221_v51 = vpack.c.bf16 %v8543_v47, %v8535_v35 }
 0x61f   : > { %8550 = vrcp.f32 %v4174_v60  ;;  %v4078_v27 = vpop.f32.mrf.mxu1 }
 0x620   : > { %v3805_v15 = vsub.f32 0.0, %v3789_v17  ;;  %v4112_v22 = vmul.f32 0.25, %v4078_v27  ;;  %4261 = vmatmul.bf16.vlgmr.msra.gmra.mxu2 %v4221_v51 }
 0x622   : > { %v8545_v9 = vpop.eup %8544  ;;  %v3825_v31 = vmul.f32 1.442695, %v3805_v15  ;;  %v4128_v46 = vsub.f32 0.0, %v4112_v22  ;;  %v11079_v18 = vpop.f32.mrf.mxu2 }
 0x623   : > { %v8547_v0 = vpop.eup %8546  ;;  %v3852_v34 = vadd.f32 1.0, %v8545_v9  ;;  %v3295_v57 = vpop.f32.mrf.mxu0 }
 0x624   : > { %v8549_v12 = vpop.eup %8548  ;;  %7292 = vst [vmem:[%s10180_s16 + $0x310] sm:$0xff] %v8547_v0  ;;  %8552 = vpow2.f32 %v3825_v31  ;;  %v4148_v13 = vmul.f32 1.442695, %v4128_v46  ;;  %v7818_v55 = vpack.i.bf16 %v3295_v57, %v3293_v21 }
 0x625   : > { %v8551_v35 = vpop.eup %8550  ;;  %8554 = vrcp.f32 %v3852_v34  ;;  %v4175_v47 = vadd.f32 1.0, %v8549_v12  ;;  %v3757_v60 = vpop.f32.mrf.mxu3 }
 0x626   : > { %7316 = vst [vmem:[%s10180_s16 + $0x390] sm:$0xff] %v8551_v35  ;;  %8556 = vpow2.f32 %v4148_v13  ;;  %v3790_v24 = vmul.f32 0.25, %v3757_v60  ;;  %7819 = vrot.lane.b32.xlu2 %v7818_v55, %s13018_s0 }
 0x627   : > { %8558 = vrcp.f32 %v4175_v47  ;;  %v4080_v15 = vpop.f32.mrf.mxu1 }
 0x628   : > { %v3806_v22 = vsub.f32 0.0, %v3790_v24  ;;  %v4113_v9 = vmul.f32 0.25, %v4080_v15  ;;  %v13129_v15 = vpack.i.bf16 %v10958_v26, %v10947_v56 }
 0x62a   : > { %v8553_v17 = vpop.eup %8552  ;;  %v3827_v51 = vmul.f32 1.442695, %v3806_v22  ;;  %v4129_v27 = vsub.f32 0.0, %v4113_v9  ;;  %v11084_v31 = vpop.f32.mrf.mxu2 }
 0x62b   : > { %v8555_v21 = vpop.eup %8554  ;;  %v3853_v46 = vadd.f32 1.0, %v8553_v17  ;;  %v3298_v12 = vpop.f32.mrf.mxu0 }
 0x62c   : > { %v8557_v34 = vpop.eup %8556  ;;  %7293 = vst [vmem:[%s10180_s16 + $0x318] sm:$0xff] %v8555_v21  ;;  %8560 = vpow2.f32 %v3827_v51  ;;  %v4150_v57 = vmul.f32 1.442695, %v4129_v27  ;;  %v3899_v13 = vpack.c.bf16 %v8555_v21, %v8547_v0 }
 0x62d   : > { %v8559_v60 = vpop.eup %8558  ;;  %8562 = vrcp.f32 %v3853_v46  ;;  %v4176_v55 = vadd.f32 1.0, %v8557_v34  ;;  %v3760_v47 = vpop.f32.mrf.mxu3 }
 0x62e   : > { %7317 = vst [vmem:[%s10180_s16 + $0x398] sm:$0xff] %v8559_v60  ;;  %8564 = vpow2.f32 %v4150_v57  ;;  %v3791_v24 = vmul.f32 0.25, %v3760_v47  ;;  %7824 = vrot.lane.b32.xlu2 %v13129_v15, %s8916_s23  ;;  %3943 = vmatmul.bf16.gmra.mxu0 %v3899_v13  ;;  %v4222_v22 = vpack.c.bf16 %v8559_v60, %v8551_v35 }
 0x62f   : > { %8566 = vrcp.f32 %v4176_v55  ;;  %v4083_v9 = vpop.f32.mrf.mxu1 }
 0x630   : > { %v3807_v17 = vsub.f32 0.0, %v3791_v24  ;;  %v4114_v51 = vmul.f32 0.25, %v4083_v9  ;;  %4266 = vmatmul.bf16.gmra.mxu2 %v4222_v22 }
 0x632   : > { %v8561_v0 = vpop.eup %8560  ;;  %v3829_v27 = vmul.f32 1.442695, %v3807_v17  ;;  %v4130_v21 = vsub.f32 0.0, %v4114_v51 }
 0x633   : > { %v8563_v46 = vpop.eup %8562  ;;  %v3854_v34 = vadd.f32 1.0, %v8561_v0  ;;  %v3300_v57 = vpop.f32.mrf.mxu0 }
 0x634   : > { %v11092_v47 = vpop.f32.mrf.mxu2  ;;  %v8565_v58 = vpop.eup %8564  ;;  %7294 = vst [vmem:[%s10180_s16 + $0x320] sm:$0xff] %v8563_v46  ;;  %8568 = vpow2.f32 %v3829_v27  ;;  %v4152_v56 = vmul.f32 1.442695, %v4130_v21  ;;  %v7828_v26 = vpack.i.bf16 %v3300_v57, %v3298_v12  ;;  %v7833_v12 = vpack.i.bf16 %v11084_v31, %v11079_v18 }
 0x635   : > { %v8567_v35 = vpop.eup %8566  ;;  %8570 = vrcp.f32 %v3854_v34  ;;  %v4177_v13 = vadd.f32 1.0, %v8565_v58  ;;  %v3762_v60 = vpop.f32.mrf.mxu3 }
 0x636   : > { %7318 = vst [vmem:[%s10180_s16 + $0x3a0] sm:$0xff] %v8567_v35  ;;  %8572 = vpow2.f32 %v4152_v56  ;;  %v3792_v55 = vmul.f32 0.25, %v3762_v60  ;;  %7829 = vrot.lane.b32.xlu1 %v7828_v26, %s13018_s0 }
 0x637   : > { %8574 = vrcp.f32 %v4177_v13  ;;  %v4085_v24 = vpop.f32.mrf.mxu1 }
 0x638   : > { %v3808_v15 = vsub.f32 0.0, %v3792_v55  ;;  %v4115_v22 = vmul.f32 0.25, %v4085_v24 }
 0x63a   : > { %v8569_v9 = vpop.eup %8568  ;;  %v3831_v17 = vmul.f32 1.442695, %v3808_v15  ;;  %v4131_v51 = vsub.f32 0.0, %v4115_v22 }
 0x63b   : > { %v8571_v0 = vpop.eup %8570  ;;  %v3855_v58 = vadd.f32 1.0, %v8569_v9  ;;  %v11099_v27 = vpop.f32.mrf.mxu0 }
 0x63c   : > { %v11101_v21 = vpop.f32.mrf.mxu2  ;;  %v8573_v34 = vpop.eup %8572  ;;  %7295 = vst [vmem:[%s10180_s16 + $0x328] sm:$0xff] %v8571_v0  ;;  %8576 = vpow2.f32 %v3831_v17  ;;  %v4154_v57 = vmul.f32 1.442695, %v4131_v51  ;;  %v3900_v26 = vpack.c.bf16 %v8571_v0, %v8563_v46 }
 0x63d   : > { %v8575_v13 = vpop.eup %8574  ;;  %8578 = vrcp.f32 %v3855_v58  ;;  %v4178_v60 = vadd.f32 1.0, %v8573_v34  ;;  %v3765_v55 = vpop.f32.mrf.mxu3 }
 0x63e   : > { %7319 = vst [vmem:[%s10180_s16 + $0x3a8] sm:$0xff] %v8575_v13  ;;  %8580 = vpow2.f32 %v4154_v57  ;;  %v3793_v18 = vmul.f32 0.25, %v3765_v55  ;;  %7834 = vrot.lane.b32.xlu1 %v7833_v12, %s8915_s29  ;;  %3948 = vmatmul.bf16.gmra.mxu0 %v3900_v26  ;;  %v4223_v31 = vpack.c.bf16 %v8575_v13, %v8567_v35 }
 0x63f   : > { %8582 = vrcp.f32 %v4178_v60  ;;  %v4088_v24 = vpop.f32.mrf.mxu1 }
 0x640   : > { %v3809_v15 = vsub.f32 0.0, %v3793_v18  ;;  %v4116_v22 = vmul.f32 0.25, %v4088_v24  ;;  %4271 = vmatmul.bf16.gmra.mxu2 %v4223_v31  ;;  %v13130_v18 = vpack.i.bf16 %v10985_v49, %v10972_v42 }
 0x642   : > { %v8577_v9 = vpop.eup %8576  ;;  %v3833_v46 = vmul.f32 1.442695, %v3809_v15  ;;  %v4132_v17 = vsub.f32 0.0, %v4116_v22 }
 0x643   : > { %v8579_v51 = vpop.eup %8578  ;;  %v3856_v0 = vadd.f32 1.0, %v8577_v9  ;;  %v11108_v58 = vpop.f32.mrf.mxu0 }
 0x644   : > { %v11110_v34 = vpop.f32.mrf.mxu2  ;;  %v8581_v57 = vpop.eup %8580  ;;  %7296 = vst [vmem:[%s10180_s16 + $0x330] sm:$0xff] %v8579_v51  ;;  %8584 = vpow2.f32 %v3833_v46  ;;  %v4156_v12 = vmul.f32 1.442695, %v4132_v17 }
 0x645   : > { %v8583_v26 = vpop.eup %8582  ;;  %8586 = vrcp.f32 %v3856_v0  ;;  %v4179_v13 = vadd.f32 1.0, %v8581_v57  ;;  %v3767_v60 = vpop.f32.mrf.mxu3 }
 0x646   : > { %7320 = vst [vmem:[%s10180_s16 + $0x3b0] sm:$0xff] %v8583_v26  ;;  %8588 = vpow2.f32 %v4156_v12  ;;  %v3794_v55 = vmul.f32 0.25, %v3767_v60  ;;  %7864 = vrot.lane.b32.xlu1 %v13130_v18, %s8916_s23 }
 0x647   : > { %8590 = vrcp.f32 %v4179_v13  ;;  %v4090_v31 = vpop.f32.mrf.mxu1 }
 0x648   : > { %v3810_v24 = vsub.f32 0.0, %v3794_v55  ;;  %v4117_v15 = vmul.f32 0.25, %v4090_v31 }
 0x64a   : > { %v8585_v22 = vpop.eup %8584  ;;  %v3835_v9 = vmul.f32 1.442695, %v3810_v24  ;;  %v4133_v46 = vsub.f32 0.0, %v4117_v15 }
 0x64b   : > { %v8587_v17 = vpop.eup %8586  ;;  %v3857_v0 = vadd.f32 1.0, %v8585_v22  ;;  %v11120_v57 = vpop.f32.mrf.mxu0 }
 0x64c   : > { %v11122_v35 = vpop.f32.mrf.mxu2  ;;  %v8589_v12 = vpop.eup %8588  ;;  %7297 = vst [vmem:[%s10180_s16 + $0x338] sm:$0xff] %v8587_v17  ;;  %8592 = vpow2.f32 %v3835_v9  ;;  %v4158_v60 = vmul.f32 1.442695, %v4133_v46  ;;  %v3901_v49 = vpack.c.bf16 %v8587_v17, %v8579_v51 }
 0x64d   : > { %v8591_v13 = vpop.eup %8590  ;;  %8594 = vrcp.f32 %v3857_v0  ;;  %v4180_v55 = vadd.f32 1.0, %v8589_v12  ;;  %v3770_v18 = vpop.f32.mrf.mxu3 }
 0x64e   : > { %7321 = vst [vmem:[%s10180_s16 + $0x3b8] sm:$0xff] %v8591_v13  ;;  %8596 = vpow2.f32 %v4158_v60  ;;  %v3795_v31 = vmul.f32 0.25, %v3770_v18  ;;  %3953 = vmatmul.bf16.gmra.mxu0 %v3901_v49  ;;  %v4224_v24 = vpack.c.bf16 %v8591_v13, %v8583_v26 }
 0x64f   : > { %8598 = vrcp.f32 %v4180_v55  ;;  %v4093_v15 = vpop.f32.mrf.mxu1 }
 0x650   : > { %v3811_v22 = vsub.f32 0.0, %v3795_v31  ;;  %v4118_v56 = vmul.f32 0.25, %v4093_v15  ;;  %4276 = vmatmul.bf16.gmra.mxu2 %v4224_v24 }
 0x652   : > { %v8593_v9 = vpop.eup %8592  ;;  %v3837_v46 = vmul.f32 1.442695, %v3811_v22  ;;  %v4134_v42 = vsub.f32 0.0, %v4118_v56 }
 0x653   : > { %v8595_v51 = vpop.eup %8594  ;;  %v3858_v17 = vadd.f32 1.0, %v8593_v9  ;;  %v11128_v0 = vpop.f32.mrf.mxu0 }
 0x654   : > { %v11130_v12 = vpop.f32.mrf.mxu2  ;;  %v8597_v60 = vpop.eup %8596  ;;  %7298 = vst [vmem:[%s10180_s16 + $0x340] sm:$0xff] %v8595_v51  ;;  %8600 = vpow2.f32 %v3837_v46  ;;  %v4160_v49 = vmul.f32 1.442695, %v4134_v42 }
 0x655   : > { %v8599_v13 = vpop.eup %8598  ;;  %8602 = vrcp.f32 %v3858_v17  ;;  %v4181_v55 = vadd.f32 1.0, %v8597_v60  ;;  %v3772_v18 = vpop.f32.mrf.mxu3 }
 0x656   : > { %7322 = vst [vmem:[%s10180_s16 + $0x3c0] sm:$0xff] %v8599_v13  ;;  %8604 = vpow2.f32 %v4160_v49  ;;  %v3796_v56 = vmul.f32 0.25, %v3772_v18 }
 0x657   : > { %8606 = vrcp.f32 %v4181_v55  ;;  %v4095_v31 = vpop.f32.mrf.mxu1 }
 0x658   : > { %v3812_v24 = vsub.f32 0.0, %v3796_v56  ;;  %v4119_v15 = vmul.f32 0.25, %v4095_v31 }
 0x65a   : > { %v8601_v22 = vpop.eup %8600  ;;  %v3839_v9 = vmul.f32 1.442695, %v3812_v24  ;;  %v4135_v46 = vsub.f32 0.0, %v4119_v15 }
 0x65b   : > { %v8603_v42 = vpop.eup %8602  ;;  %v3859_v44 = vadd.f32 1.0, %v8601_v22  ;;  %v11136_v53 = vpop.f32.mrf.mxu0 }
 0x65c   : > { %v11138_v26 = vpop.f32.mrf.mxu2  ;;  %v8605_v17 = vpop.eup %8604  ;;  %7299 = vst [vmem:[%s10180_s16 + $0x348] sm:$0xff] %v8603_v42  ;;  %8608 = vpow2.f32 %v3839_v9  ;;  %v4162_v60 = vmul.f32 1.442695, %v4135_v46  ;;  %v3902_v55 = vpack.c.bf16 %v8603_v42, %v8595_v51 }
 0x65d   : > { %v8607_v18 = vpop.eup %8606  ;;  %8610 = vrcp.f32 %v3859_v44  ;;  %v4182_v56 = vadd.f32 1.0, %v8605_v17  ;;  %v3775_v31 = vpop.f32.mrf.mxu3 }
 0x65e   : > { %7323 = vst [vmem:[%s10180_s16 + $0x3c8] sm:$0xff] %v8607_v18  ;;  %8612 = vpow2.f32 %v4162_v60  ;;  %v3797_v24 = vmul.f32 0.25, %v3775_v31  ;;  %3958 = vmatmul.bf16.gmra.mxu0 %v3902_v55  ;;  %v4225_v15 = vpack.c.bf16 %v8607_v18, %v8599_v13 }
 0x65f   : > { %8614 = vrcp.f32 %v4182_v56  ;;  %v4098_v22 = vpop.f32.mrf.mxu1 }
 0x660   : > { %v3813_v41 = vsub.f32 0.0, %v3797_v24  ;;  %v4120_v40 = vmul.f32 0.25, %v4098_v22  ;;  %4281 = vmatmul.bf16.gmra.mxu2 %v4225_v15 }
 0x662   : > { %v8609_v9 = vpop.eup %8608  ;;  %v3841_v46 = vmul.f32 1.442695, %v3813_v41  ;;  %v4136_v49 = vsub.f32 0.0, %v4120_v40 }
 0x663   : > { %v8611_v51 = vpop.eup %8610  ;;  %v3860_v42 = vadd.f32 1.0, %v8609_v9  ;;  %v11144_v44 = vpop.f32.mrf.mxu0 }
 0x664   : > { %v11146_v17 = vpop.f32.mrf.mxu2  ;;  %v8613_v60 = vpop.eup %8612  ;;  %7300 = vst [vmem:[%s10180_s16 + $0x350] sm:$0xff] %v8611_v51  ;;  %8616 = vpow2.f32 %v3841_v46  ;;  %v4164_v55 = vmul.f32 1.442695, %v4136_v49 }
 0x665   : > { %v8615_v13 = vpop.eup %8614  ;;  %8618 = vrcp.f32 %v3860_v42  ;;  %v4183_v18 = vadd.f32 1.0, %v8613_v60  ;;  %v3777_v56 = vpop.f32.mrf.mxu3 }
 0x666   : > { %7324 = vst [vmem:[%s10180_s16 + $0x3d0] sm:$0xff] %v8615_v13  ;;  %8620 = vpow2.f32 %v4164_v55  ;;  %v3798_v31 = vmul.f32 0.25, %v3777_v56 }
 0x667   : > { %8622 = vrcp.f32 %v4183_v18  ;;  %v4100_v40 = vpop.f32.mrf.mxu1 }
 0x668   : > { %v3814_v41 = vsub.f32 0.0, %v3798_v31  ;;  %v4121_v24 = vmul.f32 0.25, %v4100_v40 }
 0x66a   : > { %v8617_v15 = vpop.eup %8616  ;;  %v3843_v22 = vmul.f32 1.442695, %v3814_v41  ;;  %v4137_v9 = vsub.f32 0.0, %v4121_v24 }
 0x66b   : > { %v8619_v28 = vpop.eup %8618  ;;  %v3861_v4 = vadd.f32 1.0, %v8617_v15  ;;  %v11150_v46 = vpop.f32.mrf.mxu0 }
 0x66c   : > { %v11152_v49 = vpop.f32.mrf.mxu2  ;;  %v8621_v42 = vpop.eup %8620  ;;  %7301 = vst [vmem:[%s10180_s16 + $0x358] sm:$0xff] %v8619_v28  ;;  %8624 = vpow2.f32 %v3843_v22  ;;  %v4166_v60 = vmul.f32 1.442695, %v4137_v9  ;;  %v3903_v55 = vpack.c.bf16 %v8619_v28, %v8611_v51 }
 0x66d   : > { %v8623_v56 = vpop.eup %8622  ;;  %8626 = vrcp.f32 %v3861_v4  ;;  %v4184_v18 = vadd.f32 1.0, %v8621_v42  ;;  %v3780_v31 = vpop.f32.mrf.mxu3 }
 0x66e   : > { %7325 = vst [vmem:[%s10180_s16 + $0x3d8] sm:$0xff] %v8623_v56  ;;  %8628 = vpow2.f32 %v4166_v60  ;;  %v3799_v40 = vmul.f32 0.25, %v3780_v31  ;;  %3963 = vmatmul.bf16.gmra.mxu0 %v3903_v55  ;;  %v4226_v41 = vpack.c.bf16 %v8623_v56, %v8615_v13 }
 0x66f   : > { %8630 = vrcp.f32 %v4184_v18  ;;  %v4103_v24 = vpop.f32.mrf.mxu1 }
 0x670   : > { %v3815_v15 = vsub.f32 0.0, %v3799_v40  ;;  %v4122_v61 = vmul.f32 0.25, %v4103_v24  ;;  %4286 = vmatmul.bf16.gmra.mxu2 %v4226_v41 }
 0x672   : > { %v8625_v59 = vpop.eup %8624  ;;  %v3845_v22 = vmul.f32 1.442695, %v3815_v15  ;;  %v4138_v9 = vsub.f32 0.0, %v4122_v61 }
 0x673   : > { %v8627_v28 = vpop.eup %8626  ;;  %v3862_v51 = vadd.f32 1.0, %v8625_v59  ;;  %v11156_v4 = vpop.f32.mrf.mxu0 }
 0x674   : > { %v11158_v42 = vpop.f32.mrf.mxu2  ;;  %v8629_v60 = vpop.eup %8628  ;;  %7302 = vst [vmem:[%s10180_s16 + $0x360] sm:$0xff] %v8627_v28  ;;  %8632 = vpow2.f32 %v3845_v22  ;;  %v4168_v55 = vmul.f32 1.442695, %v4138_v9 }
 0x675   : > { %v8631_v13 = vpop.eup %8630  ;;  %8634 = vrcp.f32 %v3862_v51  ;;  %v4185_v56 = vadd.f32 1.0, %v8629_v60  ;;  %v3782_v18 = vpop.f32.mrf.mxu3 }
 0x676   : > { %7326 = vst [vmem:[%s10180_s16 + $0x3e0] sm:$0xff] %v8631_v13  ;;  %8636 = vpow2.f32 %v4168_v55  ;;  %v3800_v31 = vmul.f32 0.25, %v3782_v18 }
 0x677   : > { %8638 = vrcp.f32 %v4185_v56  ;;  %v4105_v61 = vpop.f32.mrf.mxu1 }
 0x678   : > { %v3816_v40 = vsub.f32 0.0, %v3800_v31  ;;  %v4123_v59 = vmul.f32 0.25, %v4105_v61 }
 0x67a   : > { %v8633_v41 = vpop.eup %8632  ;;  %v3847_v24 = vmul.f32 1.442695, %v3816_v40  ;;  %v4139_v15 = vsub.f32 0.0, %v4123_v59 }
 0x67b   : > { %v8635_v54 = vpop.eup %8634  ;;  %v3863_v29 = vadd.f32 1.0, %v8633_v41  ;;  %v11162_v22 = vpop.f32.mrf.mxu0 }
 0x67c   : > { %v11164_v9 = vpop.f32.mrf.mxu2  ;;  %v8637_v51 = vpop.eup %8636  ;;  %7303 = vst [vmem:[%s10180_s16 + $0x368] sm:$0xff] %v8635_v54  ;;  %8640 = vpow2.f32 %v3847_v24  ;;  %v4170_v60 = vmul.f32 1.442695, %v4139_v15  ;;  %v3904_v55 = vpack.c.bf16 %v8635_v54, %v8627_v28 }
 0x67d   : > { %v8639_v56 = vpop.eup %8638  ;;  %8642 = vrcp.f32 %v3863_v29  ;;  %v4186_v18 = vadd.f32 1.0, %v8637_v51 }
 0x67e   : > { %7327 = vst [vmem:[%s10180_s16 + $0x3e8] sm:$0xff] %v8639_v56  ;;  %8644 = vpow2.f32 %v4170_v60  ;;  %3968 = vmatmul.bf16.gmra.mxu0 %v3904_v55  ;;  %v4227_v31 = vpack.c.bf16 %v8639_v56, %v8631_v13 }
 0x67f   : > { %8646 = vrcp.f32 %v4186_v18 }
 0x680   : > { %4291 = vmatmul.bf16.gmra.mxu2 %v4227_v31 }
 0x682   : > { %v8641_v61 = vpop.eup %8640 }
 0x683   : > { %v8643_v40 = vpop.eup %8642  ;;  %v3864_v59 = vadd.f32 1.0, %v8641_v61  ;;  %v11168_v41 = vpop.f32.mrf.mxu0 }
 0x684   : > { %v11170_v24 = vpop.f32.mrf.mxu2  ;;  %v8645_v54 = vpop.eup %8644  ;;  %7304 = vst [vmem:[%s10180_s16 + $0x370] sm:$0xff] %v8643_v40 }
 0x685   : > { %v8647_v29 = vpop.eup %8646  ;;  %8648 = vrcp.f32 %v3864_v59  ;;  %v4187_v28 = vadd.f32 1.0, %v8645_v54 }
 0x686   : > { %7328 = vst [vmem:[%s10180_s16 + $0x3f0] sm:$0xff] %v8647_v29 }
 0x687   : > { %8650 = vrcp.f32 %v4187_v28 }
 0x68b   : > { %v8649_v15 = vpop.eup %8648  ;;  %v11174_v13 = vpop.f32.mrf.mxu0 }
 0x68c   : > { %13131 = vst [vmem:[#allocation50_spill] sm:$0xff] %v11174_v13  ;;  %v11176_v51 = vpop.f32.mrf.mxu2  ;;  %v3905_v60 = vpack.c.bf16 %v8649_v15, %v8643_v40  ;;  %v13133_v40 = vpack.i.bf16 %v11101_v21, %v11092_v47 }
 0x68d   : > { %13132 = vst [vmem:[#allocation51_spill] sm:$0xff] %v11176_v51  ;;  %v8651_v55 = vpop.eup %8650 }
 0x68e   : > { %7305 = vst [vmem:[%s10180_s16 + $0x378] sm:$0xff] %v8649_v15  ;;  %3973 = vmatmul.bf16.gmra.mxu0 %v3905_v60  ;;  %v4228_v56 = vpack.c.bf16 %v8651_v55, %v8647_v29 }
 0x68f   : > { %7329 = vst [vmem:[%s10180_s16 + $0x3f8] sm:$0xff] %v8651_v55  ;;  %v13134_v55 = vpack.i.bf16 %v11108_v58, %v11099_v27  ;;  %v13136_v27 = vpack.i.bf16 %v10970_v32, %v10956_v25  ;;  %v13138_v25 = vpack.i.bf16 %v10796_v52, %v10778_v37  ;;  %v13139_v32 = vpack.i.bf16 %v10993_v6, %v10983_v3 }
 0x690   : > { %4296 = vmatmul.bf16.gmra.mxu2 %v4228_v56  ;;  %v13141_v37 = vpack.i.bf16 %v11013_v48, %v11003_v2  ;;  %v13142_v52 = vpack.i.bf16 %v11138_v26, %v11130_v12  ;;  %v13143_v2 = vpack.i.bf16 %v11025_v39, %v11015_v10  ;;  %v13144_v48 = vpack.i.bf16 %v10842_v19, %v10822_v43  ;;  %v7655_v19 = vld [vmem:[%s12974_s6 + $0x18] sm:$0xff] }
 0x691   : > { %v7938_v39 = vpack.i.bf16 %v11144_v44, %v11136_v53  ;;  %v13145_v43 = vpack.i.bf16 %v10871_v8, %v10860_v63  ;;  %v7654_v53 = vld [vmem:[%s12974_s6 + $0x10] sm:$0xff]  ;;  %v7973_v44 = vpack.i.bf16 %v11156_v4, %v11150_v46  ;;  %v7790_v63 = vpop.permute.xlu2 %7789  ;;  %v7795_v8 = vpop.permute.xlu1 %7794  ;;  %v7652_v4 = vld [vmem:[%s12974_s6] sm:$0xff] }
 0x693   : > { %v11180_v18 = vpop.f32.mrf.mxu0 }
 0x694   : > { %v11182_v31 = vpop.f32.mrf.mxu2 }
 0x69b   : > { %v3939_v59 = vpop.f32.mrf.mxu0 }
 0x69c   : > { %v11184_v61 = vpop.f32.mrf.mxu2 }
 0x6a3   : > { %v3941_v54 = vpop.f32.mrf.mxu0 }
 0x6a4   : > { %v4262_v28 = vpop.f32.mrf.mxu2  ;;  %v7838_v20 = vpack.i.bf16 %v3941_v54, %v3939_v59  ;;  %v13135_v54 = vpack.i.bf16 %v11005_v33, %v10995_v11  ;;  %v13137_v11 = vpack.i.bf16 %v11122_v35, %v11110_v34  ;;  %v7659_v35 = vld [vmem:[%s12974_s6 + $0x38] sm:$0xff] }
 0x6a5   : > { %4940 = vmatpush.bf16.msra.mxu3 %v7659_v35  ;;  %v7796_v35 = vunpack.i.l.bf16 %v7795_v8 }
 0x6a6   : > { %7839 = vrot.lane.b32.xlu0 %v7838_v20, %s8914_s18 }
 0x6ab   : > { %v3944_v13 = vpop.f32.mrf.mxu0 }
 0x6ac   : > { %v4264_v51 = vpop.f32.mrf.mxu2 }
 0x6ad   : > { %v7853_v20 = vpack.i.bf16 %v4264_v51, %v4262_v28 }
 0x6ae   : > { %7844 = vrot.lane.b32.xlu0 %v13133_v40, %s8915_s29 }
 0x6b3   : > { %v3946_v29 = vpop.f32.mrf.mxu0 }
 0x6b4   : > { %v4267_v15 = vpop.f32.mrf.mxu2  ;;  %v7848_v60 = vpack.i.bf16 %v3946_v29, %v3944_v13 }
 0x6b6   : > { %7869 = vrot.lane.b32.xlu0 %v13134_v55, %s13018_s0  ;;  %7849 = vrot.lane.b32.xlu2 %v7848_v60, %s8914_s18  ;;  %v13140_v55 = vpack.i.bf16 %v11128_v0, %v11120_v57  ;;  %v7943_v57 = vpack.i.bf16 %v11152_v49, %v11146_v17  ;;  %v7657_v0 = vld [vmem:[%s12974_s6 + $0x28] sm:$0xff]  ;;  %v7656_v17 = vld [vmem:[%s12974_s6 + $0x20] sm:$0xff] }
 0x6bb   : > { %v3949_v56 = vpop.f32.mrf.mxu0 }
 0x6bc   : > { %v4269_v59 = vpop.f32.mrf.mxu2 }
 0x6bd   : > { %v7888_v28 = vpack.i.bf16 %v4269_v59, %v4267_v15 }
 0x6be   : > { %7899 = vrot.lane.b32.xlu0 %v13135_v54, %s8916_s23  ;;  %7854 = vrot.lane.b32.xlu2 %v7853_v20, %s8913_s24  ;;  %v13146_v54 = vpack.i.bf16 %v11043_v30, %v11035_v38  ;;  %v13148_v38 = vpack.i.bf16 %v11033_v62, %v11023_v23 }
 0x6c3   : > { %v3951_v47 = vpop.f32.mrf.mxu0 }
 0x6c4   : > { %v4272_v21 = vpop.f32.mrf.mxu2  ;;  %v7878_v13 = vpack.i.bf16 %v3951_v47, %v3949_v56  ;;  %v7658_v56 = vld [vmem:[%s12974_s6 + $0x30] sm:$0xff]  ;;  %v7653_v47 = vld [vmem:[%s12974_s6 + $0x8] sm:$0xff] }
 0x6c5   : > { %4941 = vmatpush.bf16.msra.mxu3 %v7658_v56 }
 0x6c6   : > { %7859 = vrot.lane.b32.xlu2 %v13136_v27, %s13016_s27  ;;  %7879 = vrot.lane.b32.xlu1 %v7878_v13, %s8914_s18 }
 0x6c9   : > { %4942 = vmatpush.bf16.msra.mxu3 %v7657_v0 }
 0x6cb   : > { %v3954_v58 = vpop.f32.mrf.mxu0 }
 0x6cc   : > { %v4274_v40 = vpop.f32.mrf.mxu2 }
 0x6cd   : > { %v7913_v51 = vpack.i.bf16 %v4274_v40, %v4272_v21  ;;  %4943 = vmatpush.bf16.msra.mxu3 %v7656_v17  ;;  %v11284_v21 = vpop.permute.xlu0 %7804  ;;  %v11292_v40 = vpop.permute.xlu1 %7799 }
 0x6ce   : > { %7874 = vrot.lane.b32.xlu2 %v13137_v11, %s8915_s29  ;;  %7889 = vrot.lane.b32.xlu1 %v7888_v28, %s8913_s24 }
 0x6cf   : > { %7914 = vrot.lane.b32.xlu0 %v7913_v51, %s8913_s24  ;;  %v7978_v51 = vpack.i.bf16 %v11164_v9, %v11158_v42  ;;  %v13150_v42 = vpack.i.bf16 %v10891_v36, %v10884_v14 }
 0x6d1   : > { %4944 = vmatpush.bf16.msra.mxu3 %v7655_v19 }
 0x6d3   : > { %v3956_v33 = vpop.f32.mrf.mxu0 }
 0x6d4   : > { %v4277_v29 = vpop.f32.mrf.mxu2  ;;  %v7918_v60 = vpack.i.bf16 %v3956_v33, %v3954_v58  ;;  %v7820_v58 = vpop.permute.xlu2 %7819  ;;  %v13149_v33 = vpack.i.bf16 %v11059_v45, %v11051_v1  ;;  %v13151_v1 = vpack.i.bf16 %v11049_v16, %v11041_v5 }
 0x6d5   : > { %4945 = vmatpush.bf16.msra.mxu3 %v7654_v53  ;;  %v11296_v11 = vpop.permute.xlu0 %7809  ;;  %v11306_v62 = vpop.permute.xlu1 %7829  ;;  %v7822_v14 = vunpack.i.h.bf16 %v7820_v58  ;;  %v7821_v36 = vunpack.i.l.bf16 %v7820_v58  ;;  %v13158_v58 = vld [vmem:[#allocation44_spill] sm:$0xff] }
 0x6d6   : > { %7884 = vrot.lane.b32.xlu2 %v13138_v25, %s8918_s26  ;;  %7894 = vrot.lane.b32.xlu1 %v13139_v32, %s13016_s27  ;;  %v7792_v32 = vunpack.i.h.bf16 %v7790_v63 }
 0x6d7   : > { %7919 = vrot.lane.b32.xlu0 %v7918_v60, %s8914_s18 }
 0x6d8   : > { %v4751_v5 = vsel %vm1726_vm3, %v10622_v7, %v7792_v32 }
 0x6d9   : > { %4946 = vmatpush.bf16.msra.mxu3 %v7653_v47 }
 0x6db   : > { %v3959_v15 = vpop.f32.mrf.mxu0 }
 0x6dc   : > { %v4279_v34 = vpop.f32.mrf.mxu2  ;;  %v11304_v23 = vpop.permute.xlu2 %7824 }
 0x6dd   : > { %v7948_v10 = vpack.i.bf16 %v4279_v34, %v4277_v29  ;;  %4947 = vmatpush.bf16.msra.mxu3 %v7652_v4  ;;  %v7815_v45 = vpop.permute.xlu0 %7814  ;;  %v7797_v34 = vunpack.i.h.bf16 %v7795_v8  ;;  %v8053_v8 = vpack.i.bf16 %v11184_v61, %v11182_v31  ;;  %v13160_v61 = vld [vmem:[#allocation50_spill] sm:$0xff] }
 0x6de   : > { %7904 = vrot.lane.b32.xlu2 %v13140_v55, %s13018_s0  ;;  %7909 = vrot.lane.b32.xlu1 %v13142_v52, %s8915_s29  ;;  %v7817_v55 = vunpack.i.h.bf16 %v7815_v45  ;;  %v7835_v52 = vpop.permute.xlu1 %7834 }
 0x6df   : > { %7929 = vrot.lane.b32.xlu0 %v13141_v37, %s13016_s27  ;;  %v7816_v37 = vunpack.i.l.bf16 %v7815_v45  ;;  %v7836_v0 = vunpack.i.l.bf16 %v7835_v52  ;;  %s13153_s27 = smov 64  }
 0x6e3   : > { %v3961_v3 = vpop.f32.mrf.mxu0 }
 0x6e4   : > { %v4282_v6 = vpop.f32.mrf.mxu2  ;;  %v7953_v59 = vpack.i.bf16 %v3961_v3, %v3959_v15  ;;  %v7791_v15 = vunpack.i.l.bf16 %v7790_v63  ;;  %v8013_v3 = vpack.i.bf16 %v11168_v41, %v11162_v22  ;;  %v13154_v22 = vld [vmem:[#allocation47_spill] sm:$0xff]  ;;  %v13155_v41 = vld [vmem:[#allocation46_spill] sm:$0xff] }
 0x6e5   : > { %v13156_v7 = vpack.i.bf16 %v13154_v22, %v13155_v41 }
 0x6e6   : > { %7934 = vrot.lane.b32.xlu2 %v13143_v2, %s8916_s23  ;;  %7924 = vrot.lane.b32.xlu1 %v13144_v48, %s8918_s26  ;;  %v4750_v16 = vsel %vm1726_vm3, %v10607_v50, %v7791_v15  ;;  %v7837_v48 = vunpack.i.h.bf16 %v7835_v52 }
 0x6e7   : > { %7944 = vrot.lane.b32.xlu0 %v7943_v57, %s8915_s29  ;;  %v4768_v57 = vsel %vm4766_vm4, %v4751_v5, %v7797_v34  ;;  %v4767_v2 = vsel %vm4766_vm4, %v4750_v16, %v7796_v35  ;;  %v7865_v34 = vpop.permute.xlu1 %7864  ;;  %v7802_v35 = vunpack.i.h.bf16 %v11292_v40  ;;  %v7826_v5 = vunpack.i.l.bf16 %v11304_v23 }
 0x6e8   : > { %v4785_v50 = vsel %vm4783_vm5, %v4768_v57, %v7817_v55  ;;  %v7801_v55 = vunpack.i.l.bf16 %v11292_v40  ;;  %v13164_v57 = vld [vmem:[#allocation31_spill] sm:$0xff] }
 0x6e9   : > { %v4802_v17 = vsel %vm4800_vm6, %v4785_v50, %v7822_v14  ;;  %v7807_v14 = vunpack.i.h.bf16 %v11284_v21  ;;  %v4753_v40 = vsel %vm1726_vm3, %v13164_v57, %v7802_v35 }
 0x6eb   : > { %v3964_v12 = vpop.f32.mrf.mxu0 }
 0x6ec   : > { %v4284_v26 = vpop.f32.mrf.mxu2 }
 0x6ed   : > { %v7983_v27 = vpack.i.bf16 %v4284_v26, %v4282_v6  ;;  %v13152_v6 = vld [vmem:[#allocation51_spill] sm:$0xff]  ;;  %v4784_v26 = vsel %vm4783_vm5, %v4767_v2, %v7816_v37  ;;  %v13165_v2 = vld [vmem:[#allocation30_spill] sm:$0xff] }
 0x6ee   : > { %7949 = vrot.lane.b32.xlu2 %v7948_v10, %s8913_s24  ;;  %7939 = vrot.lane.b32.xlu1 %v7938_v39, %s13018_s0  ;;  %v8018_v56 = vpack.i.bf16 %v13152_v6, %v11170_v24  ;;  %v4801_v24 = vsel %vm4800_vm6, %v4784_v26, %v7821_v36  ;;  %v7806_v36 = vunpack.i.l.bf16 %v11284_v21  ;;  %v7832_v6 = vunpack.i.h.bf16 %v11306_v62 }
 0x6ef   : > { %7959 = vrot.lane.b32.xlu0 %v13145_v43, %s8918_s26  ;;  %v4770_v21 = vsel %vm4766_vm4, %v4753_v40, %v7807_v14 }
 0x6f3   : > { %v3966_v20 = vpop.f32.mrf.mxu0 }
 0x6f4   : > { %v4287_v49 = vpop.f32.mrf.mxu2  ;;  %v7988_v28 = vpack.i.bf16 %v3966_v20, %v3964_v12 }
 0x6f6   : > { %7954 = vrot.lane.b32.xlu2 %v7953_v59, %s8914_s18  ;;  %7969 = vrot.lane.b32.xlu1 %v13146_v54, %s8916_s23  ;;  %v4819_v59 = vsel %vm4817_vm7, %v4802_v17, %v7837_v48  ;;  %v4752_v48 = vsel %vm1726_vm3, %v13165_v2, %v7801_v55 }
 0x6f7   : > { %7974 = vrot.lane.b32.xlu0 %v7973_v44, %s13018_s0  ;;  %s13147_s0 = smov 32   ;;  %v4818_v44 = vsel %vm4817_vm7, %v4801_v24, %v7836_v0  ;;  %v4769_v22 = vsel %vm4766_vm4, %v4752_v48, %v7806_v36 }
 0x6fb   : > { %v3969_v30 = vpop.f32.mrf.mxu0 }
 0x6fc   : > { %v4289_v46 = vpop.f32.mrf.mxu2 }
 0x6fd   : > { %v8003_v13 = vpack.i.bf16 %v4289_v46, %v4287_v49 }
 0x6fe   : > { %7964 = vrot.lane.b32.xlu2 %v13148_v38, %s13147_s0  ;;  %7984 = vrot.lane.b32.xlu1 %v7983_v27, %s8913_s24  ;;  %v13157_v27 = vld [vmem:[#allocation45_spill] sm:$0xff] }
 0x6ff   : > { %8004 = vrot.lane.b32.xlu0 %v8003_v13, %s8913_s24  ;;  %v13159_v38 = vpack.i.bf16 %v13157_v27, %v13158_v58 }
 0x703   : > { %v3971_v29 = vpop.f32.mrf.mxu0 }
 0x704   : > { %v8023_v60 = vpack.i.bf16 %v3971_v29, %v3969_v30  ;;  %v4292_v25 = vpop.f32.mrf.mxu2  ;;  %v13162_v29 = vld [vmem:[#allocation48_spill] sm:$0xff] }
 0x706   : > { %7979 = vrot.lane.b32.xlu2 %v7978_v51, %s8915_s29  ;;  %7989 = vrot.lane.b32.xlu1 %v7988_v28, %s8914_s18  ;;  %v8048_v28 = vpack.i.bf16 %v11180_v18, %v13160_v61 }
 0x707   : > { %8009 = vrot.lane.b32.xlu0 %v13149_v33, %s8916_s23  ;;  %v13161_v33 = vld [vmem:[#allocation49_spill] sm:$0xff] }
 0x70b   : > { %v3974_v13 = vpop.f32.mrf.mxu0 }
 0x70c   : > { %v4294_v12 = vpop.f32.mrf.mxu2 }
 0x70d   : > { %v8038_v54 = vpack.i.bf16 %v4294_v12, %v4292_v25 }
 0x70e   : > { %7994 = vrot.lane.b32.xlu2 %v13150_v42, %s8918_s26  ;;  %7999 = vrot.lane.b32.xlu1 %v13151_v1, %s13147_s0 }
 0x70f   : > { %8024 = vrot.lane.b32.xlu0 %v8023_v60, %s8914_s18  ;;  %v13163_v60 = vpack.i.bf16 %v13161_v33, %v13162_v29  ;;  %v7866_v33 = vunpack.i.l.bf16 %v7865_v34 }
 0x710   : > { %v11317_v9 = vpop.permute.xlu2 %7849 }
 0x711   : > { %v7852_v17 = vunpack.i.h.bf16 %v11317_v9 }
 0x713   : > { %v3976_v42 = vpop.f32.mrf.mxu0 }
 0x714   : > { %v4297_v30 = vpop.f32.mrf.mxu2  ;;  %v8058_v45 = vpack.i.bf16 %v3976_v42, %v3974_v13  ;;  %v13167_v13 = vld [vmem:[#allocation32_spill] sm:$0xff] }
 0x716   : > { %8014 = vrot.lane.b32.xlu2 %v8013_v3, %s13153_s27  ;;  %8019 = vrot.lane.b32.xlu1 %v8018_v56, %s8915_s29  ;;  %v7827_v3 = vunpack.i.h.bf16 %v11304_v23  ;;  %v7831_v56 = vunpack.i.l.bf16 %v11306_v62  ;;  %v4786_v23 = vsel %vm4783_vm5, %v4769_v22, %v7826_v5 }
 0x717   : > { %8034 = vrot.lane.b32.xlu0 %v13156_v7, %s13147_s0 }
 0x718   : > { %v7855_v10 = vpop.permute.xlu2 %7854  ;;  %v7840_v39 = vpop.permute.xlu0 %7839  ;;  %v4787_v41 = vsel %vm4783_vm5, %v4770_v21, %v7827_v3  ;;  %v4803_v7 = vsel %vm4800_vm6, %v4786_v23, %v7831_v56 }
 0x719   : > { %v7857_v43 = vunpack.i.h.bf16 %v7855_v10  ;;  %v7856_v19 = vunpack.i.l.bf16 %v7855_v10  ;;  %v7842_v49 = vunpack.i.h.bf16 %v7840_v39  ;;  %v7841_v53 = vunpack.i.l.bf16 %v7840_v39 }
 0x71a   : > { %v4804_v62 = vsel %vm4800_vm6, %v4787_v41, %v7832_v6  ;;  %v7851_v10 = vunpack.i.l.bf16 %v11317_v9 }
 0x71b   : > { %v4835_v20 = vsel %vm4834_vm8, %v4818_v44, %v7841_v53  ;;  %v4836_v63 = vsel %vm4834_vm8, %v4819_v59, %v7842_v49  ;;  %v7812_v44 = vunpack.i.h.bf16 %v11296_v11  ;;  %v7811_v59 = vunpack.i.l.bf16 %v11296_v11 }
 0x71c   : > { %v4852_v47 = vsel %vm4851_vm9, %v4835_v20, %v7856_v19  ;;  %v4853_v46 = vsel %vm4851_vm9, %v4836_v63, %v7857_v43  ;;  %v4299_v1 = vpop.f32.mrf.mxu2 }
 0x71d   : > { %v4868_v4 = vpack.c.bf16 %v4853_v46, %v4852_v47  ;;  %v8063_v32 = vpack.i.bf16 %v4299_v1, %v4297_v30  ;;  %v13166_v46 = vld [vmem:[#allocation33_spill] sm:$0xff]  ;;  %v4754_v27 = vsel %vm1726_vm3, %v13167_v13, %v7811_v59 }
 0x71e   : > { %8039 = vrot.lane.b32.xlu2 %v8038_v54, %s8913_s24  ;;  %8029 = vrot.lane.b32.xlu1 %v13159_v38, %s8918_s26  ;;  %s6909_s26 = scalar_lea.sflag [#allocation5], %s10177_s30 }
 0x71f   : > { %8054 = vrot.lane.b32.xlu0 %v8053_v8, %s8915_s29  ;;  %4948 = vmatmul.bf16.vlgmr.msra.gmra.mxu3 %v4868_v4  ;;  %v4755_v4 = vsel %vm1726_vm3, %v13166_v46, %v7812_v44 }
 0x720   : > { %v7860_v51 = vpop.permute.xlu2 %7859  ;;  %v7845_v31 = vpop.permute.xlu0 %7844 }
 0x721   : > { %v7847_v0 = vunpack.i.h.bf16 %v7845_v31  ;;  %v7846_v12 = vunpack.i.l.bf16 %v7845_v31  ;;  %v7862_v54 = vunpack.i.h.bf16 %v7860_v51  ;;  %v7861_v47 = vunpack.i.l.bf16 %v7860_v51 }
 0x723   : > { %v4820_v50 = vsel %vm4817_vm7, %v4803_v7, %v7846_v12  ;;  %v4821_v26 = vsel %vm4817_vm7, %v4804_v62, %v7847_v0  ;;  %v4771_v38 = vsel %vm4766_vm4, %v4754_v27, %v7861_v47  ;;  %v4772_v11 = vsel %vm4766_vm4, %v4755_v4, %v7862_v54  ;;  %v13168_v0 = vld [vmem:[#allocation35_spill] sm:$0xff] }
 0x724   : > { %v4837_v49 = vsel %vm4834_vm8, %v4820_v50, %v7851_v10  ;;  %v4838_v53 = vsel %vm4834_vm8, %v4821_v26, %v7852_v17 }
 0x726   : > { %8044 = vrot.lane.b32.xlu2 %v13163_v60, %s8916_s23  ;;  %8049 = vrot.lane.b32.xlu1 %v8048_v28, %s13153_s27  ;;  %v7867_v28 = vunpack.i.h.bf16 %v7865_v34  ;;  %v4788_v60 = vsel %vm4783_vm5, %v4771_v38, %v7866_v33  ;;  %s7725_s27 = sshll.u32 %s9023_s22, 10 }
 0x727   : > { %s6937_s23 = scalar_lea.hbm %s12983_s15, %s7725_s27  ;;  %s8836_s27 = scalar_lea.hbm %s12983_s15, 2048 }
 0x728   : > { %v11360_v25 = vpop.permute.xlu2 %7874  ;;  %v7870_v15 = vpop.permute.xlu0 %7869  ;;  %v4789_v42 = vsel %vm4783_vm5, %v4772_v11, %v7867_v28  ;;  %s6940_s0 = sshll.u32 %s6937_s23, 4  ;;  %s6941_s0 = int_to_ptr.hbm [resolvable:$true] %s6940_s0 }
 0x729   : > { %v7872_v30 = vunpack.i.h.bf16 %v7870_v15  ;;  %v7871_v31 = vunpack.i.l.bf16 %v7870_v15  ;;  %v7877_v51 = vunpack.i.h.bf16 %v11360_v25  ;;  %v7876_v29 = vunpack.i.l.bf16 %v11360_v25  ;;  %s8830_s20 = sshra.s32 %s6941_s0, 4  ;;  %s8831_s20 = int_to_ptr.hbm [resolvable:$true] %s8830_s20 }
 0x72a   : > { %s8832_s17 = scalar_lea.hbm %s8831_s20, 1024  ;;  %p8837_p0 = scmp.lt.s32.totalorder %s8831_s20, %s12983_s15 }
 0x72b   : > { %v4805_v1 = vsel %vm4800_vm6, %v4788_v60, %v7871_v31  ;;  %p8833_p11 = scmp.ne.s32.totalorder %s8831_s20, %s8832_s17  ;;  %p8838_p1 = scmp.lt.s32.totalorder %s8836_s27, %s8832_s17 }
 0x72c   : > { %v4822_v25 = vsel %vm4817_vm7, %v4805_v1, %v7876_v29 }
 0x72d   : > { %p8834_p12 = pnand %p8833_p11, %p9040_p5  ;;  %p8839_p2 = por %p8838_p1, %p8837_p0 }
 0x72e   : > { %8059 = vrot.lane.b32.xlu2 %v8058_v45, %s8914_s18  ;;  %8064 = vrot.lane.b32.xlu1 %v8063_v32, %s8913_s24  ;;  %v4806_v45 = vsel %vm4800_vm6, %v4789_v42, %v7872_v30  ;;  %s6938_s24 = sshll.u32 %s10180_s16, 4  ;;  %s6939_s24 = int_to_ptr.vmem [resolvable:$true] %s6938_s24 }
 0x72f   : > { %v4823_v3 = vsel %vm4817_vm7, %v4806_v45, %v7877_v51  ;;  %p8835_p13 = pneg %p8834_p12 }
 0x730   : > { %v11364_v18 = vpop.permute.xlu2 %7884  ;;  %v11368_v37 = vpop.permute.xlu0 %7899 }
 0x731   : > { %v7887_v34 = vunpack.i.h.bf16 %v11364_v18  ;;  %v7886_v36 = vunpack.i.l.bf16 %v11364_v18  ;;  %v13169_v18 = vld [vmem:[#allocation34_spill] sm:$0xff]  ;;  %v7902_v7 = vunpack.i.h.bf16 %v11368_v37  ;;  %v7901_v62 = vunpack.i.l.bf16 %v11368_v37  ;;  %p8840_p3 = pnand %p8839_p2, %p8835_p13 }
 0x733   : > { %v4757_v12 = vsel %vm1726_vm3, %v13168_v0, %v7887_v34  ;;  %v4756_v21 = vsel %vm1726_vm3, %v13169_v18, %v7886_v36  ;;  %v13172_v18 = vld [vmem:[#allocation39_spill] sm:$0xff] }
 0x738   : > { %v11370_v52 = vpop.permute.xlu1 %7879  ;;  %v11376_v16 = vpop.permute.xlu2 %7904 }
 0x739   : > { %v7882_v32 = vunpack.i.h.bf16 %v11370_v52  ;;  %v7881_v35 = vunpack.i.l.bf16 %v11370_v52 }
 0x73b   : > { %v4839_v6 = vsel %vm4834_vm8, %v4822_v25, %v7881_v35  ;;  %v4840_v56 = vsel %vm4834_vm8, %v4823_v3, %v7882_v32 }
 0x740   : > { %v7890_v39 = vpop.permute.xlu1 %7889  ;;  %v11398_v20 = vpop.permute.xlu2 %7934 }
 0x741   : > { %v7915_v24 = vpop.permute.xlu0 %7914  ;;  %v7892_v43 = vunpack.i.h.bf16 %v7890_v39  ;;  %v7891_v19 = vunpack.i.l.bf16 %v7890_v39 }
 0x742   : > { %v7917_v15 = vunpack.i.h.bf16 %v7915_v24  ;;  %v7916_v55 = vunpack.i.l.bf16 %v7915_v24 }
 0x743   : > { %v4854_v63 = vsel %vm4851_vm9, %v4837_v49, %v7891_v19  ;;  %v4855_v8 = vsel %vm4851_vm9, %v4838_v53, %v7892_v43  ;;  %v7907_v43 = vunpack.i.h.bf16 %v11376_v16  ;;  %v7906_v19 = vunpack.i.l.bf16 %v11376_v16 }
 0x744   : > { %v4869_v9 = vpack.c.bf16 %v4855_v8, %v4854_v63  ;;  %v4856_v52 = vsel %vm4851_vm9, %v4839_v6, %v7916_v55  ;;  %v4857_v48 = vsel %vm4851_vm9, %v4840_v56, %v7917_v15  ;;  %v7937_v15 = vunpack.i.h.bf16 %v11398_v20 }
 0x745   : > { %v4870_v41 = vpack.c.bf16 %v4857_v48, %v4856_v52  ;;  %v7936_v55 = vunpack.i.l.bf16 %v11398_v20 }
 0x746   : > { %4953 = vmatmul.bf16.gmra.mxu3 %v4869_v9 }
 0x748   : > { %v7895_v61 = vpop.permute.xlu1 %7894  ;;  %v7950_v14 = vpop.permute.xlu2 %7949 }
 0x749   : > { %v7920_v58 = vpop.permute.xlu0 %7919  ;;  %v7897_v57 = vunpack.i.h.bf16 %v7895_v61  ;;  %v7896_v40 = vunpack.i.l.bf16 %v7895_v61  ;;  %v7952_v9 = vunpack.i.h.bf16 %v7950_v14  ;;  %v7951_v46 = vunpack.i.l.bf16 %v7950_v14  ;;  %v13170_v61 = vld [vmem:[#allocation37_spill] sm:$0xff] }
 0x74a   : > { %v7922_v63 = vunpack.i.h.bf16 %v7920_v58  ;;  %v7921_v8 = vunpack.i.l.bf16 %v7920_v58  ;;  %v13171_v58 = vld [vmem:[#allocation36_spill] sm:$0xff] }
 0x74b   : > { %v4774_v22 = vsel %vm4766_vm4, %v4757_v12, %v7897_v57  ;;  %v4773_v23 = vsel %vm4766_vm4, %v4756_v21, %v7896_v40 }
 0x74c   : > { %v4790_v50 = vsel %vm4783_vm5, %v4773_v23, %v7901_v62  ;;  %v4791_v26 = vsel %vm4783_vm5, %v4774_v22, %v7902_v7  ;;  %v13173_v22 = vld [vmem:[#allocation38_spill] sm:$0xff] }
 0x74d   : > { %v4807_v53 = vsel %vm4800_vm6, %v4790_v50, %v7906_v19  ;;  %v4808_v44 = vsel %vm4800_vm6, %v4791_v26, %v7907_v43 }
 0x750   : > { %v7910_v2 = vpop.permute.xlu1 %7909  ;;  %v7955_v10 = vpop.permute.xlu2 %7954 }
 0x751   : > { %v7930_v5 = vpop.permute.xlu0 %7929  ;;  %v7912_v24 = vunpack.i.h.bf16 %v7910_v2  ;;  %v7911_v17 = vunpack.i.l.bf16 %v7910_v2  ;;  %v7957_v52 = vunpack.i.h.bf16 %v7955_v10  ;;  %v7956_v48 = vunpack.i.l.bf16 %v7955_v10 }
 0x752   : > { %v7932_v51 = vunpack.i.h.bf16 %v7930_v5  ;;  %v7931_v29 = vunpack.i.l.bf16 %v7930_v5 }
 0x753   : > { %v4824_v37 = vsel %vm4817_vm7, %v4807_v53, %v7911_v17  ;;  %v4825_v59 = vsel %vm4817_vm7, %v4808_v44, %v7912_v24 }
 0x754   : > { %v4841_v54 = vsel %vm4834_vm8, %v4824_v37, %v7921_v8  ;;  %v4842_v47 = vsel %vm4834_vm8, %v4825_v59, %v7922_v63 }
 0x755   : > { %v4858_v11 = vsel %vm4851_vm9, %v4841_v54, %v7951_v46  ;;  %v4859_v30 = vsel %vm4851_vm9, %v4842_v47, %v7952_v9 }
 0x756   : > { %4958 = vmatmul.bf16.gmra.mxu3 %v4870_v41  ;;  %v4871_v31 = vpack.c.bf16 %v4859_v30, %v4858_v11 }
 0x758   : > { %v7925_v49 = vpop.permute.xlu1 %7924  ;;  %v7965_v38 = vpop.permute.xlu2 %7964 }
 0x759   : > { %v7945_v39 = vpop.permute.xlu0 %7944  ;;  %v7927_v16 = vunpack.i.h.bf16 %v7925_v49  ;;  %v7926_v27 = vunpack.i.l.bf16 %v7925_v49  ;;  %v7967_v10 = vunpack.i.h.bf16 %v7965_v38 }
 0x75a   : > { %v7947_v5 = vunpack.i.h.bf16 %v7945_v39  ;;  %v7946_v6 = vunpack.i.l.bf16 %v7945_v39  ;;  %v7966_v39 = vunpack.i.l.bf16 %v7965_v38 }
 0x75b   : > { %v4759_v28 = vsel %vm1726_vm3, %v13170_v61, %v7927_v16  ;;  %v4758_v33 = vsel %vm1726_vm3, %v13171_v58, %v7926_v27 }
 0x75c   : > { %v4775_v60 = vsel %vm4766_vm4, %v4758_v33, %v7931_v29  ;;  %v4776_v42 = vsel %vm4766_vm4, %v4759_v28, %v7932_v51 }
 0x75d   : > { %v4792_v14 = vsel %vm4783_vm5, %v4775_v60, %v7936_v55  ;;  %v4793_v34 = vsel %vm4783_vm5, %v4776_v42, %v7937_v15 }
 0x760   : > { %v7940_v13 = vpop.permute.xlu1 %7939  ;;  %v7980_v36 = vpop.permute.xlu2 %7979 }
 0x761   : > { %v7960_v4 = vpop.permute.xlu0 %7959  ;;  %v7942_v1 = vunpack.i.h.bf16 %v7940_v13  ;;  %v7941_v45 = vunpack.i.l.bf16 %v7940_v13  ;;  %v7981_v13 = vunpack.i.l.bf16 %v7980_v36 }
 0x762   : > { %v7962_v56 = vunpack.i.h.bf16 %v7960_v4  ;;  %v7961_v57 = vunpack.i.l.bf16 %v7960_v4  ;;  %v7982_v4 = vunpack.i.h.bf16 %v7980_v36 }
 0x763   : > { %v4809_v25 = vsel %vm4800_vm6, %v4792_v14, %v7941_v45  ;;  %v4810_v3 = vsel %vm4800_vm6, %v4793_v34, %v7942_v1  ;;  %v13174_v45 = vld [vmem:[#allocation41_spill] sm:$0xff] }
 0x764   : > { %v4826_v40 = vsel %vm4817_vm7, %v4809_v25, %v7946_v6  ;;  %v4827_v2 = vsel %vm4817_vm7, %v4810_v3, %v7947_v5  ;;  %v4761_v21 = vsel %vm1726_vm3, %v13172_v18, %v7962_v56  ;;  %v4760_v23 = vsel %vm1726_vm3, %v13173_v22, %v7961_v57 }
 0x765   : > { %v4843_v7 = vsel %vm4834_vm8, %v4826_v40, %v7956_v48  ;;  %v4844_v62 = vsel %vm4834_vm8, %v4827_v2, %v7957_v52  ;;  %v4777_v49 = vsel %vm4766_vm4, %v4760_v23, %v7966_v39  ;;  %v4778_v53 = vsel %vm4766_vm4, %v4761_v21, %v7967_v10 }
 0x766   : > { %4963 = vmatmul.bf16.gmra.mxu3 %v4871_v31 }
 0x768   : > { %v7970_v32 = vpop.permute.xlu1 %7969  ;;  %v7995_v19 = vpop.permute.xlu2 %7994 }
 0x769   : > { %v7975_v35 = vpop.permute.xlu0 %7974  ;;  %v7972_v50 = vunpack.i.h.bf16 %v7970_v32  ;;  %v7971_v26 = vunpack.i.l.bf16 %v7970_v32  ;;  %v7997_v31 = vunpack.i.h.bf16 %v7995_v19  ;;  %v7996_v61 = vunpack.i.l.bf16 %v7995_v19 }
 0x76a   : > { %v7977_v44 = vunpack.i.h.bf16 %v7975_v35  ;;  %v7976_v37 = vunpack.i.l.bf16 %v7975_v35  ;;  %v13175_v35 = vld [vmem:[#allocation40_spill] sm:$0xff] }
 0x76b   : > { %v4794_v59 = vsel %vm4783_vm5, %v4777_v49, %v7971_v26  ;;  %v4795_v63 = vsel %vm4783_vm5, %v4778_v53, %v7972_v50  ;;  %v4763_v32 = vsel %vm1726_vm3, %v13174_v45, %v7997_v31  ;;  %v4762_v15 = vsel %vm1726_vm3, %v13175_v35, %v7996_v61  ;;  %v13176_v49 = vld [vmem:[#allocation43_spill] sm:$0xff] }
 0x76c   : > { %v4811_v54 = vsel %vm4800_vm6, %v4794_v59, %v7976_v37  ;;  %v4812_v47 = vsel %vm4800_vm6, %v4795_v63, %v7977_v44  ;;  %v13177_v44 = vld [vmem:[#allocation42_spill] sm:$0xff]  ;;  %v13178_v35 = vld [vmem:[#allocation15_spill] sm:$0xff] }
 0x76d   : > { %v4828_v27 = vsel %vm4817_vm7, %v4811_v54, %v7981_v13  ;;  %v4829_v38 = vsel %vm4817_vm7, %v4812_v47, %v7982_v4 }
 0x770   : > { %v7985_v20 = vpop.permute.xlu1 %7984  ;;  %v8015_v28 = vpop.permute.xlu2 %8014 }
 0x771   : > { %v7987_v0 = vunpack.i.h.bf16 %v7985_v20  ;;  %v7986_v12 = vunpack.i.l.bf16 %v7985_v20  ;;  %v8005_v41 = vpop.permute.xlu0 %8004  ;;  %v8017_v56 = vunpack.i.h.bf16 %v8015_v28  ;;  %v8016_v57 = vunpack.i.l.bf16 %v8015_v28 }
 0x772   : > { %v8007_v58 = vunpack.i.h.bf16 %v8005_v41  ;;  %v8006_v33 = vunpack.i.l.bf16 %v8005_v41 }
 0x773   : > { %v4860_v24 = vsel %vm4851_vm9, %v4843_v7, %v7986_v12  ;;  %v4861_v17 = vsel %vm4851_vm9, %v4844_v62, %v7987_v0 }
 0x774   : > { %v4872_v43 = vpack.c.bf16 %v4861_v17, %v4860_v24 }
 0x776   : > { %4968 = vmatmul.bf16.gmra.mxu3 %v4872_v43 }
 0x778   : > { %v7990_v8 = vpop.permute.xlu1 %7989  ;;  %v8040_v2 = vpop.permute.xlu2 %8039 }
 0x779   : > { %v7992_v9 = vunpack.i.h.bf16 %v7990_v8  ;;  %v7991_v46 = vunpack.i.l.bf16 %v7990_v8  ;;  %v8010_v16 = vpop.permute.xlu0 %8009  ;;  %v8042_v7 = vunpack.i.h.bf16 %v8040_v2  ;;  %v8041_v62 = vunpack.i.l.bf16 %v8040_v2  ;;  %v13182_v2 = vld [vmem:[#allocation18_spill] sm:$0xff] }
 0x77a   : > { %v8012_v36 = vunpack.i.h.bf16 %v8010_v16  ;;  %v8011_v25 = vunpack.i.l.bf16 %v8010_v16 }
 0x77b   : > { %v4845_v11 = vsel %vm4834_vm8, %v4828_v27, %v7991_v46  ;;  %v4846_v30 = vsel %vm4834_vm8, %v4829_v38, %v7992_v9 }
 0x77c   : > { %v4862_v42 = vsel %vm4851_vm9, %v4845_v11, %v8006_v33  ;;  %v4863_v1 = vsel %vm4851_vm9, %v4846_v30, %v8007_v58 }
 0x77d   : > { %v4873_v34 = vpack.c.bf16 %v4863_v1, %v4862_v42  ;;  %v11509_v42 = vld [vmem:[%s12975_s7] ss:$0 sm:$0xff] }
 0x780   : > { %v8000_v51 = vpop.permute.xlu1 %7999  ;;  %v8045_v43 = vpop.permute.xlu2 %8044 }
 0x781   : > { %v8002_v29 = vunpack.i.h.bf16 %v8000_v51  ;;  %v8001_v60 = vunpack.i.l.bf16 %v8000_v51  ;;  %v8025_v3 = vpop.permute.xlu0 %8024  ;;  %v8047_v9 = vunpack.i.h.bf16 %v8045_v43  ;;  %v8046_v46 = vunpack.i.l.bf16 %v8045_v43 }
 0x782   : > { %v8027_v21 = vunpack.i.h.bf16 %v8025_v3  ;;  %v8026_v22 = vunpack.i.l.bf16 %v8025_v3 }
 0x783   : > { %v4780_v55 = vsel %vm4766_vm4, %v4763_v32, %v8002_v29  ;;  %v4779_v14 = vsel %vm4766_vm4, %v4762_v15, %v8001_v60 }
 0x784   : > { %v4796_v5 = vsel %vm4783_vm5, %v4779_v14, %v8011_v25  ;;  %v4797_v6 = vsel %vm4783_vm5, %v4780_v55, %v8012_v36 }
 0x785   : > { %v4813_v20 = vsel %vm4800_vm6, %v4796_v5, %v8016_v57  ;;  %v4814_v0 = vsel %vm4800_vm6, %v4797_v6, %v8017_v56  ;;  %v13180_v6 = vld [vmem:[#allocation16_spill] sm:$0xff] }
 0x786   : > { %4973 = vmatmul.bf16.gmra.mxu3 %v4873_v34 }
 0x788   : > { %v8020_v40 = vpop.permute.xlu1 %8019  ;;  %v8060_v31 = vpop.permute.xlu2 %8059 }
 0x789   : > { %v8022_v52 = vunpack.i.h.bf16 %v8020_v40  ;;  %v8021_v48 = vunpack.i.l.bf16 %v8020_v40  ;;  %v8035_v50 = vpop.permute.xlu0 %8034  ;;  %v8062_v51 = vunpack.i.h.bf16 %v8060_v31  ;;  %v8061_v29 = vunpack.i.l.bf16 %v8060_v31 }
 0x78a   : > { %v8037_v59 = vunpack.i.h.bf16 %v8035_v50  ;;  %v8036_v63 = vunpack.i.l.bf16 %v8035_v50 }
 0x78b   : > { %v4830_v12 = vsel %vm4817_vm7, %v4813_v20, %v8021_v48  ;;  %v4831_v18 = vsel %vm4817_vm7, %v4814_v0, %v8022_v52  ;;  %v13184_v0 = vld [vmem:[#allocation19_spill] sm:$0xff] }
 0x78c   : > { %v4847_v23 = vsel %vm4834_vm8, %v4830_v12, %v8026_v22  ;;  %v4848_v41 = vsel %vm4834_vm8, %v4831_v18, %v8027_v21  ;;  %v13186_v22 = vld [vmem:[#allocation21_spill] sm:$0xff] }
 0x78d   : > { %v4864_v10 = vsel %vm4851_vm9, %v4847_v23, %v8041_v62  ;;  %v4865_v39 = vsel %vm4851_vm9, %v4848_v41, %v8042_v7  ;;  %v13188_v62 = vld [vmem:[#allocation20_spill] sm:$0xff] }
 0x78e   : > { %v4874_v19 = vpack.c.bf16 %v4865_v39, %v4864_v10 }
 0x790   : > { %v8030_v26 = vpop.permute.xlu1 %8029 }
 0x791   : > { %v8032_v24 = vunpack.i.h.bf16 %v8030_v26  ;;  %v8031_v17 = vunpack.i.l.bf16 %v8030_v26  ;;  %v8055_v16 = vpop.permute.xlu0 %8054 }
 0x792   : > { %v8057_v61 = vunpack.i.h.bf16 %v8055_v16  ;;  %v8056_v28 = vunpack.i.l.bf16 %v8055_v16 }
 0x793   : > { %v4765_v53 = vsel %vm1726_vm3, %v13176_v49, %v8032_v24  ;;  %v4764_v37 = vsel %vm1726_vm3, %v13177_v44, %v8031_v17  ;;  %v13190_v17 = vld [vmem:[#allocation23_spill] sm:$0xff] }
 0x794   : > { %v4781_v8 = vsel %vm4766_vm4, %v4764_v37, %v8036_v63  ;;  %v4782_v54 = vsel %vm4766_vm4, %v4765_v53, %v8037_v59  ;;  %v13193_v63 = vld [vmem:[#allocation22_spill] sm:$0xff] }
 0x795   : > { %v4798_v27 = vsel %vm4783_vm5, %v4781_v8, %v8046_v46  ;;  %v4799_v38 = vsel %vm4783_vm5, %v4782_v54, %v8047_v9 }
 0x796   : > { %4978 = vmatmul.bf16.gmra.mxu3 %v4874_v19  ;;  %v13192_v19 = vld [vmem:[#allocation13_spill] sm:$0xff] }
 0x798   : > { %v8050_v47 = vpop.permute.xlu1 %8049 }
 0x799   : > { %v8052_v4 = vunpack.i.h.bf16 %v8050_v47  ;;  %v8051_v13 = vunpack.i.l.bf16 %v8050_v47 }
 0x79b   : > { %v4815_v11 = vsel %vm4800_vm6, %v4798_v27, %v8051_v13  ;;  %v4816_v30 = vsel %vm4800_vm6, %v4799_v38, %v8052_v4  ;;  %v13195_v13 = vld [vmem:[#allocation25_spill] sm:$0xff] }
 0x79c   : > { %v4832_v58 = vsel %vm4817_vm7, %v4815_v11, %v8056_v28  ;;  %v4833_v33 = vsel %vm4817_vm7, %v4816_v30, %v8057_v61 }
 0x79d   : > { %v4849_v55 = vsel %vm4834_vm8, %v4832_v58, %v8061_v29  ;;  %v4850_v14 = vsel %vm4834_vm8, %v4833_v33, %v8062_v51  ;;  %v13197_v33 = vld [vmem:[#allocation24_spill] sm:$0xff] }
 0x7a0   : > { %v8065_v60 = vpop.permute.xlu1 %8064 }
 0x7a1   : > { %v8067_v1 = vunpack.i.h.bf16 %v8065_v60  ;;  %v8066_v45 = vunpack.i.l.bf16 %v8065_v60 }
 0x7a2   : > { %v4949_v32 = vpop.f32.mrf.mxu3 }
 0x7a3   : > { %v4989_v15 = vadd.f32 %v4949_v32, %v13178_v35  ;;  %v4866_v34 = vsel %vm4851_vm9, %v4849_v55, %v8066_v45  ;;  %v4867_v36 = vsel %vm4851_vm9, %v4850_v14, %v8067_v1 }
 0x7a4   : > { %v4875_v3 = vpack.c.bf16 %v4867_v36, %v4866_v34 }
 0x7a5   : > { %v11517_v25 = vadd.f32 %v11509_v42, %v4989_v15  ;;  %v13199_v15 = vld [vmem:[#allocation14_spill] sm:$0xff] }
 0x7a6   : > { %4983 = vmatmul.bf16.gmra.mxu3 %v4875_v3 }
 0x7a7   : > { %13179 = vst [vmem:[#allocation51_spill] sm:$0xff] %v11517_v25  ;;  %5027 = vadd.xlane.f32.xlu0 %v11517_v25 }
 0x7aa   : > { %v4951_v5 = vpop.f32.mrf.mxu3 }
 0x7ab   : > { %v4990_v56 = vadd.f32 %v4951_v5, %v13180_v6  ;;  %v13201_v6 = vld [vmem:[#allocation26_spill] sm:$0xff] }
 0x7ad   : > { %v11522_v57 = vadd.f32 %v11509_v42, %v4990_v56 }
 0x7af   : > { %13181 = vst [vmem:[#allocation47_spill] sm:$0xff] %v11522_v57  ;;  %5029 = vadd.xlane.f32.xlu2 %v11522_v57 }
 0x7c9   : > { %v4954_v40 = vpop.f32.mrf.mxu3 }
 0x7ca   : > { %v4991_v52 = vadd.f32 %v4954_v40, %v13182_v2 }
 0x7cc   : > { %v11527_v48 = vadd.f32 %v11509_v42, %v4991_v52 }
 0x7ce   : > { %13183 = vst [vmem:[#allocation46_spill] sm:$0xff] %v11527_v48  ;;  %5031 = vadd.xlane.f32.xlu1 %v11527_v48 }
 0x7d1   : > { %v4956_v20 = vpop.f32.mrf.mxu3 }
 0x7d2   : > { %v4992_v12 = vadd.f32 %v4956_v20, %v13184_v0 }
 0x7d4   : > { %v11532_v18 = vadd.f32 %v11509_v42, %v4992_v12 }
 0x7d6   : > { %13185 = vst [vmem:[#allocation45_spill] sm:$0xff] %v11532_v18  ;;  %5033 = vadd.xlane.f32.xlu0 %v11532_v18 }
 0x7d9   : > { %v4959_v21 = vpop.f32.mrf.mxu3 }
 0x7da   : > { %v4993_v23 = vadd.f32 %v4959_v21, %v13186_v22  ;;  %v13203_v21 = vld [vmem:[#allocation27_spill] sm:$0xff] }
 0x7dc   : > { %v11537_v41 = vadd.f32 %v11509_v42, %v4993_v23 }
 0x7de   : > { %13187 = vst [vmem:[#allocation44_spill] sm:$0xff] %v11537_v41  ;;  %5035 = vadd.xlane.f32.xlu2 %v11537_v41 }
 0x7e1   : > { %v4961_v7 = vpop.f32.mrf.mxu3 }
 0x7e2   : > { %v4994_v50 = vadd.f32 %v4961_v7, %v13188_v62 }
 0x7e4   : > { %v11542_v26 = vadd.f32 %v11509_v42, %v4994_v50 }
 0x7e6   : > { %13189 = vst [vmem:[#allocation50_spill] sm:$0xff] %v11542_v26  ;;  %5037 = vadd.xlane.f32.xlu1 %v11542_v26 }
 0x7e9   : > { %v4964_v24 = vpop.f32.mrf.mxu3 }
 0x7ea   : > { %v4995_v10 = vadd.f32 %v4964_v24, %v13190_v17  ;;  %v13205_v17 = vld [vmem:[#allocation17_spill] sm:$0xff] }
 0x7ec   : > { %v11547_v39 = vadd.f32 %v11509_v42, %v4995_v10 }
 0x7ee   : > { %13191 = vst [vmem:[#allocation49_spill] sm:$0xff] %v11547_v39  ;;  %5039 = vadd.xlane.f32.xlu1 %v11547_v39 }
 0x7f1   : > { %v4966_v44 = vpop.f32.mrf.mxu3 }
 0x7f2   : > { %v4996_v8 = vadd.f32 %v4966_v44, %v13193_v63  ;;  %v13207_v44 = vld [vmem:[#allocation29_spill] sm:$0xff] }
 0x7f3   : > { %v7476_v63 = vld [vmem:[%s12978_s10 + $0xe0] sm:$0xf] }
 0x7f4   : > { %v11562_v9 = vadd.f32 %v11509_v42, %v4996_v8  ;;  %v7690_v8 = vld [vmem:[%s12978_s10 + $0xec] sm:$0xf0] }
 0x7f6   : > { %13194 = vst [vmem:[#allocation48_spill] sm:$0xff] %v11562_v9 }
 0x7f9   : > { %v4969_v4 = vpop.f32.mrf.mxu3 }
 0x7fa   : > { %v4997_v16 = vadd.f32 %v4969_v4, %v13195_v13  ;;  %v7478_v4 = vld [vmem:[%s12978_s10 + $0xf0] sm:$0xf0]  ;;  %v7484_v13 = vld [vmem:[%s12978_s10 + $0xe8] sm:$0xf] }
 0x7fc   : > { %v11569_v27 = vadd.f32 %v11509_v42, %v4997_v16  ;;  %v7691_v16 = vld [vmem:[%s12978_s10 + $0xf4] sm:$0xf0] }
 0x7fe   : > { %13196 = vst [vmem:[#allocation31_spill] sm:$0xff] %v11569_v27 }
 0x801   : > { %v4971_v38 = vpop.f32.mrf.mxu3 }
 0x802   : > { %v4998_v51 = vadd.f32 %v4971_v38, %v13197_v33  ;;  %v7686_v33 = vld [vmem:[%s12978_s10 + $0xcc] sm:$0xf0] }
 0x804   : > { %v11584_v1 = vadd.f32 %v11509_v42, %v4998_v51  ;;  %v7684_v51 = vld [vmem:[%s12978_s10 + $0xc4] sm:$0xf] }
 0x806   : > { %13198 = vst [vmem:[#allocation30_spill] sm:$0xff] %v11584_v1 }
 0x809   : > { %v4974_v28 = vpop.f32.mrf.mxu3 }
 0x80a   : > { %v4999_v55 = vadd.f32 %v4974_v28, %v13199_v15 }
 0x80c   : > { %v11595_v36 = vadd.f32 %v11509_v42, %v4999_v55 }
 0x80e   : > { %13200 = vst [vmem:[#allocation33_spill] sm:$0xff] %v11595_v36 }
 0x811   : > { %v4976_v32 = vpop.f32.mrf.mxu3 }
 0x812   : > { %v5000_v56 = vadd.f32 %v4976_v32, %v13201_v6  ;;  %v7468_v32 = vld [vmem:[%s12978_s10 + $0xc8] sm:$0xf]  ;;  %v7444_v6 = vld [vmem:[%s12978_s10 + $0xa0] sm:$0xf] }
 0x814   : > { %v11606_v20 = vadd.f32 %v11509_v42, %v5000_v56  ;;  %v7682_v56 = vld [vmem:[%s12978_s10 + $0xac] sm:$0xf0] }
 0x816   : > { %13202 = vst [vmem:[#allocation32_spill] sm:$0xff] %v11606_v20 }
 0x819   : > { %v4979_v2 = vpop.f32.mrf.mxu3 }
 0x81a   : > { %v5028_v43 = vpop.xlane.xlu0 %5027  ;;  %v5001_v22 = vadd.f32 %v4979_v2, %v13203_v21  ;;  %v7445_v2 = vor.u32 %v7682_v56, %v7444_v6  ;;  %v7683_v21 = vld [vmem:[%s12978_s10 + $0xb4] sm:$0xf0]  ;;  %v7398_v6 = vld [vmem:[%s12978_s10 + $0x50] sm:$0xf0]  ;;  %v7404_v56 = vld [vmem:[%s12978_s10 + $0x48] sm:$0xf] }
 0x81b   : > { %v5059_v49 = vmul.f32 %v5028_v43, %v13192_v19 }
 0x81c   : > { %v11617_v50 = vadd.f32 %v11509_v42, %v5001_v22 }
 0x81d   : > { %v11552_v53 = vsub.f32 %v11517_v25, %v5059_v49 }
 0x81e   : > { %13204 = vst [vmem:[#allocation35_spill] sm:$0xff] %v11617_v50 }
 0x81f   : > { %v5091_v37 = vmul.f32 %v11552_v53, %v11552_v53 }
 0x821   : > { %5107 = vadd.xlane.f32.xlu0 %v5091_v37  ;;  %v4981_v62 = vpop.f32.mrf.mxu3 }
 0x822   : > { %v5030_v59 = vpop.xlane.xlu2 %5029  ;;  %v5002_v10 = vadd.f32 %v4981_v62, %v13205_v17  ;;  %v7681_v62 = vld [vmem:[%s12978_s10 + $0xac] sm:$0xf] }
 0x823   : > { %v5060_v54 = vmul.f32 %v5030_v59, %v13192_v19 }
 0x824   : > { %v11624_v43 = vadd.f32 %v11509_v42, %v5002_v10  ;;  %v7428_v10 = vld [vmem:[%s12978_s10 + $0x80] sm:$0xf] }
 0x825   : > { %v11559_v47 = vsub.f32 %v11522_v57, %v5060_v54  ;;  %v7688_v54 = vld [vmem:[%s12978_s10 + $0xe4] sm:$0xf] }
 0x826   : > { %13206 = vst [vmem:[#allocation34_spill] sm:$0xff] %v11624_v43  ;;  %v7481_v38 = vor.u32 %v7688_v54, %v7478_v4  ;;  %v7679_v54 = vld [vmem:[%s12978_s10 + $0x94] sm:$0xf0] }
 0x827   : > { %v5092_v46 = vmul.f32 %v11559_v47, %v11559_v47 }
 0x828   : > { %5644 = vmatpush.bf16.msrb.mxu1 %v7481_v38 }
 0x829   : > { %5109 = vadd.xlane.f32.xlu2 %v5092_v46  ;;  %5041 = vadd.xlane.f32.xlu0 %v11562_v9  ;;  %v4984_v49 = vpop.f32.mrf.mxu3  ;;  %v7477_v46 = vor.u32 %v7690_v8, %v7476_v63  ;;  %v7430_v63 = vld [vmem:[%s12978_s10 + $0x90] sm:$0xf0]  ;;  %v7436_v8 = vld [vmem:[%s12978_s10 + $0x88] sm:$0xf] }
 0x82a   : > { %v5003_v37 = vadd.f32 %v4984_v49, %v13207_v44  ;;  %v7678_v49 = vld [vmem:[%s12978_s10 + $0x8c] sm:$0xf0]  ;;  %v7676_v44 = vld [vmem:[%s12978_s10 + $0x84] sm:$0xf]  ;;  %v7437_v4 = vor.u32 %v7679_v54, %v7436_v8  ;;  %v7665_v54 = vld [vmem:[%s12978_s10 + $0x2c] sm:$0xf] }
 0x82b   : > { %5595 = vmatpush.bf16.msrb.mxu0 %v7477_v46  ;;  %v7433_v46 = vor.u32 %v7676_v44, %v7430_v63  ;;  %v7667_v44 = vld [vmem:[%s12978_s10 + $0x34] sm:$0xf0] }
 0x82c   : > { %v11629_v59 = vadd.f32 %v11509_v42, %v5003_v37  ;;  %v7429_v37 = vor.u32 %v7678_v49, %v7428_v10  ;;  %v7382_v10 = vld [vmem:[%s12978_s10 + $0x30] sm:$0xf0]  ;;  %v7388_v49 = vld [vmem:[%s12978_s10 + $0x28] sm:$0xf] }
 0x82d   : > { %v7389_v8 = vor.u32 %v7667_v44, %v7388_v49 }
 0x82e   : > { %13208 = vst [vmem:[#allocation37_spill] sm:$0xff] %v11629_v59 }
 0x831   : > { %5043 = vadd.xlane.f32.xlu0 %v11569_v27  ;;  %v4986_v44 = vpop.f32.mrf.mxu3 }
 0x841   : > { %v5032_v11 = vpop.xlane.xlu1 %5031 }
 0x842   : > { %v5061_v30 = vmul.f32 %v5032_v11, %v13192_v19  ;;  %v7485_v11 = vor.u32 %v7691_v16, %v7484_v13  ;;  %v7677_v13 = vld [vmem:[%s12978_s10 + $0x8c] sm:$0xf]  ;;  %v7438_v16 = vld [vmem:[%s12978_s10 + $0x98] sm:$0xf0] }
 0x843   : > { %v7441_v38 = vor.u32 %v7677_v13, %v7438_v16  ;;  %v7364_v16 = vld [vmem:[%s12978_s10] sm:$0xf] }
 0x844   : > { %v11574_v31 = vsub.f32 %v11527_v48, %v5061_v30  ;;  %v7689_v30 = vld [vmem:[%s12978_s10 + $0xec] sm:$0xf]  ;;  %5693 = vmatpush.bf16.msrb.mxu2 %v7485_v11  ;;  %v7412_v11 = vld [vmem:[%s12978_s10 + $0x60] sm:$0xf] }
 0x846   : > { %v5093_v61 = vmul.f32 %v11574_v31, %v11574_v31 }
 0x848   : > { %5111 = vadd.xlane.f32.xlu2 %v5093_v61  ;;  %v7486_v61 = vld [vmem:[%s12978_s10 + $0xf8] sm:$0xf0] }
 0x849   : > { %v5034_v58 = vpop.xlane.xlu0 %5033  ;;  %v7489_v28 = vor.u32 %v7689_v30, %v7486_v61  ;;  %v7674_v30 = vld [vmem:[%s12978_s10 + $0x6c] sm:$0xf0]  ;;  %v7672_v61 = vld [vmem:[%s12978_s10 + $0x64] sm:$0xf] }
 0x84a   : > { %v5062_v29 = vmul.f32 %v5034_v58, %v13192_v19  ;;  %v7460_v58 = vld [vmem:[%s12978_s10 + $0xc0] sm:$0xf] }
 0x84b   : > { %5742 = vmatpush.bf16.msrb.mxu3 %v7489_v28  ;;  %v7413_v28 = vor.u32 %v7674_v30, %v7412_v11  ;;  %v7660_v11 = vld [vmem:[%s12978_s10 + $0x4] sm:$0xf] }
 0x84c   : > { %v11581_v60 = vsub.f32 %v11532_v18, %v5062_v29  ;;  %v7461_v29 = vor.u32 %v7686_v33, %v7460_v58  ;;  %v7414_v58 = vld [vmem:[%s12978_s10 + $0x70] sm:$0xf0]  ;;  %v7420_v33 = vld [vmem:[%s12978_s10 + $0x68] sm:$0xf] }
 0x84e   : > { %v5094_v45 = vmul.f32 %v11581_v60, %v11581_v60  ;;  %5596 = vmatpush.bf16.msrb.mxu0 %v7461_v29  ;;  %v7417_v29 = vor.u32 %v7672_v61, %v7414_v58  ;;  %v7372_v58 = vld [vmem:[%s12978_s10 + $0x8] sm:$0xf] }
 0x850   : > { %5113 = vadd.xlane.f32.xlu1 %v5094_v45  ;;  %5045 = vadd.xlane.f32.xlu2 %v11584_v1  ;;  %v7462_v45 = vld [vmem:[%s12978_s10 + $0xd0] sm:$0xf0] }
 0x851   : > { %v5036_v35 = vpop.xlane.xlu2 %5035  ;;  %v7465_v15 = vor.u32 %v7684_v51, %v7462_v45  ;;  %v7675_v51 = vld [vmem:[%s12978_s10 + $0x74] sm:$0xf0] }
 0x852   : > { %v5063_v14 = vmul.f32 %v5036_v35, %v13192_v19  ;;  %v7687_v35 = vld [vmem:[%s12978_s10 + $0xd4] sm:$0xf0]  ;;  %5597 = vmatpush.bf16.msrb.mxu0 %v7445_v2  ;;  %v7421_v45 = vor.u32 %v7675_v51, %v7420_v33 }
 0x853   : > { %v7469_v55 = vor.u32 %v7687_v35, %v7468_v32  ;;  %5645 = vmatpush.bf16.msrb.mxu1 %v7465_v15  ;;  %v7673_v32 = vld [vmem:[%s12978_s10 + $0x6c] sm:$0xf]  ;;  %v7422_v35 = vld [vmem:[%s12978_s10 + $0x78] sm:$0xf0]  ;;  %v7663_v51 = vld [vmem:[%s12978_s10 + $0x14] sm:$0xf0] }
 0x854   : > { %v11592_v34 = vsub.f32 %v11537_v41, %v5063_v14  ;;  %v7685_v14 = vld [vmem:[%s12978_s10 + $0xcc] sm:$0xf]  ;;  %v7425_v15 = vor.u32 %v7673_v32, %v7422_v35  ;;  %v7373_v32 = vor.u32 %v7663_v51, %v7372_v58 }
 0x855   : > { %5694 = vmatpush.bf16.msrb.mxu2 %v7469_v55  ;;  %v7396_v55 = vld [vmem:[%s12978_s10 + $0x40] sm:$0xf] }
 0x856   : > { %v5095_v3 = vmul.f32 %v11592_v34, %v11592_v34  ;;  %5598 = vmatpush.bf16.msrb.mxu0 %v7429_v37 }
 0x858   : > { %5115 = vadd.xlane.f32.xlu1 %v5095_v3  ;;  %5047 = vadd.xlane.f32.xlu2 %v11595_v36  ;;  %v7470_v3 = vld [vmem:[%s12978_s10 + $0xd8] sm:$0xf0] }
 0x859   : > { %v5038_v5 = vpop.xlane.xlu1 %5037 }
 0x85a   : > { %v5064_v40 = vmul.f32 %v5038_v5, %v13192_v19  ;;  %v7473_v5 = vor.u32 %v7685_v14, %v7470_v3  ;;  %5599 = vmatpush.bf16.msrb.mxu0 %v7413_v28  ;;  %v7670_v14 = vld [vmem:[%s12978_s10 + $0x4c] sm:$0xf0]  ;;  %v7668_v3 = vld [vmem:[%s12978_s10 + $0x44] sm:$0xf]  ;;  %v7366_v28 = vld [vmem:[%s12978_s10 + $0x10] sm:$0xf0] }
 0x85b   : > { %v7401_v2 = vor.u32 %v7668_v3, %v7398_v6  ;;  %v7369_v33 = vor.u32 %v7660_v11, %v7366_v28 }
 0x85c   : > { %v11603_v52 = vsub.f32 %v11542_v26, %v5064_v40  ;;  %v7680_v40 = vld [vmem:[%s12978_s10 + $0xa4] sm:$0xf]  ;;  %5743 = vmatpush.bf16.msrb.mxu3 %v7473_v5  ;;  %v7397_v5 = vor.u32 %v7670_v14, %v7396_v55 }
 0x85e   : > { %v5096_v0 = vmul.f32 %v11603_v52, %v11603_v52  ;;  %5600 = vmatpush.bf16.msrb.mxu0 %v7397_v5 }
 0x860   : > { %5117 = vadd.xlane.f32.xlu0 %v5096_v0  ;;  %5049 = vadd.xlane.f32.xlu1 %v11606_v20  ;;  %v7446_v0 = vld [vmem:[%s12978_s10 + $0xb0] sm:$0xf0] }
 0x861   : > { %v5040_v12 = vpop.xlane.xlu1 %5039  ;;  %v7449_v22 = vor.u32 %v7680_v40, %v7446_v0  ;;  %v7671_v40 = vld [vmem:[%s12978_s10 + $0x54] sm:$0xf0] }
 0x862   : > { %v5065_v23 = vmul.f32 %v5040_v12, %v13192_v19  ;;  %v7452_v12 = vld [vmem:[%s12978_s10 + $0xa8] sm:$0xf]  ;;  %v7405_v0 = vor.u32 %v7671_v40, %v7404_v56 }
 0x863   : > { %5646 = vmatpush.bf16.msrb.mxu1 %v7449_v22 }
 0x864   : > { %v11614_v7 = vsub.f32 %v11547_v39, %v5065_v23  ;;  %v7453_v23 = vor.u32 %v7683_v21, %v7452_v12  ;;  %v7669_v12 = vld [vmem:[%s12978_s10 + $0x4c] sm:$0xf]  ;;  %v7406_v21 = vld [vmem:[%s12978_s10 + $0x58] sm:$0xf0] }
 0x865   : > { %v7409_v22 = vor.u32 %v7669_v12, %v7406_v21 }
 0x866   : > { %v5097_v24 = vmul.f32 %v11614_v7, %v11614_v7  ;;  %5695 = vmatpush.bf16.msrb.mxu2 %v7453_v23  ;;  %v7380_v23 = vld [vmem:[%s12978_s10 + $0x20] sm:$0xf] }
 0x867   : > { %5647 = vmatpush.bf16.msrb.mxu1 %v7433_v46  ;;  %v7390_v46 = vld [vmem:[%s12978_s10 + $0x38] sm:$0xf0] }
 0x868   : > { %5119 = vadd.xlane.f32.xlu0 %v5097_v24  ;;  %5051 = vadd.xlane.f32.xlu1 %v11617_v50  ;;  %v7454_v24 = vld [vmem:[%s12978_s10 + $0xb8] sm:$0xf0]  ;;  %v7393_v13 = vor.u32 %v7665_v54, %v7390_v46 }
 0x869   : > { %v7457_v17 = vor.u32 %v7681_v62, %v7454_v24  ;;  %v7666_v62 = vld [vmem:[%s12978_s10 + $0x2c] sm:$0xf0]  ;;  %v7664_v24 = vld [vmem:[%s12978_s10 + $0x24] sm:$0xf]  ;;  %v13209_v54 = vld [vmem:[#allocation28_spill] sm:$0xff] }
 0x86a   : > { %5696 = vmatpush.bf16.msrb.mxu2 %v7437_v4  ;;  %v7385_v63 = vor.u32 %v7664_v24, %v7382_v10  ;;  %v5004_v46 = vadd.f32 %v4986_v44, %v13209_v54 }
 0x86b   : > { %5744 = vmatpush.bf16.msrb.mxu3 %v7457_v17  ;;  %5648 = vmatpush.bf16.msrb.mxu1 %v7417_v29  ;;  %v7381_v17 = vor.u32 %v7666_v62, %v7380_v23  ;;  %v7661_v29 = vld [vmem:[%s12978_s10 + $0xc] sm:$0xf] }
 0x86c   : > { %v11846_v11 = vadd.f32 %v11509_v42, %v5004_v46 }
 0x86d   : > { %5601 = vmatpush.bf16.msrb.mxu0 %v7381_v17 }
 0x86e   : > { %5697 = vmatpush.bf16.msrb.mxu2 %v7421_v45  ;;  %v7374_v45 = vld [vmem:[%s12978_s10 + $0x18] sm:$0xf0]  ;;  %13210 = vst [vmem:[#allocation36_spill] sm:$0xff] %v11846_v11 }
 0x86f   : > { %5745 = vmatpush.bf16.msrb.mxu3 %v7441_v38  ;;  %5649 = vmatpush.bf16.msrb.mxu1 %v7401_v2  ;;  %v7662_v38 = vld [vmem:[%s12978_s10 + $0xc] sm:$0xf0]  ;;  %v7377_v35 = vor.u32 %v7661_v29, %v7374_v45 }
 0x870   : > { %5053 = vadd.xlane.f32.xlu0 %v11624_v43  ;;  %v7365_v61 = vor.u32 %v7662_v38, %v7364_v16 }
 0x872   : > { %5698 = vmatpush.bf16.msrb.mxu2 %v7405_v0  ;;  %5602 = vmatpush.bf16.msrb.mxu0 %v7365_v61  ;;  %v11851_v61 = vld [vmem:[%s12977_s9] ss:$0 sm:$0xff] }
 0x873   : > { %5746 = vmatpush.bf16.msrb.mxu3 %v7425_v15  ;;  %5650 = vmatpush.bf16.msrb.mxu1 %v7385_v63 }
 0x876   : > { %5699 = vmatpush.bf16.msrb.mxu2 %v7389_v8 }
 0x877   : > { %5747 = vmatpush.bf16.msrb.mxu3 %v7409_v22  ;;  %5651 = vmatpush.bf16.msrb.mxu1 %v7369_v33 }
 0x878   : > { %5055 = vadd.xlane.f32.xlu0 %v11629_v59 }
 0x87a   : > { %5700 = vmatpush.bf16.msrb.mxu2 %v7373_v32 }
 0x87b   : > { %5748 = vmatpush.bf16.msrb.mxu3 %v7393_v13  ;;  %v11842_v13 = vld [vmem:[%s12976_s8] ss:$0 sm:$0xff] }
 0x87f   : > { %5749 = vmatpush.bf16.msrb.mxu3 %v7377_v35 }
 0x894   : > { %v5108_v37 = vpop.xlane.xlu0 %5107 }
 0x895   : > { %v5139_v4 = vmul.f32 %v5108_v37, %v13192_v19 }
 0x897   : > { %v5155_v30 = vadd.f32 1e-05, %v5139_v4 }
 0x899   : > { %8652 = vrsqrt.f32 %v5155_v30  ;;  %vm5177_vm10 = vweird.f32 %v5155_v30 }
 0x89c   : > { %v5110_v15 = vpop.xlane.xlu2 %5109  ;;  %v5042_v55 = vpop.xlane.xlu0 %5041 }
 0x89d   : > { %v5140_v14 = vmul.f32 %v5110_v15, %v13192_v19  ;;  %v5066_v3 = vmul.f32 %v5042_v55, %v13192_v19 }
 0x89f   : > { %v8653_v5 = vpop.eup %8652  ;;  %v5156_v6 = vadd.f32 1e-05, %v5140_v14  ;;  %v11828_v56 = vsub.f32 %v11562_v9, %v5066_v3 }
 0x8a0   : > { %v5172_v40 = vmul.f32 %v8653_v5, %v5155_v30  ;;  %vm5178_vm3 = vweird.f32 %v8653_v5 }
 0x8a1   : > { %8654 = vrsqrt.f32 %v5156_v6  ;;  %v5098_v2 = vmul.f32 %v11828_v56, %v11828_v56  ;;  %vm5179_vm11 = vmor %vm5177_vm10, %vm5178_vm3  ;;  %vm5187_vm13 = vweird.f32 %v5156_v6 }
 0x8a2   : > { %v5173_v0 = vmul.f32 %v8653_v5, %v5172_v40 }
 0x8a3   : > { %5121 = vadd.xlane.f32.xlu2 %v5098_v2 }
 0x8a4   : > { %v5174_v12 = vmul.f32 0.5, %v5173_v0  ;;  %v5044_v21 = vpop.xlane.xlu0 %5043 }
 0x8a5   : > { %v5067_v22 = vmul.f32 %v5044_v21, %v13192_v19 }
 0x8a6   : > { %v5175_v23 = vsub.f32 1.5, %v5174_v12 }
 0x8a7   : > { %v8655_v62 = vpop.eup %8654  ;;  %v11834_v24 = vsub.f32 %v11569_v27, %v5067_v22 }
 0x8a8   : > { %v5176_v17 = vmul.f32 %v8653_v5, %v5175_v23  ;;  %v5182_v10 = vmul.f32 %v8655_v62, %v5156_v6  ;;  %vm5188_vm12 = vweird.f32 %v8655_v62 }
 0x8a9   : > { %v5099_v49 = vmul.f32 %v11834_v24, %v11834_v24  ;;  %vm5189_vm14 = vmor %vm5187_vm13, %vm5188_vm12 }
 0x8aa   : > { %v5183_v37 = vmul.f32 %v8655_v62, %v5182_v10  ;;  %v5180_v63 = vsel %vm5179_vm11, %v8653_v5, %v5176_v17 }
 0x8ab   : > { %5123 = vadd.xlane.f32.xlu2 %v5099_v49  ;;  %v5331_v16 = vmul.f32 %v5180_v63, %v11552_v53 }
 0x8ac   : > { %v5184_v8 = vmul.f32 0.5, %v5183_v37 }
 0x8ad   : > { %v5350_v28 = vmul.f32 %v11842_v13, %v5331_v16 }
 0x8ae   : > { %v5185_v4 = vsub.f32 1.5, %v5184_v8 }
 0x8af   : > { %v5369_v33 = vadd.f32 %v11851_v61, %v5350_v28 }
 0x8b0   : > { %v5186_v38 = vmul.f32 %v8655_v62, %v5185_v4 }
 0x8b2   : > { %v5190_v30 = vsel %vm5189_vm14, %v8655_v62, %v5186_v38 }
 0x8b3   : > { %v5332_v58 = vmul.f32 %v5190_v30, %v11559_v47  ;;  %5057 = vadd.xlane.f32.xlu2 %v11846_v11 }
 0x8b5   : > { %v5351_v53 = vmul.f32 %v11842_v13, %v5332_v58 }
 0x8b7   : > { %v5370_v42 = vadd.f32 %v11851_v61, %v5351_v53 }
 0x8b9   : > { %v5385_v51 = vpack.c.bf16 %v5370_v42, %v5369_v33 }
 0x8bb   : > { %5603 = vmatmul.bf16.vlgmr.msrb.gmra.mxu0 %v5385_v51  ;;  %5652 = vmatmul.bf16.vlgmr.msrb.gmra.mxu1 %v5385_v51  ;;  %v5112_v29 = vpop.xlane.xlu2 %5111 }
 0x8bc   : > { %5701 = vmatmul.bf16.vlgmr.msrb.gmra.mxu2 %v5385_v51  ;;  %5750 = vmatmul.bf16.vlgmr.msrb.gmra.mxu3 %v5385_v51  ;;  %v5141_v45 = vmul.f32 %v5112_v29, %v13192_v19 }
 0x8be   : > { %v5157_v32 = vadd.f32 1e-05, %v5141_v45 }
 0x8c0   : > { %8656 = vrsqrt.f32 %v5157_v32  ;;  %vm5197_vm0 = vweird.f32 %v5157_v32 }
 0x8c3   : > { %v5114_v35 = vpop.xlane.xlu1 %5113  ;;  %v5046_v47 = vpop.xlane.xlu2 %5045 }
 0x8c4   : > { %v5142_v15 = vmul.f32 %v5114_v35, %v13192_v19  ;;  %v5068_v55 = vmul.f32 %v5046_v47, %v13192_v19 }
 0x8c6   : > { %v8657_v14 = vpop.eup %8656  ;;  %v5158_v3 = vadd.f32 1e-05, %v5142_v15  ;;  %v11863_v5 = vsub.f32 %v11584_v1, %v5068_v55 }
 0x8c7   : > { %v5192_v6 = vmul.f32 %v8657_v14, %v5157_v32  ;;  %vm5198_vm15 = vweird.f32 %v8657_v14 }
 0x8c8   : > { %8658 = vrsqrt.f32 %v5158_v3  ;;  %v5100_v40 = vmul.f32 %v11863_v5, %v11863_v5  ;;  %vm5199_vm1 = vmor %vm5197_vm0, %vm5198_vm15  ;;  %vm5207_vm4 = vweird.f32 %v5158_v3 }
 0x8c9   : > { %v5193_v2 = vmul.f32 %v8657_v14, %v5192_v6 }
 0x8ca   : > { %5125 = vadd.xlane.f32.xlu1 %v5100_v40 }
 0x8cb   : > { %v5194_v0 = vmul.f32 0.5, %v5193_v2  ;;  %v5116_v12 = vpop.xlane.xlu1 %5115  ;;  %v5048_v21 = vpop.xlane.xlu2 %5047 }
 0x8cc   : > { %v5143_v22 = vmul.f32 %v5116_v12, %v13192_v19  ;;  %v5069_v23 = vmul.f32 %v5048_v21, %v13192_v19 }
 0x8cd   : > { %v5195_v62 = vsub.f32 1.5, %v5194_v0 }
 0x8ce   : > { %v8659_v17 = vpop.eup %8658  ;;  %v5159_v10 = vadd.f32 1e-05, %v5143_v22  ;;  %v11870_v49 = vsub.f32 %v11595_v36, %v5069_v23 }
 0x8cf   : > { %v5196_v44 = vmul.f32 %v8657_v14, %v5195_v62  ;;  %v5202_v37 = vmul.f32 %v8659_v17, %v5158_v3  ;;  %vm5208_vm2 = vweird.f32 %v8659_v17 }
 0x8d0   : > { %8660 = vrsqrt.f32 %v5159_v10  ;;  %v5101_v63 = vmul.f32 %v11870_v49, %v11870_v49  ;;  %vm5209_vm5 = vmor %vm5207_vm4, %vm5208_vm2  ;;  %vm5217_vm7 = vweird.f32 %v5159_v10 }
 0x8d1   : > { %v5203_v8 = vmul.f32 %v8659_v17, %v5202_v37  ;;  %v5200_v54 = vsel %vm5199_vm1, %v8657_v14, %v5196_v44 }
 0x8d2   : > { %5127 = vadd.xlane.f32.xlu1 %v5101_v63  ;;  %v5333_v53 = vmul.f32 %v5200_v54, %v11574_v31 }
 0x8d3   : > { %v5204_v46 = vmul.f32 0.5, %v5203_v8  ;;  %v5118_v4 = vpop.xlane.xlu0 %5117  ;;  %v5050_v16 = vpop.xlane.xlu1 %5049 }
 0x8d4   : > { %v5144_v38 = vmul.f32 %v5118_v4, %v13192_v19  ;;  %v5070_v30 = vmul.f32 %v5050_v16, %v13192_v19  ;;  %v5352_v15 = vmul.f32 %v11842_v13, %v5333_v53 }
 0x8d5   : > { %v5205_v28 = vsub.f32 1.5, %v5204_v46 }
 0x8d6   : > { %v8661_v58 = vpop.eup %8660  ;;  %v5160_v33 = vadd.f32 1e-05, %v5144_v38  ;;  %v11878_v42 = vsub.f32 %v11606_v20, %v5070_v30  ;;  %v5371_v12 = vadd.f32 %v11851_v61, %v5352_v15 }
 0x8d7   : > { %v5206_v51 = vmul.f32 %v8659_v17, %v5205_v28  ;;  %v5212_v29 = vmul.f32 %v8661_v58, %v5159_v10  ;;  %vm5218_vm6 = vweird.f32 %v8661_v58 }
 0x8d8   : > { %8662 = vrsqrt.f32 %v5160_v33  ;;  %v5102_v45 = vmul.f32 %v11878_v42, %v11878_v42  ;;  %vm5219_vm8 = vmor %vm5217_vm7, %vm5218_vm6  ;;  %vm5227_vm3 = vweird.f32 %v5160_v33 }
 0x8d9   : > { %v5210_v32 = vsel %vm5209_vm5, %v8659_v17, %v5206_v51  ;;  %v5213_v35 = vmul.f32 %v8661_v58, %v5212_v29 }
 0x8da   : > { %v5334_v47 = vmul.f32 %v5210_v32, %v11581_v60  ;;  %5129 = vadd.xlane.f32.xlu0 %v5102_v45 }
 0x8db   : > { %v5214_v31 = vmul.f32 0.5, %v5213_v35  ;;  %v5120_v55 = vpop.xlane.xlu0 %5119  ;;  %v5052_v14 = vpop.xlane.xlu1 %5051 }
 0x8dc   : > { %v5071_v6 = vmul.f32 %v5052_v14, %v13192_v19  ;;  %v5353_v3 = vmul.f32 %v11842_v13, %v5334_v47 }
 0x8dd   : > { %v5215_v40 = vsub.f32 1.5, %v5214_v31 }
 0x8de   : > { %v8663_v2 = vpop.eup %8662  ;;  %v11887_v0 = vsub.f32 %v11617_v50, %v5071_v6  ;;  %v5372_v21 = vadd.f32 %v11851_v61, %v5353_v3 }
 0x8df   : > { %v5216_v60 = vmul.f32 %v8661_v58, %v5215_v40  ;;  %v5222_v22 = vmul.f32 %v8663_v2, %v5160_v33  ;;  %vm5228_vm9 = vweird.f32 %v8663_v2 }
 0x8e0   : > { %v5386_v23 = vpack.c.bf16 %v5372_v21, %v5371_v12  ;;  %v5103_v62 = vmul.f32 %v11887_v0, %v11887_v0  ;;  %vm5229_vm10 = vmor %vm5227_vm3, %vm5228_vm9 }
 0x8e1   : > { %v5223_v17 = vmul.f32 %v8663_v2, %v5222_v22  ;;  %v5220_v44 = vsel %vm5219_vm8, %v8661_v58, %v5216_v60 }
 0x8e2   : > { %5608 = vmatmul.bf16.gmra.mxu0 %v5386_v23  ;;  %5657 = vmatmul.bf16.gmra.mxu1 %v5386_v23  ;;  %v5335_v46 = vmul.f32 %v5220_v44, %v11592_v34 }
 0x8e3   : > { %v5224_v37 = vmul.f32 0.5, %v5223_v17  ;;  %5706 = vmatmul.bf16.gmra.mxu2 %v5386_v23  ;;  %5755 = vmatmul.bf16.gmra.mxu3 %v5386_v23  ;;  %v5054_v63 = vpop.xlane.xlu0 %5053 }
 0x8e4   : > { %5131 = vadd.xlane.f32.xlu2 %v5103_v62  ;;  %v5072_v8 = vmul.f32 %v5054_v63, %v13192_v19  ;;  %v5354_v28 = vmul.f32 %v11842_v13, %v5335_v46 }
 0x8e5   : > { %v5225_v54 = vsub.f32 1.5, %v5224_v37 }
 0x8e6   : > { %v11896_v4 = vsub.f32 %v11624_v43, %v5072_v8  ;;  %v5373_v33 = vadd.f32 %v11851_v61, %v5354_v28 }
 0x8e7   : > { %v5226_v10 = vmul.f32 %v8663_v2, %v5225_v54 }
 0x8e8   : > { %v5104_v16 = vmul.f32 %v11896_v4, %v11896_v4 }
 0x8e9   : > { %v5230_v38 = vsel %vm5229_vm10, %v8663_v2, %v5226_v10 }
 0x8ea   : > { %v5336_v30 = vmul.f32 %v5230_v38, %v11603_v52  ;;  %5133 = vadd.xlane.f32.xlu1 %v5104_v16  ;;  %v5145_v52 = vmul.f32 %v5120_v55, %v13192_v19 }
 0x8eb   : > { %v5056_v58 = vpop.xlane.xlu0 %5055 }
 0x8ec   : > { %v5073_v53 = vmul.f32 %v5056_v58, %v13192_v19  ;;  %v5355_v34 = vmul.f32 %v11842_v13, %v5336_v30  ;;  %v5161_v35 = vadd.f32 1e-05, %v5145_v52 }
 0x8ee   : > { %v11905_v51 = vsub.f32 %v11629_v59, %v5073_v53  ;;  %v5374_v29 = vadd.f32 %v11851_v61, %v5355_v34  ;;  %8664 = vrsqrt.f32 %v5161_v35  ;;  %vm5237_vm12 = vweird.f32 %v5161_v35 }
 0x8f0   : > { %v5387_v45 = vpack.c.bf16 %v5374_v29, %v5373_v33  ;;  %v5105_v32 = vmul.f32 %v11905_v51, %v11905_v51 }
 0x8f2   : > { %5613 = vmatmul.bf16.gmra.mxu0 %v5387_v45  ;;  %5662 = vmatmul.bf16.gmra.mxu1 %v5387_v45 }
 0x8f3   : > { %5711 = vmatmul.bf16.gmra.mxu2 %v5387_v45  ;;  %5760 = vmatmul.bf16.gmra.mxu3 %v5387_v45 }
 0x8f4   : > { %5135 = vadd.xlane.f32.xlu0 %v5105_v32  ;;  %v8665_v47 = vpop.eup %8664 }
 0x8f5   : > { %v5232_v15 = vmul.f32 %v8665_v47, %v5161_v35  ;;  %vm5238_vm11 = vweird.f32 %v8665_v47 }
 0x8f6   : > { %vm5239_vm13 = vmor %vm5237_vm12, %vm5238_vm11 }
 0x8f7   : > { %v5233_v31 = vmul.f32 %v8665_v47, %v5232_v15 }
 0x8f9   : > { %v5234_v40 = vmul.f32 0.5, %v5233_v31 }
 0x8fb   : > { %v5235_v2 = vsub.f32 1.5, %v5234_v40 }
 0x8fd   : > { %v5236_v60 = vmul.f32 %v8665_v47, %v5235_v2 }
 0x8ff   : > { %v5240_v55 = vsel %vm5239_vm13, %v8665_v47, %v5236_v60 }
 0x900   : > { %v5337_v63 = vmul.f32 %v5240_v55, %v11614_v7 }
 0x902   : > { %v5356_v28 = vmul.f32 %v11842_v13, %v5337_v63 }
 0x904   : > { %v5375_v58 = vadd.f32 %v11851_v61, %v5356_v28 }
 0x916   : > { %v5122_v14 = vpop.xlane.xlu2 %5121 }
 0x917   : > { %v5146_v6 = vmul.f32 %v5122_v14, %v13192_v19 }
 0x919   : > { %v5162_v3 = vadd.f32 1e-05, %v5146_v6 }
 0x91b   : > { %8666 = vrsqrt.f32 %v5162_v3  ;;  %vm5247_vm15 = vweird.f32 %v5162_v3 }
 0x91e   : > { %v5124_v12 = vpop.xlane.xlu2 %5123 }
 0x91f   : > { %v5147_v8 = vmul.f32 %v5124_v12, %v13192_v19 }
 0x921   : > { %v8667_v21 = vpop.eup %8666  ;;  %v5163_v30 = vadd.f32 1e-05, %v5147_v8 }
 0x922   : > { %v5242_v22 = vmul.f32 %v8667_v21, %v5162_v3  ;;  %vm5248_vm14 = vweird.f32 %v8667_v21 }
 0x923   : > { %vm5249_vm0 = vmor %vm5247_vm15, %vm5248_vm14  ;;  %8668 = vrsqrt.f32 %v5163_v30  ;;  %vm5257_vm2 = vweird.f32 %v5163_v30 }
 0x924   : > { %v5243_v23 = vmul.f32 %v8667_v21, %v5242_v22 }
 0x926   : > { %v5244_v62 = vmul.f32 0.5, %v5243_v23  ;;  %v5058_v17 = vpop.xlane.xlu2 %5057 }
 0x927   : > { %v5074_v44 = vmul.f32 %v5058_v17, %v13192_v19 }
 0x928   : > { %v5245_v37 = vsub.f32 1.5, %v5244_v62 }
 0x929   : > { %v11917_v54 = vsub.f32 %v11846_v11, %v5074_v44  ;;  %v8669_v33 = vpop.eup %8668 }
 0x92a   : > { %v5246_v46 = vmul.f32 %v8667_v21, %v5245_v37  ;;  %v5252_v29 = vmul.f32 %v8669_v33, %v5163_v30  ;;  %vm5258_vm1 = vweird.f32 %v8669_v33 }
 0x92b   : > { %v5106_v10 = vmul.f32 %v11917_v54, %v11917_v54  ;;  %vm5259_vm4 = vmor %vm5257_vm2, %vm5258_vm1 }
 0x92c   : > { %v5250_v16 = vsel %vm5249_vm0, %v8667_v21, %v5246_v46  ;;  %v5253_v45 = vmul.f32 %v8669_v33, %v5252_v29 }
 0x92d   : > { %v5338_v38 = vmul.f32 %v5250_v16, %v11828_v56  ;;  %5137 = vadd.xlane.f32.xlu2 %v5106_v10 }
 0x92e   : > { %v5254_v35 = vmul.f32 0.5, %v5253_v45 }
 0x92f   : > { %v5357_v7 = vmul.f32 %v11842_v13, %v5338_v38 }
 0x930   : > { %v5255_v47 = vsub.f32 1.5, %v5254_v35 }
 0x931   : > { %v5376_v53 = vadd.f32 %v11851_v61, %v5357_v7 }
 0x932   : > { %v5256_v3 = vmul.f32 %v8669_v33, %v5255_v47 }
 0x933   : > { %v5388_v34 = vpack.c.bf16 %v5376_v53, %v5375_v58 }
 0x934   : > { %v5260_v12 = vsel %vm5259_vm4, %v8669_v33, %v5256_v3 }
 0x935   : > { %5618 = vmatmul.bf16.gmra.mxu0 %v5388_v34  ;;  %5667 = vmatmul.bf16.gmra.mxu1 %v5388_v34  ;;  %v5339_v62 = vmul.f32 %v5260_v12, %v11834_v24 }
 0x936   : > { %5716 = vmatmul.bf16.gmra.mxu2 %v5388_v34  ;;  %5765 = vmatmul.bf16.gmra.mxu3 %v5388_v34 }
 0x937   : > { %v5358_v10 = vmul.f32 %v11842_v13, %v5339_v62 }
 0x939   : > { %v5377_v58 = vadd.f32 %v11851_v61, %v5358_v10 }
 0x93d   : > { %v5126_v56 = vpop.xlane.xlu1 %5125 }
 0x93e   : > { %v5148_v32 = vmul.f32 %v5126_v56, %v13192_v19 }
 0x940   : > { %v5164_v52 = vadd.f32 1e-05, %v5148_v32 }
 0x942   : > { %8670 = vrsqrt.f32 %v5164_v52  ;;  %vm5267_vm6 = vweird.f32 %v5164_v52 }
 0x945   : > { %v5128_v15 = vpop.xlane.xlu1 %5127 }
 0x946   : > { %v5149_v31 = vmul.f32 %v5128_v15, %v13192_v19 }
 0x948   : > { %v8671_v14 = vpop.eup %8670  ;;  %v5165_v6 = vadd.f32 1e-05, %v5149_v31 }
 0x949   : > { %v5262_v40 = vmul.f32 %v8671_v14, %v5164_v52  ;;  %vm5268_vm5 = vweird.f32 %v8671_v14 }
 0x94a   : > { %8672 = vrsqrt.f32 %v5165_v6  ;;  %vm5269_vm7 = vmor %vm5267_vm6, %vm5268_vm5  ;;  %vm5277_vm9 = vweird.f32 %v5165_v6 }
 0x94b   : > { %v5263_v2 = vmul.f32 %v8671_v14, %v5262_v40 }
 0x94d   : > { %v5264_v21 = vmul.f32 0.5, %v5263_v2  ;;  %v5130_v60 = vpop.xlane.xlu0 %5129 }
 0x94e   : > { %v5150_v22 = vmul.f32 %v5130_v60, %v13192_v19 }
 0x94f   : > { %v5265_v23 = vsub.f32 1.5, %v5264_v21 }
 0x950   : > { %v8673_v55 = vpop.eup %8672  ;;  %v5166_v17 = vadd.f32 1e-05, %v5150_v22 }
 0x951   : > { %v5266_v44 = vmul.f32 %v8671_v14, %v5265_v23  ;;  %v5272_v37 = vmul.f32 %v8673_v55, %v5165_v6  ;;  %vm5278_vm8 = vweird.f32 %v8673_v55 }
 0x952   : > { %8674 = vrsqrt.f32 %v5166_v17  ;;  %vm5279_vm3 = vmor %vm5277_vm9, %vm5278_vm8  ;;  %vm5287_vm11 = vweird.f32 %v5166_v17 }
 0x953   : > { %v5270_v63 = vsel %vm5269_vm7, %v8671_v14, %v5266_v44  ;;  %v5273_v8 = vmul.f32 %v8673_v55, %v5272_v37 }
 0x954   : > { %v5340_v46 = vmul.f32 %v5270_v63, %v11863_v5 }
 0x955   : > { %v5274_v16 = vmul.f32 0.5, %v5273_v8 }
 0x956   : > { %v5359_v38 = vmul.f32 %v11842_v13, %v5340_v46  ;;  %v5604_v46 = vpop.f32.mrf.mxu0 }
 0x957   : > { %v5132_v30 = vpop.xlane.xlu2 %5131  ;;  %v5275_v7 = vsub.f32 1.5, %v5274_v16  ;;  %v5653_v16 = vpop.f32.mrf.mxu1 }
 0x958   : > { %v8675_v28 = vpop.eup %8674  ;;  %v5151_v24 = vmul.f32 %v5132_v30, %v13192_v19  ;;  %v5378_v53 = vadd.f32 %v11851_v61, %v5359_v38 }
 0x959   : > { %v5282_v34 = vmul.f32 %v8675_v28, %v5166_v17  ;;  %v5276_v56 = vmul.f32 %v8673_v55, %v5275_v7  ;;  %vm5288_vm10 = vweird.f32 %v8675_v28 }
 0x95a   : > { %v5167_v33 = vadd.f32 1e-05, %v5151_v24  ;;  %v5389_v29 = vpack.c.bf16 %v5378_v53, %v5377_v58  ;;  %vm5289_vm12 = vmor %vm5287_vm11, %vm5288_vm10  ;;  %v5425_v24 = vld [vmem:[%s12979_s11] sm:$0xf] }
 0x95b   : > { %v5283_v45 = vmul.f32 %v8675_v28, %v5282_v34  ;;  %v5280_v47 = vsel %vm5279_vm3, %v8673_v55, %v5276_v56 }
 0x95c   : > { %8676 = vrsqrt.f32 %v5167_v33  ;;  %5623 = vmatmul.bf16.gmra.mxu0 %v5389_v29  ;;  %5672 = vmatmul.bf16.gmra.mxu1 %v5389_v29  ;;  %v5341_v3 = vmul.f32 %v5280_v47, %v11870_v49  ;;  %vm5297_vm14 = vweird.f32 %v5167_v33 }
 0x95d   : > { %v5284_v5 = vmul.f32 0.5, %v5283_v45  ;;  %5721 = vmatmul.bf16.gmra.mxu2 %v5389_v29  ;;  %5770 = vmatmul.bf16.gmra.mxu3 %v5389_v29  ;;  %v5134_v32 = vpop.xlane.xlu1 %5133 }
 0x95e   : > { %v5152_v52 = vmul.f32 %v5134_v32, %v13192_v19  ;;  %v5360_v22 = vmul.f32 %v11842_v13, %v5341_v3  ;;  %v5606_v45 = vpop.f32.mrf.mxu0 }
 0x95f   : > { %v5285_v35 = vsub.f32 1.5, %v5284_v5  ;;  %v5655_v32 = vpop.f32.mrf.mxu1 }
 0x960   : > { %v5168_v15 = vadd.f32 1e-05, %v5152_v52  ;;  %v5379_v49 = vadd.f32 %v11851_v61, %v5360_v22 }
 0x961   : > { %v5286_v31 = vmul.f32 %v8675_v28, %v5285_v35  ;;  %v11959_v35 = vperm.slane %v5425_v24, 2 }
 0x962   : > { %v8677_v14 = vpop.eup %8676  ;;  %8678 = vrsqrt.f32 %v5168_v15  ;;  %vm5307_vm1 = vweird.f32 %v5168_v15 }
 0x963   : > { %v5290_v40 = vsel %vm5289_vm12, %v8675_v28, %v5286_v31  ;;  %v5292_v2 = vmul.f32 %v8677_v14, %v5167_v33  ;;  %vm5298_vm13 = vweird.f32 %v8677_v14  ;;  %v5702_v28 = vpop.f32.mrf.mxu2  ;;  %v11950_v33 = vperm.slane %v5425_v24, 0 }
 0x964   : > { %v5342_v12 = vmul.f32 %v5290_v40, %v11878_v42  ;;  %vm5299_vm15 = vmor %vm5297_vm14, %vm5298_vm13  ;;  %v11977_v3 = vadd.f32 %v5702_v28, %v11959_v35 }
 0x965   : > { %v5293_v21 = vmul.f32 %v8677_v14, %v5292_v2  ;;  %v11957_v5 = vadd.f32 %v5604_v46, %v11950_v33 }
 0x966   : > { %v5361_v6 = vmul.f32 %v11842_v13, %v5342_v12 }
 0x967   : > { %v5294_v60 = vmul.f32 0.5, %v5293_v21 }
 0x968   : > { %v8679_v23 = vpop.eup %8678  ;;  %v5380_v17 = vadd.f32 %v11851_v61, %v5361_v6 }
 0x969   : > { %v5295_v55 = vsub.f32 1.5, %v5294_v60  ;;  %v5302_v62 = vmul.f32 %v8679_v23, %v5168_v15  ;;  %vm5308_vm0 = vweird.f32 %v8679_v23  ;;  %v5857_v60 = vmul.f32 0.044715, %v11977_v3 }
 0x96a   : > { %v5390_v42 = vpack.c.bf16 %v5380_v17, %v5379_v49  ;;  %vm5309_vm2 = vmor %vm5307_vm1, %vm5308_vm0 }
 0x96b   : > { %v5296_v44 = vmul.f32 %v8677_v14, %v5295_v55  ;;  %v5303_v37 = vmul.f32 %v8679_v23, %v5302_v62  ;;  %v5704_v47 = vpop.f32.mrf.mxu2  ;;  %v5921_v49 = vmul.f32 %v5857_v60, %v11977_v3 }
 0x96c   : > { %5628 = vmatmul.bf16.gmra.mxu0 %v5390_v42  ;;  %5677 = vmatmul.bf16.gmra.mxu1 %v5390_v42 }
 0x96d   : > { %v5304_v63 = vmul.f32 0.5, %v5303_v37  ;;  %v5300_v8 = vsel %vm5299_vm15, %v8677_v14, %v5296_v44  ;;  %5726 = vmatmul.bf16.gmra.mxu2 %v5390_v42  ;;  %5775 = vmatmul.bf16.gmra.mxu3 %v5390_v42  ;;  %v11974_v14 = vadd.f32 %v5704_v47, %v11959_v35  ;;  %v5136_v37 = vpop.xlane.xlu0 %5135  ;;  %v12007_v47 = vperm.slane %v5425_v24, 3 }
 0x96e   : > { %v5343_v38 = vmul.f32 %v5300_v8, %v11887_v0  ;;  %v11953_v0 = vperm.slane %v5425_v24, 1  ;;  %v5153_v46 = vmul.f32 %v5136_v37, %v13192_v19  ;;  %v7715_v24 = vld [vmem:[%s12980_s12 + $0xb8] sm:$0xff]  ;;  %v7706_v37 = vld [vmem:[%s12980_s12 + $0x70] sm:$0xff] }
 0x96f   : > { %v5305_v10 = vsub.f32 1.5, %v5304_v63  ;;  %v5861_v6 = vmul.f32 0.044715, %v11974_v14  ;;  %6753 = vmatpush.bf16.msra.mxu2 %v7715_v24 }
 0x970   : > { %v5362_v53 = vmul.f32 %v11842_v13, %v5343_v38  ;;  %v11967_v15 = vadd.f32 %v5653_v16, %v11953_v0  ;;  %v11970_v31 = vadd.f32 %v5655_v32, %v11953_v0  ;;  %v5609_v38 = vpop.f32.mrf.mxu0 }
 0x971   : > { %v5306_v30 = vmul.f32 %v8679_v23, %v5305_v10  ;;  %v5925_v44 = vmul.f32 %v5861_v6, %v11974_v14  ;;  %v7707_v6 = vld [vmem:[%s12980_s12 + $0x78] sm:$0xff] }
 0x972   : > { %v5381_v56 = vadd.f32 %v11851_v61, %v5362_v53  ;;  %v5856_v2 = vmul.f32 0.044715, %v11967_v15  ;;  %v5860_v12 = vmul.f32 0.044715, %v11970_v31  ;;  %v12003_v53 = vadd.f32 1e-05, %v5153_v46  ;;  %6704 = vmatpush.bf16.msra.mxu1 %v7707_v6 }
 0x973   : > { %v5310_v7 = vsel %vm5309_vm2, %v8679_v23, %v5306_v30  ;;  %v5989_v16 = vmul.f32 %v5925_v44, %v11974_v14  ;;  %v5985_v30 = vmul.f32 %v5921_v49, %v11977_v3  ;;  %v7698_v44 = vld [vmem:[%s12980_s12 + $0x30] sm:$0xff] }
 0x974   : > { %v5344_v58 = vmul.f32 %v5310_v7, %v11896_v4  ;;  %v11961_v4 = vpop.f32.mrf.mxu3  ;;  %v5920_v23 = vmul.f32 %v5856_v2, %v11967_v15  ;;  %v5924_v55 = vmul.f32 %v5860_v12, %v11970_v31  ;;  %8680 = vrsqrt.f32 %v12003_v53  ;;  %v7714_v49 = vld [vmem:[%s12980_s12 + $0xb0] sm:$0xff] }
 0x975   : > { %13211 = vst [vmem:[#allocation39_spill] sm:$0xff] %v11961_v4  ;;  %6754 = vmatpush.bf16.msra.mxu2 %v7714_v49  ;;  %vm5317_vm5 = vweird.f32 %v12003_v53 }
 0x976   : > { %v5363_v34 = vmul.f32 %v11842_v13, %v5344_v58  ;;  %v11964_v13 = vadd.f32 %v5606_v45, %v11950_v33  ;;  %v5984_v42 = vmul.f32 %v5920_v23, %v11967_v15  ;;  %v5988_v8 = vmul.f32 %v5924_v55, %v11970_v31  ;;  %v12027_v23 = vpop.f32.mrf.mxu2  ;;  %6705 = vmatpush.bf16.msra.mxu1 %v7706_v37 }
 0x977   : > { %v6053_v45 = vadd.f32 %v5989_v16, %v11974_v14 }
 0x978   : > { %v5382_v29 = vadd.f32 %v11851_v61, %v5363_v34  ;;  %v5855_v61 = vmul.f32 0.044715, %v11957_v5  ;;  %v5859_v40 = vmul.f32 0.044715, %v11964_v13  ;;  %v6048_v7 = vadd.f32 %v5984_v42, %v11967_v15  ;;  %v5611_v55 = vpop.f32.mrf.mxu0  ;;  %v12046_v42 = vld [vmem:[%s12980_s12 + $0xf0] sm:$0xff] }
 0x979   : > { %v6052_v58 = vadd.f32 %v5988_v8, %v11970_v31  ;;  %v6117_v2 = vmul.f32 0.7978846, %v6053_v45  ;;  %v12051_v46 = vadd.f32 %v5611_v55, %v11950_v33  ;;  %v7697_v45 = vld [vmem:[%s12980_s12 + $0x28] sm:$0xff]  ;;  %v5793_v55 = vmul.f32 0.5, %v11977_v3 }
 0x97a   : > { %v5391_v52 = vpack.c.bf16 %v5382_v29, %v5381_v56  ;;  %v5919_v21 = vmul.f32 %v5855_v61, %v11957_v5  ;;  %v5923_v22 = vmul.f32 %v5859_v40, %v11964_v13  ;;  %v6049_v56 = vadd.f32 %v5985_v30, %v11977_v3  ;;  %v5658_v61 = vpop.f32.mrf.mxu1  ;;  %v12048_v8 = vpop.eup %8680  ;;  %v7704_v3 = vld [vmem:[%s12980_s12 + $0x60] sm:$0xff] }
 0x97b   : > { %v6116_v40 = vmul.f32 0.7978846, %v6052_v58  ;;  %vm5318_vm4 = vweird.f32 %v12048_v8 }
 0x97c   : > { %5633 = vmatmul.bf16.gmra.mxu0 %v5391_v52  ;;  %5682 = vmatmul.bf16.gmra.mxu1 %v5391_v52  ;;  %v11988_v62 = vpop.f32.mrf.mxu3  ;;  %v5983_v17 = vmul.f32 %v5919_v21, %v11957_v5  ;;  %v5987_v63 = vmul.f32 %v5923_v22, %v11964_v13  ;;  %v7699_v21 = vld [vmem:[%s12980_s12 + $0x38] sm:$0xff]  ;;  %v6113_v60 = vmul.f32 0.7978846, %v6049_v56  ;;  %v7705_v56 = vld [vmem:[%s12980_s12 + $0x68] sm:$0xff]  ;;  %vm12241_vm6 = vmor %vm5317_vm5, %vm5318_vm4 }
 0x97d   : > { %5731 = vmatmul.bf16.gmra.mxu2 %v5391_v52  ;;  %5780 = vmatmul.bf16.gmra.mxu3 %v5391_v52  ;;  %13212 = vst [vmem:[#allocation38_spill] sm:$0xff] %v11988_v62  ;;  %v6112_v52 = vmul.f32 0.7978846, %v6048_v7  ;;  %v12025_v22 = vld [vmem:[%s12980_s12 + $0xf8] sm:$0xff]  ;;  %v5312_v7 = vmul.f32 %v12048_v8, %v12003_v53  ;;  %v7692_v53 = vld [vmem:[%s12980_s12] sm:$0xff] }
 0x97e   : > { %v6047_v10 = vadd.f32 %v5983_v17, %v11957_v5  ;;  %v6051_v28 = vadd.f32 %v5987_v63, %v11964_v13  ;;  %6655 = vmatpush.bf16.msra.mxu0 %v7699_v21  ;;  %v12030_v17 = vadd.f32 %v5609_v38, %v11950_v33  ;;  %7726 = vmatpush.bf16.msra.mxu3 %v12025_v22  ;;  %v12077_v21 = vld [vmem:[%s12980_s12 + $0xe8] sm:$0xff] }
 0x97f   : > { %6706 = vmatpush.bf16.msra.mxu1 %v7705_v56 }
 0x980   : > { %v6111_v29 = vmul.f32 0.7978846, %v6047_v10  ;;  %v6115_v32 = vmul.f32 0.7978846, %v6051_v28  ;;  %v5863_v30 = vmul.f32 0.044715, %v12030_v17 }
 0x982   : > { %8682 = vtanh.f32 %v6111_v29  ;;  %6656 = vmatpush.bf16.msra.mxu0 %v7698_v44  ;;  %7727 = vmatpush.bf16.msra.mxu3 %v12046_v42 }
 0x983   : > { %8684 = vtanh.f32 %v6115_v32  ;;  %v7713_v32 = vld [vmem:[%s12980_s12 + $0xa8] sm:$0xff]  ;;  %6707 = vmatpush.bf16.msra.mxu1 %v7704_v3 }
 0x984   : > { %v5756_v34 = vpop.f32.mrf.mxu3  ;;  %8686 = vtanh.f32 %v6112_v52  ;;  %6755 = vmatpush.bf16.msra.mxu2 %v7713_v32  ;;  %v5796_v32 = vmul.f32 0.5, %v11970_v31 }
 0x985   : > { %v12011_v12 = vadd.f32 %v5756_v34, %v12007_v47  ;;  %8688 = vtanh.f32 %v6116_v40  ;;  %v12058_v34 = vpop.f32.mrf.mxu1  ;;  %v5791_v40 = vmul.f32 0.5, %v11957_v5  ;;  %v5795_v5 = vmul.f32 0.5, %v11964_v13  ;;  %v7712_v13 = vld [vmem:[%s12980_s12 + $0xa0] sm:$0xff] }
 0x986   : > { %8690 = vtanh.f32 %v6117_v2  ;;  %v5867_v2 = vmul.f32 0.044715, %v12051_v46  ;;  %6657 = vmatpush.bf16.msra.mxu0 %v7697_v45  ;;  %7728 = vmatpush.bf16.msra.mxu3 %v12077_v21  ;;  %v12102_v45 = vld [vmem:[%s12980_s12 + $0xe0] sm:$0xff] }
 0x987   : > { %v5866_v63 = vmul.f32 0.044715, %v12011_v12  ;;  %8692 = vtanh.f32 %v6113_v60  ;;  %v5792_v60 = vmul.f32 0.5, %v11967_v15  ;;  %v7696_v15 = vld [vmem:[%s12980_s12 + $0x20] sm:$0xff] }
 0x988   : > { %v8683_v16 = vpop.eup %8682  ;;  %v5931_v57 = vmul.f32 %v5867_v2, %v12051_v46  ;;  %6756 = vmatpush.bf16.msra.mxu2 %v7712_v13  ;;  %v7702_v13 = vld [vmem:[%s12980_s12 + $0x50] sm:$0xff] }
 0x989   : > { %v8685_v38 = vpop.eup %8684  ;;  %v5930_v58 = vmul.f32 %v5866_v63, %v12011_v12  ;;  %v6239_v24 = vadd.f32 1.0, %v8683_v16  ;;  %v5927_v63 = vmul.f32 %v5863_v30, %v12030_v17  ;;  %v5313_v16 = vmul.f32 %v12048_v8, %v5312_v7 }
 0x98a   : > { %v8687_v28 = vpop.eup %8686  ;;  %v6243_v44 = vadd.f32 1.0, %v8685_v38  ;;  %v5709_v38 = vpop.f32.mrf.mxu2  ;;  %6658 = vmatpush.bf16.msra.mxu0 %v7696_v15  ;;  %7729 = vmatpush.bf16.msra.mxu3 %v12102_v45  ;;  %v12149_v15 = vadd.f32 %v12058_v34, %v11953_v0 }
 0x98b   : > { %v8689_v52 = vpop.eup %8688  ;;  %v6240_v49 = vadd.f32 1.0, %v8687_v28  ;;  %v12108_v59 = vmul.f32 %v6239_v24, %v5791_v40  ;;  %v5991_v31 = vmul.f32 %v5927_v63, %v12030_v17  ;;  %v7695_v24 = vld [vmem:[%s12980_s12 + $0x18] sm:$0xff]  ;;  %v5995_v63 = vmul.f32 %v5931_v57, %v12051_v46 }
 0x98c   : > { %v5758_v10 = vpop.f32.mrf.mxu3  ;;  %v8691_v6 = vpop.eup %8690  ;;  %v6244_v56 = vadd.f32 1.0, %v8689_v52  ;;  %v12110_v43 = vmul.f32 %v6243_v44, %v5795_v5  ;;  %v12163_v34 = vadd.f32 %v5709_v38, %v11959_v35 }
 0x98d   : > { %v12061_v29 = vadd.f32 %v5758_v10, %v12007_v47  ;;  %v8693_v37 = vpop.eup %8692  ;;  %v12084_v10 = vadd.f32 %v5658_v61, %v11953_v0  ;;  %v5994_v61 = vmul.f32 %v5930_v58, %v12011_v12  ;;  %v6245_v25 = vadd.f32 1.0, %v8691_v6  ;;  %v5614_v6 = vpop.f32.mrf.mxu0 }
 0x98e   : > { %v6241_v7 = vadd.f32 1.0, %v8693_v37  ;;  %v5797_v58 = vmul.f32 0.5, %v11974_v14  ;;  %v5314_v14 = vmul.f32 0.5, %v5313_v16  ;;  %v12132_v44 = vmul.f32 %v6244_v56, %v5796_v32  ;;  %v5663_v3 = vpop.f32.mrf.mxu1  ;;  %6659 = vmatpush.bf16.msra.mxu0 %v7695_v24 }
 0x98f   : > { %v5870_v30 = vmul.f32 0.044715, %v12061_v29  ;;  %v5864_v50 = vmul.f32 0.044715, %v12084_v10  ;;  %v6058_v2 = vadd.f32 %v5994_v61, %v12011_v12  ;;  %v12136_v37 = vadd.f32 %v12027_v23, %v11959_v35  ;;  %v7694_v23 = vld [vmem:[%s12980_s12 + $0x10] sm:$0xff] }
 0x990   : > { %v12144_v5 = vmul.f32 %v6245_v25, %v5797_v58  ;;  %v12159_v16 = vmul.f32 %v6241_v7, %v5793_v55  ;;  %v7710_v61 = vld [vmem:[%s12980_s12 + $0x90] sm:$0xff]  ;;  %v6055_v55 = vadd.f32 %v5991_v31, %v12030_v17  ;;  %v12182_v58 = vmul.f32 0.5, %v12030_v17  ;;  %v7701_v17 = vld [vmem:[%s12980_s12 + $0x48] sm:$0xff] }
 0x991   : > { %v5934_v40 = vmul.f32 %v5870_v30, %v12061_v29  ;;  %v5928_v57 = vmul.f32 %v5864_v50, %v12084_v10  ;;  %v12172_v30 = vld [vmem:[%s12980_s12 + $0xd0] sm:$0xff]  ;;  %v6122_v56 = vmul.f32 0.7978846, %v6058_v2  ;;  %v5865_v32 = vmul.f32 0.044715, %v12136_v37 }
 0x992   : > { %v6059_v24 = vadd.f32 %v5995_v63, %v12051_v46  ;;  %v5868_v31 = vmul.f32 0.044715, %v12149_v15  ;;  %v5712_v2 = vpop.f32.mrf.mxu2  ;;  %6660 = vmatpush.bf16.msra.mxu0 %v7694_v23  ;;  %v7709_v63 = vld [vmem:[%s12980_s12 + $0x88] sm:$0xff]  ;;  %v12224_v1 = vadd.f32 %v5663_v3, %v11953_v0  ;;  %v7700_v3 = vld [vmem:[%s12980_s12 + $0x40] sm:$0xff] }
 0x993   : > { %v5998_v50 = vmul.f32 %v5934_v40, %v12061_v29  ;;  %v7693_v40 = vld [vmem:[%s12980_s12 + $0x8] sm:$0xff]  ;;  %v12215_v7 = vmul.f32 %v5928_v57, %v12084_v10  ;;  %v5929_v36 = vmul.f32 %v5865_v32, %v12136_v37  ;;  %v12269_v41 = vadd.f32 %v5712_v2, %v11959_v35 }
 0x994   : > { %v12113_v20 = vpop.f32.mrf.mxu3  ;;  %v12212_v23 = vld [vmem:[%s12980_s12 + $0xc8] sm:$0xff]  ;;  %v5932_v57 = vmul.f32 %v5868_v31, %v12149_v15  ;;  %v12256_v31 = vld [vmem:[%s12980_s12 + $0xc0] sm:$0xff]  ;;  %v5872_v26 = vmul.f32 0.044715, %v12224_v1 }
 0x996   : > { %6661 = vmatpush.bf16.msra.mxu0 %v7693_v40  ;;  %v12259_v40 = vmul.f32 0.5, %v12051_v46 }
 0x99a   : > { %6662 = vmatpush.bf16.msra.mxu0 %v7692_v53  ;;  %v5936_v53 = vmul.f32 %v5872_v26, %v12224_v1 }
 0x99c   : > { %v5763_v27 = vpop.f32.mrf.mxu3 }
 0x99e   : > { %6802 = vmatpush.bf16.msrb.mxu0 %v12025_v22  ;;  %v5993_v22 = vmul.f32 %v5929_v36, %v12136_v37 }
 0x9a0   : > { %v5138_v28 = vpop.xlane.xlu2 %5137 }
 0x9a1   : > { %v5154_v11 = vmul.f32 %v5138_v28, %v13192_v19  ;;  %v12118_v19 = vmul.f32 %v6240_v49, %v5792_v60  ;;  %v7711_v60 = vld [vmem:[%s12980_s12 + $0x98] sm:$0xff]  ;;  %v5315_v28 = vsub.f32 1.5, %v5314_v14  ;;  %v12190_v14 = vadd.f32 %v5614_v6, %v11950_v33 }
 0x9a2   : > { %v12142_v49 = vld [vmem:[%s12980_s12 + $0xd8] sm:$0xff]  ;;  %6757 = vmatpush.bf16.msra.mxu2 %v7711_v60  ;;  %v12199_v60 = vmul.f32 0.5, %v12084_v10  ;;  %v5869_v6 = vmul.f32 0.044715, %v12163_v34  ;;  %6803 = vmatpush.bf16.msrb.mxu0 %v12046_v42 }
 0x9a3   : > { %v12115_v52 = vadd.f32 1e-05, %v5154_v11  ;;  %v7703_v11 = vld [vmem:[%s12980_s12 + $0x58] sm:$0xff]  ;;  %7730 = vmatpush.bf16.msra.mxu3 %v12142_v49  ;;  %v5316_v38 = vmul.f32 %v12048_v8, %v5315_v28  ;;  %v5871_v9 = vmul.f32 0.044715, %v12190_v14  ;;  %v12230_v28 = vadd.f32 %v12113_v20, %v12007_v47 }
 0x9a4   : > { %6708 = vmatpush.bf16.msra.mxu1 %v7703_v11  ;;  %v12186_v11 = vmul.f32 0.5, %v12011_v12  ;;  %v5933_v20 = vmul.f32 %v5869_v6, %v12163_v34  ;;  %v5665_v6 = vpop.f32.mrf.mxu1 }
 0x9a5   : > { %8694 = vrsqrt.f32 %v12115_v52  ;;  %v12281_v2 = vadd.f32 %v5665_v6, %v11953_v0  ;;  %vm5327_vm8 = vweird.f32 %v12115_v52  ;;  %v8814_v6 = vld [vmem:[%s12976_s8] ss:$0 sm:$0xff] }
 0x9a6   : > { %6758 = vmatpush.bf16.msra.mxu2 %v7710_v61  ;;  %8696 = vtanh.f32 %v6122_v56  ;;  %v6062_v61 = vadd.f32 %v5998_v50, %v12061_v29  ;;  %v5616_v56 = vpop.f32.mrf.mxu0  ;;  %6804 = vmatpush.bf16.msrb.mxu0 %v12077_v21 }
 0x9a7   : > { %7731 = vmatpush.bf16.msra.mxu3 %v12172_v30  ;;  %v12272_v18 = vadd.f32 %v5616_v56, %v11950_v33 }
 0x9a8   : > { %6709 = vmatpush.bf16.msra.mxu1 %v7702_v13  ;;  %v6119_v13 = vmul.f32 0.7978846, %v6055_v55  ;;  %v6123_v55 = vmul.f32 0.7978846, %v6059_v24  ;;  %v7708_v24 = vld [vmem:[%s12980_s12 + $0x80] sm:$0xff] }
 0x9a9   : > { %v5875_v32 = vmul.f32 0.044715, %v12272_v18 }
 0x9aa   : > { %6759 = vmatpush.bf16.msra.mxu2 %v7709_v63  ;;  %8698 = vtanh.f32 %v6119_v13  ;;  %v12265_v63 = vadd.f32 %v5763_v27, %v12007_v47  ;;  %v12275_v13 = vmul.f32 %v5871_v9, %v12190_v14  ;;  %v5996_v9 = vmul.f32 %v5932_v57, %v12149_v15  ;;  %6805 = vmatpush.bf16.msrb.mxu0 %v12102_v45 }
 0x9ab   : > { %v12201_v12 = vpop.eup %8694  ;;  %7732 = vmatpush.bf16.msra.mxu3 %v12212_v23  ;;  %8700 = vtanh.f32 %v6123_v55  ;;  %v5714_v55 = vpop.f32.mrf.mxu2 }
 0x9ac   : > { %v5322_v25 = vmul.f32 %v12201_v12, %v12115_v52  ;;  %6710 = vmatpush.bf16.msra.mxu1 %v7701_v17  ;;  %v6126_v17 = vmul.f32 0.7978846, %v6062_v61  ;;  %v8697_v46 = vpop.eup %8696  ;;  %vm5328_vm7 = vweird.f32 %v12201_v12  ;;  %v12285_v61 = vmul.f32 0.5, %v12149_v15 }
 0x9ad   : > { %vm5329_vm9 = vmor %vm5327_vm8, %vm5328_vm7  ;;  %v6056_v52 = vadd.f32 %v12215_v7, %v12084_v10  ;;  %v6060_v36 = vadd.f32 %v5996_v9, %v12149_v15  ;;  %v8815_v9 = vld [vmem:[%s12977_s9] ss:$0 sm:$0xff] }
 0x9ae   : > { %v5323_v50 = vmul.f32 %v12201_v12, %v5322_v25  ;;  %v12247_v25 = vmul.f32 0.5, %v12061_v29  ;;  %v5320_v29 = vsel %vm12241_vm6, %v12048_v8, %v5316_v38  ;;  %v5874_v8 = vmul.f32 0.044715, %v12230_v28  ;;  %6760 = vmatpush.bf16.msra.mxu2 %v7708_v24  ;;  %6806 = vmatpush.bf16.msrb.mxu0 %v12142_v49 }
 0x9af   : > { %v5345_v27 = vmul.f32 %v5320_v29, %v11905_v51  ;;  %7733 = vmatpush.bf16.msra.mxu3 %v12256_v31  ;;  %8702 = vtanh.f32 %v6126_v17  ;;  %v12303_v17 = vadd.f32 %v5714_v55, %v11959_v35  ;;  %v6120_v4 = vmul.f32 0.7978846, %v6056_v52 }
 0x9b0   : > { %v5324_v39 = vmul.f32 0.5, %v5323_v50  ;;  %6711 = vmatpush.bf16.msra.mxu1 %v7700_v3  ;;  %v8699_v51 = vpop.eup %8698  ;;  %v6250_v50 = vadd.f32 1.0, %v8697_v46  ;;  %v5873_v3 = vmul.f32 0.044715, %v12269_v41  ;;  %v5938_v57 = vmul.f32 %v5874_v8, %v12230_v28 }
 0x9b1   : > { %v8701_v29 = vpop.eup %8700  ;;  %v5364_v46 = vmul.f32 %v8814_v6, %v5345_v27  ;;  %v5997_v8 = vmul.f32 %v5933_v20, %v12163_v34  ;;  %v6247_v10 = vadd.f32 1.0, %v8699_v51  ;;  %v5877_v42 = vmul.f32 0.044715, %v12303_v17 }
 0x9b2   : > { %v5325_v38 = vsub.f32 1.5, %v5324_v39  ;;  %v5878_v39 = vmul.f32 0.044715, %v12265_v63  ;;  %v5937_v7 = vmul.f32 %v5873_v3, %v12269_v41  ;;  %v5619_v55 = vpop.f32.mrf.mxu0  ;;  %v12317_v27 = vmul.f32 %v6250_v50, %v12186_v11  ;;  %v5668_v48 = vpop.f32.mrf.mxu1  ;;  %6807 = vmatpush.bf16.msrb.mxu0 %v12172_v30 }
 0x9b3   : > { %v6251_v62 = vadd.f32 1.0, %v8701_v29  ;;  %v6002_v15 = vmul.f32 %v5938_v57, %v12230_v28  ;;  %v5383_v51 = vadd.f32 %v8815_v9, %v5364_v46  ;;  %v12328_v50 = vmul.f32 %v6247_v10, %v12182_v58 }
 0x9b4   : > { %v5326_v56 = vmul.f32 %v12201_v12, %v5325_v38  ;;  %v5942_v38 = vmul.f32 %v5878_v39, %v12265_v63  ;;  %v6057_v39 = vadd.f32 %v5993_v22, %v12136_v37  ;;  %v6124_v52 = vmul.f32 0.7978846, %v6060_v36 }
 0x9b5   : > { %v8703_v20 = vpop.eup %8702  ;;  %v5999_v46 = vmul.f32 %v12275_v13, %v12190_v14  ;;  %v12343_v58 = vmul.f32 0.5, %v12163_v34  ;;  %v5941_v21 = vmul.f32 %v5877_v42, %v12303_v17  ;;  %8704 = vtanh.f32 %v6120_v4 }
 0x9b6   : > { %v5330_v24 = vsel %vm5329_vm9, %v12201_v12, %v5326_v56  ;;  %v5876_v12 = vmul.f32 0.044715, %v12281_v2  ;;  %v6006_v22 = vmul.f32 %v5942_v38, %v12265_v63  ;;  %v6066_v38 = vadd.f32 %v6002_v15, %v12230_v28  ;;  %6808 = vmatpush.bf16.msrb.mxu0 %v12212_v23 }
 0x9b7   : > { %v5346_v26 = vmul.f32 %v5330_v24, %v11917_v54  ;;  %v5939_v54 = vmul.f32 %v5875_v32, %v12272_v18  ;;  %v6061_v32 = vadd.f32 %v5997_v8, %v12163_v34  ;;  %v12340_v8 = vmul.f32 %v6251_v62, %v12259_v40 }
 0x9b8   : > { %v5940_v11 = vmul.f32 %v5876_v12, %v12281_v2  ;;  %v6121_v12 = vmul.f32 0.7978846, %v6057_v39  ;;  %8706 = vtanh.f32 %v6124_v52  ;;  %v12349_v62 = vmul.f32 0.5, %v12230_v28 }
 0x9b9   : > { %v5766_v56 = vpop.f32.mrf.mxu3  ;;  %v5365_v24 = vmul.f32 %v8814_v6, %v5346_v26  ;;  %v12332_v57 = vpop.f32.mrf.mxu2  ;;  %v6254_v26 = vadd.f32 1.0, %v8703_v20  ;;  %v12335_v6 = vmul.f32 0.5, %v12136_v37  ;;  %v6125_v10 = vmul.f32 0.7978846, %v6061_v32 }
 0x9ba   : > { %v6003_v37 = vmul.f32 %v5939_v54, %v12272_v18  ;;  %v6070_v34 = vadd.f32 %v6006_v22, %v12265_v63  ;;  %v6000_v40 = vmul.f32 %v5936_v53, %v12224_v1  ;;  %v6063_v4 = vadd.f32 %v5999_v46, %v12190_v14  ;;  %v5621_v39 = vpop.f32.mrf.mxu0  ;;  %v5670_v42 = vpop.f32.mrf.mxu1  ;;  %6809 = vmatpush.bf16.msrb.mxu0 %v12256_v31 }
 0x9bb   : > { %v5384_v3 = vadd.f32 %v8815_v9, %v5365_v24  ;;  %v12354_v36 = vmul.f32 %v6254_v26, %v12247_v25  ;;  %v12357_v24 = vmul.f32 0.5, %v12265_v63  ;;  %v6004_v54 = vmul.f32 %v5940_v11, %v12281_v2 }
 0x9bc   : > { %v12363_v28 = vadd.f32 %v5619_v55, %v11950_v33  ;;  %v6371_v20 = vpack.c.bf16 %v12340_v8, %v12328_v50  ;;  %8708 = vtanh.f32 %v6121_v12  ;;  %v6130_v53 = vmul.f32 0.7978846, %v6066_v38 }
 0x9bd   : > { %v5392_v29 = vpack.c.bf16 %v5384_v3, %v5383_v51  ;;  %v12368_v25 = vadd.f32 %v5766_v56, %v12007_v47  ;;  %8710 = vtanh.f32 %v6125_v10  ;;  %v6067_v63 = vadd.f32 %v6003_v37, %v12272_v18  ;;  %v8705_v3 = vpop.eup %8704 }
 0x9be   : > { %v6005_v15 = vmul.f32 %v5941_v21, %v12303_v17  ;;  %v6134_v55 = vmul.f32 0.7978846, %v6070_v34  ;;  %v6064_v9 = vadd.f32 %v6000_v40, %v12224_v1  ;;  %v6001_v51 = vmul.f32 %v5937_v7, %v12269_v41  ;;  %v8707_v22 = vpop.eup %8706 }
 0x9bf   : > { %5638 = vmatmul.bf16.gmra.mxu0 %v5392_v29  ;;  %5687 = vmatmul.bf16.gmra.mxu1 %v5392_v29  ;;  %v12378_v32 = vadd.f32 %v5668_v48, %v11953_v0  ;;  %v12381_v56 = vmul.f32 0.5, %v12190_v14  ;;  %v6127_v11 = vmul.f32 0.7978846, %v6063_v4  ;;  %v6068_v52 = vadd.f32 %v6004_v54, %v12281_v2 }
 0x9c0   : > { %5736 = vmatmul.bf16.gmra.mxu2 %v5392_v29  ;;  %5785 = vmatmul.bf16.gmra.mxu3 %v5392_v29  ;;  %v5879_v29 = vmul.f32 0.044715, %v12363_v28  ;;  %v12387_v26 = vadd.f32 %v5621_v39, %v11950_v33  ;;  %v6374_v7 = vpack.c.bf16 %v12354_v36, %v12317_v27  ;;  %8712 = vtanh.f32 %v6130_v53 }
 0x9c1   : > { %v5768_v13 = vpop.f32.mrf.mxu3  ;;  %v5882_v48 = vmul.f32 0.044715, %v12368_v25  ;;  %v12393_v14 = vadd.f32 %v5670_v42, %v11953_v0  ;;  %v5719_v46 = vpop.f32.mrf.mxu2  ;;  %v6131_v12 = vmul.f32 0.7978846, %v6067_v63  ;;  %v6069_v38 = vadd.f32 %v6005_v15, %v12303_v17 }
 0x9c2   : > { %v12373_v45 = vadd.f32 %v5768_v13, %v12007_v47  ;;  %v8709_v49 = vpop.eup %8708  ;;  %8714 = vtanh.f32 %v6134_v55  ;;  %v6128_v10 = vmul.f32 0.7978846, %v6064_v9  ;;  %v6065_v37 = vadd.f32 %v6001_v51, %v12269_v41 }
 0x9c3   : > { %v8711_v34 = vpop.eup %8710  ;;  %v5880_v27 = vmul.f32 0.044715, %v12378_v32  ;;  %v6248_v40 = vadd.f32 1.0, %v8705_v3  ;;  %8716 = vtanh.f32 %v6127_v11  ;;  %v6132_v13 = vmul.f32 0.7978846, %v6068_v52 }
 0x9c4   : > { %v5886_v21 = vmul.f32 0.044715, %v12373_v45  ;;  %v5943_v36 = vmul.f32 %v5879_v29, %v12363_v28  ;;  %v12403_v4 = vadd.f32 %v12332_v57, %v11959_v35  ;;  %v5883_v54 = vmul.f32 0.044715, %v12387_v26 }
 0x9c5   : > { %v12407_v53 = vadd.f32 %v5719_v46, %v11959_v35  ;;  %v5946_v39 = vmul.f32 %v5882_v48, %v12368_v25  ;;  %v5884_v63 = vmul.f32 0.044715, %v12393_v14  ;;  %8718 = vtanh.f32 %v6131_v12 }
 0x9c6   : > { %v6133_v15 = vmul.f32 0.7978846, %v6069_v38  ;;  %v8713_v42 = vpop.eup %8712  ;;  %v5950_v30 = vmul.f32 %v5886_v21, %v12373_v45  ;;  %v6252_v55 = vadd.f32 1.0, %v8707_v22  ;;  %8720 = vtanh.f32 %v6128_v10 }
 0x9c7   : > { %v6129_v9 = vmul.f32 0.7978846, %v6065_v37  ;;  %v5944_v57 = vmul.f32 %v5880_v27, %v12378_v32  ;;  %v6249_v51 = vadd.f32 1.0, %v8709_v49  ;;  %v6253_v3 = vadd.f32 1.0, %v8711_v34 }
 0x9c8   : > { %8722 = vtanh.f32 %v6132_v13  ;;  %v8715_v11 = vpop.eup %8714  ;;  %v5881_v52 = vmul.f32 0.044715, %v12403_v4  ;;  %v5947_v29 = vmul.f32 %v5883_v54, %v12387_v26  ;;  %v5885_v48 = vmul.f32 0.044715, %v12407_v53 }
 0x9c9   : > { %v6007_v46 = vmul.f32 %v5943_v36, %v12363_v28  ;;  %v8717_v12 = vpop.eup %8716  ;;  %v5948_v22 = vmul.f32 %v5884_v63, %v12393_v14  ;;  %v13215_v38 = vpack.c.bf16 %v12110_v43, %v12108_v59  ;;  %v13216_v49 = vpack.c.bf16 %v12132_v44, %v12118_v19 }
 0x9ca   : > { %v5811_v23 = vmul.f32 0.5, %v12272_v18  ;;  %8724 = vtanh.f32 %v6133_v15  ;;  %v6010_v21 = vmul.f32 %v5946_v39, %v12368_v25  ;;  %v13217_v10 = vpack.c.bf16 %v12144_v5, %v12159_v16 }
 0x9cb   : > { %v12431_v37 = vmul.f32 %v6248_v40, %v12199_v60  ;;  %v12434_v43 = vmul.f32 0.5, %v12224_v1  ;;  %8726 = vtanh.f32 %v6129_v9  ;;  %v6014_v59 = vmul.f32 %v5950_v30, %v12373_v45  ;;  %v8719_v19 = vpop.eup %8718 }
 0x9cc   : > { %v12438_v18 = vmul.f32 %v6252_v55, %v12285_v61  ;;  %v12441_v44 = vmul.f32 %v6249_v51, %v12335_v6  ;;  %v12444_v5 = vmul.f32 %v6253_v3, %v12343_v58  ;;  %v6008_v16 = vmul.f32 %v5944_v57, %v12378_v32  ;;  %v8721_v60 = vpop.eup %8720 }
 0x9cd   : > { %v5945_v1 = vmul.f32 %v5881_v52, %v12403_v4  ;;  %v6011_v34 = vmul.f32 %v5947_v29, %v12387_v26  ;;  %v6071_v61 = vadd.f32 %v6007_v46, %v12363_v28  ;;  %v6258_v40 = vadd.f32 1.0, %v8713_v42 }
 0x9ce   : > { %v8723_v27 = vpop.eup %8722  ;;  %v6262_v6 = vadd.f32 1.0, %v8715_v11  ;;  %v6074_v13 = vadd.f32 %v6010_v21, %v12368_v25  ;;  %v6012_v58 = vmul.f32 %v5948_v22, %v12393_v14  ;;  %v5812_v36 = vmul.f32 0.5, %v12281_v2 }
 0x9cf   : > { %6663 = vmatmul.bf16.vlgmr.msra.gmra.mxu0 %v13215_v38  ;;  %6712 = vmatmul.bf16.vlgmr.msra.gmra.mxu1 %v13216_v49  ;;  %v5809_v31 = vmul.f32 0.5, %v12269_v41  ;;  %v5813_v54 = vmul.f32 0.5, %v12303_v17  ;;  %v6078_v39 = vadd.f32 %v6014_v59, %v12373_v45  ;;  %v6372_v15 = vpack.c.bf16 %v12438_v18, %v12431_v37 }
 0x9d0   : > { %6761 = vmatmul.bf16.vlgmr.msra.gmra.mxu2 %v13217_v10  ;;  %6815 = vmatmul.bf16.vlgmr.msra.gmra.mxu3 %v6374_v7  ;;  %v5949_v7 = vmul.f32 %v5885_v48, %v12407_v53  ;;  %v8725_v63 = vpop.eup %8724  ;;  %v6373_v42 = vpack.c.bf16 %v12444_v5, %v12441_v44  ;;  %v6255_v30 = vadd.f32 1.0, %v8717_v12  ;;  %v6072_v55 = vadd.f32 %v6008_v16, %v12378_v32 }
 0x9d1   : > { %v8727_v9 = vpop.eup %8726  ;;  %v6075_v57 = vadd.f32 %v6011_v34, %v12387_v26  ;;  %v6135_v2 = vmul.f32 0.7978846, %v6071_v61  ;;  %v6009_v41 = vmul.f32 %v5945_v1, %v12403_v4  ;;  %v6322_v51 = vmul.f32 %v6258_v40, %v12349_v62 }
 0x9d2   : > { %v6013_v17 = vmul.f32 %v5949_v7, %v12407_v53  ;;  %v6326_v3 = vmul.f32 %v6262_v6, %v12357_v24  ;;  %v6138_v11 = vmul.f32 0.7978846, %v6074_v13  ;;  %v6076_v52 = vadd.f32 %v6012_v58, %v12393_v14 }
 0x9d3   : > { %v6259_v29 = vadd.f32 1.0, %v8719_v19  ;;  %v6260_v48 = vadd.f32 1.0, %v8723_v27  ;;  %v6261_v46 = vadd.f32 1.0, %v8725_v63  ;;  %v6142_v12 = vmul.f32 0.7978846, %v6078_v39 }
 0x9d4   : > { %v12470_v22 = vmul.f32 %v6255_v30, %v12381_v56  ;;  %v6256_v38 = vadd.f32 1.0, %v8721_v60  ;;  %v6257_v49 = vadd.f32 1.0, %v8727_v9  ;;  %v6136_v21 = vmul.f32 0.7978846, %v6072_v55 }
 0x9d5   : > { %v6139_v59 = vmul.f32 0.7978846, %v6075_v57  ;;  %8728 = vtanh.f32 %v6135_v2  ;;  %v6073_v62 = vadd.f32 %v6009_v41, %v12403_v4  ;;  %v6077_v24 = vadd.f32 %v6013_v17, %v12407_v53 }
 0x9d6   : > { %8730 = vtanh.f32 %v6138_v11  ;;  %v6140_v56 = vmul.f32 0.7978846, %v6076_v52  ;;  %v12480_v44 = vmul.f32 %v6259_v29, %v5811_v23  ;;  %v12482_v5 = vmul.f32 %v6260_v48, %v5812_v36 }
 0x9d7   : > { %v12484_v16 = vmul.f32 %v6261_v46, %v5813_v54  ;;  %8732 = vtanh.f32 %v6142_v12  ;;  %v6378_v7 = vpack.c.bf16 %v6326_v3, %v6322_v51  ;;  %v12489_v34 = vmul.f32 %v6256_v38, %v12434_v43 }
 0x9d8   : > { %8734 = vtanh.f32 %v6136_v21  ;;  %v12491_v61 = vmul.f32 %v6257_v49, %v5809_v31  ;;  %v6141_v27 = vmul.f32 0.7978846, %v6077_v24  ;;  %v6137_v6 = vmul.f32 0.7978846, %v6073_v62 }
 0x9d9   : > { %v5624_v10 = vpop.f32.mrf.mxu0  ;;  %v5673_v37 = vpop.f32.mrf.mxu1  ;;  %8736 = vtanh.f32 %v6139_v59  ;;  %v6375_v43 = vpack.c.bf16 %v12480_v44, %v12470_v22  ;;  %v6376_v58 = vpack.c.bf16 %v12482_v5, %v12489_v34  ;;  %v12505_v31 = vmul.f32 0.5, %v12363_v28 }
 0x9da   : > { %v12475_v18 = vadd.f32 %v5624_v10, %v11950_v33  ;;  %v12478_v19 = vadd.f32 %v5673_v37, %v11953_v0  ;;  %8738 = vtanh.f32 %v6140_v56  ;;  %v6377_v36 = vpack.c.bf16 %v12484_v16, %v12491_v61 }
 0x9db   : > { %v8729_v13 = vpop.eup %8728  ;;  %v5818_v54 = vmul.f32 0.5, %v12368_v25  ;;  %v5819_v39 = vmul.f32 0.5, %v12387_v26  ;;  %v12510_v63 = vmul.f32 0.5, %v12378_v32  ;;  %8740 = vtanh.f32 %v6141_v27 }
 0x9dc   : > { %v5887_v60 = vmul.f32 0.044715, %v12475_v18  ;;  %v5888_v1 = vmul.f32 0.044715, %v12478_v19  ;;  %v8731_v50 = vpop.eup %8730  ;;  %v5820_v2 = vmul.f32 0.5, %v12393_v14  ;;  %8742 = vtanh.f32 %v6137_v6 }
 0x9dd   : > { %v5822_v3 = vmul.f32 0.5, %v12373_v45  ;;  %v6266_v11 = vadd.f32 1.0, %v8731_v50  ;;  %v6263_v14 = vadd.f32 1.0, %v8729_v13  ;;  %v5821_v49 = vmul.f32 0.5, %v12407_v53 }
 0x9de   : > { %v5951_v23 = vmul.f32 %v5887_v60, %v12475_v18  ;;  %v5952_v40 = vmul.f32 %v5888_v1, %v12478_v19 }
 0x9df   : > { %6668 = vmatmul.bf16.gmra.mxu0 %v6371_v20  ;;  %6717 = vmatmul.bf16.gmra.mxu1 %v6372_v15  ;;  %v6330_v24 = vmul.f32 %v6266_v11, %v5818_v54 }
 0x9e0   : > { %6766 = vmatmul.bf16.gmra.mxu2 %v6373_v42  ;;  %6820 = vmatmul.bf16.gmra.mxu3 %v6378_v7  ;;  %v5722_v8 = vpop.f32.mrf.mxu2  ;;  %v5771_v20 = vpop.f32.mrf.mxu3  ;;  %v6015_v15 = vmul.f32 %v5951_v23, %v12475_v18  ;;  %v6016_v57 = vmul.f32 %v5952_v40, %v12478_v19 }
 0x9e1   : > { %v8733_v42 = vpop.eup %8732  ;;  %v12514_v30 = vadd.f32 %v5722_v8, %v11959_v35  ;;  %v12517_v55 = vadd.f32 %v5771_v20, %v12007_v47  ;;  %v5626_v28 = vpop.f32.mrf.mxu0 }
 0x9e2   : > { %v5675_v9 = vpop.f32.mrf.mxu1  ;;  %v8735_v25 = vpop.eup %8734  ;;  %v12521_v26 = vadd.f32 %v5626_v28, %v11950_v33  ;;  %v6270_v46 = vadd.f32 1.0, %v8733_v42  ;;  %v6079_v12 = vadd.f32 %v6015_v15, %v12475_v18  ;;  %v6080_v21 = vadd.f32 %v6016_v57, %v12478_v19 }
 0x9e3   : > { %v12524_v32 = vadd.f32 %v5675_v9, %v11953_v0  ;;  %v8737_v41 = vpop.eup %8736  ;;  %v5889_v17 = vmul.f32 0.044715, %v12514_v30  ;;  %v5890_v51 = vmul.f32 0.044715, %v12517_v55  ;;  %v6264_v56 = vadd.f32 1.0, %v8735_v25 }
 0x9e4   : > { %v8739_v52 = vpop.eup %8738  ;;  %v5891_v29 = vmul.f32 0.044715, %v12521_v26  ;;  %v6267_v59 = vadd.f32 1.0, %v8737_v41  ;;  %v6334_v40 = vmul.f32 %v6270_v46, %v5822_v3  ;;  %v6143_v6 = vmul.f32 0.7978846, %v6079_v12 }
 0x9e5   : > { %v5892_v48 = vmul.f32 0.044715, %v12524_v32  ;;  %v5954_v38 = vmul.f32 %v5890_v51, %v12517_v55  ;;  %v5953_v10 = vmul.f32 %v5889_v17, %v12514_v30  ;;  %v8741_v62 = vpop.eup %8740  ;;  %v6268_v60 = vadd.f32 1.0, %v8739_v52 }
 0x9e6   : > { %v5955_v45 = vmul.f32 %v5891_v29, %v12521_v26  ;;  %v8743_v7 = vpop.eup %8742  ;;  %v6144_v54 = vmul.f32 0.7978846, %v6080_v21  ;;  %v12549_v15 = vmul.f32 %v6267_v59, %v5819_v39  ;;  %v6269_v42 = vadd.f32 1.0, %v8741_v62 }
 0x9e7   : > { %v5956_v37 = vmul.f32 %v5892_v48, %v12524_v32  ;;  %v6018_v1 = vmul.f32 %v5954_v38, %v12517_v55  ;;  %v6017_v9 = vmul.f32 %v5953_v10, %v12514_v30  ;;  %v12555_v41 = vmul.f32 %v6268_v60, %v5820_v2 }
 0x9e8   : > { %v5724_v27 = vpop.f32.mrf.mxu2  ;;  %v5773_v23 = vpop.f32.mrf.mxu3  ;;  %v6019_v53 = vmul.f32 %v5955_v45, %v12521_v26  ;;  %v6265_v17 = vadd.f32 1.0, %v8743_v7  ;;  %8744 = vtanh.f32 %v6143_v6  ;;  %v6382_v46 = vpack.c.bf16 %v6334_v40, %v6330_v24 }
 0x9e9   : > { %v6020_v13 = vmul.f32 %v5956_v37, %v12524_v32  ;;  %v12543_v50 = vadd.f32 %v5724_v27, %v11959_v35  ;;  %v12546_v8 = vadd.f32 %v5773_v23, %v12007_v47  ;;  %v6082_v20 = vadd.f32 %v6018_v1, %v12517_v55  ;;  %v5629_v51 = vpop.f32.mrf.mxu0 }
 0x9ea   : > { %v6083_v28 = vadd.f32 %v6019_v53, %v12521_v26  ;;  %v5678_v3 = vpop.f32.mrf.mxu1  ;;  %8746 = vtanh.f32 %v6144_v54  ;;  %v12567_v2 = vmul.f32 %v6263_v14, %v12505_v31  ;;  %v5817_v12 = vmul.f32 0.5, %v12403_v4 }
 0x9eb   : > { %v5893_v57 = vmul.f32 0.044715, %v12543_v50  ;;  %v5894_v25 = vmul.f32 0.044715, %v12546_v8  ;;  %v6146_v11 = vmul.f32 0.7978846, %v6082_v20  ;;  %v6084_v39 = vadd.f32 %v6020_v13, %v12524_v32 }
 0x9ec   : > { %v6147_v52 = vmul.f32 0.7978846, %v6083_v28  ;;  %v12570_v38 = vmul.f32 %v6269_v42, %v5821_v49  ;;  %v6081_v21 = vadd.f32 %v6017_v9, %v12514_v30  ;;  %v12574_v10 = vadd.f32 %v5629_v51, %v11950_v33 }
 0x9ed   : > { %v5957_v29 = vmul.f32 %v5893_v57, %v12543_v50  ;;  %v5958_v48 = vmul.f32 %v5894_v25, %v12546_v8  ;;  %v12580_v22 = vmul.f32 %v6264_v56, %v12510_v63  ;;  %8748 = vtanh.f32 %v6146_v11 }
 0x9ee   : > { %v12583_v5 = vmul.f32 %v6265_v17, %v5817_v12  ;;  %8750 = vtanh.f32 %v6147_v52  ;;  %v6148_v4 = vmul.f32 0.7978846, %v6084_v39  ;;  %v6379_v16 = vpack.c.bf16 %v12549_v15, %v12567_v2 }
 0x9ef   : > { %6673 = vmatmul.bf16.gmra.mxu0 %v6375_v43  ;;  %6722 = vmatmul.bf16.gmra.mxu1 %v6376_v58  ;;  %v6022_v44 = vmul.f32 %v5958_v48, %v12546_v8  ;;  %v6021_v34 = vmul.f32 %v5957_v29, %v12543_v50  ;;  %v12587_v43 = vadd.f32 %v5678_v3, %v11953_v0  ;;  %v5823_v63 = vmul.f32 0.5, %v12475_v18 }
 0x9f0   : > { %6771 = vmatmul.bf16.gmra.mxu2 %v6377_v36  ;;  %6825 = vmatmul.bf16.gmra.mxu3 %v6382_v46  ;;  %v6380_v61 = vpack.c.bf16 %v12555_v41, %v12580_v22  ;;  %v8745_v36 = vpop.eup %8744  ;;  %v6381_v31 = vpack.c.bf16 %v12570_v38, %v12583_v5  ;;  %v5824_v14 = vmul.f32 0.5, %v12478_v19  ;;  %v6145_v49 = vmul.f32 0.7978846, %v6081_v21  ;;  %v5727_v59 = vpop.f32.mrf.mxu2 }
 0x9f1   : > { %v6086_v58 = vadd.f32 %v6022_v44, %v12546_v8  ;;  %v8747_v45 = vpop.eup %8746  ;;  %v5895_v37 = vmul.f32 0.044715, %v12574_v10  ;;  %v5776_v62 = vpop.f32.mrf.mxu3  ;;  %v5826_v24 = vmul.f32 0.5, %v12517_v55  ;;  %v6085_v60 = vadd.f32 %v6021_v34, %v12543_v50 }
 0x9f2   : > { %v12602_v1 = vadd.f32 %v5776_v62, %v12007_v47  ;;  %v5631_v7 = vpop.f32.mrf.mxu0  ;;  %v5680_v27 = vpop.f32.mrf.mxu1  ;;  %v5827_v18 = vmul.f32 0.5, %v12521_v26  ;;  %8752 = vtanh.f32 %v6148_v4  ;;  %v12606_v19 = vmul.f32 0.5, %v12514_v30 }
 0x9f3   : > { %v6150_v56 = vmul.f32 0.7978846, %v6086_v58  ;;  %v8749_v23 = vpop.eup %8748  ;;  %v5896_v40 = vmul.f32 0.044715, %v12587_v43  ;;  %v12610_v53 = vadd.f32 %v5631_v7, %v11950_v33  ;;  %v6271_v55 = vadd.f32 1.0, %v8745_v36 }
 0x9f4   : > { %v8751_v6 = vpop.eup %8750  ;;  %v5898_v13 = vmul.f32 0.044715, %v12602_v1  ;;  %v12614_v20 = vadd.f32 %v5680_v27, %v11953_v0  ;;  %v6272_v54 = vadd.f32 1.0, %v8747_v45  ;;  %v5959_v26 = vmul.f32 %v5895_v37, %v12574_v10 }
 0x9f5   : > { %8754 = vtanh.f32 %v6150_v56  ;;  %v12618_v30 = vadd.f32 %v5727_v59, %v11959_v35  ;;  %v5899_v42 = vmul.f32 0.044715, %v12610_v53  ;;  %v6149_v28 = vmul.f32 0.7978846, %v6085_v60 }
 0x9f6   : > { %8756 = vtanh.f32 %v6145_v49  ;;  %v5962_v9 = vmul.f32 %v5898_v13, %v12602_v1  ;;  %v5830_v57 = vmul.f32 0.5, %v12546_v8  ;;  %v5828_v25 = vmul.f32 0.5, %v12524_v32 }
 0x9f7   : > { %v12625_v17 = vmul.f32 0.5, %v12543_v50  ;;  %v5963_v51 = vmul.f32 %v5899_v42, %v12610_v53  ;;  %v6274_v3 = vadd.f32 1.0, %v8749_v23  ;;  %v6275_v11 = vadd.f32 1.0, %v8751_v6 }
 0x9f8   : > { %v12628_v52 = vmul.f32 %v6271_v55, %v5823_v63  ;;  %v8753_v39 = vpop.eup %8752  ;;  %v5960_v29 = vmul.f32 %v5896_v40, %v12587_v43  ;;  %v5900_v48 = vmul.f32 0.044715, %v12614_v20  ;;  %v12632_v46 = vmul.f32 %v6272_v54, %v5824_v14  ;;  %v5729_v50 = vpop.f32.mrf.mxu2 }
 0x9f9   : > { %v6026_v8 = vmul.f32 %v5962_v9, %v12602_v1  ;;  %v5897_v32 = vmul.f32 0.044715, %v12618_v30  ;;  %v5778_v21 = vpop.f32.mrf.mxu3  ;;  %8758 = vtanh.f32 %v6149_v28  ;;  %v12637_v44 = vmul.f32 0.5, %v12574_v10 }
 0x9fa   : > { %v6023_v4 = vmul.f32 %v5959_v26, %v12574_v10  ;;  %v12641_v58 = vadd.f32 %v5729_v50, %v11959_v35  ;;  %v12644_v36 = vadd.f32 %v5778_v21, %v12007_v47  ;;  %v5634_v63 = vpop.f32.mrf.mxu0  ;;  %v5683_v14 = vpop.f32.mrf.mxu1  ;;  %v6338_v37 = vmul.f32 %v6274_v3, %v5826_v24 }
 0x9fb   : > { %v8755_v12 = vpop.eup %8754  ;;  %v6090_v45 = vadd.f32 %v6026_v8, %v12602_v1  ;;  %v12647_v59 = vmul.f32 %v6275_v11, %v5827_v18  ;;  %v6276_v62 = vadd.f32 1.0, %v8753_v39  ;;  %v6027_v56 = vmul.f32 %v5963_v51, %v12610_v53 }
 0x9fc   : > { %v8757_v34 = vpop.eup %8756  ;;  %v6278_v49 = vadd.f32 1.0, %v8755_v12  ;;  %v5964_v60 = vmul.f32 %v5900_v48, %v12614_v20  ;;  %v5901_v7 = vmul.f32 0.044715, %v12641_v58  ;;  %v5902_v27 = vmul.f32 0.044715, %v12644_v36 }
 0x9fd   : > { %v6273_v18 = vadd.f32 1.0, %v8757_v34  ;;  %v6154_v23 = vmul.f32 0.7978846, %v6090_v45  ;;  %v6087_v40 = vadd.f32 %v6023_v4, %v12574_v10  ;;  %v6024_v55 = vmul.f32 %v5960_v29, %v12587_v43 }
 0x9fe   : > { %v6342_v24 = vmul.f32 %v6278_v49, %v5830_v57  ;;  %v5961_v6 = vmul.f32 %v5897_v32, %v12618_v30  ;;  %v5966_v15 = vmul.f32 %v5902_v27, %v12644_v36  ;;  %v12670_v22 = vadd.f32 %v5634_v63, %v11950_v33 }
 0x9ff   : > { %6678 = vmatmul.bf16.gmra.mxu0 %v6379_v16  ;;  %6727 = vmatmul.bf16.gmra.mxu1 %v6380_v61  ;;  %v12667_v16 = vmul.f32 0.5, %v12587_v43  ;;  %v8759_v41 = vpop.eup %8758  ;;  %v12672_v38 = vmul.f32 %v6276_v62, %v5828_v25  ;;  %v12675_v5 = vmul.f32 0.5, %v12602_v1  ;;  %v6091_v10 = vadd.f32 %v6027_v56, %v12610_v53 }
 0xa00   : > { %6776 = vmatmul.bf16.gmra.mxu2 %v6381_v31  ;;  %v6386_v2 = vpack.c.bf16 %v6342_v24, %v6338_v37  ;;  %v5965_v61 = vmul.f32 %v5901_v7, %v12641_v58  ;;  %v6383_v31 = vpack.c.bf16 %v12647_v59, %v12628_v52  ;;  %v6030_v13 = vmul.f32 %v5966_v15, %v12644_v36  ;;  %v5732_v26 = vpop.f32.mrf.mxu2 }
 0xa01   : > { %v6028_v54 = vmul.f32 %v5964_v60, %v12614_v20  ;;  %v5781_v42 = vpop.f32.mrf.mxu3  ;;  %v6337_v28 = vmul.f32 %v6273_v18, %v12606_v19  ;;  %8760 = vtanh.f32 %v6154_v23  ;;  %v6151_v9 = vmul.f32 0.7978846, %v6087_v40 }
 0xa02   : > { %6830 = vmatmul.bf16.gmra.mxu3 %v6386_v2  ;;  %v6088_v1 = vadd.f32 %v6024_v55, %v12587_v43  ;;  %v12686_v57 = vadd.f32 %v5683_v14, %v11953_v0  ;;  %v12689_v25 = vadd.f32 %v5781_v42, %v12007_v47  ;;  %v5636_v51 = vpop.f32.mrf.mxu0  ;;  %v5685_v3 = vpop.f32.mrf.mxu1  ;;  %v6277_v11 = vadd.f32 1.0, %v8759_v41 }
 0xa03   : > { %v6094_v52 = vadd.f32 %v6030_v13, %v12644_v36  ;;  %v5903_v39 = vmul.f32 0.044715, %v12670_v22  ;;  %v12694_v29 = vadd.f32 %v5636_v51, %v11950_v33  ;;  %v6155_v19 = vmul.f32 0.7978846, %v6091_v10 }
 0xa04   : > { %v6092_v48 = vadd.f32 %v6028_v54, %v12614_v20  ;;  %v5906_v43 = vmul.f32 0.044715, %v12689_v25  ;;  %v6025_v12 = vmul.f32 %v5961_v6, %v12618_v30  ;;  %v6029_v32 = vmul.f32 %v5965_v61, %v12641_v58 }
 0xa05   : > { %v6158_v8 = vmul.f32 0.7978846, %v6094_v52  ;;  %v12701_v50 = vadd.f32 %v5685_v3, %v11953_v0  ;;  %8762 = vtanh.f32 %v6151_v9  ;;  %v6152_v21 = vmul.f32 0.7978846, %v6088_v1 }
 0xa06   : > { %v6156_v4 = vmul.f32 0.7978846, %v6092_v48  ;;  %v5970_v34 = vmul.f32 %v5906_v43, %v12689_v25  ;;  %v6384_v63 = vpack.c.bf16 %v12672_v38, %v12632_v46  ;;  %v12707_v14 = vmul.f32 0.5, %v12610_v53 }
 0xa07   : > { %8764 = vtanh.f32 %v6158_v8  ;;  %v8761_v49 = vpop.eup %8760  ;;  %v5904_v45 = vmul.f32 0.044715, %v12686_v57  ;;  %v5907_v37 = vmul.f32 0.044715, %v12694_v29  ;;  %v6341_v59 = vmul.f32 %v6277_v11, %v12625_v17 }
 0xa08   : > { %8766 = vtanh.f32 %v6155_v19  ;;  %v12713_v62 = vadd.f32 %v5732_v26, %v11959_v35  ;;  %v6089_v56 = vadd.f32 %v6025_v12, %v12618_v30  ;;  %v6093_v46 = vadd.f32 %v6029_v32, %v12641_v58  ;;  %v5734_v7 = vpop.f32.mrf.mxu2 }
 0xa09   : > { %8768 = vtanh.f32 %v6156_v4  ;;  %v5967_v60 = vmul.f32 %v5903_v39, %v12670_v22  ;;  %v5908_v53 = vmul.f32 0.044715, %v12701_v50  ;;  %v5783_v27 = vpop.f32.mrf.mxu3  ;;  %v6034_v24 = vmul.f32 %v5970_v34, %v12689_v25 }
 0xa0a   : > { %8770 = vtanh.f32 %v6152_v21  ;;  %v12721_v17 = vadd.f32 %v5783_v27, %v12007_v47  ;;  %v6282_v18 = vadd.f32 1.0, %v8761_v49  ;;  %v6153_v23 = vmul.f32 0.7978846, %v6089_v56 }
 0xa0b   : > { %v6157_v40 = vmul.f32 0.7978846, %v6093_v46  ;;  %v8763_v55 = vpop.eup %8762  ;;  %v5971_v6 = vmul.f32 %v5907_v37, %v12694_v29  ;;  %v12725_v15 = vadd.f32 %v5734_v7, %v11959_v35  ;;  %v6385_v2 = vpack.c.bf16 %v6341_v59, %v6337_v28 }
 0xa0c   : > { %v6098_v41 = vadd.f32 %v6034_v24, %v12689_v25  ;;  %v5905_v10 = vmul.f32 0.044715, %v12713_v62  ;;  %v5910_v61 = vmul.f32 0.044715, %v12721_v17  ;;  %v5836_v13 = vmul.f32 0.5, %v12614_v20 }
 0xa0d   : > { %v8765_v38 = vpop.eup %8764  ;;  %8772 = vtanh.f32 %v6153_v23  ;;  %v5838_v26 = vmul.f32 0.5, %v12644_v36  ;;  %v6031_v28 = vmul.f32 %v5967_v60, %v12670_v22  ;;  %v5968_v1 = vmul.f32 %v5904_v45, %v12686_v57 }
 0xa0e   : > { %v8767_v54 = vpop.eup %8766  ;;  %v6286_v42 = vadd.f32 1.0, %v8765_v38  ;;  %8774 = vtanh.f32 %v6157_v40  ;;  %v5972_v51 = vmul.f32 %v5908_v53, %v12701_v50  ;;  %v5974_v3 = vmul.f32 %v5910_v61, %v12721_v17 }
 0xa0f   : > { %6683 = vmatmul.bf16.gmra.mxu0 %v6383_v31  ;;  %6732 = vmatmul.bf16.gmra.mxu1 %v6384_v63  ;;  %v8769_v9 = vpop.eup %8768  ;;  %v6346_v31 = vmul.f32 %v6282_v18, %v12675_v5  ;;  %v5909_v20 = vmul.f32 0.044715, %v12725_v15  ;;  %v6162_v39 = vmul.f32 0.7978846, %v6098_v41  ;;  %v6035_v36 = vmul.f32 %v5971_v6, %v12694_v29 }
 0xa10   : > { %6781 = vmatmul.bf16.gmra.mxu2 %v6385_v2  ;;  %v8771_v11 = vpop.eup %8770  ;;  %v6350_v52 = vmul.f32 %v6286_v42, %v5838_v26  ;;  %v5969_v19 = vmul.f32 %v5905_v10, %v12713_v62  ;;  %v6283_v48 = vadd.f32 1.0, %v8767_v54  ;;  %v5833_v43 = vmul.f32 0.5, %v12618_v30 }
 0xa11   : > { %v6038_v8 = vmul.f32 %v5974_v3, %v12721_v17  ;;  %v6284_v32 = vadd.f32 1.0, %v8769_v9  ;;  %v6095_v21 = vadd.f32 %v6031_v28, %v12670_v22  ;;  %v6099_v5 = vadd.f32 %v6035_v36, %v12694_v29 }
 0xa12   : > { %v6390_v12 = vpack.c.bf16 %v6350_v52, %v6346_v31  ;;  %8776 = vtanh.f32 %v6162_v39  ;;  %v6032_v63 = vmul.f32 %v5968_v1, %v12686_v57  ;;  %v6036_v49 = vmul.f32 %v5972_v51, %v12701_v50 }
 0xa13   : > { %v8773_v4 = vpop.eup %8772  ;;  %v6102_v34 = vadd.f32 %v6038_v8, %v12721_v17  ;;  %v5973_v37 = vmul.f32 %v5909_v20, %v12725_v15  ;;  %v6279_v30 = vadd.f32 1.0, %v8763_v55  ;;  %v6280_v59 = vadd.f32 1.0, %v8771_v11 }
 0xa14   : > { %v8775_v45 = vpop.eup %8774  ;;  %6835 = vmatmul.bf16.gmra.mxu3 %v6390_v12  ;;  %v6163_v56 = vmul.f32 0.7978846, %v6099_v5  ;;  %v6096_v53 = vadd.f32 %v6032_v63, %v12686_v57  ;;  %v6100_v7 = vadd.f32 %v6036_v49, %v12701_v50  ;;  %v6347_v27 = vmul.f32 %v6283_v48, %v12707_v14 }
 0xa15   : > { %v6285_v46 = vadd.f32 1.0, %v8775_v45  ;;  %v6166_v60 = vmul.f32 0.7978846, %v6102_v34  ;;  %v5837_v24 = vmul.f32 0.5, %v12641_v58  ;;  %v6281_v18 = vadd.f32 1.0, %v8773_v4 }
 0xa16   : > { %v6033_v23 = vmul.f32 %v5969_v19, %v12713_v62  ;;  %v6348_v40 = vmul.f32 %v6284_v32, %v5836_v13  ;;  %v6159_v6 = vmul.f32 0.7978846, %v6095_v21  ;;  %v6164_v2 = vmul.f32 0.7978846, %v6100_v7 }
 0xa17   : > { %8778 = vtanh.f32 %v6166_v60  ;;  %v6349_v55 = vmul.f32 %v6285_v46, %v5837_v24  ;;  %v6160_v41 = vmul.f32 0.7978846, %v6096_v53  ;;  %v6037_v38 = vmul.f32 %v5973_v37, %v12725_v15 }
 0xa18   : > { %v6097_v10 = vadd.f32 %v6033_v23, %v12713_v62  ;;  %v8777_v61 = vpop.eup %8776  ;;  %v6343_v54 = vmul.f32 %v6279_v30, %v12637_v44  ;;  %v6344_v14 = vmul.f32 %v6280_v59, %v12667_v16  ;;  %8780 = vtanh.f32 %v6163_v56 }
 0xa19   : > { %v6345_v58 = vmul.f32 %v6281_v18, %v5833_v43  ;;  %8782 = vtanh.f32 %v6164_v2  ;;  %v6101_v26 = vadd.f32 %v6037_v38, %v12725_v15  ;;  %v6290_v1 = vadd.f32 1.0, %v8777_v61  ;;  %v13219_v2 = vld [vmem:[#allocation38_spill] sm:$0xff] }
 0xa1a   : > { %v6161_v13 = vmul.f32 0.7978846, %v6097_v10  ;;  %v6387_v42 = vpack.c.bf16 %v6347_v27, %v6343_v54  ;;  %v6388_v28 = vpack.c.bf16 %v6348_v40, %v6344_v14  ;;  %8784 = vtanh.f32 %v6159_v6  ;;  %v13218_v40 = vld [vmem:[#allocation39_spill] sm:$0xff] }
 0xa1b   : > { %v6389_v9 = vpack.c.bf16 %v6349_v55, %v6345_v58  ;;  %8786 = vtanh.f32 %v6160_v41  ;;  %v6165_v51 = vmul.f32 0.7978846, %v6101_v26  ;;  %v5842_v44 = vmul.f32 0.5, %v12689_v25 }
 0xa1c   : > { %8788 = vtanh.f32 %v6161_v13  ;;  %v5846_v16 = vmul.f32 0.5, %v12721_v17  ;;  %v5843_v21 = vmul.f32 0.5, %v12694_v29  ;;  %v5844_v25 = vmul.f32 0.5, %v12701_v50 }
 0xa1d   : > { %v8779_v3 = vpop.eup %8778  ;;  %8790 = vtanh.f32 %v6165_v51  ;;  %v6354_v52 = vmul.f32 %v6290_v1, %v5842_v44  ;;  %v5845_v34 = vmul.f32 0.5, %v12725_v15  ;;  %v5839_v49 = vmul.f32 0.5, %v12670_v22 }
 0xa1e   : > { %v6294_v31 = vadd.f32 1.0, %v8779_v3  ;;  %v8781_v11 = vpop.eup %8780  ;;  %v5840_v37 = vmul.f32 0.5, %v12686_v57  ;;  %v5841_v59 = vmul.f32 0.5, %v12713_v62  ;;  %v12778_v6 = vadd.f32 %v13218_v40, %v12007_v47 }
 0xa1f   : > { %6688 = vmatmul.bf16.gmra.mxu0 %v6387_v42  ;;  %6737 = vmatmul.bf16.gmra.mxu1 %v6388_v28  ;;  %v8783_v20 = vpop.eup %8782  ;;  %v6291_v8 = vadd.f32 1.0, %v8781_v11  ;;  %v12782_v55 = vadd.f32 %v13219_v2, %v12007_v47 }
 0xa20   : > { %6786 = vmatmul.bf16.gmra.mxu2 %v6389_v9  ;;  %v6358_v39 = vmul.f32 %v6294_v31, %v5846_v16  ;;  %v8785_v36 = vpop.eup %8784  ;;  %v6292_v12 = vadd.f32 1.0, %v8783_v20  ;;  %v5858_v9 = vmul.f32 0.044715, %v12778_v6 }
 0xa21   : > { %v8787_v19 = vpop.eup %8786  ;;  %v6287_v5 = vadd.f32 1.0, %v8785_v36  ;;  %v6355_v45 = vmul.f32 %v6291_v8, %v5843_v21  ;;  %v5862_v44 = vmul.f32 0.044715, %v12782_v55 }
 0xa22   : > { %v6394_v48 = vpack.c.bf16 %v6358_v39, %v6354_v52  ;;  %v8789_v43 = vpop.eup %8788  ;;  %v6288_v17 = vadd.f32 1.0, %v8787_v19  ;;  %v6356_v30 = vmul.f32 %v6292_v12, %v5844_v25 }
 0xa23   : > { %v8791_v32 = vpop.eup %8790  ;;  %v6289_v63 = vadd.f32 1.0, %v8789_v43  ;;  %v6351_v46 = vmul.f32 %v6287_v5, %v5839_v49  ;;  %v5926_v43 = vmul.f32 %v5862_v44, %v12782_v55 }
 0xa24   : > { %6840 = vmatmul.bf16.gmra.mxu3 %v6394_v48  ;;  %v6293_v4 = vadd.f32 1.0, %v8791_v32  ;;  %v6352_v60 = vmul.f32 %v6288_v17, %v5840_v37  ;;  %v5922_v48 = vmul.f32 %v5858_v9, %v12778_v6 }
 0xa25   : > { %v6353_v29 = vmul.f32 %v6289_v63, %v5841_v59  ;;  %v6391_v53 = vpack.c.bf16 %v6355_v45, %v6351_v46  ;;  %v5990_v59 = vmul.f32 %v5926_v43, %v12782_v55 }
 0xa26   : > { %v6357_v56 = vmul.f32 %v6293_v4, %v5845_v34  ;;  %v6392_v7 = vpack.c.bf16 %v6356_v30, %v6352_v60 }
 0xa28   : > { %v6393_v50 = vpack.c.bf16 %v6357_v56, %v6353_v29 }
 0xa2f   : > { %6693 = vmatmul.bf16.gmra.mxu0 %v6391_v53  ;;  %6742 = vmatmul.bf16.gmra.mxu1 %v6392_v7 }
 0xa30   : > { %6791 = vmatmul.bf16.gmra.mxu2 %v6393_v50 }
 0xa3c   : > { %v5639_v15 = vpop.f32.mrf.mxu0  ;;  %v5688_v27 = vpop.f32.mrf.mxu1 }
 0xa3d   : > { %v12767_v22 = vadd.f32 %v5639_v15, %v11950_v33  ;;  %v12770_v57 = vadd.f32 %v5688_v27, %v11953_v0 }
 0xa3f   : > { %v5911_v62 = vmul.f32 0.044715, %v12767_v22  ;;  %v5912_v24 = vmul.f32 0.044715, %v12770_v57 }
 0xa41   : > { %v5975_v18 = vmul.f32 %v5911_v62, %v12767_v22  ;;  %v5976_v23 = vmul.f32 %v5912_v24, %v12770_v57  ;;  %v6054_v24 = vadd.f32 %v5990_v59, %v12782_v55 }
 0xa43   : > { %v5737_v41 = vpop.f32.mrf.mxu2  ;;  %v5786_v38 = vpop.f32.mrf.mxu3  ;;  %v6039_v10 = vmul.f32 %v5975_v18, %v12767_v22  ;;  %v6040_v61 = vmul.f32 %v5976_v23, %v12770_v57 }
 0xa44   : > { %v12787_v54 = vadd.f32 %v5737_v41, %v11959_v35  ;;  %v12790_v14 = vadd.f32 %v5786_v38, %v12007_v47  ;;  %v5641_v58 = vpop.f32.mrf.mxu0  ;;  %v5690_v26 = vpop.f32.mrf.mxu1 }
 0xa45   : > { %v12793_v13 = vadd.f32 %v5641_v58, %v11950_v33  ;;  %v12796_v42 = vadd.f32 %v5690_v26, %v11953_v0  ;;  %v6103_v28 = vadd.f32 %v6039_v10, %v12767_v22  ;;  %v6104_v3 = vadd.f32 %v6040_v61, %v12770_v57 }
 0xa46   : > { %v5913_v1 = vmul.f32 0.044715, %v12787_v54  ;;  %v5914_v51 = vmul.f32 0.044715, %v12790_v14 }
 0xa47   : > { %v5915_v16 = vmul.f32 0.044715, %v12793_v13  ;;  %v5916_v33 = vmul.f32 0.044715, %v12796_v42  ;;  %v6167_v11 = vmul.f32 0.7978846, %v6103_v28 }
 0xa48   : > { %v5977_v31 = vmul.f32 %v5913_v1, %v12787_v54  ;;  %v5978_v0 = vmul.f32 %v5914_v51, %v12790_v14  ;;  %v6168_v39 = vmul.f32 0.7978846, %v6104_v3  ;;  %v6118_v3 = vmul.f32 0.7978846, %v6054_v24 }
 0xa49   : > { %v5979_v20 = vmul.f32 %v5915_v16, %v12793_v13  ;;  %v5980_v52 = vmul.f32 %v5916_v33, %v12796_v42  ;;  %8792 = vtanh.f32 %v6167_v11  ;;  %v5847_v33 = vmul.f32 0.5, %v12767_v22 }
 0xa4a   : > { %v6041_v36 = vmul.f32 %v5977_v31, %v12787_v54  ;;  %v6042_v19 = vmul.f32 %v5978_v0, %v12790_v14  ;;  %8794 = vtanh.f32 %v6168_v39  ;;  %v5851_v31 = vmul.f32 0.5, %v12793_v13 }
 0xa4b   : > { %v5739_v8 = vpop.f32.mrf.mxu2  ;;  %v5788_v12 = vpop.f32.mrf.mxu3  ;;  %v6043_v32 = vmul.f32 %v5979_v20, %v12793_v13  ;;  %v6044_v21 = vmul.f32 %v5980_v52, %v12796_v42  ;;  %v5848_v11 = vmul.f32 0.5, %v12770_v57  ;;  %v5852_v20 = vmul.f32 0.5, %v12796_v42 }
 0xa4c   : > { %v12817_v5 = vadd.f32 %v5739_v8, %v11959_v35  ;;  %v12820_v25 = vadd.f32 %v5788_v12, %v12007_v47  ;;  %v6664_v17 = vpop.f32.mrf.mxu0  ;;  %v6713_v4 = vpop.f32.mrf.mxu1  ;;  %v6105_v34 = vadd.f32 %v6041_v36, %v12787_v54  ;;  %v6106_v37 = vadd.f32 %v6042_v19, %v12790_v14 }
 0xa4d   : > { %v6714_v63 = vadd.f32 %v6713_v4, %v6664_v17  ;;  %v6107_v49 = vadd.f32 %v6043_v32, %v12793_v13  ;;  %v6108_v45 = vadd.f32 %v6044_v21, %v12796_v42  ;;  %v5986_v47 = vmul.f32 %v5922_v48, %v12778_v6 }
 0xa4e   : > { %v5917_v30 = vmul.f32 0.044715, %v12817_v5  ;;  %v5918_v35 = vmul.f32 0.044715, %v12820_v25  ;;  %v6169_v53 = vmul.f32 0.7978846, %v6105_v34 }
 0xa4f   : > { %v6171_v56 = vmul.f32 0.7978846, %v6107_v49  ;;  %v6172_v46 = vmul.f32 0.7978846, %v6108_v45  ;;  %v6170_v7 = vmul.f32 0.7978846, %v6106_v37  ;;  %v8793_v50 = vpop.eup %8792  ;;  %v6050_v62 = vadd.f32 %v5986_v47, %v12778_v6 }
 0xa50   : > { %v5981_v60 = vmul.f32 %v5917_v30, %v12817_v5  ;;  %v5982_v29 = vmul.f32 %v5918_v35, %v12820_v25  ;;  %v8795_v40 = vpop.eup %8794  ;;  %v6295_v26 = vadd.f32 1.0, %v8793_v50  ;;  %v5849_v49 = vmul.f32 0.5, %v12787_v54 }
 0xa51   : > { %8796 = vtanh.f32 %v6171_v56  ;;  %v6114_v51 = vmul.f32 0.7978846, %v6050_v62  ;;  %v6296_v44 = vadd.f32 1.0, %v8795_v40  ;;  %v5853_v45 = vmul.f32 0.5, %v12817_v5 }
 0xa52   : > { %8798 = vtanh.f32 %v6172_v46  ;;  %v6045_v15 = vmul.f32 %v5981_v60, %v12817_v5  ;;  %v6046_v27 = vmul.f32 %v5982_v29, %v12820_v25  ;;  %v6359_v36 = vmul.f32 %v6295_v26, %v5847_v33 }
 0xa53   : > { %v6762_v18 = vpop.f32.mrf.mxu2  ;;  %v12836_v23 = vpop.f32.mrf.mxu3  ;;  %8800 = vtanh.f32 %v6169_v53  ;;  %v6360_v12 = vmul.f32 %v6296_v44, %v5848_v11  ;;  %v5850_v30 = vmul.f32 0.5, %v12790_v14  ;;  %v5854_v35 = vmul.f32 0.5, %v12820_v25 }
 0xa54   : > { %v12838_v2 = vadd.f32 %v6762_v18, %v6714_v63  ;;  %v6666_v41 = vpop.f32.mrf.mxu0  ;;  %v6715_v38 = vpop.f32.mrf.mxu1  ;;  %v6109_v10 = vadd.f32 %v6045_v15, %v12817_v5  ;;  %v6110_v61 = vadd.f32 %v6046_v27, %v12820_v25  ;;  %8802 = vtanh.f32 %v6170_v7 }
 0xa55   : > { %v6716_v58 = vadd.f32 %v6715_v38, %v6666_v41  ;;  %v5798_v25 = vmul.f32 0.5, %v12782_v55  ;;  %v12858_v41 = vld [vmem:[%s12981_s13] ss:$0 sm:$0xff]  ;;  %v5794_v38 = vmul.f32 0.5, %v12778_v6 }
 0xa56   : > { %v6173_v28 = vmul.f32 0.7978846, %v6109_v10  ;;  %v6174_v9 = vmul.f32 0.7978846, %v6110_v61  ;;  %v13220_v10 = vld [vmem:[#allocation46_spill] sm:$0xff] }
 0xa57   : > { %v8797_v1 = vpop.eup %8796 }
 0xa58   : > { %v8799_v16 = vpop.eup %8798  ;;  %v6299_v0 = vadd.f32 1.0, %v8797_v1  ;;  %8804 = vtanh.f32 %v6173_v28 }
 0xa59   : > { %v6300_v52 = vadd.f32 1.0, %v8799_v16  ;;  %8806 = vtanh.f32 %v6174_v9  ;;  %v8801_v39 = vpop.eup %8800  ;;  %v13221_v16 = vld [vmem:[#allocation45_spill] sm:$0xff] }
 0xa5a   : > { %v6363_v19 = vmul.f32 %v6299_v0, %v5851_v31  ;;  %v8803_v48 = vpop.eup %8802  ;;  %8808 = vtanh.f32 %v6118_v3  ;;  %v6297_v4 = vadd.f32 1.0, %v8801_v39 }
 0xa5b   : > { %v6764_v43 = vpop.f32.mrf.mxu2  ;;  %v6818_v8 = vpop.f32.mrf.mxu3  ;;  %v6364_v32 = vmul.f32 %v6300_v52, %v5852_v20  ;;  %8810 = vtanh.f32 %v6114_v51  ;;  %v6298_v34 = vadd.f32 1.0, %v8803_v48 }
 0xa5c   : > { %v12846_v22 = vadd.f32 %v6764_v43, %v6716_v58  ;;  %v6669_v13 = vpop.f32.mrf.mxu0  ;;  %v6718_v21 = vpop.f32.mrf.mxu1  ;;  %v6395_v17 = vpack.c.bf16 %v6363_v19, %v6359_v36  ;;  %v6361_v56 = vmul.f32 %v6297_v4, %v5849_v49  ;;  %v13222_v19 = vld [vmem:[#allocation44_spill] sm:$0xff]  ;;  %v13223_v4 = vld [vmem:[#allocation50_spill] sm:$0xff] }
 0xa5d   : > { %v6396_v57 = vpack.c.bf16 %v6364_v32, %v6360_v12  ;;  %v6719_v60 = vadd.f32 %v6718_v21, %v6669_v13  ;;  %v6362_v29 = vmul.f32 %v6298_v34, %v5850_v30 }
 0xa5e   : > { %v8805_v42 = vpop.eup %8804  ;;  %6698 = vmatmul.bf16.gmra.mxu0 %v6395_v17 }
 0xa5f   : > { %v8807_v63 = vpop.eup %8806  ;;  %6747 = vmatmul.bf16.gmra.mxu1 %v6396_v57  ;;  %v6301_v37 = vadd.f32 1.0, %v8805_v42 }
 0xa60   : > { %v6302_v47 = vadd.f32 1.0, %v8807_v63  ;;  %v8809_v59 = vpop.eup %8808 }
 0xa61   : > { %v6365_v46 = vmul.f32 %v6301_v37, %v5853_v45  ;;  %v8811_v7 = vpop.eup %8810  ;;  %v6246_v24 = vadd.f32 1.0, %v8809_v59 }
 0xa62   : > { %v6366_v53 = vmul.f32 %v6302_v47, %v5854_v35  ;;  %v6242_v14 = vadd.f32 1.0, %v8811_v7 }
 0xa63   : > { %v6767_v50 = vpop.f32.mrf.mxu2  ;;  %v6397_v15 = vpack.c.bf16 %v6365_v46, %v6361_v56  ;;  %v6821_v18 = vpop.f32.mrf.mxu3  ;;  %v6310_v58 = vmul.f32 %v6246_v24, %v5798_v25 }
 0xa64   : > { %v6768_v27 = vadd.f32 %v6767_v50, %v6719_v60  ;;  %v6671_v54 = vpop.f32.mrf.mxu0  ;;  %v6720_v62 = vpop.f32.mrf.mxu1  ;;  %v6398_v5 = vpack.c.bf16 %v6366_v53, %v6362_v29  ;;  %v6306_v9 = vmul.f32 %v6242_v14, %v5794_v38 }
 0xa65   : > { %6796 = vmatmul.bf16.gmra.mxu2 %v6397_v15  ;;  %v6721_v28 = vadd.f32 %v6720_v62, %v6671_v54 }
 0xa66   : > { %v6817_v40 = vadd.f32 %v12836_v23, %v6768_v27  ;;  %6845 = vmatmul.bf16.gmra.mxu3 %v6398_v5  ;;  %v6370_v3 = vpack.c.bf16 %v6310_v58, %v6306_v9 }
 0xa68   : > { %v6853_v61 = vadd.f32 %v6817_v40, %v13220_v10 }
 0xa6a   : > { %v6873_v26 = vadd.f32 %v12858_v41, %v6853_v61 }
 0xa6b   : > { %v6769_v1 = vpop.f32.mrf.mxu2  ;;  %v6823_v6 = vpop.f32.mrf.mxu3 }
 0xa6c   : > { %6889 = vst [vmem:[%s12863_s1 + $0x10] sm:$0xff] %v6873_v26  ;;  %v6770_v55 = vadd.f32 %v6769_v1, %v6721_v28  ;;  %v6674_v23 = vpop.f32.mrf.mxu0  ;;  %v6723_v51 = vpop.f32.mrf.mxu1 }
 0xa6d   : > { %v6724_v0 = vadd.f32 %v6723_v51, %v6674_v23 }
 0xa6e   : > { %v6819_v44 = vadd.f32 %v6818_v8, %v6770_v55  ;;  %6810 = vmatmul.bf16.vlgmr.msrb.gmra.mxu0 %v6370_v3 }
 0xa70   : > { %v6854_v33 = vadd.f32 %v6819_v44, %v13221_v16 }
 0xa72   : > { %v6874_v31 = vadd.f32 %v12858_v41, %v6854_v33 }
 0xa73   : > { %v6772_v11 = vpop.f32.mrf.mxu2  ;;  %v6826_v43 = vpop.f32.mrf.mxu3 }
 0xa74   : > { %6890 = vst [vmem:[%s12863_s1 + $0x18] sm:$0xff] %v6874_v31  ;;  %v6773_v20 = vadd.f32 %v6772_v11, %v6724_v0  ;;  %v6676_v52 = vpop.f32.mrf.mxu0  ;;  %v6725_v39 = vpop.f32.mrf.mxu1 }
 0xa75   : > { %v6726_v12 = vadd.f32 %v6725_v39, %v6676_v52 }
 0xa76   : > { %v6822_v36 = vadd.f32 %v6821_v18, %v6773_v20 }
 0xa78   : > { %v6855_v48 = vadd.f32 %v6822_v36, %v13222_v19 }
 0xa7a   : > { %v6875_v8 = vadd.f32 %v12858_v41, %v6855_v48 }
 0xa7b   : > { %v6774_v32 = vpop.f32.mrf.mxu2 }
 0xa7c   : > { %6891 = vst [vmem:[%s12863_s1 + $0x20] sm:$0xff] %v6875_v8  ;;  %v6775_v13 = vadd.f32 %v6774_v32, %v6726_v12  ;;  %v6679_v21 = vpop.f32.mrf.mxu0  ;;  %v6728_v17 = vpop.f32.mrf.mxu1 }
 0xa7d   : > { %v6729_v63 = vadd.f32 %v6728_v17, %v6679_v21 }
 0xa7e   : > { %v6824_v57 = vadd.f32 %v6823_v6, %v6775_v13 }
 0xa80   : > { %v6856_v42 = vadd.f32 %v6824_v57, %v13223_v4 }
 0xa82   : > { %v6876_v34 = vadd.f32 %v12858_v41, %v6856_v42 }
 0xa83   : > { %8843 = shalt.err (!%p8840_p3)
}
 0xa84   : > { %s8920_s23 = smov 128   ;;  %s8921_s2 = smov 8   ;;  %v6828_v49 = vpop.f32.mrf.mxu3  ;;  %v6777_v45 = vpop.f32.mrf.mxu2  ;;  %6892 = vst [vmem:[%s12863_s1 + $0x28] sm:$0xff] %v6876_v34  ;;  %v13224_v59 = vld [vmem:[#allocation49_spill] sm:$0xff]  ;;  %v13225_v54 = vld [vmem:[#allocation48_spill] sm:$0xff]  ;;  %v13226_v61 = vld [vmem:[#allocation31_spill] sm:$0xff] }
 0xa85   : > { %7735 = dma.vmem_to_hbm [thread:$0]  (%p9040_p5), %s6939_s24, 16384, %s6941_s0, %s6909_s26, %s8920_s23, %s8920_s23, %s8921_s2   ;;  %v6778_v37 = vadd.f32 %v6777_v45, %v6729_v63  ;;  %v6681_v30 = vpop.f32.mrf.mxu0  ;;  %v6730_v35 = vpop.f32.mrf.mxu1  ;;  %v13227_v44 = vld [vmem:[#allocation30_spill] sm:$0xff]  ;;  %v13228_v39 = vld [vmem:[#allocation33_spill] sm:$0xff]  ;;  %v13229_v17 = vld [vmem:[#allocation32_spill] sm:$0xff] }
 0xa86   : > { %v6731_v60 = vadd.f32 %v6730_v35, %v6681_v30  ;;  %v13230_v35 = vld [vmem:[#allocation35_spill] sm:$0xff]  ;;  %s7724_s24 = sshll.u32 %s9023_s22, 7  ;;  %s6921_s22 = sshll.u32 %s12863_s1, 4  ;;  %s6922_s22 = int_to_ptr.vmem [resolvable:$true] %s6921_s22 }
 0xa87   : > { %v6827_v47 = vadd.f32 %v6826_v43, %v6778_v37  ;;  %s6920_s20 = scalar_lea.hbm %s12982_s14, %s7724_s24  ;;  %s6904_s16 = scalar_lea.sflag [#allocation3], %s10177_s30 }
 0xa88   : > { %s6923_s17 = sshll.u32 %s6920_s20, 4  ;;  %s8864_s24 = scalar_lea.hbm %s12982_s14, 256  ;;  %s6924_s17 = int_to_ptr.hbm [resolvable:$true] %s6923_s17 }
 0xa89   : > { %v6857_v56 = vadd.f32 %v6827_v47, %v13224_v59  ;;  %s8858_s25 = sshra.s32 %s6924_s17, 4  ;;  %s8859_s25 = int_to_ptr.hbm [resolvable:$true] %s8858_s25 }
 0xa8a   : > { %s8860_s27 = scalar_lea.hbm %s8859_s25, 128  ;;  %p8865_p9 = scmp.lt.s32.totalorder %s8859_s25, %s12982_s14 }
 0xa8b   : > { %v6877_v46 = vadd.f32 %v12858_v41, %v6857_v56  ;;  %p8861_p4 = scmp.ne.s32.totalorder %s8859_s25, %s8860_s27  ;;  %p8866_p10 = scmp.lt.s32.totalorder %s8864_s24, %s8860_s27 }
 0xa8c   : > { %v6831_v29 = vpop.f32.mrf.mxu3  ;;  %v6779_v53 = vpop.f32.mrf.mxu2 }
 0xa8d   : > { %6893 = vst [vmem:[%s12863_s1 + $0x30] sm:$0xff] %v6877_v46  ;;  %v6780_v7 = vadd.f32 %v6779_v53, %v6731_v60  ;;  %v6684_v50 = vpop.f32.mrf.mxu0  ;;  %v6733_v15 = vpop.f32.mrf.mxu1  ;;  %p8862_p7 = pnand %p8861_p4, %p9040_p5  ;;  %p8867_p11 = por %p8866_p10, %p8865_p9 }
 0xa8e   : > { %v6734_v24 = vadd.f32 %v6733_v15, %v6684_v50 }
 0xa8f   : > { %v6829_v27 = vadd.f32 %v6828_v49, %v6780_v7  ;;  %v13231_v7 = vld [vmem:[#allocation34_spill] sm:$0xff]  ;;  %p8863_p8 = pneg %p8862_p7 }
 0xa91   : > { %v6858_v62 = vadd.f32 %v6829_v27, %v13225_v54  ;;  %p8868_p12 = pnand %p8867_p11, %p8863_p8 }
 0xa93   : > { %v6878_v5 = vadd.f32 %v12858_v41, %v6858_v62 }
 0xa94   : > { %v6782_v18 = vpop.f32.mrf.mxu2  ;;  %v6833_v38 = vpop.f32.mrf.mxu3 }
 0xa95   : > { %6894 = vst [vmem:[%s12863_s1 + $0x38] sm:$0xff] %v6878_v5  ;;  %v6783_v14 = vadd.f32 %v6782_v18, %v6734_v24  ;;  %v6686_v25 = vpop.f32.mrf.mxu0  ;;  %v6735_v40 = vpop.f32.mrf.mxu1 }
 0xa96   : > { %v6736_v28 = vadd.f32 %v6735_v40, %v6686_v25 }
 0xa97   : > { %v6832_v10 = vadd.f32 %v6831_v29, %v6783_v14 }
 0xa99   : > { %v6859_v58 = vadd.f32 %v6832_v10, %v13226_v61  ;;  %v13232_v61 = vld [vmem:[#allocation37_spill] sm:$0xff] }
 0xa9b   : > { %v6879_v26 = vadd.f32 %v12858_v41, %v6859_v58 }
 0xa9c   : > { %v6784_v9 = vpop.f32.mrf.mxu2  ;;  %v6836_v3 = vpop.f32.mrf.mxu3 }
 0xa9d   : > { %6895 = vst [vmem:[%s12863_s1 + $0x40] sm:$0xff] %v6879_v26  ;;  %v6785_v1 = vadd.f32 %v6784_v9, %v6736_v28  ;;  %v6689_v55 = vpop.f32.mrf.mxu0  ;;  %v6738_v23 = vpop.f32.mrf.mxu1  ;;  %v13233_v26 = vld [vmem:[#allocation51_spill] sm:$0xff] }
 0xa9e   : > { %v6739_v33 = vadd.f32 %v6738_v23, %v6689_v55 }
 0xa9f   : > { %v6834_v51 = vadd.f32 %v6833_v38, %v6785_v1 }
 0xaa1   : > { %v6860_v6 = vadd.f32 %v6834_v51, %v13227_v44 }
 0xaa3   : > { %v6880_v16 = vadd.f32 %v12858_v41, %v6860_v6 }
 0xaa4   : > { %v6787_v31 = vpop.f32.mrf.mxu2  ;;  %v6838_v19 = vpop.f32.mrf.mxu3 }
 0xaa5   : > { %6896 = vst [vmem:[%s12863_s1 + $0x48] sm:$0xff] %v6880_v16  ;;  %v6788_v0 = vadd.f32 %v6787_v31, %v6739_v33  ;;  %v6691_v11 = vpop.f32.mrf.mxu0  ;;  %v6740_v20 = vpop.f32.mrf.mxu1  ;;  %v13234_v16 = vld [vmem:[#allocation36_spill] sm:$0xff]  ;;  %v13235_v31 = vld [vmem:[#allocation47_spill] sm:$0xff] }
 0xaa6   : > { %v6741_v43 = vadd.f32 %v6740_v20, %v6691_v11 }
 0xaa7   : > { %v6837_v52 = vadd.f32 %v6836_v3, %v6788_v0 }
 0xaa9   : > { %v6861_v36 = vadd.f32 %v6837_v52, %v13228_v39 }
 0xaab   : > { %v6881_v48 = vadd.f32 %v12858_v41, %v6861_v36 }
 0xaac   : > { %v6789_v8 = vpop.f32.mrf.mxu2  ;;  %v6841_v34 = vpop.f32.mrf.mxu3 }
 0xaad   : > { %6897 = vst [vmem:[%s12863_s1 + $0x50] sm:$0xff] %v6881_v48  ;;  %v6790_v12 = vadd.f32 %v6789_v8, %v6741_v43  ;;  %v6694_v32 = vpop.f32.mrf.mxu0  ;;  %v6743_v13 = vpop.f32.mrf.mxu1 }
 0xaae   : > { %v6744_v42 = vadd.f32 %v6743_v13, %v6694_v32 }
 0xaaf   : > { %v6839_v21 = vadd.f32 %v6838_v19, %v6790_v12 }
 0xab1   : > { %v6862_v57 = vadd.f32 %v6839_v21, %v13229_v17 }
 0xab3   : > { %v6882_v4 = vadd.f32 %v12858_v41, %v6862_v57 }
 0xab4   : > { %v6792_v63 = vpop.f32.mrf.mxu2  ;;  %v6843_v29 = vpop.f32.mrf.mxu3 }
 0xab5   : > { %6898 = vst [vmem:[%s12863_s1 + $0x58] sm:$0xff] %v6882_v4  ;;  %v6793_v49 = vadd.f32 %v6792_v63, %v6744_v42  ;;  %v6696_v37 = vpop.f32.mrf.mxu0  ;;  %v6745_v30 = vpop.f32.mrf.mxu1 }
 0xab6   : > { %v6746_v56 = vadd.f32 %v6745_v30, %v6696_v37 }
 0xab7   : > { %v6842_v45 = vadd.f32 %v6841_v34, %v6793_v49 }
 0xab9   : > { %v6863_v47 = vadd.f32 %v6842_v45, %v13230_v35 }
 0xabb   : > { %v6883_v59 = vadd.f32 %v12858_v41, %v6863_v47 }
 0xabc   : > { %v6794_v46 = vpop.f32.mrf.mxu2 }
 0xabd   : > { %6899 = vst [vmem:[%s12863_s1 + $0x60] sm:$0xff] %v6883_v59  ;;  %v6795_v60 = vadd.f32 %v6794_v46, %v6746_v56 }
 0xabf   : > { %v6844_v53 = vadd.f32 %v6843_v29, %v6795_v60 }
 0xac1   : > { %v6864_v50 = vadd.f32 %v6844_v53, %v13231_v7 }
 0xac3   : > { %v6884_v15 = vadd.f32 %v12858_v41, %v6864_v50 }
 0xac5   : > { %6900 = vst [vmem:[%s12863_s1 + $0x68] sm:$0xff] %v6884_v15 }
 0xadb   : > { %v6699_v27 = vpop.f32.mrf.mxu0 }
 0xadc   : > { %v6748_v54 = vpop.f32.mrf.mxu1 }
 0xadd   : > { %v6749_v5 = vadd.f32 %v6748_v54, %v6699_v27 }
 0xae3   : > { %v6701_v62 = vpop.f32.mrf.mxu0 }
 0xae4   : > { %v6750_v38 = vpop.f32.mrf.mxu1 }
 0xae5   : > { %v6751_v9 = vadd.f32 %v6750_v38, %v6701_v62 }
 0xae8   : > { %v6797_v24 = vpop.f32.mrf.mxu2 }
 0xae9   : > { %v6798_v18 = vadd.f32 %v6797_v24, %v6749_v5  ;;  %v6846_v14 = vpop.f32.mrf.mxu3 }
 0xaeb   : > { %v6847_v25 = vadd.f32 %v6846_v14, %v6798_v18  ;;  %v6811_v40 = vpop.f32.mrf.mxu0 }
 0xaec   : > { %v6812_v10 = vadd.f32 %v6811_v40, %v12838_v2 }
 0xaed   : > { %v6865_v58 = vadd.f32 %v6847_v25, %v13232_v61 }
 0xaee   : > { %v6851_v28 = vadd.f32 %v6812_v10, %v13233_v26 }
 0xaef   : > { %v6885_v1 = vadd.f32 %v12858_v41, %v6865_v58 }
 0xaf0   : > { %v6871_v55 = vadd.f32 %v12858_v41, %v6851_v28  ;;  %v6799_v23 = vpop.f32.mrf.mxu2 }
 0xaf1   : > { %6901 = vst [vmem:[%s12863_s1 + $0x70] sm:$0xff] %v6885_v1  ;;  %v6800_v51 = vadd.f32 %v6799_v23, %v6751_v9  ;;  %v6848_v3 = vpop.f32.mrf.mxu3 }
 0xaf2   : > { %6887 = vst [vmem:[%s12863_s1] sm:$0xff] %v6871_v55 }
 0xaf3   : > { %v6849_v2 = vadd.f32 %v6848_v3, %v6800_v51  ;;  %v6813_v44 = vpop.f32.mrf.mxu0 }
 0xaf4   : > { %v6814_v6 = vadd.f32 %v6813_v44, %v12846_v22 }
 0xaf5   : > { %v6866_v33 = vadd.f32 %v6849_v2, %v13234_v16 }
 0xaf6   : > { %v6852_v0 = vadd.f32 %v6814_v6, %v13235_v31 }
 0xaf7   : > { %v6886_v11 = vadd.f32 %v12858_v41, %v6866_v33 }
 0xaf8   : > { %v6872_v20 = vadd.f32 %v12858_v41, %v6852_v0 }
 0xaf9   : > { %6902 = vst [vmem:[%s12863_s1 + $0x78] sm:$0xff] %v6886_v11 }
 0xafa   : > { %6888 = vst [vmem:[%s12863_s1 + $0x8] sm:$0xff] %v6872_v20 }
 0xafb   : > { %8871 = shalt.err (!%p8868_p12)
}
 0xafc   : > { %7734 = dma.vmem_to_hbm [thread:$0]  (%p9040_p5), %s6922_s22, 2048, %s6924_s17, %s6904_s16, %s8920_s23, %s8920_s23, %s8921_s2  }
 0xafd PF: > { %s13236_s30 = sld [smem:[#allocation8_spill]]  ;;  %p7745_p13 = scmp.ge.s32.totalorder %s8910_s21, 2 }
 0xaff   : > { %p7739_p0 = pnand %p7745_p13, %p9044_p6 }
 0xb01   : > { %p7740_p1 = pneg %p7739_p0 }
 0xb03   : > { %s6955_s20 = sand.u32 1, %s13236_s30  }
 0xb04   : > { %s6956_s25 = scalar_lea.sflag [#allocation3], %s6955_s20 }
 0xb05   : > { %8889 = dma.done.wait (%p7740_p1), %s6956_s25, 2048  }
 0xb06   : > { %8891 = vsyncadd (%p7740_p1), %s6956_s25, 4294965248  ;;  %s6966_s27 = scalar_lea.sflag [#allocation5], %s6955_s20 }
 0xb07   : > { %8893 = dma.done.wait (%p7740_p1), %s6966_s27, 16384  }
 0xb08   : > { %8895 = vsyncadd (%p7740_p1), %s6966_s27, 4294950912  ;;  %s13238_s21 = sld [smem:[#allocation10_spill]]  ;;  %s13241_s18 = smov %s8902_s19 }
 0xb09   : > { %s13239_s28 = sld [smem:[#allocation9_spill]] }
 0xb0a   : > { %s13240_s20 = sld [smem:[#allocation11_spill]] }
 0xb0e   : > { %p29_p5 = scmp.ge.s32.totalorder %s13238_s21, 4  }
 0xb0f   : > { %s13242_s19 = smov %s13239_s28 }
 0xb10   :  { %31 = sbr.rel (!%p29_p5) target bundleno = 9 (0x9), region = 138 }
 0xb15   :  { %6972 = vsyncpa [#allocation3], 1 }
 0xb16   :  { %6974 = vsyncpa [#allocation3 + $0x1], 1 }
 0xb17   :  { %6975 = vsyncpa [#allocation5], 1 }
 0xb18   :  { %6977 = vsyncpa [#allocation5 + $0x1], 1 }

</bundles_post_ra>
